<compile_context>
chip_gen: v7x
topology: tpu7x:2x2x1
jax: 0.10.0
libtpu: 0.0.40
codegen_flags: <defaults>
</compile_context>

<pallas_src>
import functools

import jax
import jax.numpy as jnp
from jax import lax
from jax.experimental import pallas as pl
from jax.experimental.pallas import tpu as pltpu


# ----------------------------------------------------------------------------
# Fused forward kernel: one invocation per block of GB graphs
# ----------------------------------------------------------------------------
def _gin_forward_kernel(xp_ref, e_in_ref, gat_ref, sct_ref,
                        atom_w_ref, atom_b_ref,
                        edge_w_ref, edge_b_ref,
                        mlp_w1_ref, mlp_b1_ref, mlp_w2_ref, mlp_b2_ref,
                        wqkv_ref, bqkv_ref, wo_ref, bo_ref,
                        pred_wt_ref, pred_bt_ref,
                        out_ref, *, num_layers, n_head, gb, eps):
    f32 = jnp.float32
    bf16 = jnp.bfloat16

    xp = xp_ref[0]          # (N, F)        bf16, N = gb*S   [x || pos]
    e_in = e_in_ref[0]      # (E, 4)        bf16, E = gb*Eg  [edge_attr || bond_length]
    gat = gat_ref[0]        # (gb, Eg, S)   bf16 one-hot of src  (gather via MXU)
    sct = sct_ref[0]        # (gb, S, Eg)   bf16 one-hot of dst  (scatter-add via MXU)

    N = xp.shape[0]
    S = N // gb
    E = e_in.shape[0]
    Eg = E // gb
    D = atom_w_ref.shape[1]
    dh = D // n_head

    # batched (over graphs) matmul: contract lhs last dim with rhs middle dim
    bmm = (((2,), (1,)), ((0,), (0,)))

    # ---- atom encoder: one matmul over all graphs in the block ----
    h = (jnp.dot(xp, atom_w_ref[...], preferred_element_type=f32)
         + atom_b_ref[...])                                        # (N, D) f32

    # ---- all layers' edge embeddings in one fused matmul (hoisted) ----
    e_all = (jnp.dot(e_in, edge_w_ref[...], preferred_element_type=f32)
             + edge_b_ref[...])                                    # (E, L*D) f32
    e_all = jnp.maximum(e_all, 0.0)

    for l in range(num_layers):
        # ---- GINConv (edge-conditioned, OGB-style) -------------------------
        h_g = h.reshape(gb, S, D).astype(bf16)
        h_src = lax.dot_general(gat, h_g, bmm,
                                preferred_element_type=f32)        # (gb, Eg, D)
        e_emb = e_all[:, l * D:(l + 1) * D].reshape(gb, Eg, D)
        msg = jnp.maximum(h_src + e_emb, 0.0).astype(bf16)
        agg = lax.dot_general(sct, msg, bmm,
                              preferred_element_type=f32)          # (gb, S, D)
        pre = ((1.0 + eps[l]) * h + agg.reshape(N, D)).astype(bf16)
        z = (jnp.dot(pre, mlp_w1_ref[l], preferred_element_type=f32)
             + mlp_b1_ref[l])
        z = jnp.maximum(z, 0.0).astype(bf16)
        # eval BatchNorm is folded into mlp_w2 / mlp_b2 in the wrapper
        h = jnp.dot(z, mlp_w2_ref[l], preferred_element_type=f32) + mlp_b2_ref[l]

        # ---- multi-head self-attention (block-diagonal over graphs) --------
        qkv = (jnp.dot(h.astype(bf16), wqkv_ref[l], preferred_element_type=f32)
               + bqkv_ref[l])                                      # (N, 3D), Q pre-scaled
        qkv = qkv.reshape(gb, S, 3 * D).astype(bf16)
        wo_l = wo_ref[l]                                           # (D, D) bf16
        attn = jnp.zeros((N, D), f32)
        for hh in range(n_head):
            lo = hh * dh
            qh = qkv[:, :, lo:lo + dh]
            kh = qkv[:, :, D + lo:D + lo + dh]
            vh = qkv[:, :, 2 * D + lo:2 * D + lo + dh]
            sc = lax.dot_general(qh, kh, (((2,), (2,)), ((0,), (0,))),
                                 preferred_element_type=f32)       # (gb, S, S)
            sc = sc - jnp.max(sc, axis=-1, keepdims=True)
            p = jnp.exp(sc)
            p = p * pl.reciprocal(jnp.sum(p, axis=-1, keepdims=True), approx=True)
            oh = lax.dot_general(p.astype(bf16), vh, bmm,
                                 preferred_element_type=f32)       # (gb, S, dh)
            # fold the output projection per head: no lane-concat of heads
            attn = attn + jnp.dot(oh.reshape(N, dh).astype(bf16),
                                  wo_l[lo:lo + dh, :],
                                  preferred_element_type=f32)
        h = attn + bo_ref[l]

        # residual=False; dropout (eval) = identity; ReLU on all but last layer
        if l < num_layers - 1:
            h = jnp.maximum(h, 0.0)

    # ---- JK='last', job_level='node' (pool = identity); prediction head.
    # Produced as (num_tasks, N) so the HBM store is lane-dense (lane = N).
    out = (lax.dot_general(pred_wt_ref[...], h.astype(bf16),
                           (((1,), (1,)), ((), ())),
                           preferred_element_type=f32)
           + pred_bt_ref[...])                                     # (T, N)
    out_ref[0] = out.astype(out_ref.dtype)


# ----------------------------------------------------------------------------
# Deterministic parameter initialization (synthetic weights, no checkpoint)
# ----------------------------------------------------------------------------
def init_params(key, n_features, emb_dim, n_head, num_layers, num_tasks):
    def nrm(k, shape, scale=0.1):
        return jax.random.normal(k, shape, jnp.float32) * scale

    keys = jax.random.split(key, 4 + num_layers)
    params = {
        "atom_w": nrm(keys[0], (n_features + 3, emb_dim)),   # linear over [x || pos]
        "atom_b": nrm(keys[1], (emb_dim,)),
        "pred_w": nrm(keys[2], (emb_dim, num_tasks)),
        "pred_b": nrm(keys[3], (num_tasks,)),
        "layers": [],
    }
    for layer in range(num_layers):
        lk = jax.random.split(keys[4 + layer], 16)
        p = {
            "eps": 0.0,                                   # GIN epsilon (init 0)
            "edge_w": nrm(lk[0], (4, emb_dim)),           # [edge_attr || bond_length]
            "edge_b": nrm(lk[1], (emb_dim,)),
            "mlp_w1": nrm(lk[2], (emb_dim, 2 * emb_dim)), # GIN MLP: D -> 2D -> D
            "mlp_b1": nrm(lk[3], (2 * emb_dim,)),
            "mlp_w2": nrm(lk[4], (2 * emb_dim, emb_dim)),
            "mlp_b2": nrm(lk[5], (emb_dim,)),
            "wq": nrm(lk[6], (emb_dim, emb_dim)),
            "bq": nrm(lk[7], (emb_dim,)),
            "wk": nrm(lk[8], (emb_dim, emb_dim)),
            "bk": nrm(lk[9], (emb_dim,)),
            "wv": nrm(lk[10], (emb_dim, emb_dim)),
            "bv": nrm(lk[11], (emb_dim,)),
            "wo": nrm(lk[12], (emb_dim, emb_dim)),
            "bo": nrm(lk[13], (emb_dim,)),
            # BatchNorm1d running stats / affine (fresh PyTorch init; eval mode)
            "bn_gamma": jnp.ones((emb_dim,), jnp.float32),
            "bn_beta": jnp.zeros((emb_dim,), jnp.float32),
            "bn_mean": jnp.zeros((emb_dim,), jnp.float32),
            "bn_var": jnp.ones((emb_dim,), jnp.float32),
        }
        params["layers"].append(p)
    return params


def _pick_graphs_per_block(num_graphs, nodes_per_graph, target_rows=256):
    """Largest divisor of num_graphs with GB*S <= target_rows, keeping >= 2
    grid steps when possible so v7x's two TensorCores both get work."""
    gb = max(1, min(num_graphs, target_rows // max(nodes_per_graph, 1)))
    while num_graphs % gb:
        gb -= 1
    while gb > 1 and num_graphs // gb < 2:
        gb //= 2
        while num_graphs % gb:
            gb -= 1
    return gb


# ----------------------------------------------------------------------------
# GINGraphPooling forward (eval mode: dropout = identity, BN uses running stats)
# ----------------------------------------------------------------------------
def gin_graph_pooling_forward(params, x, pos, edge_index, edge_attr, bond_length,
                              *, num_graphs, n_head, num_layers,
                              graphs_per_block=None):
    f32, bf16 = jnp.float32, jnp.bfloat16
    num_nodes = x.shape[0]
    emb_dim, num_tasks = params["pred_w"].shape
    # The module's attention view h.view(len(batch), -1, emb_dim) requires a
    # fixed node count per graph; edges are assumed grouped per graph.
    # TODO(synk): support ragged graphs via padding masks + scalar-prefetch
    # segment sums (the reshape-based grouping below assumes uniform S / Eg).
    S = num_nodes // num_graphs
    num_edges = edge_index.shape[1]
    Eg = num_edges // num_graphs

    if graphs_per_block is None:
        graphs_per_block = _pick_graphs_per_block(num_graphs, S)
    GB = graphs_per_block
    NB = num_graphs // GB
    N = GB * S          # nodes per grid step
    E = GB * Eg         # edges per grid step

    # ---- one-time plain-JAX glue: packing + one-hot gather/scatter (bf16) ---
    xp = jnp.concatenate([x, pos], axis=1).astype(bf16).reshape(NB, N, -1)
    e_in = jnp.concatenate([edge_attr, bond_length[:, None]], axis=1)
    e_in = e_in.astype(bf16).reshape(NB, E, -1)

    goff = jnp.arange(num_graphs, dtype=edge_index.dtype)[:, None] * S
    src_l = edge_index[0].reshape(num_graphs, Eg) - goff          # local node ids
    dst_l = edge_index[1].reshape(num_graphs, Eg) - goff
    nid = jnp.arange(S)
    gat = (src_l[:, :, None] == nid[None, None, :]).astype(bf16)  # (G, Eg, S)
    sct = (dst_l[:, :, None] == nid[None, None, :]).astype(bf16)
    sct = sct.transpose(0, 2, 1)                                  # (G, S, Eg)
    gat = gat.reshape(NB, GB, Eg, S)
    sct = sct.reshape(NB, GB, S, Eg)
    # TODO(synk): at realistic N/E replace the dense one-hot gather/scatter with
    # scalar-prefetched src/dst indices (PrefetchScalarGridSpec) + segment sums.

    # ---- weight stacking: fused QKV (scale folded), fused edge encoders,
    #      eval BatchNorm folded into mlp_w2 / mlp_b2 using actual stats ------
    layers = params["layers"]
    dh = emb_dim // n_head
    scale = 1.0 / float(dh) ** 0.5

    edge_w = jnp.concatenate([p["edge_w"] for p in layers], axis=1).astype(bf16)
    edge_b = jnp.concatenate([p["edge_b"] for p in layers]).reshape(1, -1).astype(f32)

    mlp_w1 = jnp.stack([p["mlp_w1"] for p in layers]).astype(bf16)          # (L, D, 2D)
    mlp_b1 = jnp.stack([p["mlp_b1"].reshape(1, -1) for p in layers]).astype(f32)

    folded = []
    for p in layers:
        s = p["bn_gamma"] / jnp.sqrt(p["bn_var"] + 1e-5)
        folded.append((p["mlp_w2"] * s[None, :],
                       (p["mlp_b2"] - p["bn_mean"]) * s + p["bn_beta"]))
    mlp_w2 = jnp.stack([w for w, _ in folded]).astype(bf16)                 # (L, 2D, D)
    mlp_b2 = jnp.stack([b.reshape(1, -1) for _, b in folded]).astype(f32)

    wqkv = jnp.stack([jnp.concatenate([p["wq"] * scale, p["wk"], p["wv"]], axis=1)
                      for p in layers]).astype(bf16)                        # (L, D, 3D)
    bqkv = jnp.stack([jnp.concatenate([p["bq"] * scale, p["bk"], p["bv"]]).reshape(1, -1)
                      for p in layers]).astype(f32)
    wo = jnp.stack([p["wo"] for p in layers]).astype(bf16)                  # (L, D, D)
    bo = jnp.stack([p["bo"].reshape(1, -1) for p in layers]).astype(f32)

    atom_w = params["atom_w"].astype(bf16)
    atom_b = params["atom_b"].reshape(1, -1).astype(f32)
    pred_wt = params["pred_w"].T.astype(bf16)                               # (T, D)
    pred_bt = params["pred_b"].reshape(-1, 1).astype(f32)                   # (T, 1)
    eps = tuple(float(p["eps"]) for p in layers)

    # ---- BlockSpecs: per-block data; whole-array (constant-index) weights ---
    def block_spec(a):
        shp = (1,) + a.shape[1:]
        nz = len(shp) - 1
        return pl.BlockSpec(shp, lambda g, _nz=nz: (g,) + (0,) * _nz)

    def whole_spec(a):
        return pl.BlockSpec(a.shape, lambda g, _z=(0,) * a.ndim: _z)

    per_block = [xp, e_in, gat, sct]
    weights = [atom_w, atom_b, edge_w, edge_b,
               mlp_w1, mlp_b1, mlp_w2, mlp_b2,
               wqkv, bqkv, wo, bo, pred_wt, pred_bt]
    in_specs = ([block_spec(a) for a in per_block]
                + [whole_spec(a) for a in weights])

    kern = functools.partial(_gin_forward_kernel,
                             num_layers=num_layers, n_head=n_head,
                             gb=GB, eps=eps)
    out = pl.pallas_call(
        kern,
        out_shape=jax.ShapeDtypeStruct((NB, num_tasks, N), f32),
        grid=(NB,),
        in_specs=in_specs,
        out_specs=pl.BlockSpec((1, num_tasks, N), lambda g: (g, 0, 0)),
        compiler_params=pltpu.CompilerParams(
            dimension_semantics=("parallel",),     # v7x: graph blocks split across TCs
            vmem_limit_bytes=64 * 1024 * 1024),
    )(*per_block, *weights)

    # (NB, T, GB*S) -> (num_nodes, T); node order is preserved (block-major).
    return out.transpose(0, 2, 1).reshape(num_nodes, num_tasks)


# ----------------------------------------------------------------------------
if __name__ == "__main__":
    # module config: num_tasks=1, num_layers=3, emb_dim=32, n_head=4,
    # data_type='smiles' (n_features=9), job_level='node', eval mode
    NUM_GRAPHS = 8
    NODES_PER_GRAPH = 8
    NUM_NODES = NUM_GRAPHS * NODES_PER_GRAPH
    N_FEATURES = 9
    EMB_DIM = 32
    N_HEAD = 4
    NUM_LAYERS = 3
    NUM_TASKS = 1

    key = jax.random.PRNGKey(0)
    k_param, k_x, k_pos, k_ea, k_bl = jax.random.split(key, 5)

    params = init_params(k_param, N_FEATURES, EMB_DIM, N_HEAD, NUM_LAYERS, NUM_TASKS)

    x = jax.random.normal(k_x, (NUM_NODES, N_FEATURES), jnp.float32)
    pos = jax.random.normal(k_pos, (NUM_NODES, 3), jnp.float32)

    # ring graph per batch element, both edge directions (edges grouped per graph)
    src_list, dst_list = [], []
    for g in range(NUM_GRAPHS):
        off = g * NODES_PER_GRAPH
        for i in range(NODES_PER_GRAPH):
            a, b = off + i, off + (i + 1) % NODES_PER_GRAPH
            src_list += [a, b]
            dst_list += [b, a]
    edge_index = jnp.array([src_list, dst_list], dtype=jnp.int32)
    num_edges = edge_index.shape[1]
    edge_attr = jax.random.normal(k_ea, (num_edges, 3), jnp.float32)
    bond_length = jnp.abs(jax.random.normal(k_bl, (num_edges,), jnp.float32)) + 0.5

    out = gin_graph_pooling_forward(
        params, x, pos, edge_index, edge_attr, bond_length,
        num_graphs=NUM_GRAPHS, n_head=N_HEAD, num_layers=NUM_LAYERS)
    out = jax.block_until_ready(out)
    assert out.shape == (NUM_NODES, NUM_TASKS)
    assert bool(jnp.all(jnp.isfinite(out)))

    # TODO(synk): EmbAtomEncoder / GINConv / MultiHeadAttention source was not
    # provided; standard OGB / transformer-style definitions are used here.
    print("KERNEL_OK")
</pallas_src>

<mosaic_0001>
module attributes {stable_mosaic.version = 11 : i64} {
  func.func @_gin_forward_kernel(%arg0: i32, %arg1: memref<1x32x12xbf16, #tpu.memory_space<vmem>>, %arg2: memref<1x64x4xbf16, #tpu.memory_space<vmem>>, %arg3: memref<1x4x16x8xbf16, #tpu.memory_space<vmem>>, %arg4: memref<1x4x8x16xbf16, #tpu.memory_space<vmem>>, %arg5: memref<12x32xbf16, #tpu.memory_space<vmem>>, %arg6: memref<1x32xf32, #tpu.memory_space<vmem>>, %arg7: memref<4x96xbf16, #tpu.memory_space<vmem>>, %arg8: memref<1x96xf32, #tpu.memory_space<vmem>>, %arg9: memref<3x32x64xbf16, #tpu.memory_space<vmem>>, %arg10: memref<3x1x64xf32, #tpu.memory_space<vmem>>, %arg11: memref<3x64x32xbf16, #tpu.memory_space<vmem>>, %arg12: memref<3x1x32xf32, #tpu.memory_space<vmem>>, %arg13: memref<3x32x96xbf16, #tpu.memory_space<vmem>>, %arg14: memref<3x1x96xf32, #tpu.memory_space<vmem>>, %arg15: memref<3x32x32xbf16, #tpu.memory_space<vmem>>, %arg16: memref<3x1x32xf32, #tpu.memory_space<vmem>>, %arg17: memref<1x32xbf16, #tpu.memory_space<vmem>>, %arg18: memref<1x1xf32, #tpu.memory_space<vmem>>, %arg19: memref<1x1x32xf32, #tpu.memory_space<vmem>>) attributes {dimension_semantics = [#tpu.dimension_semantics<parallel>], iteration_bounds = array<i64: 2>, scalar_prefetch = 0 : i64, scratch_operands = 0 : i64, tpu.core_type = #tpu.core_type<tc>, window_params = [{transform_indices = @transform_0, window_bounds = array<i64: 1, 32, 12>}, {transform_indices = @transform_1, window_bounds = array<i64: 1, 64, 4>}, {transform_indices = @transform_2, window_bounds = array<i64: 1, 4, 16, 8>}, {transform_indices = @transform_3, window_bounds = array<i64: 1, 4, 8, 16>}, {pipeline_mode = #tpu.pipeline_mode<synchronous>, transform_indices = @transform_4, window_bounds = array<i64: 12, 32>}, {pipeline_mode = #tpu.pipeline_mode<synchronous>, transform_indices = @transform_5, window_bounds = array<i64: 1, 32>}, {pipeline_mode = #tpu.pipeline_mode<synchronous>, transform_indices = @transform_6, window_bounds = array<i64: 4, 96>}, {pipeline_mode = #tpu.pipeline_mode<synchronous>, transform_indices = @transform_7, window_bounds = array<i64: 1, 96>}, {pipeline_mode = #tpu.pipeline_mode<synchronous>, transform_indices = @transform_8, window_bounds = array<i64: 3, 32, 64>}, {pipeline_mode = #tpu.pipeline_mode<synchronous>, transform_indices = @transform_9, window_bounds = array<i64: 3, 1, 64>}, {pipeline_mode = #tpu.pipeline_mode<synchronous>, transform_indices = @transform_10, window_bounds = array<i64: 3, 64, 32>}, {pipeline_mode = #tpu.pipeline_mode<synchronous>, transform_indices = @transform_11, window_bounds = array<i64: 3, 1, 32>}, {pipeline_mode = #tpu.pipeline_mode<synchronous>, transform_indices = @transform_12, window_bounds = array<i64: 3, 32, 96>}, {pipeline_mode = #tpu.pipeline_mode<synchronous>, transform_indices = @transform_13, window_bounds = array<i64: 3, 1, 96>}, {pipeline_mode = #tpu.pipeline_mode<synchronous>, transform_indices = @transform_14, window_bounds = array<i64: 3, 32, 32>}, {pipeline_mode = #tpu.pipeline_mode<synchronous>, transform_indices = @transform_15, window_bounds = array<i64: 3, 1, 32>}, {pipeline_mode = #tpu.pipeline_mode<synchronous>, transform_indices = @transform_16, window_bounds = array<i64: 1, 32>}, {pipeline_mode = #tpu.pipeline_mode<synchronous>, transform_indices = @transform_17, window_bounds = array<i64: 1, 1>}, {transform_indices = @transform_18, window_bounds = array<i64: 1, 1, 32>}]} {
    %c0 = arith.constant 0 : index
    %c0_0 = arith.constant 0 : index
    %c0_1 = arith.constant 0 : index
    %0 = vector.load %arg1[%c0, %c0_0, %c0_1] : memref<1x32x12xbf16, #tpu.memory_space<vmem>>, vector<1x32x12xbf16>
    %1 = vector.shape_cast %0 : vector<1x32x12xbf16> to vector<32x12xbf16>
    %c0_2 = arith.constant 0 : index
    %c0_3 = arith.constant 0 : index
    %c0_4 = arith.constant 0 : index
    %2 = vector.load %arg2[%c0_2, %c0_3, %c0_4] : memref<1x64x4xbf16, #tpu.memory_space<vmem>>, vector<1x64x4xbf16>
    %3 = vector.shape_cast %2 : vector<1x64x4xbf16> to vector<64x4xbf16>
    %c0_5 = arith.constant 0 : index
    %c0_6 = arith.constant 0 : index
    %c0_7 = arith.constant 0 : index
    %c0_8 = arith.constant 0 : index
    %4 = vector.load %arg3[%c0_5, %c0_6, %c0_7, %c0_8] : memref<1x4x16x8xbf16, #tpu.memory_space<vmem>>, vector<1x4x16x8xbf16>
    %5 = vector.shape_cast %4 : vector<1x4x16x8xbf16> to vector<4x16x8xbf16>
    %c0_9 = arith.constant 0 : index
    %c0_10 = arith.constant 0 : index
    %c0_11 = arith.constant 0 : index
    %c0_12 = arith.constant 0 : index
    %6 = vector.load %arg4[%c0_9, %c0_10, %c0_11, %c0_12] : memref<1x4x8x16xbf16, #tpu.memory_space<vmem>>, vector<1x4x8x16xbf16>
    %7 = vector.shape_cast %6 : vector<1x4x8x16xbf16> to vector<4x8x16xbf16>
    %c0_13 = arith.constant 0 : index
    %c0_14 = arith.constant 0 : index
    %8 = vector.load %arg5[%c0_13, %c0_14] : memref<12x32xbf16, #tpu.memory_space<vmem>>, vector<12x32xbf16>
    %cst = arith.constant dense<0.000000e+00> : vector<32x32xf32>
    %9 = tpu.matmul %1, %8, %cst {dimension_numbers = #tpu.dot_dimension_numbers<[1], [0], [0], [1], [0, 0, 1, 1], [], []>} : vector<32x12xbf16>, vector<12x32xbf16>, vector<32x32xf32> -> vector<32x32xf32>
    %c0_15 = arith.constant 0 : index
    %c0_16 = arith.constant 0 : index
    %10 = vector.load %arg6[%c0_15, %c0_16] : memref<1x32xf32, #tpu.memory_space<vmem>>, vector<1x32xf32>
    %11 = vector.broadcast %10 : vector<1x32xf32> to vector<32x32xf32>
    %12 = arith.addf %9, %11 : vector<32x32xf32>
    %c0_17 = arith.constant 0 : index
    %c0_18 = arith.constant 0 : index
    %13 = vector.load %arg7[%c0_17, %c0_18] : memref<4x96xbf16, #tpu.memory_space<vmem>>, vector<4x96xbf16>
    %cst_19 = arith.constant dense<0.000000e+00> : vector<64x96xf32>
    %14 = tpu.matmul %3, %13, %cst_19 {dimension_numbers = #tpu.dot_dimension_numbers<[1], [0], [0], [1], [0, 0, 1, 1], [], []>} : vector<64x4xbf16>, vector<4x96xbf16>, vector<64x96xf32> -> vector<64x96xf32>
    %c0_20 = arith.constant 0 : index
    %c0_21 = arith.constant 0 : index
    %15 = vector.load %arg8[%c0_20, %c0_21] : memref<1x96xf32, #tpu.memory_space<vmem>>, vector<1x96xf32>
    %16 = vector.broadcast %15 : vector<1x96xf32> to vector<64x96xf32>
    %17 = arith.addf %14, %16 : vector<64x96xf32>
    %cst_22 = arith.constant 0.000000e+00 : f32
    %18 = vector.broadcast %cst_22 : f32 to vector<64x96xf32>
    %19 = arith.maximumf %17, %18 : vector<64x96xf32>
    %20 = vector.shape_cast %12 : vector<32x32xf32> to vector<4x8x32xf32>
    %21 = arith.truncf %20 : vector<4x8x32xf32> to vector<4x8x32xbf16>
    %cst_23 = arith.constant dense<0.000000e+00> : vector<4x16x32xf32>
    %22 = tpu.matmul %5, %21, %cst_23 {dimension_numbers = #tpu.dot_dimension_numbers<[2], [1], [1], [2], [0, 0, 0, 1, 1, 2], [0], [0]>} : vector<4x16x8xbf16>, vector<4x8x32xbf16>, vector<4x16x32xf32> -> vector<4x16x32xf32>
    %23 = vector.extract_strided_slice %19 {offsets = [0, 0], sizes = [64, 32], strides = [1, 1]} : vector<64x96xf32> to vector<64x32xf32>
    %24 = vector.shape_cast %23 : vector<64x32xf32> to vector<4x16x32xf32>
    %25 = arith.addf %22, %24 : vector<4x16x32xf32>
    %cst_24 = arith.constant 0.000000e+00 : f32
    %26 = vector.broadcast %cst_24 : f32 to vector<4x16x32xf32>
    %27 = arith.maximumf %25, %26 : vector<4x16x32xf32>
    %28 = arith.truncf %27 : vector<4x16x32xf32> to vector<4x16x32xbf16>
    %cst_25 = arith.constant dense<0.000000e+00> : vector<4x8x32xf32>
    %29 = tpu.matmul %7, %28, %cst_25 {dimension_numbers = #tpu.dot_dimension_numbers<[2], [1], [1], [2], [0, 0, 0, 1, 1, 2], [0], [0]>} : vector<4x8x16xbf16>, vector<4x16x32xbf16>, vector<4x8x32xf32> -> vector<4x8x32xf32>
    %cst_26 = arith.constant 1.000000e+00 : f32
    %30 = vector.broadcast %cst_26 : f32 to vector<32x32xf32>
    %31 = arith.mulf %30, %12 : vector<32x32xf32>
    %32 = vector.shape_cast %29 : vector<4x8x32xf32> to vector<32x32xf32>
    %33 = arith.addf %31, %32 : vector<32x32xf32>
    %34 = arith.truncf %33 : vector<32x32xf32> to vector<32x32xbf16>
    %c0_27 = arith.constant 0 : index
    %c0_28 = arith.constant 0 : index
    %c0_29 = arith.constant 0 : index
    %35 = vector.load %arg9[%c0_27, %c0_28, %c0_29] : memref<3x32x64xbf16, #tpu.memory_space<vmem>>, vector<1x32x64xbf16>
    %36 = vector.shape_cast %35 : vector<1x32x64xbf16> to vector<32x64xbf16>
    %cst_30 = arith.constant dense<0.000000e+00> : vector<32x64xf32>
    %37 = tpu.matmul %34, %36, %cst_30 {dimension_numbers = #tpu.dot_dimension_numbers<[1], [0], [0], [1], [0, 0, 1, 1], [], []>} : vector<32x32xbf16>, vector<32x64xbf16>, vector<32x64xf32> -> vector<32x64xf32>
    %c0_31 = arith.constant 0 : index
    %c0_32 = arith.constant 0 : index
    %c0_33 = arith.constant 0 : index
    %38 = vector.load %arg10[%c0_31, %c0_32, %c0_33] : memref<3x1x64xf32, #tpu.memory_space<vmem>>, vector<1x1x64xf32>
    %39 = vector.shape_cast %38 : vector<1x1x64xf32> to vector<1x64xf32>
    %40 = vector.broadcast %39 : vector<1x64xf32> to vector<32x64xf32>
    %41 = arith.addf %37, %40 : vector<32x64xf32>
    %cst_34 = arith.constant 0.000000e+00 : f32
    %42 = vector.broadcast %cst_34 : f32 to vector<32x64xf32>
    %43 = arith.maximumf %41, %42 : vector<32x64xf32>
    %44 = arith.truncf %43 : vector<32x64xf32> to vector<32x64xbf16>
    %c0_35 = arith.constant 0 : index
    %c0_36 = arith.constant 0 : index
    %c0_37 = arith.constant 0 : index
    %45 = vector.load %arg11[%c0_35, %c0_36, %c0_37] : memref<3x64x32xbf16, #tpu.memory_space<vmem>>, vector<1x64x32xbf16>
    %46 = vector.shape_cast %45 : vector<1x64x32xbf16> to vector<64x32xbf16>
    %cst_38 = arith.constant dense<0.000000e+00> : vector<32x32xf32>
    %47 = tpu.matmul %44, %46, %cst_38 {dimension_numbers = #tpu.dot_dimension_numbers<[1], [0], [0], [1], [0, 0, 1, 1], [], []>} : vector<32x64xbf16>, vector<64x32xbf16>, vector<32x32xf32> -> vector<32x32xf32>
    %c0_39 = arith.constant 0 : index
    %c0_40 = arith.constant 0 : index
    %c0_41 = arith.constant 0 : index
    %48 = vector.load %arg12[%c0_39, %c0_40, %c0_41] : memref<3x1x32xf32, #tpu.memory_space<vmem>>, vector<1x1x32xf32>
    %49 = vector.shape_cast %48 : vector<1x1x32xf32> to vector<1x32xf32>
    %50 = vector.broadcast %49 : vector<1x32xf32> to vector<32x32xf32>
    %51 = arith.addf %47, %50 : vector<32x32xf32>
    %52 = arith.truncf %51 : vector<32x32xf32> to vector<32x32xbf16>
    %c0_42 = arith.constant 0 : index
    %c0_43 = arith.constant 0 : index
    %c0_44 = arith.constant 0 : index
    %53 = vector.load %arg13[%c0_42, %c0_43, %c0_44] : memref<3x32x96xbf16, #tpu.memory_space<vmem>>, vector<1x32x96xbf16>
    %54 = vector.shape_cast %53 : vector<1x32x96xbf16> to vector<32x96xbf16>
    %cst_45 = arith.constant dense<0.000000e+00> : vector<32x96xf32>
    %55 = tpu.matmul %52, %54, %cst_45 {dimension_numbers = #tpu.dot_dimension_numbers<[1], [0], [0], [1], [0, 0, 1, 1], [], []>} : vector<32x32xbf16>, vector<32x96xbf16>, vector<32x96xf32> -> vector<32x96xf32>
    %c0_46 = arith.constant 0 : index
    %c0_47 = arith.constant 0 : index
    %c0_48 = arith.constant 0 : index
    %56 = vector.load %arg14[%c0_46, %c0_47, %c0_48] : memref<3x1x96xf32, #tpu.memory_space<vmem>>, vector<1x1x96xf32>
    %57 = vector.shape_cast %56 : vector<1x1x96xf32> to vector<1x96xf32>
    %58 = vector.broadcast %57 : vector<1x96xf32> to vector<32x96xf32>
    %59 = arith.addf %55, %58 : vector<32x96xf32>
    %60 = vector.shape_cast %59 : vector<32x96xf32> to vector<4x8x96xf32>
    %61 = arith.truncf %60 : vector<4x8x96xf32> to vector<4x8x96xbf16>
    %c0_49 = arith.constant 0 : index
    %c0_50 = arith.constant 0 : index
    %c0_51 = arith.constant 0 : index
    %62 = vector.load %arg15[%c0_49, %c0_50, %c0_51] : memref<3x32x32xbf16, #tpu.memory_space<vmem>>, vector<1x32x32xbf16>
    %63 = vector.shape_cast %62 : vector<1x32x32xbf16> to vector<32x32xbf16>
    %cst_52 = arith.constant 0.000000e+00 : f32
    %64 = vector.broadcast %cst_52 : f32 to vector<32x32xf32>
    %65 = vector.extract_strided_slice %61 {offsets = [0, 0, 0], sizes = [4, 8, 8], strides = [1, 1, 1]} : vector<4x8x96xbf16> to vector<4x8x8xbf16>
    %66 = vector.extract_strided_slice %61 {offsets = [0, 0, 32], sizes = [4, 8, 8], strides = [1, 1, 1]} : vector<4x8x96xbf16> to vector<4x8x8xbf16>
    %67 = vector.extract_strided_slice %61 {offsets = [0, 0, 64], sizes = [4, 8, 8], strides = [1, 1, 1]} : vector<4x8x96xbf16> to vector<4x8x8xbf16>
    %cst_53 = arith.constant dense<0.000000e+00> : vector<4x8x8xf32>
    %68 = tpu.matmul %65, %66, %cst_53 {dimension_numbers = #tpu.dot_dimension_numbers<[2], [2], [1], [1], [0, 0, 0, 1, 1, 1], [0], [0]>} : vector<4x8x8xbf16>, vector<4x8x8xbf16>, vector<4x8x8xf32> -> vector<4x8x8xf32>
    %cst_54 = arith.constant dense<0xFF800000> : vector<4x8xf32>
    %69 = vector.multi_reduction <maximumf>, %68, %cst_54 [2] : vector<4x8x8xf32> to vector<4x8xf32>
    %70 = vector.shape_cast %69 : vector<4x8xf32> to vector<4x8x1xf32>
    %71 = vector.broadcast %70 : vector<4x8x1xf32> to vector<4x8x8xf32>
    %72 = arith.subf %68, %71 : vector<4x8x8xf32>
    %73 = math.exp %72 : vector<4x8x8xf32>
    %cst_55 = arith.constant dense<0.000000e+00> : vector<4x8xf32>
    %74 = vector.multi_reduction <add>, %73, %cst_55 [2] : vector<4x8x8xf32> to vector<4x8xf32>
    %75 = vector.shape_cast %74 : vector<4x8xf32> to vector<4x8x1xf32>
    %76 = tpu.reciprocal %75 {approx = true} : vector<4x8x1xf32> -> vector<4x8x1xf32>
    %77 = vector.broadcast %76 : vector<4x8x1xf32> to vector<4x8x8xf32>
    %78 = arith.mulf %73, %77 : vector<4x8x8xf32>
    %79 = arith.truncf %78 : vector<4x8x8xf32> to vector<4x8x8xbf16>
    %cst_56 = arith.constant dense<0.000000e+00> : vector<4x8x8xf32>
    %80 = tpu.matmul %79, %67, %cst_56 {dimension_numbers = #tpu.dot_dimension_numbers<[2], [1], [1], [2], [0, 0, 0, 1, 1, 2], [0], [0]>} : vector<4x8x8xbf16>, vector<4x8x8xbf16>, vector<4x8x8xf32> -> vector<4x8x8xf32>
    %81 = vector.shape_cast %80 : vector<4x8x8xf32> to vector<32x8xf32>
    %82 = arith.truncf %81 : vector<32x8xf32> to vector<32x8xbf16>
    %83 = vector.extract_strided_slice %63 {offsets = [0, 0], sizes = [8, 32], strides = [1, 1]} : vector<32x32xbf16> to vector<8x32xbf16>
    %cst_57 = arith.constant dense<0.000000e+00> : vector<32x32xf32>
    %84 = tpu.matmul %82, %83, %cst_57 {dimension_numbers = #tpu.dot_dimension_numbers<[1], [0], [0], [1], [0, 0, 1, 1], [], []>} : vector<32x8xbf16>, vector<8x32xbf16>, vector<32x32xf32> -> vector<32x32xf32>
    %85 = arith.addf %64, %84 : vector<32x32xf32>
    %86 = vector.extract_strided_slice %61 {offsets = [0, 0, 8], sizes = [4, 8, 8], strides = [1, 1, 1]} : vector<4x8x96xbf16> to vector<4x8x8xbf16>
    %87 = vector.extract_strided_slice %61 {offsets = [0, 0, 40], sizes = [4, 8, 8], strides = [1, 1, 1]} : vector<4x8x96xbf16> to vector<4x8x8xbf16>
    %88 = vector.extract_strided_slice %61 {offsets = [0, 0, 72], sizes = [4, 8, 8], strides = [1, 1, 1]} : vector<4x8x96xbf16> to vector<4x8x8xbf16>
    %cst_58 = arith.constant dense<0.000000e+00> : vector<4x8x8xf32>
    %89 = tpu.matmul %86, %87, %cst_58 {dimension_numbers = #tpu.dot_dimension_numbers<[2], [2], [1], [1], [0, 0, 0, 1, 1, 1], [0], [0]>} : vector<4x8x8xbf16>, vector<4x8x8xbf16>, vector<4x8x8xf32> -> vector<4x8x8xf32>
    %cst_59 = arith.constant dense<0xFF800000> : vector<4x8xf32>
    %90 = vector.multi_reduction <maximumf>, %89, %cst_59 [2] : vector<4x8x8xf32> to vector<4x8xf32>
    %91 = vector.shape_cast %90 : vector<4x8xf32> to vector<4x8x1xf32>
    %92 = vector.broadcast %91 : vector<4x8x1xf32> to vector<4x8x8xf32>
    %93 = arith.subf %89, %92 : vector<4x8x8xf32>
    %94 = math.exp %93 : vector<4x8x8xf32>
    %cst_60 = arith.constant dense<0.000000e+00> : vector<4x8xf32>
    %95 = vector.multi_reduction <add>, %94, %cst_60 [2] : vector<4x8x8xf32> to vector<4x8xf32>
    %96 = vector.shape_cast %95 : vector<4x8xf32> to vector<4x8x1xf32>
    %97 = tpu.reciprocal %96 {approx = true} : vector<4x8x1xf32> -> vector<4x8x1xf32>
    %98 = vector.broadcast %97 : vector<4x8x1xf32> to vector<4x8x8xf32>
    %99 = arith.mulf %94, %98 : vector<4x8x8xf32>
    %100 = arith.truncf %99 : vector<4x8x8xf32> to vector<4x8x8xbf16>
    %cst_61 = arith.constant dense<0.000000e+00> : vector<4x8x8xf32>
    %101 = tpu.matmul %100, %88, %cst_61 {dimension_numbers = #tpu.dot_dimension_numbers<[2], [1], [1], [2], [0, 0, 0, 1, 1, 2], [0], [0]>} : vector<4x8x8xbf16>, vector<4x8x8xbf16>, vector<4x8x8xf32> -> vector<4x8x8xf32>
    %102 = vector.shape_cast %101 : vector<4x8x8xf32> to vector<32x8xf32>
    %103 = arith.truncf %102 : vector<32x8xf32> to vector<32x8xbf16>
    %104 = vector.extract_strided_slice %63 {offsets = [8, 0], sizes = [8, 32], strides = [1, 1]} : vector<32x32xbf16> to vector<8x32xbf16>
    %cst_62 = arith.constant dense<0.000000e+00> : vector<32x32xf32>
    %105 = tpu.matmul %103, %104, %cst_62 {dimension_numbers = #tpu.dot_dimension_numbers<[1], [0], [0], [1], [0, 0, 1, 1], [], []>} : vector<32x8xbf16>, vector<8x32xbf16>, vector<32x32xf32> -> vector<32x32xf32>
    %106 = arith.addf %85, %105 : vector<32x32xf32>
    %107 = vector.extract_strided_slice %61 {offsets = [0, 0, 16], sizes = [4, 8, 8], strides = [1, 1, 1]} : vector<4x8x96xbf16> to vector<4x8x8xbf16>
    %108 = vector.extract_strided_slice %61 {offsets = [0, 0, 48], sizes = [4, 8, 8], strides = [1, 1, 1]} : vector<4x8x96xbf16> to vector<4x8x8xbf16>
    %109 = vector.extract_strided_slice %61 {offsets = [0, 0, 80], sizes = [4, 8, 8], strides = [1, 1, 1]} : vector<4x8x96xbf16> to vector<4x8x8xbf16>
    %cst_63 = arith.constant dense<0.000000e+00> : vector<4x8x8xf32>
    %110 = tpu.matmul %107, %108, %cst_63 {dimension_numbers = #tpu.dot_dimension_numbers<[2], [2], [1], [1], [0, 0, 0, 1, 1, 1], [0], [0]>} : vector<4x8x8xbf16>, vector<4x8x8xbf16>, vector<4x8x8xf32> -> vector<4x8x8xf32>
    %cst_64 = arith.constant dense<0xFF800000> : vector<4x8xf32>
    %111 = vector.multi_reduction <maximumf>, %110, %cst_64 [2] : vector<4x8x8xf32> to vector<4x8xf32>
    %112 = vector.shape_cast %111 : vector<4x8xf32> to vector<4x8x1xf32>
    %113 = vector.broadcast %112 : vector<4x8x1xf32> to vector<4x8x8xf32>
    %114 = arith.subf %110, %113 : vector<4x8x8xf32>
    %115 = math.exp %114 : vector<4x8x8xf32>
    %cst_65 = arith.constant dense<0.000000e+00> : vector<4x8xf32>
    %116 = vector.multi_reduction <add>, %115, %cst_65 [2] : vector<4x8x8xf32> to vector<4x8xf32>
    %117 = vector.shape_cast %116 : vector<4x8xf32> to vector<4x8x1xf32>
    %118 = tpu.reciprocal %117 {approx = true} : vector<4x8x1xf32> -> vector<4x8x1xf32>
    %119 = vector.broadcast %118 : vector<4x8x1xf32> to vector<4x8x8xf32>
    %120 = arith.mulf %115, %119 : vector<4x8x8xf32>
    %121 = arith.truncf %120 : vector<4x8x8xf32> to vector<4x8x8xbf16>
    %cst_66 = arith.constant dense<0.000000e+00> : vector<4x8x8xf32>
    %122 = tpu.matmul %121, %109, %cst_66 {dimension_numbers = #tpu.dot_dimension_numbers<[2], [1], [1], [2], [0, 0, 0, 1, 1, 2], [0], [0]>} : vector<4x8x8xbf16>, vector<4x8x8xbf16>, vector<4x8x8xf32> -> vector<4x8x8xf32>
    %123 = vector.shape_cast %122 : vector<4x8x8xf32> to vector<32x8xf32>
    %124 = arith.truncf %123 : vector<32x8xf32> to vector<32x8xbf16>
    %125 = vector.extract_strided_slice %63 {offsets = [16, 0], sizes = [8, 32], strides = [1, 1]} : vector<32x32xbf16> to vector<8x32xbf16>
    %cst_67 = arith.constant dense<0.000000e+00> : vector<32x32xf32>
    %126 = tpu.matmul %124, %125, %cst_67 {dimension_numbers = #tpu.dot_dimension_numbers<[1], [0], [0], [1], [0, 0, 1, 1], [], []>} : vector<32x8xbf16>, vector<8x32xbf16>, vector<32x32xf32> -> vector<32x32xf32>
    %127 = arith.addf %106, %126 : vector<32x32xf32>
    %128 = vector.extract_strided_slice %61 {offsets = [0, 0, 24], sizes = [4, 8, 8], strides = [1, 1, 1]} : vector<4x8x96xbf16> to vector<4x8x8xbf16>
    %129 = vector.extract_strided_slice %61 {offsets = [0, 0, 56], sizes = [4, 8, 8], strides = [1, 1, 1]} : vector<4x8x96xbf16> to vector<4x8x8xbf16>
    %130 = vector.extract_strided_slice %61 {offsets = [0, 0, 88], sizes = [4, 8, 8], strides = [1, 1, 1]} : vector<4x8x96xbf16> to vector<4x8x8xbf16>
    %cst_68 = arith.constant dense<0.000000e+00> : vector<4x8x8xf32>
    %131 = tpu.matmul %128, %129, %cst_68 {dimension_numbers = #tpu.dot_dimension_numbers<[2], [2], [1], [1], [0, 0, 0, 1, 1, 1], [0], [0]>} : vector<4x8x8xbf16>, vector<4x8x8xbf16>, vector<4x8x8xf32> -> vector<4x8x8xf32>
    %cst_69 = arith.constant dense<0xFF800000> : vector<4x8xf32>
    %132 = vector.multi_reduction <maximumf>, %131, %cst_69 [2] : vector<4x8x8xf32> to vector<4x8xf32>
    %133 = vector.shape_cast %132 : vector<4x8xf32> to vector<4x8x1xf32>
    %134 = vector.broadcast %133 : vector<4x8x1xf32> to vector<4x8x8xf32>
    %135 = arith.subf %131, %134 : vector<4x8x8xf32>
    %136 = math.exp %135 : vector<4x8x8xf32>
    %cst_70 = arith.constant dense<0.000000e+00> : vector<4x8xf32>
    %137 = vector.multi_reduction <add>, %136, %cst_70 [2] : vector<4x8x8xf32> to vector<4x8xf32>
    %138 = vector.shape_cast %137 : vector<4x8xf32> to vector<4x8x1xf32>
    %139 = tpu.reciprocal %138 {approx = true} : vector<4x8x1xf32> -> vector<4x8x1xf32>
    %140 = vector.broadcast %139 : vector<4x8x1xf32> to vector<4x8x8xf32>
    %141 = arith.mulf %136, %140 : vector<4x8x8xf32>
    %142 = arith.truncf %141 : vector<4x8x8xf32> to vector<4x8x8xbf16>
    %cst_71 = arith.constant dense<0.000000e+00> : vector<4x8x8xf32>
    %143 = tpu.matmul %142, %130, %cst_71 {dimension_numbers = #tpu.dot_dimension_numbers<[2], [1], [1], [2], [0, 0, 0, 1, 1, 2], [0], [0]>} : vector<4x8x8xbf16>, vector<4x8x8xbf16>, vector<4x8x8xf32> -> vector<4x8x8xf32>
    %144 = vector.shape_cast %143 : vector<4x8x8xf32> to vector<32x8xf32>
    %145 = arith.truncf %144 : vector<32x8xf32> to vector<32x8xbf16>
    %146 = vector.extract_strided_slice %63 {offsets = [24, 0], sizes = [8, 32], strides = [1, 1]} : vector<32x32xbf16> to vector<8x32xbf16>
    %cst_72 = arith.constant dense<0.000000e+00> : vector<32x32xf32>
    %147 = tpu.matmul %145, %146, %cst_72 {dimension_numbers = #tpu.dot_dimension_numbers<[1], [0], [0], [1], [0, 0, 1, 1], [], []>} : vector<32x8xbf16>, vector<8x32xbf16>, vector<32x32xf32> -> vector<32x32xf32>
    %148 = arith.addf %127, %147 : vector<32x32xf32>
    %c0_73 = arith.constant 0 : index
    %c0_74 = arith.constant 0 : index
    %c0_75 = arith.constant 0 : index
    %149 = vector.load %arg16[%c0_73, %c0_74, %c0_75] : memref<3x1x32xf32, #tpu.memory_space<vmem>>, vector<1x1x32xf32>
    %150 = vector.shape_cast %149 : vector<1x1x32xf32> to vector<1x32xf32>
    %151 = vector.broadcast %150 : vector<1x32xf32> to vector<32x32xf32>
    %152 = arith.addf %148, %151 : vector<32x32xf32>
    %cst_76 = arith.constant 0.000000e+00 : f32
    %153 = vector.broadcast %cst_76 : f32 to vector<32x32xf32>
    %154 = arith.maximumf %152, %153 : vector<32x32xf32>
    %155 = vector.shape_cast %154 : vector<32x32xf32> to vector<4x8x32xf32>
    %156 = arith.truncf %155 : vector<4x8x32xf32> to vector<4x8x32xbf16>
    %cst_77 = arith.constant dense<0.000000e+00> : vector<4x16x32xf32>
    %157 = tpu.matmul %5, %156, %cst_77 {dimension_numbers = #tpu.dot_dimension_numbers<[2], [1], [1], [2], [0, 0, 0, 1, 1, 2], [0], [0]>} : vector<4x16x8xbf16>, vector<4x8x32xbf16>, vector<4x16x32xf32> -> vector<4x16x32xf32>
    %158 = vector.extract_strided_slice %19 {offsets = [0, 32], sizes = [64, 32], strides = [1, 1]} : vector<64x96xf32> to vector<64x32xf32>
    %159 = vector.shape_cast %158 : vector<64x32xf32> to vector<4x16x32xf32>
    %160 = arith.addf %157, %159 : vector<4x16x32xf32>
    %cst_78 = arith.constant 0.000000e+00 : f32
    %161 = vector.broadcast %cst_78 : f32 to vector<4x16x32xf32>
    %162 = arith.maximumf %160, %161 : vector<4x16x32xf32>
    %163 = arith.truncf %162 : vector<4x16x32xf32> to vector<4x16x32xbf16>
    %cst_79 = arith.constant dense<0.000000e+00> : vector<4x8x32xf32>
    %164 = tpu.matmul %7, %163, %cst_79 {dimension_numbers = #tpu.dot_dimension_numbers<[2], [1], [1], [2], [0, 0, 0, 1, 1, 2], [0], [0]>} : vector<4x8x16xbf16>, vector<4x16x32xbf16>, vector<4x8x32xf32> -> vector<4x8x32xf32>
    %cst_80 = arith.constant 1.000000e+00 : f32
    %165 = vector.broadcast %cst_80 : f32 to vector<32x32xf32>
    %166 = arith.mulf %165, %154 : vector<32x32xf32>
    %167 = vector.shape_cast %164 : vector<4x8x32xf32> to vector<32x32xf32>
    %168 = arith.addf %166, %167 : vector<32x32xf32>
    %169 = arith.truncf %168 : vector<32x32xf32> to vector<32x32xbf16>
    %c1 = arith.constant 1 : index
    %c0_81 = arith.constant 0 : index
    %c0_82 = arith.constant 0 : index
    %170 = vector.load %arg9[%c1, %c0_81, %c0_82] : memref<3x32x64xbf16, #tpu.memory_space<vmem>>, vector<1x32x64xbf16>
    %171 = vector.shape_cast %170 : vector<1x32x64xbf16> to vector<32x64xbf16>
    %cst_83 = arith.constant dense<0.000000e+00> : vector<32x64xf32>
    %172 = tpu.matmul %169, %171, %cst_83 {dimension_numbers = #tpu.dot_dimension_numbers<[1], [0], [0], [1], [0, 0, 1, 1], [], []>} : vector<32x32xbf16>, vector<32x64xbf16>, vector<32x64xf32> -> vector<32x64xf32>
    %c1_84 = arith.constant 1 : index
    %c0_85 = arith.constant 0 : index
    %c0_86 = arith.constant 0 : index
    %173 = vector.load %arg10[%c1_84, %c0_85, %c0_86] : memref<3x1x64xf32, #tpu.memory_space<vmem>>, vector<1x1x64xf32>
    %174 = vector.shape_cast %173 : vector<1x1x64xf32> to vector<1x64xf32>
    %175 = vector.broadcast %174 : vector<1x64xf32> to vector<32x64xf32>
    %176 = arith.addf %172, %175 : vector<32x64xf32>
    %cst_87 = arith.constant 0.000000e+00 : f32
    %177 = vector.broadcast %cst_87 : f32 to vector<32x64xf32>
    %178 = arith.maximumf %176, %177 : vector<32x64xf32>
    %179 = arith.truncf %178 : vector<32x64xf32> to vector<32x64xbf16>
    %c1_88 = arith.constant 1 : index
    %c0_89 = arith.constant 0 : index
    %c0_90 = arith.constant 0 : index
    %180 = vector.load %arg11[%c1_88, %c0_89, %c0_90] : memref<3x64x32xbf16, #tpu.memory_space<vmem>>, vector<1x64x32xbf16>
    %181 = vector.shape_cast %180 : vector<1x64x32xbf16> to vector<64x32xbf16>
    %cst_91 = arith.constant dense<0.000000e+00> : vector<32x32xf32>
    %182 = tpu.matmul %179, %181, %cst_91 {dimension_numbers = #tpu.dot_dimension_numbers<[1], [0], [0], [1], [0, 0, 1, 1], [], []>} : vector<32x64xbf16>, vector<64x32xbf16>, vector<32x32xf32> -> vector<32x32xf32>
    %c1_92 = arith.constant 1 : index
    %c0_93 = arith.constant 0 : index
    %c0_94 = arith.constant 0 : index
    %183 = vector.load %arg12[%c1_92, %c0_93, %c0_94] : memref<3x1x32xf32, #tpu.memory_space<vmem>>, vector<1x1x32xf32>
    %184 = vector.shape_cast %183 : vector<1x1x32xf32> to vector<1x32xf32>
    %185 = vector.broadcast %184 : vector<1x32xf32> to vector<32x32xf32>
    %186 = arith.addf %182, %185 : vector<32x32xf32>
    %187 = arith.truncf %186 : vector<32x32xf32> to vector<32x32xbf16>
    %c1_95 = arith.constant 1 : index
    %c0_96 = arith.constant 0 : index
    %c0_97 = arith.constant 0 : index
    %188 = vector.load %arg13[%c1_95, %c0_96, %c0_97] : memref<3x32x96xbf16, #tpu.memory_space<vmem>>, vector<1x32x96xbf16>
    %189 = vector.shape_cast %188 : vector<1x32x96xbf16> to vector<32x96xbf16>
    %cst_98 = arith.constant dense<0.000000e+00> : vector<32x96xf32>
    %190 = tpu.matmul %187, %189, %cst_98 {dimension_numbers = #tpu.dot_dimension_numbers<[1], [0], [0], [1], [0, 0, 1, 1], [], []>} : vector<32x32xbf16>, vector<32x96xbf16>, vector<32x96xf32> -> vector<32x96xf32>
    %c1_99 = arith.constant 1 : index
    %c0_100 = arith.constant 0 : index
    %c0_101 = arith.constant 0 : index
    %191 = vector.load %arg14[%c1_99, %c0_100, %c0_101] : memref<3x1x96xf32, #tpu.memory_space<vmem>>, vector<1x1x96xf32>
    %192 = vector.shape_cast %191 : vector<1x1x96xf32> to vector<1x96xf32>
    %193 = vector.broadcast %192 : vector<1x96xf32> to vector<32x96xf32>
    %194 = arith.addf %190, %193 : vector<32x96xf32>
    %195 = vector.shape_cast %194 : vector<32x96xf32> to vector<4x8x96xf32>
    %196 = arith.truncf %195 : vector<4x8x96xf32> to vector<4x8x96xbf16>
    %c1_102 = arith.constant 1 : index
    %c0_103 = arith.constant 0 : index
    %c0_104 = arith.constant 0 : index
    %197 = vector.load %arg15[%c1_102, %c0_103, %c0_104] : memref<3x32x32xbf16, #tpu.memory_space<vmem>>, vector<1x32x32xbf16>
    %198 = vector.shape_cast %197 : vector<1x32x32xbf16> to vector<32x32xbf16>
    %cst_105 = arith.constant 0.000000e+00 : f32
    %199 = vector.broadcast %cst_105 : f32 to vector<32x32xf32>
    %200 = vector.extract_strided_slice %196 {offsets = [0, 0, 0], sizes = [4, 8, 8], strides = [1, 1, 1]} : vector<4x8x96xbf16> to vector<4x8x8xbf16>
    %201 = vector.extract_strided_slice %196 {offsets = [0, 0, 32], sizes = [4, 8, 8], strides = [1, 1, 1]} : vector<4x8x96xbf16> to vector<4x8x8xbf16>
    %202 = vector.extract_strided_slice %196 {offsets = [0, 0, 64], sizes = [4, 8, 8], strides = [1, 1, 1]} : vector<4x8x96xbf16> to vector<4x8x8xbf16>
    %cst_106 = arith.constant dense<0.000000e+00> : vector<4x8x8xf32>
    %203 = tpu.matmul %200, %201, %cst_106 {dimension_numbers = #tpu.dot_dimension_numbers<[2], [2], [1], [1], [0, 0, 0, 1, 1, 1], [0], [0]>} : vector<4x8x8xbf16>, vector<4x8x8xbf16>, vector<4x8x8xf32> -> vector<4x8x8xf32>
    %cst_107 = arith.constant dense<0xFF800000> : vector<4x8xf32>
    %204 = vector.multi_reduction <maximumf>, %203, %cst_107 [2] : vector<4x8x8xf32> to vector<4x8xf32>
    %205 = vector.shape_cast %204 : vector<4x8xf32> to vector<4x8x1xf32>
    %206 = vector.broadcast %205 : vector<4x8x1xf32> to vector<4x8x8xf32>
    %207 = arith.subf %203, %206 : vector<4x8x8xf32>
    %208 = math.exp %207 : vector<4x8x8xf32>
    %cst_108 = arith.constant dense<0.000000e+00> : vector<4x8xf32>
    %209 = vector.multi_reduction <add>, %208, %cst_108 [2] : vector<4x8x8xf32> to vector<4x8xf32>
    %210 = vector.shape_cast %209 : vector<4x8xf32> to vector<4x8x1xf32>
    %211 = tpu.reciprocal %210 {approx = true} : vector<4x8x1xf32> -> vector<4x8x1xf32>
    %212 = vector.broadcast %211 : vector<4x8x1xf32> to vector<4x8x8xf32>
    %213 = arith.mulf %208, %212 : vector<4x8x8xf32>
    %214 = arith.truncf %213 : vector<4x8x8xf32> to vector<4x8x8xbf16>
    %cst_109 = arith.constant dense<0.000000e+00> : vector<4x8x8xf32>
    %215 = tpu.matmul %214, %202, %cst_109 {dimension_numbers = #tpu.dot_dimension_numbers<[2], [1], [1], [2], [0, 0, 0, 1, 1, 2], [0], [0]>} : vector<4x8x8xbf16>, vector<4x8x8xbf16>, vector<4x8x8xf32> -> vector<4x8x8xf32>
    %216 = vector.shape_cast %215 : vector<4x8x8xf32> to vector<32x8xf32>
    %217 = arith.truncf %216 : vector<32x8xf32> to vector<32x8xbf16>
    %218 = vector.extract_strided_slice %198 {offsets = [0, 0], sizes = [8, 32], strides = [1, 1]} : vector<32x32xbf16> to vector<8x32xbf16>
    %cst_110 = arith.constant dense<0.000000e+00> : vector<32x32xf32>
    %219 = tpu.matmul %217, %218, %cst_110 {dimension_numbers = #tpu.dot_dimension_numbers<[1], [0], [0], [1], [0, 0, 1, 1], [], []>} : vector<32x8xbf16>, vector<8x32xbf16>, vector<32x32xf32> -> vector<32x32xf32>
    %220 = arith.addf %199, %219 : vector<32x32xf32>
    %221 = vector.extract_strided_slice %196 {offsets = [0, 0, 8], sizes = [4, 8, 8], strides = [1, 1, 1]} : vector<4x8x96xbf16> to vector<4x8x8xbf16>
    %222 = vector.extract_strided_slice %196 {offsets = [0, 0, 40], sizes = [4, 8, 8], strides = [1, 1, 1]} : vector<4x8x96xbf16> to vector<4x8x8xbf16>
    %223 = vector.extract_strided_slice %196 {offsets = [0, 0, 72], sizes = [4, 8, 8], strides = [1, 1, 1]} : vector<4x8x96xbf16> to vector<4x8x8xbf16>
    %cst_111 = arith.constant dense<0.000000e+00> : vector<4x8x8xf32>
    %224 = tpu.matmul %221, %222, %cst_111 {dimension_numbers = #tpu.dot_dimension_numbers<[2], [2], [1], [1], [0, 0, 0, 1, 1, 1], [0], [0]>} : vector<4x8x8xbf16>, vector<4x8x8xbf16>, vector<4x8x8xf32> -> vector<4x8x8xf32>
    %cst_112 = arith.constant dense<0xFF800000> : vector<4x8xf32>
    %225 = vector.multi_reduction <maximumf>, %224, %cst_112 [2] : vector<4x8x8xf32> to vector<4x8xf32>
    %226 = vector.shape_cast %225 : vector<4x8xf32> to vector<4x8x1xf32>
    %227 = vector.broadcast %226 : vector<4x8x1xf32> to vector<4x8x8xf32>
    %228 = arith.subf %224, %227 : vector<4x8x8xf32>
    %229 = math.exp %228 : vector<4x8x8xf32>
    %cst_113 = arith.constant dense<0.000000e+00> : vector<4x8xf32>
    %230 = vector.multi_reduction <add>, %229, %cst_113 [2] : vector<4x8x8xf32> to vector<4x8xf32>
    %231 = vector.shape_cast %230 : vector<4x8xf32> to vector<4x8x1xf32>
    %232 = tpu.reciprocal %231 {approx = true} : vector<4x8x1xf32> -> vector<4x8x1xf32>
    %233 = vector.broadcast %232 : vector<4x8x1xf32> to vector<4x8x8xf32>
    %234 = arith.mulf %229, %233 : vector<4x8x8xf32>
    %235 = arith.truncf %234 : vector<4x8x8xf32> to vector<4x8x8xbf16>
    %cst_114 = arith.constant dense<0.000000e+00> : vector<4x8x8xf32>
    %236 = tpu.matmul %235, %223, %cst_114 {dimension_numbers = #tpu.dot_dimension_numbers<[2], [1], [1], [2], [0, 0, 0, 1, 1, 2], [0], [0]>} : vector<4x8x8xbf16>, vector<4x8x8xbf16>, vector<4x8x8xf32> -> vector<4x8x8xf32>
    %237 = vector.shape_cast %236 : vector<4x8x8xf32> to vector<32x8xf32>
    %238 = arith.truncf %237 : vector<32x8xf32> to vector<32x8xbf16>
    %239 = vector.extract_strided_slice %198 {offsets = [8, 0], sizes = [8, 32], strides = [1, 1]} : vector<32x32xbf16> to vector<8x32xbf16>
    %cst_115 = arith.constant dense<0.000000e+00> : vector<32x32xf32>
    %240 = tpu.matmul %238, %239, %cst_115 {dimension_numbers = #tpu.dot_dimension_numbers<[1], [0], [0], [1], [0, 0, 1, 1], [], []>} : vector<32x8xbf16>, vector<8x32xbf16>, vector<32x32xf32> -> vector<32x32xf32>
    %241 = arith.addf %220, %240 : vector<32x32xf32>
    %242 = vector.extract_strided_slice %196 {offsets = [0, 0, 16], sizes = [4, 8, 8], strides = [1, 1, 1]} : vector<4x8x96xbf16> to vector<4x8x8xbf16>
    %243 = vector.extract_strided_slice %196 {offsets = [0, 0, 48], sizes = [4, 8, 8], strides = [1, 1, 1]} : vector<4x8x96xbf16> to vector<4x8x8xbf16>
    %244 = vector.extract_strided_slice %196 {offsets = [0, 0, 80], sizes = [4, 8, 8], strides = [1, 1, 1]} : vector<4x8x96xbf16> to vector<4x8x8xbf16>
    %cst_116 = arith.constant dense<0.000000e+00> : vector<4x8x8xf32>
    %245 = tpu.matmul %242, %243, %cst_116 {dimension_numbers = #tpu.dot_dimension_numbers<[2], [2], [1], [1], [0, 0, 0, 1, 1, 1], [0], [0]>} : vector<4x8x8xbf16>, vector<4x8x8xbf16>, vector<4x8x8xf32> -> vector<4x8x8xf32>
    %cst_117 = arith.constant dense<0xFF800000> : vector<4x8xf32>
    %246 = vector.multi_reduction <maximumf>, %245, %cst_117 [2] : vector<4x8x8xf32> to vector<4x8xf32>
    %247 = vector.shape_cast %246 : vector<4x8xf32> to vector<4x8x1xf32>
    %248 = vector.broadcast %247 : vector<4x8x1xf32> to vector<4x8x8xf32>
    %249 = arith.subf %245, %248 : vector<4x8x8xf32>
    %250 = math.exp %249 : vector<4x8x8xf32>
    %cst_118 = arith.constant dense<0.000000e+00> : vector<4x8xf32>
    %251 = vector.multi_reduction <add>, %250, %cst_118 [2] : vector<4x8x8xf32> to vector<4x8xf32>
    %252 = vector.shape_cast %251 : vector<4x8xf32> to vector<4x8x1xf32>
    %253 = tpu.reciprocal %252 {approx = true} : vector<4x8x1xf32> -> vector<4x8x1xf32>
    %254 = vector.broadcast %253 : vector<4x8x1xf32> to vector<4x8x8xf32>
    %255 = arith.mulf %250, %254 : vector<4x8x8xf32>
    %256 = arith.truncf %255 : vector<4x8x8xf32> to vector<4x8x8xbf16>
    %cst_119 = arith.constant dense<0.000000e+00> : vector<4x8x8xf32>
    %257 = tpu.matmul %256, %244, %cst_119 {dimension_numbers = #tpu.dot_dimension_numbers<[2], [1], [1], [2], [0, 0, 0, 1, 1, 2], [0], [0]>} : vector<4x8x8xbf16>, vector<4x8x8xbf16>, vector<4x8x8xf32> -> vector<4x8x8xf32>
    %258 = vector.shape_cast %257 : vector<4x8x8xf32> to vector<32x8xf32>
    %259 = arith.truncf %258 : vector<32x8xf32> to vector<32x8xbf16>
    %260 = vector.extract_strided_slice %198 {offsets = [16, 0], sizes = [8, 32], strides = [1, 1]} : vector<32x32xbf16> to vector<8x32xbf16>
    %cst_120 = arith.constant dense<0.000000e+00> : vector<32x32xf32>
    %261 = tpu.matmul %259, %260, %cst_120 {dimension_numbers = #tpu.dot_dimension_numbers<[1], [0], [0], [1], [0, 0, 1, 1], [], []>} : vector<32x8xbf16>, vector<8x32xbf16>, vector<32x32xf32> -> vector<32x32xf32>
    %262 = arith.addf %241, %261 : vector<32x32xf32>
    %263 = vector.extract_strided_slice %196 {offsets = [0, 0, 24], sizes = [4, 8, 8], strides = [1, 1, 1]} : vector<4x8x96xbf16> to vector<4x8x8xbf16>
    %264 = vector.extract_strided_slice %196 {offsets = [0, 0, 56], sizes = [4, 8, 8], strides = [1, 1, 1]} : vector<4x8x96xbf16> to vector<4x8x8xbf16>
    %265 = vector.extract_strided_slice %196 {offsets = [0, 0, 88], sizes = [4, 8, 8], strides = [1, 1, 1]} : vector<4x8x96xbf16> to vector<4x8x8xbf16>
    %cst_121 = arith.constant dense<0.000000e+00> : vector<4x8x8xf32>
    %266 = tpu.matmul %263, %264, %cst_121 {dimension_numbers = #tpu.dot_dimension_numbers<[2], [2], [1], [1], [0, 0, 0, 1, 1, 1], [0], [0]>} : vector<4x8x8xbf16>, vector<4x8x8xbf16>, vector<4x8x8xf32> -> vector<4x8x8xf32>
    %cst_122 = arith.constant dense<0xFF800000> : vector<4x8xf32>
    %267 = vector.multi_reduction <maximumf>, %266, %cst_122 [2] : vector<4x8x8xf32> to vector<4x8xf32>
    %268 = vector.shape_cast %267 : vector<4x8xf32> to vector<4x8x1xf32>
    %269 = vector.broadcast %268 : vector<4x8x1xf32> to vector<4x8x8xf32>
    %270 = arith.subf %266, %269 : vector<4x8x8xf32>
    %271 = math.exp %270 : vector<4x8x8xf32>
    %cst_123 = arith.constant dense<0.000000e+00> : vector<4x8xf32>
    %272 = vector.multi_reduction <add>, %271, %cst_123 [2] : vector<4x8x8xf32> to vector<4x8xf32>
    %273 = vector.shape_cast %272 : vector<4x8xf32> to vector<4x8x1xf32>
    %274 = tpu.reciprocal %273 {approx = true} : vector<4x8x1xf32> -> vector<4x8x1xf32>
    %275 = vector.broadcast %274 : vector<4x8x1xf32> to vector<4x8x8xf32>
    %276 = arith.mulf %271, %275 : vector<4x8x8xf32>
    %277 = arith.truncf %276 : vector<4x8x8xf32> to vector<4x8x8xbf16>
    %cst_124 = arith.constant dense<0.000000e+00> : vector<4x8x8xf32>
    %278 = tpu.matmul %277, %265, %cst_124 {dimension_numbers = #tpu.dot_dimension_numbers<[2], [1], [1], [2], [0, 0, 0, 1, 1, 2], [0], [0]>} : vector<4x8x8xbf16>, vector<4x8x8xbf16>, vector<4x8x8xf32> -> vector<4x8x8xf32>
    %279 = vector.shape_cast %278 : vector<4x8x8xf32> to vector<32x8xf32>
    %280 = arith.truncf %279 : vector<32x8xf32> to vector<32x8xbf16>
    %281 = vector.extract_strided_slice %198 {offsets = [24, 0], sizes = [8, 32], strides = [1, 1]} : vector<32x32xbf16> to vector<8x32xbf16>
    %cst_125 = arith.constant dense<0.000000e+00> : vector<32x32xf32>
    %282 = tpu.matmul %280, %281, %cst_125 {dimension_numbers = #tpu.dot_dimension_numbers<[1], [0], [0], [1], [0, 0, 1, 1], [], []>} : vector<32x8xbf16>, vector<8x32xbf16>, vector<32x32xf32> -> vector<32x32xf32>
    %283 = arith.addf %262, %282 : vector<32x32xf32>
    %c1_126 = arith.constant 1 : index
    %c0_127 = arith.constant 0 : index
    %c0_128 = arith.constant 0 : index
    %284 = vector.load %arg16[%c1_126, %c0_127, %c0_128] : memref<3x1x32xf32, #tpu.memory_space<vmem>>, vector<1x1x32xf32>
    %285 = vector.shape_cast %284 : vector<1x1x32xf32> to vector<1x32xf32>
    %286 = vector.broadcast %285 : vector<1x32xf32> to vector<32x32xf32>
    %287 = arith.addf %283, %286 : vector<32x32xf32>
    %cst_129 = arith.constant 0.000000e+00 : f32
    %288 = vector.broadcast %cst_129 : f32 to vector<32x32xf32>
    %289 = arith.maximumf %287, %288 : vector<32x32xf32>
    %290 = vector.shape_cast %289 : vector<32x32xf32> to vector<4x8x32xf32>
    %291 = arith.truncf %290 : vector<4x8x32xf32> to vector<4x8x32xbf16>
    %cst_130 = arith.constant dense<0.000000e+00> : vector<4x16x32xf32>
    %292 = tpu.matmul %5, %291, %cst_130 {dimension_numbers = #tpu.dot_dimension_numbers<[2], [1], [1], [2], [0, 0, 0, 1, 1, 2], [0], [0]>} : vector<4x16x8xbf16>, vector<4x8x32xbf16>, vector<4x16x32xf32> -> vector<4x16x32xf32>
    %293 = vector.extract_strided_slice %19 {offsets = [0, 64], sizes = [64, 32], strides = [1, 1]} : vector<64x96xf32> to vector<64x32xf32>
    %294 = vector.shape_cast %293 : vector<64x32xf32> to vector<4x16x32xf32>
    %295 = arith.addf %292, %294 : vector<4x16x32xf32>
    %cst_131 = arith.constant 0.000000e+00 : f32
    %296 = vector.broadcast %cst_131 : f32 to vector<4x16x32xf32>
    %297 = arith.maximumf %295, %296 : vector<4x16x32xf32>
    %298 = arith.truncf %297 : vector<4x16x32xf32> to vector<4x16x32xbf16>
    %cst_132 = arith.constant dense<0.000000e+00> : vector<4x8x32xf32>
    %299 = tpu.matmul %7, %298, %cst_132 {dimension_numbers = #tpu.dot_dimension_numbers<[2], [1], [1], [2], [0, 0, 0, 1, 1, 2], [0], [0]>} : vector<4x8x16xbf16>, vector<4x16x32xbf16>, vector<4x8x32xf32> -> vector<4x8x32xf32>
    %cst_133 = arith.constant 1.000000e+00 : f32
    %300 = vector.broadcast %cst_133 : f32 to vector<32x32xf32>
    %301 = arith.mulf %300, %289 : vector<32x32xf32>
    %302 = vector.shape_cast %299 : vector<4x8x32xf32> to vector<32x32xf32>
    %303 = arith.addf %301, %302 : vector<32x32xf32>
    %304 = arith.truncf %303 : vector<32x32xf32> to vector<32x32xbf16>
    %c2 = arith.constant 2 : index
    %c0_134 = arith.constant 0 : index
    %c0_135 = arith.constant 0 : index
    %305 = vector.load %arg9[%c2, %c0_134, %c0_135] : memref<3x32x64xbf16, #tpu.memory_space<vmem>>, vector<1x32x64xbf16>
    %306 = vector.shape_cast %305 : vector<1x32x64xbf16> to vector<32x64xbf16>
    %cst_136 = arith.constant dense<0.000000e+00> : vector<32x64xf32>
    %307 = tpu.matmul %304, %306, %cst_136 {dimension_numbers = #tpu.dot_dimension_numbers<[1], [0], [0], [1], [0, 0, 1, 1], [], []>} : vector<32x32xbf16>, vector<32x64xbf16>, vector<32x64xf32> -> vector<32x64xf32>
    %c2_137 = arith.constant 2 : index
    %c0_138 = arith.constant 0 : index
    %c0_139 = arith.constant 0 : index
    %308 = vector.load %arg10[%c2_137, %c0_138, %c0_139] : memref<3x1x64xf32, #tpu.memory_space<vmem>>, vector<1x1x64xf32>
    %309 = vector.shape_cast %308 : vector<1x1x64xf32> to vector<1x64xf32>
    %310 = vector.broadcast %309 : vector<1x64xf32> to vector<32x64xf32>
    %311 = arith.addf %307, %310 : vector<32x64xf32>
    %cst_140 = arith.constant 0.000000e+00 : f32
    %312 = vector.broadcast %cst_140 : f32 to vector<32x64xf32>
    %313 = arith.maximumf %311, %312 : vector<32x64xf32>
    %314 = arith.truncf %313 : vector<32x64xf32> to vector<32x64xbf16>
    %c2_141 = arith.constant 2 : index
    %c0_142 = arith.constant 0 : index
    %c0_143 = arith.constant 0 : index
    %315 = vector.load %arg11[%c2_141, %c0_142, %c0_143] : memref<3x64x32xbf16, #tpu.memory_space<vmem>>, vector<1x64x32xbf16>
    %316 = vector.shape_cast %315 : vector<1x64x32xbf16> to vector<64x32xbf16>
    %cst_144 = arith.constant dense<0.000000e+00> : vector<32x32xf32>
    %317 = tpu.matmul %314, %316, %cst_144 {dimension_numbers = #tpu.dot_dimension_numbers<[1], [0], [0], [1], [0, 0, 1, 1], [], []>} : vector<32x64xbf16>, vector<64x32xbf16>, vector<32x32xf32> -> vector<32x32xf32>
    %c2_145 = arith.constant 2 : index
    %c0_146 = arith.constant 0 : index
    %c0_147 = arith.constant 0 : index
    %318 = vector.load %arg12[%c2_145, %c0_146, %c0_147] : memref<3x1x32xf32, #tpu.memory_space<vmem>>, vector<1x1x32xf32>
    %319 = vector.shape_cast %318 : vector<1x1x32xf32> to vector<1x32xf32>
    %320 = vector.broadcast %319 : vector<1x32xf32> to vector<32x32xf32>
    %321 = arith.addf %317, %320 : vector<32x32xf32>
    %322 = arith.truncf %321 : vector<32x32xf32> to vector<32x32xbf16>
    %c2_148 = arith.constant 2 : index
    %c0_149 = arith.constant 0 : index
    %c0_150 = arith.constant 0 : index
    %323 = vector.load %arg13[%c2_148, %c0_149, %c0_150] : memref<3x32x96xbf16, #tpu.memory_space<vmem>>, vector<1x32x96xbf16>
    %324 = vector.shape_cast %323 : vector<1x32x96xbf16> to vector<32x96xbf16>
    %cst_151 = arith.constant dense<0.000000e+00> : vector<32x96xf32>
    %325 = tpu.matmul %322, %324, %cst_151 {dimension_numbers = #tpu.dot_dimension_numbers<[1], [0], [0], [1], [0, 0, 1, 1], [], []>} : vector<32x32xbf16>, vector<32x96xbf16>, vector<32x96xf32> -> vector<32x96xf32>
    %c2_152 = arith.constant 2 : index
    %c0_153 = arith.constant 0 : index
    %c0_154 = arith.constant 0 : index
    %326 = vector.load %arg14[%c2_152, %c0_153, %c0_154] : memref<3x1x96xf32, #tpu.memory_space<vmem>>, vector<1x1x96xf32>
    %327 = vector.shape_cast %326 : vector<1x1x96xf32> to vector<1x96xf32>
    %328 = vector.broadcast %327 : vector<1x96xf32> to vector<32x96xf32>
    %329 = arith.addf %325, %328 : vector<32x96xf32>
    %330 = vector.shape_cast %329 : vector<32x96xf32> to vector<4x8x96xf32>
    %331 = arith.truncf %330 : vector<4x8x96xf32> to vector<4x8x96xbf16>
    %c2_155 = arith.constant 2 : index
    %c0_156 = arith.constant 0 : index
    %c0_157 = arith.constant 0 : index
    %332 = vector.load %arg15[%c2_155, %c0_156, %c0_157] : memref<3x32x32xbf16, #tpu.memory_space<vmem>>, vector<1x32x32xbf16>
    %333 = vector.shape_cast %332 : vector<1x32x32xbf16> to vector<32x32xbf16>
    %cst_158 = arith.constant 0.000000e+00 : f32
    %334 = vector.broadcast %cst_158 : f32 to vector<32x32xf32>
    %335 = vector.extract_strided_slice %331 {offsets = [0, 0, 0], sizes = [4, 8, 8], strides = [1, 1, 1]} : vector<4x8x96xbf16> to vector<4x8x8xbf16>
    %336 = vector.extract_strided_slice %331 {offsets = [0, 0, 32], sizes = [4, 8, 8], strides = [1, 1, 1]} : vector<4x8x96xbf16> to vector<4x8x8xbf16>
    %337 = vector.extract_strided_slice %331 {offsets = [0, 0, 64], sizes = [4, 8, 8], strides = [1, 1, 1]} : vector<4x8x96xbf16> to vector<4x8x8xbf16>
    %cst_159 = arith.constant dense<0.000000e+00> : vector<4x8x8xf32>
    %338 = tpu.matmul %335, %336, %cst_159 {dimension_numbers = #tpu.dot_dimension_numbers<[2], [2], [1], [1], [0, 0, 0, 1, 1, 1], [0], [0]>} : vector<4x8x8xbf16>, vector<4x8x8xbf16>, vector<4x8x8xf32> -> vector<4x8x8xf32>
    %cst_160 = arith.constant dense<0xFF800000> : vector<4x8xf32>
    %339 = vector.multi_reduction <maximumf>, %338, %cst_160 [2] : vector<4x8x8xf32> to vector<4x8xf32>
    %340 = vector.shape_cast %339 : vector<4x8xf32> to vector<4x8x1xf32>
    %341 = vector.broadcast %340 : vector<4x8x1xf32> to vector<4x8x8xf32>
    %342 = arith.subf %338, %341 : vector<4x8x8xf32>
    %343 = math.exp %342 : vector<4x8x8xf32>
    %cst_161 = arith.constant dense<0.000000e+00> : vector<4x8xf32>
    %344 = vector.multi_reduction <add>, %343, %cst_161 [2] : vector<4x8x8xf32> to vector<4x8xf32>
    %345 = vector.shape_cast %344 : vector<4x8xf32> to vector<4x8x1xf32>
    %346 = tpu.reciprocal %345 {approx = true} : vector<4x8x1xf32> -> vector<4x8x1xf32>
    %347 = vector.broadcast %346 : vector<4x8x1xf32> to vector<4x8x8xf32>
    %348 = arith.mulf %343, %347 : vector<4x8x8xf32>
    %349 = arith.truncf %348 : vector<4x8x8xf32> to vector<4x8x8xbf16>
    %cst_162 = arith.constant dense<0.000000e+00> : vector<4x8x8xf32>
    %350 = tpu.matmul %349, %337, %cst_162 {dimension_numbers = #tpu.dot_dimension_numbers<[2], [1], [1], [2], [0, 0, 0, 1, 1, 2], [0], [0]>} : vector<4x8x8xbf16>, vector<4x8x8xbf16>, vector<4x8x8xf32> -> vector<4x8x8xf32>
    %351 = vector.shape_cast %350 : vector<4x8x8xf32> to vector<32x8xf32>
    %352 = arith.truncf %351 : vector<32x8xf32> to vector<32x8xbf16>
    %353 = vector.extract_strided_slice %333 {offsets = [0, 0], sizes = [8, 32], strides = [1, 1]} : vector<32x32xbf16> to vector<8x32xbf16>
    %cst_163 = arith.constant dense<0.000000e+00> : vector<32x32xf32>
    %354 = tpu.matmul %352, %353, %cst_163 {dimension_numbers = #tpu.dot_dimension_numbers<[1], [0], [0], [1], [0, 0, 1, 1], [], []>} : vector<32x8xbf16>, vector<8x32xbf16>, vector<32x32xf32> -> vector<32x32xf32>
    %355 = arith.addf %334, %354 : vector<32x32xf32>
    %356 = vector.extract_strided_slice %331 {offsets = [0, 0, 8], sizes = [4, 8, 8], strides = [1, 1, 1]} : vector<4x8x96xbf16> to vector<4x8x8xbf16>
    %357 = vector.extract_strided_slice %331 {offsets = [0, 0, 40], sizes = [4, 8, 8], strides = [1, 1, 1]} : vector<4x8x96xbf16> to vector<4x8x8xbf16>
    %358 = vector.extract_strided_slice %331 {offsets = [0, 0, 72], sizes = [4, 8, 8], strides = [1, 1, 1]} : vector<4x8x96xbf16> to vector<4x8x8xbf16>
    %cst_164 = arith.constant dense<0.000000e+00> : vector<4x8x8xf32>
    %359 = tpu.matmul %356, %357, %cst_164 {dimension_numbers = #tpu.dot_dimension_numbers<[2], [2], [1], [1], [0, 0, 0, 1, 1, 1], [0], [0]>} : vector<4x8x8xbf16>, vector<4x8x8xbf16>, vector<4x8x8xf32> -> vector<4x8x8xf32>
    %cst_165 = arith.constant dense<0xFF800000> : vector<4x8xf32>
    %360 = vector.multi_reduction <maximumf>, %359, %cst_165 [2] : vector<4x8x8xf32> to vector<4x8xf32>
    %361 = vector.shape_cast %360 : vector<4x8xf32> to vector<4x8x1xf32>
    %362 = vector.broadcast %361 : vector<4x8x1xf32> to vector<4x8x8xf32>
    %363 = arith.subf %359, %362 : vector<4x8x8xf32>
    %364 = math.exp %363 : vector<4x8x8xf32>
    %cst_166 = arith.constant dense<0.000000e+00> : vector<4x8xf32>
    %365 = vector.multi_reduction <add>, %364, %cst_166 [2] : vector<4x8x8xf32> to vector<4x8xf32>
    %366 = vector.shape_cast %365 : vector<4x8xf32> to vector<4x8x1xf32>
    %367 = tpu.reciprocal %366 {approx = true} : vector<4x8x1xf32> -> vector<4x8x1xf32>
    %368 = vector.broadcast %367 : vector<4x8x1xf32> to vector<4x8x8xf32>
    %369 = arith.mulf %364, %368 : vector<4x8x8xf32>
    %370 = arith.truncf %369 : vector<4x8x8xf32> to vector<4x8x8xbf16>
    %cst_167 = arith.constant dense<0.000000e+00> : vector<4x8x8xf32>
    %371 = tpu.matmul %370, %358, %cst_167 {dimension_numbers = #tpu.dot_dimension_numbers<[2], [1], [1], [2], [0, 0, 0, 1, 1, 2], [0], [0]>} : vector<4x8x8xbf16>, vector<4x8x8xbf16>, vector<4x8x8xf32> -> vector<4x8x8xf32>
    %372 = vector.shape_cast %371 : vector<4x8x8xf32> to vector<32x8xf32>
    %373 = arith.truncf %372 : vector<32x8xf32> to vector<32x8xbf16>
    %374 = vector.extract_strided_slice %333 {offsets = [8, 0], sizes = [8, 32], strides = [1, 1]} : vector<32x32xbf16> to vector<8x32xbf16>
    %cst_168 = arith.constant dense<0.000000e+00> : vector<32x32xf32>
    %375 = tpu.matmul %373, %374, %cst_168 {dimension_numbers = #tpu.dot_dimension_numbers<[1], [0], [0], [1], [0, 0, 1, 1], [], []>} : vector<32x8xbf16>, vector<8x32xbf16>, vector<32x32xf32> -> vector<32x32xf32>
    %376 = arith.addf %355, %375 : vector<32x32xf32>
    %377 = vector.extract_strided_slice %331 {offsets = [0, 0, 16], sizes = [4, 8, 8], strides = [1, 1, 1]} : vector<4x8x96xbf16> to vector<4x8x8xbf16>
    %378 = vector.extract_strided_slice %331 {offsets = [0, 0, 48], sizes = [4, 8, 8], strides = [1, 1, 1]} : vector<4x8x96xbf16> to vector<4x8x8xbf16>
    %379 = vector.extract_strided_slice %331 {offsets = [0, 0, 80], sizes = [4, 8, 8], strides = [1, 1, 1]} : vector<4x8x96xbf16> to vector<4x8x8xbf16>
    %cst_169 = arith.constant dense<0.000000e+00> : vector<4x8x8xf32>
    %380 = tpu.matmul %377, %378, %cst_169 {dimension_numbers = #tpu.dot_dimension_numbers<[2], [2], [1], [1], [0, 0, 0, 1, 1, 1], [0], [0]>} : vector<4x8x8xbf16>, vector<4x8x8xbf16>, vector<4x8x8xf32> -> vector<4x8x8xf32>
    %cst_170 = arith.constant dense<0xFF800000> : vector<4x8xf32>
    %381 = vector.multi_reduction <maximumf>, %380, %cst_170 [2] : vector<4x8x8xf32> to vector<4x8xf32>
    %382 = vector.shape_cast %381 : vector<4x8xf32> to vector<4x8x1xf32>
    %383 = vector.broadcast %382 : vector<4x8x1xf32> to vector<4x8x8xf32>
    %384 = arith.subf %380, %383 : vector<4x8x8xf32>
    %385 = math.exp %384 : vector<4x8x8xf32>
    %cst_171 = arith.constant dense<0.000000e+00> : vector<4x8xf32>
    %386 = vector.multi_reduction <add>, %385, %cst_171 [2] : vector<4x8x8xf32> to vector<4x8xf32>
    %387 = vector.shape_cast %386 : vector<4x8xf32> to vector<4x8x1xf32>
    %388 = tpu.reciprocal %387 {approx = true} : vector<4x8x1xf32> -> vector<4x8x1xf32>
    %389 = vector.broadcast %388 : vector<4x8x1xf32> to vector<4x8x8xf32>
    %390 = arith.mulf %385, %389 : vector<4x8x8xf32>
    %391 = arith.truncf %390 : vector<4x8x8xf32> to vector<4x8x8xbf16>
    %cst_172 = arith.constant dense<0.000000e+00> : vector<4x8x8xf32>
    %392 = tpu.matmul %391, %379, %cst_172 {dimension_numbers = #tpu.dot_dimension_numbers<[2], [1], [1], [2], [0, 0, 0, 1, 1, 2], [0], [0]>} : vector<4x8x8xbf16>, vector<4x8x8xbf16>, vector<4x8x8xf32> -> vector<4x8x8xf32>
    %393 = vector.shape_cast %392 : vector<4x8x8xf32> to vector<32x8xf32>
    %394 = arith.truncf %393 : vector<32x8xf32> to vector<32x8xbf16>
    %395 = vector.extract_strided_slice %333 {offsets = [16, 0], sizes = [8, 32], strides = [1, 1]} : vector<32x32xbf16> to vector<8x32xbf16>
    %cst_173 = arith.constant dense<0.000000e+00> : vector<32x32xf32>
    %396 = tpu.matmul %394, %395, %cst_173 {dimension_numbers = #tpu.dot_dimension_numbers<[1], [0], [0], [1], [0, 0, 1, 1], [], []>} : vector<32x8xbf16>, vector<8x32xbf16>, vector<32x32xf32> -> vector<32x32xf32>
    %397 = arith.addf %376, %396 : vector<32x32xf32>
    %398 = vector.extract_strided_slice %331 {offsets = [0, 0, 24], sizes = [4, 8, 8], strides = [1, 1, 1]} : vector<4x8x96xbf16> to vector<4x8x8xbf16>
    %399 = vector.extract_strided_slice %331 {offsets = [0, 0, 56], sizes = [4, 8, 8], strides = [1, 1, 1]} : vector<4x8x96xbf16> to vector<4x8x8xbf16>
    %400 = vector.extract_strided_slice %331 {offsets = [0, 0, 88], sizes = [4, 8, 8], strides = [1, 1, 1]} : vector<4x8x96xbf16> to vector<4x8x8xbf16>
    %cst_174 = arith.constant dense<0.000000e+00> : vector<4x8x8xf32>
    %401 = tpu.matmul %398, %399, %cst_174 {dimension_numbers = #tpu.dot_dimension_numbers<[2], [2], [1], [1], [0, 0, 0, 1, 1, 1], [0], [0]>} : vector<4x8x8xbf16>, vector<4x8x8xbf16>, vector<4x8x8xf32> -> vector<4x8x8xf32>
    %cst_175 = arith.constant dense<0xFF800000> : vector<4x8xf32>
    %402 = vector.multi_reduction <maximumf>, %401, %cst_175 [2] : vector<4x8x8xf32> to vector<4x8xf32>
    %403 = vector.shape_cast %402 : vector<4x8xf32> to vector<4x8x1xf32>
    %404 = vector.broadcast %403 : vector<4x8x1xf32> to vector<4x8x8xf32>
    %405 = arith.subf %401, %404 : vector<4x8x8xf32>
    %406 = math.exp %405 : vector<4x8x8xf32>
    %cst_176 = arith.constant dense<0.000000e+00> : vector<4x8xf32>
    %407 = vector.multi_reduction <add>, %406, %cst_176 [2] : vector<4x8x8xf32> to vector<4x8xf32>
    %408 = vector.shape_cast %407 : vector<4x8xf32> to vector<4x8x1xf32>
    %409 = tpu.reciprocal %408 {approx = true} : vector<4x8x1xf32> -> vector<4x8x1xf32>
    %410 = vector.broadcast %409 : vector<4x8x1xf32> to vector<4x8x8xf32>
    %411 = arith.mulf %406, %410 : vector<4x8x8xf32>
    %412 = arith.truncf %411 : vector<4x8x8xf32> to vector<4x8x8xbf16>
    %cst_177 = arith.constant dense<0.000000e+00> : vector<4x8x8xf32>
    %413 = tpu.matmul %412, %400, %cst_177 {dimension_numbers = #tpu.dot_dimension_numbers<[2], [1], [1], [2], [0, 0, 0, 1, 1, 2], [0], [0]>} : vector<4x8x8xbf16>, vector<4x8x8xbf16>, vector<4x8x8xf32> -> vector<4x8x8xf32>
    %414 = vector.shape_cast %413 : vector<4x8x8xf32> to vector<32x8xf32>
    %415 = arith.truncf %414 : vector<32x8xf32> to vector<32x8xbf16>
    %416 = vector.extract_strided_slice %333 {offsets = [24, 0], sizes = [8, 32], strides = [1, 1]} : vector<32x32xbf16> to vector<8x32xbf16>
    %cst_178 = arith.constant dense<0.000000e+00> : vector<32x32xf32>
    %417 = tpu.matmul %415, %416, %cst_178 {dimension_numbers = #tpu.dot_dimension_numbers<[1], [0], [0], [1], [0, 0, 1, 1], [], []>} : vector<32x8xbf16>, vector<8x32xbf16>, vector<32x32xf32> -> vector<32x32xf32>
    %418 = arith.addf %397, %417 : vector<32x32xf32>
    %c2_179 = arith.constant 2 : index
    %c0_180 = arith.constant 0 : index
    %c0_181 = arith.constant 0 : index
    %419 = vector.load %arg16[%c2_179, %c0_180, %c0_181] : memref<3x1x32xf32, #tpu.memory_space<vmem>>, vector<1x1x32xf32>
    %420 = vector.shape_cast %419 : vector<1x1x32xf32> to vector<1x32xf32>
    %421 = vector.broadcast %420 : vector<1x32xf32> to vector<32x32xf32>
    %422 = arith.addf %418, %421 : vector<32x32xf32>
    %c0_182 = arith.constant 0 : index
    %c0_183 = arith.constant 0 : index
    %423 = vector.load %arg17[%c0_182, %c0_183] : memref<1x32xbf16, #tpu.memory_space<vmem>>, vector<1x32xbf16>
    %424 = arith.truncf %422 : vector<32x32xf32> to vector<32x32xbf16>
    %cst_184 = arith.constant dense<0.000000e+00> : vector<1x32xf32>
    %425 = tpu.matmul %423, %424, %cst_184 {dimension_numbers = #tpu.dot_dimension_numbers<[1], [1], [0], [0], [0, 0, 1, 0], [], []>} : vector<1x32xbf16>, vector<32x32xbf16>, vector<1x32xf32> -> vector<1x32xf32>
    %c0_185 = arith.constant 0 : index
    %c0_186 = arith.constant 0 : index
    %426 = vector.load %arg18[%c0_185, %c0_186] : memref<1x1xf32, #tpu.memory_space<vmem>>, vector<1x1xf32>
    %427 = vector.broadcast %426 : vector<1x1xf32> to vector<1x32xf32>
    %428 = arith.addf %425, %427 : vector<1x32xf32>
    %c0_187 = arith.constant 0 : index
    %c0_188 = arith.constant 0 : index
    %c0_189 = arith.constant 0 : index
    %429 = vector.load %arg19[%c0_187, %c0_188, %c0_189] : memref<1x1x32xf32, #tpu.memory_space<vmem>>, vector<1x1x32xf32>
    %430 = vector.shape_cast %429 : vector<1x1x32xf32> to vector<1x32xf32>
    %431 = vector.shape_cast %428 : vector<1x32xf32> to vector<1x1x32xf32>
    tpu.vector_store %arg19[%c0_187, %c0_188, %c0_189], %431 {strides = array<i32>} : memref<1x1x32xf32, #tpu.memory_space<vmem>>, vector<1x1x32xf32>,
    return
  }
  func.func @transform_0(%arg0: i32) -> (i32, i32, i32) {
    %c0_i32 = arith.constant 0 : i32
    %c0_i32_0 = arith.constant 0 : i32
    %c0_i32_1 = arith.constant 0 : i32
    return %arg0, %c0_i32, %c0_i32_0 : i32, i32, i32
  }
  func.func @transform_1(%arg0: i32) -> (i32, i32, i32) {
    %c0_i32 = arith.constant 0 : i32
    %c0_i32_0 = arith.constant 0 : i32
    %c0_i32_1 = arith.constant 0 : i32
    return %arg0, %c0_i32, %c0_i32_0 : i32, i32, i32
  }
  func.func @transform_2(%arg0: i32) -> (i32, i32, i32, i32) {
    %c0_i32 = arith.constant 0 : i32
    %c0_i32_0 = arith.constant 0 : i32
    %c0_i32_1 = arith.constant 0 : i32
    %c0_i32_2 = arith.constant 0 : i32
    return %arg0, %c0_i32, %c0_i32_0, %c0_i32_1 : i32, i32, i32, i32
  }
  func.func @transform_3(%arg0: i32) -> (i32, i32, i32, i32) {
    %c0_i32 = arith.constant 0 : i32
    %c0_i32_0 = arith.constant 0 : i32
    %c0_i32_1 = arith.constant 0 : i32
    %c0_i32_2 = arith.constant 0 : i32
    return %arg0, %c0_i32, %c0_i32_0, %c0_i32_1 : i32, i32, i32, i32
  }
  func.func @transform_4(%arg0: i32) -> (i32, i32) {
    %c0_i32 = arith.constant 0 : i32
    %c0_i32_0 = arith.constant 0 : i32
    %c0_i32_1 = arith.constant 0 : i32
    return %c0_i32, %c0_i32_0 : i32, i32
  }
  func.func @transform_5(%arg0: i32) -> (i32, i32) {
    %c0_i32 = arith.constant 0 : i32
    %c0_i32_0 = arith.constant 0 : i32
    %c0_i32_1 = arith.constant 0 : i32
    return %c0_i32, %c0_i32_0 : i32, i32
  }
  func.func @transform_6(%arg0: i32) -> (i32, i32) {
    %c0_i32 = arith.constant 0 : i32
    %c0_i32_0 = arith.constant 0 : i32
    %c0_i32_1 = arith.constant 0 : i32
    return %c0_i32, %c0_i32_0 : i32, i32
  }
  func.func @transform_7(%arg0: i32) -> (i32, i32) {
    %c0_i32 = arith.constant 0 : i32
    %c0_i32_0 = arith.constant 0 : i32
    %c0_i32_1 = arith.constant 0 : i32
    return %c0_i32, %c0_i32_0 : i32, i32
  }
  func.func @transform_8(%arg0: i32) -> (i32, i32, i32) {
    %c0_i32 = arith.constant 0 : i32
    %c0_i32_0 = arith.constant 0 : i32
    %c0_i32_1 = arith.constant 0 : i32
    %c0_i32_2 = arith.constant 0 : i32
    return %c0_i32, %c0_i32_0, %c0_i32_1 : i32, i32, i32
  }
  func.func @transform_9(%arg0: i32) -> (i32, i32, i32) {
    %c0_i32 = arith.constant 0 : i32
    %c0_i32_0 = arith.constant 0 : i32
    %c0_i32_1 = arith.constant 0 : i32
    %c0_i32_2 = arith.constant 0 : i32
    return %c0_i32, %c0_i32_0, %c0_i32_1 : i32, i32, i32
  }
  func.func @transform_10(%arg0: i32) -> (i32, i32, i32) {
    %c0_i32 = arith.constant 0 : i32
    %c0_i32_0 = arith.constant 0 : i32
    %c0_i32_1 = arith.constant 0 : i32
    %c0_i32_2 = arith.constant 0 : i32
    return %c0_i32, %c0_i32_0, %c0_i32_1 : i32, i32, i32
  }
  func.func @transform_11(%arg0: i32) -> (i32, i32, i32) {
    %c0_i32 = arith.constant 0 : i32
    %c0_i32_0 = arith.constant 0 : i32
    %c0_i32_1 = arith.constant 0 : i32
    %c0_i32_2 = arith.constant 0 : i32
    return %c0_i32, %c0_i32_0, %c0_i32_1 : i32, i32, i32
  }
  func.func @transform_12(%arg0: i32) -> (i32, i32, i32) {
    %c0_i32 = arith.constant 0 : i32
    %c0_i32_0 = arith.constant 0 : i32
    %c0_i32_1 = arith.constant 0 : i32
    %c0_i32_2 = arith.constant 0 : i32
    return %c0_i32, %c0_i32_0, %c0_i32_1 : i32, i32, i32
  }
  func.func @transform_13(%arg0: i32) -> (i32, i32, i32) {
    %c0_i32 = arith.constant 0 : i32
    %c0_i32_0 = arith.constant 0 : i32
    %c0_i32_1 = arith.constant 0 : i32
    %c0_i32_2 = arith.constant 0 : i32
    return %c0_i32, %c0_i32_0, %c0_i32_1 : i32, i32, i32
  }
  func.func @transform_14(%arg0: i32) -> (i32, i32, i32) {
    %c0_i32 = arith.constant 0 : i32
    %c0_i32_0 = arith.constant 0 : i32
    %c0_i32_1 = arith.constant 0 : i32
    %c0_i32_2 = arith.constant 0 : i32
    return %c0_i32, %c0_i32_0, %c0_i32_1 : i32, i32, i32
  }
  func.func @transform_15(%arg0: i32) -> (i32, i32, i32) {
    %c0_i32 = arith.constant 0 : i32
    %c0_i32_0 = arith.constant 0 : i32
    %c0_i32_1 = arith.constant 0 : i32
    %c0_i32_2 = arith.constant 0 : i32
    return %c0_i32, %c0_i32_0, %c0_i32_1 : i32, i32, i32
  }
  func.func @transform_16(%arg0: i32) -> (i32, i32) {
    %c0_i32 = arith.constant 0 : i32
    %c0_i32_0 = arith.constant 0 : i32
    %c0_i32_1 = arith.constant 0 : i32
    return %c0_i32, %c0_i32_0 : i32, i32
  }
  func.func @transform_17(%arg0: i32) -> (i32, i32) {
    %c0_i32 = arith.constant 0 : i32
    %c0_i32_0 = arith.constant 0 : i32
    %c0_i32_1 = arith.constant 0 : i32
    return %c0_i32, %c0_i32_0 : i32, i32
  }
  func.func @transform_18(%arg0: i32) -> (i32, i32, i32) {
    %c0_i32 = arith.constant 0 : i32
    %c0_i32_0 = arith.constant 0 : i32
    %c0_i32_1 = arith.constant 0 : i32
    return %arg0, %c0_i32, %c0_i32_0 : i32, i32, i32
  }
}

</mosaic_0001>

<bundles_post_ra>
// kernel: tpu_custom_call.1
= control target key start
LH: loop header
LB: loop body
LE: loop exit
PB: predicated region body
PF: predicated region fallthrough
CT: control target
= control target key end

     0   :  { %s14148_s0 = inlined_call_operand.hbm [shape: bf16[2,32,12], index: 0, kind: input, shape index: {}]   ;;  %s14149_s1 = inlined_call_operand.hbm [shape: bf16[2,64,4], index: 1, kind: input, shape index: {}]   ;;  %s14150_s2 = inlined_call_operand.hbm [shape: bf16[2,4,16,8], index: 2, kind: input, shape index: {}]   ;;  %s14151_s3 = inlined_call_operand.hbm [shape: bf16[2,4,8,16], index: 3, kind: input, shape index: {}]   ;;  %s14152_s4 = inlined_call_operand.hbm [shape: bf16[12,32], index: 4, kind: input, shape index: {}]   ;;  %s14153_s5 = inlined_call_operand.hbm [shape: f32[1,32], index: 5, kind: input, shape index: {}]   ;;  %s14154_s6 = inlined_call_operand.hbm [shape: bf16[4,96], index: 6, kind: input, shape index: {}]   ;;  %s14155_s7 = inlined_call_operand.hbm [shape: f32[1,96], index: 7, kind: input, shape index: {}]   ;;  %s14156_s8 = inlined_call_operand.hbm [shape: bf16[3,32,64], index: 8, kind: input, shape index: {}]   ;;  %s14157_s9 = inlined_call_operand.hbm [shape: f32[3,1,64], index: 9, kind: input, shape index: {}]   ;;  %s14158_s10 = inlined_call_operand.hbm [shape: bf16[3,64,32], index: 10, kind: input, shape index: {}]   ;;  %s14159_s11 = inlined_call_operand.hbm [shape: f32[3,1,32], index: 11, kind: input, shape index: {}]   ;;  %s14160_s12 = inlined_call_operand.hbm [shape: bf16[3,32,96], index: 12, kind: input, shape index: {}]   ;;  %s14161_s13 = inlined_call_operand.hbm [shape: f32[3,1,96], index: 13, kind: input, shape index: {}]   ;;  %s14162_s14 = inlined_call_operand.hbm [shape: bf16[3,32,32], index: 14, kind: input, shape index: {}]   ;;  %s14163_s15 = inlined_call_operand.hbm [shape: f32[3,1,32], index: 15, kind: input, shape index: {}]   ;;  %s14164_s16 = inlined_call_operand.hbm [shape: bf16[1,32], index: 16, kind: input, shape index: {}]   ;;  %s14165_s17 = inlined_call_operand.<no memory space> [shape: f32[1,1], index: 17, kind: input, shape index: {}]   ;;  %s14166_s18 = inlined_call_operand.hbm [shape: f32[2,1,32], index: 18, kind: output, shape index: {}]  }
   0x1   :  { %14202 = sst [smem:[#allocation49_spill]] %s14148_s0  ;;  %v23_v0 = vstv %s14165_s17 }
   0x2   :  { %14203 = sst [smem:[#allocation50_spill]] %s14149_s1  ;;  %24 = vst [vmem:[#allocation2] sm:$0x1] %v23_v0 }
   0x3   :  { %14204 = sst [smem:[#allocation51_spill]] %s14150_s2 }
   0x4   :  { %14205 = sst [smem:[#allocation52_spill]] %s14151_s3 }
   0x5   :  { %14206 = sst [smem:[#allocation53_spill]] %s14152_s4 }
   0x6   :  { %14207 = sst [smem:[#allocation54_spill]] %s14153_s5 }
   0x7   :  { %14208 = sst [smem:[#allocation55_spill]] %s14154_s6 }
   0x8   :  { %14209 = sst [smem:[#allocation56_spill]] %s14155_s7 }
   0x9   :  { %14210 = sst [smem:[#allocation57_spill]] %s14156_s8 }
   0xa   :  { %14211 = sst [smem:[#allocation58_spill]] %s14157_s9 }
   0xb   :  { %14212 = sst [smem:[#allocation59_spill]] %s14158_s10 }
   0xc   :  { %14213 = sst [smem:[#allocation60_spill]] %s14159_s11 }
   0xd   :  { %14214 = sst [smem:[#allocation61_spill]] %s14160_s12 }
   0xe   :  { %14215 = sst [smem:[#allocation62_spill]] %s14161_s13 }
   0xf   :  { %14216 = sst [smem:[#allocation63_spill]] %s14162_s14 }
  0x10   :  { %14217 = sst [smem:[#allocation64_spill]] %s14163_s15 }
  0x11   :  { %14218 = sst [smem:[#allocation65_spill]] %s14164_s16 }
  0x12   :  { %14219 = sst [smem:[#allocation66_spill]] %s14166_s18 }
  0x13   :  { %25 = vsyncpa [#allocation4], 0 }
  0x14   :  { %27 = vsyncpa [#allocation4 + $0x1], 0 }
  0x15   :  { %28 = vsyncpa [#allocation7], 0 }
  0x16   :  { %30 = vsyncpa [#allocation7 + $0x1], 0 }
  0x17   :  { %31 = vsyncpa [#allocation10], 0 }
  0x18   :  { %33 = vsyncpa [#allocation10 + $0x1], 0 }
  0x19   :  { %34 = vsyncpa [#allocation13], 0 }
  0x1a   :  { %35 = vsyncpa [#allocation16], 0 }
  0x1b   :  { %36 = vsyncpa [#allocation19], 0 }
  0x1c   :  { %37 = vsyncpa [#allocation22], 0 }
  0x1d   :  { %38 = vsyncpa [#allocation25], 0 }
  0x1e   :  { %39 = vsyncpa [#allocation28], 0 }
  0x1f   :  { %40 = vsyncpa [#allocation5], 0 }
  0x20   :  { %42 = vsyncpa [#allocation5 + $0x1], 0  ;;  %s12223_s29 = smov 0   ;;  %s12225_s30 = smov 0  }
  0x21   :  { %s12227_s17 = smov 0   ;;  %s12229_s0 = smov 0  }
  0x22 LB: > { %14220 = sst [smem:[#allocation42_spill]] %s12075_s29  ;;  %s12089_s19 = smov [#allocation11]   ;;  %s12087_s0 = sphi %s12229_s0, %s14289_s0   ;;  %s12083_s17 = sphi %s12227_s17, %s14291_s17   ;;  %s12079_s30 = sphi %s12225_s30, %s14293_s30   ;;  %s12075_s29 = sphi %s12223_s29, %s14292_s29  }
  0x23   : > { %14221 = sst [smem:[#allocation43_spill]] %s12083_s17  ;;  %s489_s1 = sshll.u32 %s12089_s19, 4  ;;  %s12249_s1 = int_to_ptr.vmem [resolvable:$true] %s489_s1 }
  0x24   : > { %s12244_s20 = sadd.s32 4294967295, %s12087_s0   ;;  %p9498_p0 = scmp.ge.s32.totalorder %s12087_s0, 1 }
  0x25   : > { %p14176_p1 = scmp.eq.s32.totalorder %s12244_s20, 0  ;;  %p477_p2 = scmp.lt.s32.totalorder %s12087_s0, 3 }
  0x26   : > { %s12090_s22 = smov [#allocation12]   ;;  %s12091_s24 = smov [#allocation15]  }
  0x27   : > { %p12251_p3 = pnand %p9498_p0, %p477_p2  ;;  %s503_s2 = sshll.u32 %s12090_s22, 4  ;;  %s12264_s2 = int_to_ptr.vmem [resolvable:$true] %s503_s2 }
  0x28   : > { %s525_s25 = sshll.u32 %s12091_s24, 4  ;;  %s14225_s4 = sld [smem:[#allocation53_spill]]  ;;  %s12266_s25 = int_to_ptr.vmem [resolvable:$true] %s525_s25 }
  0x29   : > { %s14222_s21 = scalar_select %p12251_p3, 1, 0 }
  0x2a   : > { %p11109_p5 = pneg %p12251_p3 }
  0x2b   : > { %14223 = sst [smem:[#allocation44_spill]] %s14222_s21 }
  0x2c   : > { %p12260_p6 = pnand %p11109_p5, %p14176_p1 }
  0x2e   : > { %s14224_s23 = scalar_select %p12260_p6, 1, 0 }
  0x2f   : > { %s11501_s28 = scalar_lea.hbm %s14225_s4, 128  ;;  %p12276_p8 = pneg %p12260_p6 }
  0x30   : > { %p11502_p7 = scmp.ne.s32.totalorder %s14225_s4, %s11501_s28  ;;  %p11508_p11 = scmp.lt.u32.totalorder %s11501_s28, %s14225_s4 }
  0x31   : > { %s14226_s22 = scalar_select %p12276_p8, 1, 0 }
  0x32   : > { %p11504_p9 = pnand %p12276_p8, %p11502_p7 }
  0x34   : > { %p11505_p10 = pneg %p11504_p9 }
  0x36   : > { %p11510_p12 = pnand %p11508_p11, %p11505_p10 }
  0x38   : > { %11513 = shalt.err (!%p11510_p12)
}
  0x39   : > { %s11514_s18 = scalar_lea.vmem %s12249_s1, 128  ;;  %p11522_p5 = scmp.lt.s32.totalorder %s12249_s1, %s12249_s1 }
  0x3a   : > { %p11515_p13 = scmp.ne.s32.totalorder %s12249_s1, %s11514_s18  ;;  %p11523_p4 = scmp.lt.s32.totalorder %s11514_s18, %s11514_s18 }
  0x3c   : > { %p11517_p0 = pnand %p11515_p13, %p12276_p8  ;;  %p11524_p7 = por %p11523_p4, %p11522_p5 }
  0x3e   : > { %p11518_p2 = pneg %p11517_p0 }
  0x40   : > { %p11525_p9 = pnand %p11524_p7, %p11518_p2 }
  0x42   : > { %11528 = shalt.err (!%p11525_p9)
}
  0x43   : > { %s14178_s26 = smov 64   ;;  %s14180_s21 = smov 4  }
  0x44   : > { %11112 = dma.hbm_to_vmem [thread:$0]  (!%p12260_p6), %s14225_s4, 128, %s12249_s1, [#allocation10], %s14178_s26, %s14178_s26, %s14180_s21  }
  0x45   : > { %s14227_s5 = sld [smem:[#allocation54_spill]] }
  0x4b   : > { %s11529_s18 = scalar_lea.hbm %s14227_s5, 16 }
  0x4c   : > { %p11530_p4 = scmp.ne.s32.totalorder %s14227_s5, %s11529_s18  ;;  %p11536_p12 = scmp.lt.u32.totalorder %s11529_s18, %s14227_s5 }
  0x4e   : > { %p11532_p10 = pnand %p11530_p4, %p12276_p8 }
  0x50   : > { %p11533_p11 = pneg %p11532_p10 }
  0x52   : > { %p11538_p13 = pnand %p11536_p12, %p11533_p11 }
  0x54   : > { %11541 = shalt.err (!%p11538_p13)
}
  0x55   : > { %s11542_s1 = scalar_lea.vmem %s12264_s2, 16  ;;  %s11549_s3 = scalar_lea.vmem %s12264_s2, 32 }
  0x56   : > { %p11543_p0 = scmp.ne.s32.totalorder %s12264_s2, %s11542_s1  ;;  %p11550_p7 = scmp.lt.s32.totalorder %s12264_s2, %s12264_s2 }
  0x57   : > { %p11551_p9 = scmp.lt.s32.totalorder %s11549_s3, %s11542_s1 }
  0x58   : > { %p11545_p2 = pnand %p11543_p0, %p12276_p8 }
  0x59   : > { %p11552_p4 = por %p11551_p9, %p11550_p7 }
  0x5a   : > { %p11546_p5 = pneg %p11545_p2 }
  0x5c   : > { %p11553_p10 = pnand %p11552_p4, %p11546_p5 }
  0x5e   : > { %11556 = shalt.err (!%p11553_p10)
}
  0x5f   : > { %11115 = dma.hbm_to_vmem [thread:$0]  (!%p12260_p6), %s14227_s5, 16, %s12264_s2, [#allocation13]  }
  0x60   : > { %s14228_s7 = sld [smem:[#allocation56_spill]] }
  0x66   : > { %s11557_s28 = scalar_lea.hbm %s14228_s7, 16 }
  0x67   : > { %p11558_p11 = scmp.ne.s32.totalorder %s14228_s7, %s11557_s28  ;;  %p11564_p0 = scmp.lt.u32.totalorder %s11557_s28, %s14228_s7 }
  0x69   : > { %p11560_p12 = pnand %p11558_p11, %p12276_p8 }
  0x6b   : > { %p11561_p13 = pneg %p11560_p12 }
  0x6d   : > { %p11566_p2 = pnand %p11564_p0, %p11561_p13 }
  0x6f   : > { %11569 = shalt.err (!%p11566_p2)
}
  0x70   : > { %s11570_s2 = scalar_lea.vmem %s12266_s25, 16  ;;  %s11577_s3 = scalar_lea.vmem %s12266_s25, 32 }
  0x71   : > { %p11571_p5 = scmp.ne.s32.totalorder %s12266_s25, %s11570_s2  ;;  %p11578_p4 = scmp.lt.s32.totalorder %s12266_s25, %s12266_s25 }
  0x72   : > { %p11579_p10 = scmp.lt.s32.totalorder %s11577_s3, %s11570_s2 }
  0x73   : > { %p11573_p7 = pnand %p11571_p5, %p12276_p8 }
  0x74   : > { %p11580_p11 = por %p11579_p10, %p11578_p4 }
  0x75   : > { %p11574_p9 = pneg %p11573_p7 }
  0x77   : > { %p11581_p12 = pnand %p11580_p11, %p11574_p9 }
  0x79   : > { %11584 = shalt.err (!%p11581_p12)
}
  0x7a   : > { %11121 = dma.hbm_to_vmem [thread:$0]  (!%p12260_p6), %s14228_s7, 16, %s12266_s25, [#allocation16]  }
  0x7b   : > { %s12094_s16 = smov [#allocation18]   ;;  %s14229_s9 = sld [smem:[#allocation58_spill]] }
  0x7c   : > { %s548_s27 = sshll.u32 %s12094_s16, 4  ;;  %s549_s27 = int_to_ptr.vmem [resolvable:$true] %s548_s27 }
  0x81   : > { %s11585_s24 = scalar_lea.hbm %s14229_s9, 48 }
  0x82   : > { %p11586_p13 = scmp.ne.s32.totalorder %s14229_s9, %s11585_s24  ;;  %p11592_p5 = scmp.lt.u32.totalorder %s11585_s24, %s14229_s9 }
  0x84   : > { %p11588_p0 = pnand %p11586_p13, %p12276_p8 }
  0x86   : > { %p11589_p2 = pneg %p11588_p0 }
  0x88   : > { %p11594_p7 = pnand %p11592_p5, %p11589_p2 }
  0x8a   : > { %11597 = shalt.err (!%p11594_p7)
}
  0x8b   : > { %s11598_s25 = scalar_lea.vmem %s549_s27, 48  ;;  %s11605_s12 = scalar_lea.vmem %s549_s27, 64 }
  0x8c   : > { %p11599_p9 = scmp.ne.s32.totalorder %s549_s27, %s11598_s25  ;;  %p11606_p11 = scmp.lt.s32.totalorder %s549_s27, %s549_s27 }
  0x8d   : > { %p11607_p12 = scmp.lt.s32.totalorder %s11605_s12, %s11598_s25 }
  0x8e   : > { %p11601_p4 = pnand %p11599_p9, %p12276_p8 }
  0x8f   : > { %p11608_p1 = por %p11607_p12, %p11606_p11 }
  0x90   : > { %p11602_p10 = pneg %p11601_p4 }
  0x92   : > { %p11609_p3 = pnand %p11608_p1, %p11602_p10 }
  0x94   : > { %11612 = shalt.err (!%p11609_p3)
}
  0x95   : > { %s12095_s14 = smov 16   ;;  %s12096_s16 = smov 1  }
  0x96   : > { %11127 = dma.hbm_to_vmem [thread:$0]  (!%p12260_p6), %s14229_s9, 48, %s549_s27, [#allocation19], %s12095_s14, %s12095_s14, %s12096_s16  }
  0x97   : > { %s12097_s24 = smov [#allocation21]   ;;  %s12098_s1 = smov [#allocation24]  }
  0x98   : > { %s574_s18 = sshll.u32 %s12097_s24, 4  ;;  %s600_s2 = sshll.u32 %s12098_s1, 4  ;;  %s575_s18 = int_to_ptr.vmem [resolvable:$true] %s574_s18  ;;  %s12369_s2 = int_to_ptr.vmem [resolvable:$true] %s600_s2 }
  0x99   : > { %s14230_s11 = sld [smem:[#allocation60_spill]] }
  0x9f   : > { %s11613_s12 = scalar_lea.hbm %s14230_s11, 48 }
  0xa0   : > { %p11614_p1 = scmp.ne.s32.totalorder %s14230_s11, %s11613_s12  ;;  %p11620_p0 = scmp.lt.u32.totalorder %s11613_s12, %s14230_s11 }
  0xa2   : > { %p11616_p3 = pnand %p11614_p1, %p12276_p8 }
  0xa4   : > { %p11617_p13 = pneg %p11616_p3 }
  0xa6   : > { %p11622_p2 = pnand %p11620_p0, %p11617_p13 }
  0xa8   : > { %11625 = shalt.err (!%p11622_p2)
}
  0xa9   : > { %s11626_s19 = scalar_lea.vmem %s575_s18, 48  ;;  %s11633_s24 = scalar_lea.vmem %s575_s18, 64 }
  0xaa   : > { %p11627_p5 = scmp.ne.s32.totalorder %s575_s18, %s11626_s19  ;;  %p11634_p4 = scmp.lt.s32.totalorder %s575_s18, %s575_s18 }
  0xab   : > { %p11635_p10 = scmp.lt.s32.totalorder %s11633_s24, %s11626_s19 }
  0xac   : > { %p11629_p7 = pnand %p11627_p5, %p12276_p8 }
  0xad   : > { %p11636_p11 = por %p11635_p10, %p11634_p4 }
  0xae   : > { %p11630_p9 = pneg %p11629_p7 }
  0xb0   : > { %p11637_p12 = pnand %p11636_p11, %p11630_p9 }
  0xb2   : > { %11640 = shalt.err (!%p11637_p12)
}
  0xb3   : > { %11133 = dma.hbm_to_vmem [thread:$0]  (!%p12260_p6), %s14230_s11, 48, %s575_s18, [#allocation22], %s12095_s14, %s12095_s14, %s12096_s16  }
  0xb4   : > { %s14231_s13 = sld [smem:[#allocation62_spill]] }
  0xba   : > { %s11641_s25 = scalar_lea.hbm %s14231_s13, 48 }
  0xbb   : > { %p11642_p1 = scmp.ne.s32.totalorder %s14231_s13, %s11641_s25  ;;  %p11648_p0 = scmp.lt.u32.totalorder %s11641_s25, %s14231_s13 }
  0xbd   : > { %p11644_p3 = pnand %p11642_p1, %p12276_p8 }
  0xbf   : > { %p11645_p13 = pneg %p11644_p3 }
  0xc1   : > { %p11650_p2 = pnand %p11648_p0, %p11645_p13 }
  0xc3   : > { %11653 = shalt.err (!%p11650_p2)
}
  0xc4   : > { %s11654_s18 = scalar_lea.vmem %s12369_s2, 48  ;;  %s11661_s24 = scalar_lea.vmem %s12369_s2, 64 }
  0xc5   : > { %p11655_p5 = scmp.ne.s32.totalorder %s12369_s2, %s11654_s18  ;;  %p11662_p4 = scmp.lt.s32.totalorder %s12369_s2, %s12369_s2 }
  0xc6   : > { %p11663_p10 = scmp.lt.s32.totalorder %s11661_s24, %s11654_s18 }
  0xc7   : > { %p11657_p7 = pnand %p11655_p5, %p12276_p8 }
  0xc8   : > { %p11664_p11 = por %p11663_p10, %p11662_p4 }
  0xc9   : > { %p11658_p9 = pneg %p11657_p7 }
  0xcb   : > { %p11665_p12 = pnand %p11664_p11, %p11658_p9 }
  0xcd   : > { %11668 = shalt.err (!%p11665_p12)
}
  0xce   : > { %11139 = dma.hbm_to_vmem [thread:$0]  (!%p12260_p6), %s14231_s13, 48, %s12369_s2, [#allocation25], %s12095_s14, %s12095_s14, %s12096_s16  }
  0xcf   : > { %s12099_s1 = smov [#allocation27]   ;;  %s14232_s15 = sld [smem:[#allocation64_spill]] }
  0xd0   : > { %s626_s3 = sshll.u32 %s12099_s1, 4  ;;  %s627_s3 = int_to_ptr.vmem [resolvable:$true] %s626_s3 }
  0xd5   : > { %s11669_s28 = scalar_lea.hbm %s14232_s15, 48 }
  0xd6   : > { %p11670_p1 = scmp.ne.s32.totalorder %s14232_s15, %s11669_s28  ;;  %p11676_p0 = scmp.lt.u32.totalorder %s11669_s28, %s14232_s15 }
  0xd8   : > { %p11672_p3 = pnand %p11670_p1, %p12276_p8 }
  0xda   : > { %p11673_p13 = pneg %p11672_p3 }
  0xdc   : > { %p11678_p2 = pnand %p11676_p0, %p11673_p13 }
  0xde   : > { %11681 = shalt.err (!%p11678_p2)
}
  0xdf   : > { %s11682_s2 = scalar_lea.vmem %s627_s3, 48  ;;  %s11689_s26 = scalar_lea.vmem %s627_s3, 64 }
  0xe0   : > { %p11683_p5 = scmp.ne.s32.totalorder %s627_s3, %s11682_s2  ;;  %p11690_p4 = scmp.lt.s32.totalorder %s627_s3, %s627_s3 }
  0xe1   : > { %p11691_p10 = scmp.lt.s32.totalorder %s11689_s26, %s11682_s2 }
  0xe2   : > { %p11685_p7 = pnand %p11683_p5, %p12276_p8 }
  0xe3   : > { %p11692_p11 = por %p11691_p10, %p11690_p4 }
  0xe4   : > { %p11686_p9 = pneg %p11685_p7 }
  0xe6   : > { %p11693_p12 = pnand %p11692_p11, %p11686_p9 }
  0xe8   : > { %11696 = shalt.err (!%p11693_p12)
}
  0xe9   : > { %11145 = dma.hbm_to_vmem [thread:$0]  (!%p12260_p6), %s14232_s15, 48, %s627_s3, [#allocation28], %s12095_s14, %s12095_s14, %s12096_s16  }
  0xea   : > { %s9497_s25 = sadd.s32 4294967294, %s12087_s0   ;;  %s12442_s12 = sadd.s32 1, %s12087_s0  }
  0xeb   : > { %14233 = sst [smem:[#allocation45_spill]] %s12442_s12  ;;  %s55_s28 = sadd.s32 1, %s12083_s17 }
  0xec   : > { %s52_s27 = ssub.s32 %s12087_s0, %s12442_s12  ;;  %p62_p1 = scmp.ne.s32.totalorder %s12083_s17, %s12079_s30 }
  0xed   : > { %p53_p3 = scmp.eq.s32.totalorder %s52_s27, 0  ;;  %p63_p13 = scmp.eq.s32.totalorder %s12087_s0, 0 }
  0xee   : > { %p68_p0 = scmp.ne.s32.totalorder %s12079_s30, %s12075_s29  ;;  %p464_p2 = scmp.eq.s32.totalorder %s12244_s20, 1 }
  0xef   : > { %s12454_s19 = scalar_select %p53_p3, %s12083_s17, %s55_s28  }
  0xf0   : > { %p64_p5 = por %p63_p13, %p62_p1  ;;  %p14235_p7 = scmp.eq.s32.totalorder %s12244_s20, 0 }
  0xf1   : > { %14234 = sst [smem:[#allocation46_spill]] %s12454_s19  ;;  %p12462_p4 = por %p464_p2, %p62_p1 }
  0xf2   : > { %p12458_p9 = por %p14235_p7, %p68_p0  ;;  %p470_p10 = scmp.eq.s32.totalorder %s9497_s25, 1 }
  0xf3   : > { %s14237_s16 = scalar_select %p12462_p4, 1, 0 }
  0xf4   : > { %s14236_s14 = scalar_select %p12458_p9, 1, 0 }
  0xf5   : > { %14238 = sst [smem:[#allocation47_spill]] %s14237_s16  ;;  %p11179_p11 = scmp.lt.s32.totalorder %s12087_s0, 2 }
  0xf6   : > { %s12468_s3 = sand.u32 1, %s12083_s17   ;;  %p12470_p12 = por %p470_p10, %p68_p0 }
  0xf7   : > { %p12475_p3 = pnand %p11179_p11, %p64_p5  ;;  %s14182_s26 = sshll.u32 %s12468_s3, 5 }
  0xf8   : > { %s14239_s18 = scalar_select %p12470_p12, 1, 0 }
  0xf9   : > { %s14241_s2 = scalar_select %p12475_p3, 1, 0 }
  0xfa   : > { %14240 = sst [smem:[#allocation48_spill]] %s14239_s18  ;;  %s14183_s21 = sshll.u32 %s12087_s0, 9 }
  0xfb   : > { %s14242_s28 = sld [smem:[#allocation50_spill]]  ;;  %s679_s4 = scalar_lea.vmem [#allocation6], %s14182_s26 }
  0xfc   : > { %s686_s24 = sshll.u32 %s679_s4, 4  ;;  %s14243_s5 = sand.u32 1, %s12087_s0   ;;  %s12490_s24 = int_to_ptr.vmem [resolvable:$true] %s686_s24 }
  0xfd   : > { %s12494_s7 = scalar_lea.sflag [#allocation7], %s14243_s5  ;;  %p12500_p13 = pneg %p12475_p3 }
  0xff   : > { %s14244_s11 = scalar_select %p12500_p13, 1, 0 }
 0x101   : > { %s12486_s27 = scalar_lea.hbm %s14242_s28, %s14183_s21  ;;  %s11702_s4 = scalar_lea.hbm %s14242_s28, 1024 }
 0x102   : > { %s11697_s9 = scalar_lea.hbm %s12486_s27, 512  ;;  %p11703_p5 = scmp.lt.u32.totalorder %s12486_s27, %s14242_s28 }
 0x103   : > { %p11698_p1 = scmp.ne.s32.totalorder %s12486_s27, %s11697_s9  ;;  %p11704_p7 = scmp.lt.u32.totalorder %s11702_s4, %s11697_s9 }
 0x104   : > { %p11706_p11 = scmp.lt.u32.totalorder %s11697_s9, %s12486_s27 }
 0x105   : > { %p11700_p0 = pnand %p12500_p13, %p11698_p1  ;;  %p11705_p10 = por %p11704_p7, %p11703_p5 }
 0x107   : > { %p11701_p2 = pneg %p11700_p0  ;;  %p11707_p12 = por %p11706_p11, %p11705_p10 }
 0x109   : > { %p11708_p4 = pnand %p11707_p12, %p11701_p2 }
 0x10b   : > { %11711 = shalt.err (!%p11708_p4)
}
 0x10c   : > { %s11712_s5 = scalar_lea.vmem %s12490_s24, 512  ;;  %s12100_s1 = smov [#allocation6]  }
 0x10d   : > { %p11713_p1 = scmp.ne.s32.totalorder %s12490_s24, %s11712_s5  ;;  %s11717_s25 = sshll.u32 %s12100_s1, 4  ;;  %s11718_s25 = int_to_ptr.vmem [resolvable:$false] %s11717_s25 }
 0x10e   : > { %s11719_s26 = scalar_lea.vmem %s11718_s25, 1024  ;;  %p11720_p6 = scmp.lt.s32.totalorder %s12490_s24, %s11718_s25 }
 0x10f   : > { %p11715_p0 = pnand %p11713_p1, %p12500_p13  ;;  %p11721_p8 = scmp.lt.s32.totalorder %s11719_s26, %s11712_s5 }
 0x111   : > { %p11716_p9 = pneg %p11715_p0  ;;  %p11722_p5 = por %p11721_p8, %p11720_p6 }
 0x113   : > { %p11723_p7 = pnand %p11722_p5, %p11716_p9 }
 0x115   : > { %11726 = shalt.err (!%p11723_p7)
}
 0x116   : > { %s14245_s9 = smov 4   ;;  %s14246_s21 = smov 64  }
 0x117   : > { %11155 = dma.hbm_to_vmem [thread:$0]  (!%p12475_p3), %s12486_s27, 512, %s12490_s24, %s12494_s7, %s14246_s21, %s14246_s21, %s14245_s9  }
 0x118   : > { %s14247_s4 = sshll.u32 %s12087_s0, 9  ;;  %s14248_s25 = sld [smem:[#allocation51_spill]] }
 0x119   : > { %s14249_s26 = sshll.u32 %s12468_s3, 5  ;;  %s12101_s19 = smov [#allocation14]  }
 0x11a   : > { %s700_s15 = scalar_lea.vmem [#allocation8], %s14249_s26  ;;  %s514_s17 = sshll.u32 %s12101_s19, 4  ;;  %s515_s17 = int_to_ptr.vmem [resolvable:$true] %s514_s17 }
 0x11b   : > { %s707_s28 = sshll.u32 %s700_s15, 4  ;;  %s12102_s12 = smov [#allocation17]   ;;  %s12536_s28 = int_to_ptr.vmem [resolvable:$true] %s707_s28 }
 0x11c   : > { %s535_s18 = sshll.u32 %s12102_s12, 4  ;;  %s14250_s6 = sld [smem:[#allocation55_spill]]  ;;  %s12538_s18 = int_to_ptr.vmem [resolvable:$true] %s535_s18 }
 0x11d   : > { %p14251_p8 = scmp.ne.s32.totalorder %s14226_s22, 0 }
 0x11e   : > { %s12532_s5 = scalar_lea.hbm %s14248_s25, %s14247_s4 }
 0x122   : > { %s11727_s27 = scalar_lea.hbm %s14250_s6, 32 }
 0x123   : > { %p11728_p6 = scmp.ne.s32.totalorder %s14250_s6, %s11727_s27  ;;  %p11734_p12 = scmp.lt.u32.totalorder %s11727_s27, %s14250_s6 }
 0x125   : > { %p11730_p9 = pnand %p11728_p6, %p14251_p8 }
 0x127   : > { %p11731_p4 = pneg %p11730_p9 }
 0x129   : > { %p11736_p2 = pnand %p11734_p12, %p11731_p4 }
 0x12b   : > { %11739 = shalt.err (!%p11736_p2)
}
 0x12c   : > { %s11740_s12 = scalar_lea.vmem %s515_s17, 32  ;;  %p11748_p0 = scmp.lt.s32.totalorder %s515_s17, %s515_s17 }
 0x12d   : > { %p11741_p10 = scmp.ne.s32.totalorder %s515_s17, %s11740_s12  ;;  %p11749_p5 = scmp.lt.s32.totalorder %s11740_s12, %s11740_s12 }
 0x12f   : > { %p11743_p11 = pnand %p11741_p10, %p14251_p8  ;;  %p11750_p7 = por %p11749_p5, %p11748_p0 }
 0x131   : > { %p11744_p1 = pneg %p11743_p11 }
 0x133   : > { %p11751_p3 = pnand %p11750_p7, %p11744_p1 }
 0x135   : > { %11754 = shalt.err (!%p11751_p3)
}
 0x136   : > { %p14252_p6 = scmp.ne.s32.totalorder %s14224_s23, 0  ;;  %s14253_s8 = sld [smem:[#allocation57_spill]] }
 0x138   : > { %11118 = dma.hbm_to_vmem [thread:$0]  (!%p14252_p6), %s14250_s6, 32, %s515_s17, [#allocation13]  }
 0x13c   : > { %s11755_s26 = scalar_lea.hbm %s14253_s8, 768 }
 0x13d   : > { %p11756_p9 = scmp.ne.s32.totalorder %s14253_s8, %s11755_s26  ;;  %p11762_p3 = scmp.lt.u32.totalorder %s11755_s26, %s14253_s8 }
 0x13f   : > { %p11758_p4 = pnand %p11756_p9, %p14251_p8 }
 0x141   : > { %p11759_p12 = pneg %p11758_p4 }
 0x143   : > { %p11764_p2 = pnand %p11762_p3, %p11759_p12 }
 0x145   : > { %11767 = shalt.err (!%p11764_p2)
}
 0x146   : > { %s11768_s17 = scalar_lea.vmem %s12538_s18, 768  ;;  %p11776_p0 = scmp.lt.s32.totalorder %s12538_s18, %s12538_s18 }
 0x147   : > { %p11769_p10 = scmp.ne.s32.totalorder %s12538_s18, %s11768_s17  ;;  %p11777_p5 = scmp.lt.s32.totalorder %s11768_s17, %s11768_s17 }
 0x149   : > { %p11771_p11 = pnand %p11769_p10, %p14251_p8  ;;  %p11778_p7 = por %p11777_p5, %p11776_p0 }
 0x14b   : > { %p11772_p1 = pneg %p11771_p11 }
 0x14d   : > { %p11779_p9 = pnand %p11778_p7, %p11772_p1 }
 0x14f   : > { %11782 = shalt.err (!%p11779_p9)
}
 0x150   : > { %11124 = dma.hbm_to_vmem [thread:$0]  (!%p14252_p6), %s14253_s8, 768, %s12538_s18, [#allocation16], %s14246_s21, %s14246_s21, %s14245_s9  }
 0x151   : > { %s12103_s29 = smov [#allocation20]   ;;  %s12104_s16 = smov [#allocation23]  }
 0x152   : > { %s561_s19 = sshll.u32 %s12103_s29, 4  ;;  %s587_s1 = sshll.u32 %s12104_s16, 4  ;;  %s562_s19 = int_to_ptr.vmem [resolvable:$true] %s561_s19  ;;  %s12584_s1 = int_to_ptr.vmem [resolvable:$true] %s587_s1 }
 0x153   : > { %s14254_s10 = sld [smem:[#allocation59_spill]] }
 0x159   : > { %s11783_s27 = scalar_lea.hbm %s14254_s10, 1536 }
 0x15a   : > { %p11784_p4 = scmp.ne.s32.totalorder %s14254_s10, %s11783_s27  ;;  %p11790_p2 = scmp.lt.u32.totalorder %s11783_s27, %s14254_s10 }
 0x15c   : > { %p11786_p12 = pnand %p11784_p4, %p14251_p8 }
 0x15e   : > { %p11787_p3 = pneg %p11786_p12 }
 0x160   : > { %p11792_p10 = pnand %p11790_p2, %p11787_p3 }
 0x162   : > { %11795 = shalt.err (!%p11792_p10)
}
 0x163   : > { %s11796_s4 = scalar_lea.vmem %s562_s19, 1536  ;;  %p11804_p5 = scmp.lt.s32.totalorder %s562_s19, %s562_s19 }
 0x164   : > { %p11797_p11 = scmp.ne.s32.totalorder %s562_s19, %s11796_s4  ;;  %p11805_p7 = scmp.lt.s32.totalorder %s11796_s4, %s11796_s4 }
 0x166   : > { %p11799_p1 = pnand %p11797_p11, %p14251_p8  ;;  %p11806_p9 = por %p11805_p7, %p11804_p5 }
 0x168   : > { %p11800_p0 = pneg %p11799_p1 }
 0x16a   : > { %p11807_p13 = pnand %p11806_p9, %p11800_p0 }
 0x16c   : > { %11810 = shalt.err (!%p11807_p13)
}
 0x16d   : > { %11130 = dma.hbm_to_vmem [thread:$0]  (!%p14252_p6), %s14254_s10, 1536, %s562_s19, [#allocation19], %s14246_s21, %s14246_s21, %s14245_s9  }
 0x16e   : > { %s14255_s24 = sld [smem:[#allocation61_spill]] }
 0x174   : > { %s11811_s27 = scalar_lea.hbm %s14255_s24, 768 }
 0x175   : > { %p11812_p4 = scmp.ne.s32.totalorder %s14255_s24, %s11811_s27  ;;  %p11818_p3 = scmp.lt.u32.totalorder %s11811_s27, %s14255_s24 }
 0x177   : > { %p11814_p13 = pnand %p11812_p4, %p14251_p8 }
 0x179   : > { %p11815_p12 = pneg %p11814_p13 }
 0x17b   : > { %p11820_p2 = pnand %p11818_p3, %p11815_p12 }
 0x17d   : > { %11823 = shalt.err (!%p11820_p2)
}
 0x17e   : > { %s11824_s19 = scalar_lea.vmem %s12584_s1, 768  ;;  %p11832_p0 = scmp.lt.s32.totalorder %s12584_s1, %s12584_s1 }
 0x17f   : > { %p11825_p10 = scmp.ne.s32.totalorder %s12584_s1, %s11824_s19  ;;  %p11833_p5 = scmp.lt.s32.totalorder %s11824_s19, %s11824_s19 }
 0x181   : > { %p11827_p11 = pnand %p11825_p10, %p14251_p8  ;;  %p11834_p7 = por %p11833_p5, %p11832_p0 }
 0x183   : > { %p11828_p1 = pneg %p11827_p11 }
 0x185   : > { %p11835_p9 = pnand %p11834_p7, %p11828_p1 }
 0x187   : > { %11838 = shalt.err (!%p11835_p9)
}
 0x188   : > { %11136 = dma.hbm_to_vmem [thread:$0]  (!%p14252_p6), %s14255_s24, 768, %s12584_s1, [#allocation22], %s14246_s21, %s14246_s21, %s14245_s9  }
 0x189   : > { %s12105_s29 = smov [#allocation26]   ;;  %s12106_s26 = smov [#allocation29]  }
 0x18a   : > { %s613_s16 = sshll.u32 %s12105_s29, 4  ;;  %s640_s27 = sshll.u32 %s12106_s26, 4  ;;  %s614_s16 = int_to_ptr.vmem [resolvable:$true] %s613_s16  ;;  %s12633_s27 = int_to_ptr.vmem [resolvable:$true] %s640_s27 }
 0x18b   : > { %s14256_s17 = sld [smem:[#allocation63_spill]] }
 0x191   : > { %s14257_s18 = smov %s14256_s17  ;;  %s11839_s19 = scalar_lea.hbm %s14256_s17, 768 }
 0x192   : > { %p11840_p4 = scmp.ne.s32.totalorder %s14257_s18, %s11839_s19  ;;  %p11846_p3 = scmp.lt.u32.totalorder %s11839_s19, %s14257_s18 }
 0x194   : > { %p11842_p13 = pnand %p11840_p4, %p14251_p8 }
 0x196   : > { %p11843_p12 = pneg %p11842_p13 }
 0x198   : > { %p11848_p2 = pnand %p11846_p3, %p11843_p12 }
 0x19a   : > { %11851 = shalt.err (!%p11848_p2)
}
 0x19b   : > { %s11852_s12 = scalar_lea.vmem %s614_s16, 768  ;;  %p11860_p0 = scmp.lt.s32.totalorder %s614_s16, %s614_s16 }
 0x19c   : > { %p11853_p10 = scmp.ne.s32.totalorder %s614_s16, %s11852_s12  ;;  %p11861_p5 = scmp.lt.s32.totalorder %s11852_s12, %s11852_s12 }
 0x19e   : > { %p11855_p11 = pnand %p11853_p10, %p14251_p8  ;;  %p11862_p7 = por %p11861_p5, %p11860_p0 }
 0x1a0   : > { %p11856_p1 = pneg %p11855_p11 }
 0x1a2   : > { %p11863_p9 = pnand %p11862_p7, %p11856_p1 }
 0x1a4   : > { %11866 = shalt.err (!%p11863_p9)
}
 0x1a5   : > { %11142 = dma.hbm_to_vmem [thread:$0]  (!%p14252_p6), %s14257_s18, 768, %s614_s16, [#allocation25], %s14246_s21, %s14246_s21, %s14245_s9  }
 0x1a6   : > { %s14258_s13 = sld [smem:[#allocation65_spill]] }
 0x1ac   : > { %s11867_s15 = scalar_lea.hbm %s14258_s13, 16 }
 0x1ad   : > { %p11868_p4 = scmp.ne.s32.totalorder %s14258_s13, %s11867_s15  ;;  %p11874_p3 = scmp.lt.u32.totalorder %s11867_s15, %s14258_s13 }
 0x1af   : > { %p11870_p13 = pnand %p11868_p4, %p14251_p8 }
 0x1b1   : > { %p11871_p12 = pneg %p11870_p13 }
 0x1b3   : > { %p11876_p2 = pnand %p11874_p3, %p11871_p12 }
 0x1b5   : > { %11879 = shalt.err (!%p11876_p2)
}
 0x1b6   : > { %s11880_s16 = scalar_lea.vmem %s12633_s27, 16  ;;  %s11887_s12 = scalar_lea.vmem %s12633_s27, 32 }
 0x1b7   : > { %p11881_p10 = scmp.ne.s32.totalorder %s12633_s27, %s11880_s16  ;;  %p11888_p0 = scmp.lt.s32.totalorder %s12633_s27, %s12633_s27 }
 0x1b8   : > { %p11889_p5 = scmp.lt.s32.totalorder %s11887_s12, %s11880_s16 }
 0x1b9   : > { %p11883_p11 = pnand %p11881_p10, %p14251_p8 }
 0x1ba   : > { %p11890_p7 = por %p11889_p5, %p11888_p0 }
 0x1bb   : > { %p11884_p1 = pneg %p11883_p11 }
 0x1bd   : > { %p11891_p9 = pnand %p11890_p7, %p11884_p1 }
 0x1bf   : > { %11894 = shalt.err (!%p11891_p9)
}
 0x1c0   : > { %11148 = dma.hbm_to_vmem [thread:$0]  (!%p14252_p6), %s14258_s13, 16, %s12633_s27, [#allocation28]  }
 0x1c1   : > { %s9513_s22 = sshll.u32 %s12468_s3, 4  ;;  %s9764_s29 = sshll.u32 %s12087_s0, 8 }
 0x1c2   : > { %s14259_s17 = sld [smem:[#allocation49_spill]]  ;;  %s658_s23 = scalar_lea.vmem [#allocation3], %s9513_s22 }
 0x1c3   : > { %s665_s1 = sshll.u32 %s658_s23, 4  ;;  %s655_s16 = scalar_lea.sflag [#allocation4], %s12468_s3  ;;  %s12691_s1 = int_to_ptr.vmem [resolvable:$true] %s665_s1 }
 0x1c4   : > { %p14261_p6 = scmp.ne.s32.totalorder %s14244_s11, 0 }
 0x1c8   : > { %s14260_s19 = smov %s14259_s17  ;;  %s12687_s4 = scalar_lea.hbm %s14259_s17, %s9764_s29 }
 0x1c9   : > { %s11895_s12 = scalar_lea.hbm %s12687_s4, 256  ;;  %s11900_s8 = scalar_lea.hbm %s14260_s19, 512 }
 0x1ca   : > { %p11896_p8 = scmp.ne.s32.totalorder %s12687_s4, %s11895_s12  ;;  %p11901_p12 = scmp.lt.u32.totalorder %s12687_s4, %s14260_s19 }
 0x1cb   : > { %p11902_p3 = scmp.lt.u32.totalorder %s11900_s8, %s11895_s12  ;;  %p11904_p10 = scmp.lt.u32.totalorder %s11895_s12, %s12687_s4 }
 0x1cc   : > { %p11898_p4 = pnand %p11896_p8, %p14261_p6 }
 0x1cd   : > { %p11903_p2 = por %p11902_p3, %p11901_p12 }
 0x1ce   : > { %p11899_p13 = pneg %p11898_p4 }
 0x1cf   : > { %p11905_p11 = por %p11904_p10, %p11903_p2 }
 0x1d1   : > { %p11906_p1 = pnand %p11905_p11, %p11899_p13 }
 0x1d3   : > { %11909 = shalt.err (!%p11906_p1)
}
 0x1d4   : > { %s11910_s17 = scalar_lea.vmem %s12691_s1, 256  ;;  %s12107_s23 = smov [#allocation3]  }
 0x1d5   : > { %p11911_p0 = scmp.ne.s32.totalorder %s12691_s1, %s11910_s17  ;;  %s11915_s27 = sshll.u32 %s12107_s23, 4  ;;  %s11916_s27 = int_to_ptr.vmem [resolvable:$false] %s11915_s27 }
 0x1d6   : > { %s11917_s6 = scalar_lea.vmem %s11916_s27, 512  ;;  %p11918_p9 = scmp.lt.s32.totalorder %s12691_s1, %s11916_s27 }
 0x1d7   : > { %p11913_p5 = pnand %p11911_p0, %p14261_p6  ;;  %p11919_p8 = scmp.lt.s32.totalorder %s11917_s6, %s11910_s17 }
 0x1d9   : > { %p11914_p7 = pneg %p11913_p5  ;;  %p11920_p4 = por %p11919_p8, %p11918_p9 }
 0x1db   : > { %p11921_p12 = pnand %p11920_p4, %p11914_p7 }
 0x1dd   : > { %11924 = shalt.err (!%p11921_p12)
}
 0x1de   : > { %p14262_p13 = scmp.ne.s32.totalorder %s14241_s2, 0  ;;  %s14263_s26 = sld [smem:[#allocation52_spill]] }
 0x1df   : > { %s721_s17 = scalar_lea.vmem [#allocation9], %s9513_s22  ;;  %s11925_s27 = scalar_lea.hbm %s12532_s5, 512 }
 0x1e0   : > { %11152 = dma.hbm_to_vmem [thread:$0]  (!%p14262_p13), %s12687_s4, 256, %s12691_s1, %s655_s16, %s14246_s21, %s14246_s21, %s14245_s9  }
 0x1e1   : > { %s728_s23 = sshll.u32 %s721_s17, 4  ;;  %p11926_p3 = scmp.ne.s32.totalorder %s12532_s5, %s11925_s27  ;;  %s12729_s23 = int_to_ptr.vmem [resolvable:$true] %s728_s23 }
 0x1e2   : > { %s11930_s4 = scalar_lea.hbm %s14248_s25, 1024  ;;  %p11931_p11 = scmp.lt.u32.totalorder %s12532_s5, %s14248_s25 }
 0x1e3   : > { %p11928_p2 = pnand %p11926_p3, %p14261_p6  ;;  %p11932_p1 = scmp.lt.u32.totalorder %s11930_s4, %s11925_s27 }
 0x1e4   : > { %s12725_s15 = scalar_lea.hbm %s14263_s26, %s9764_s29  ;;  %p11934_p5 = scmp.lt.u32.totalorder %s11925_s27, %s12532_s5 }
 0x1e5   : > { %p11929_p10 = pneg %p11928_p2  ;;  %p11933_p0 = por %p11932_p1, %p11931_p11 }
 0x1e7   : > { %p11935_p7 = por %p11934_p5, %p11933_p0 }
 0x1e9   : > { %p11936_p9 = pnand %p11935_p7, %p11929_p10 }
 0x1eb   : > { %11939 = shalt.err (!%p11936_p9)
}
 0x1ec   : > { %s11940_s3 = scalar_lea.vmem %s12536_s28, 512  ;;  %s12108_s10 = smov [#allocation8]  }
 0x1ed   : > { %p11941_p8 = scmp.ne.s32.totalorder %s12536_s28, %s11940_s3  ;;  %s11945_s22 = sshll.u32 %s12108_s10, 4  ;;  %s11946_s22 = int_to_ptr.vmem [resolvable:$false] %s11945_s22 }
 0x1ee   : > { %s11947_s29 = scalar_lea.vmem %s11946_s22, 1024  ;;  %p11948_p3 = scmp.lt.s32.totalorder %s12536_s28, %s11946_s22 }
 0x1ef   : > { %p11943_p4 = pnand %p11941_p8, %p14261_p6  ;;  %p11949_p2 = scmp.lt.s32.totalorder %s11947_s29, %s11940_s3 }
 0x1f1   : > { %p11944_p12 = pneg %p11943_p4  ;;  %p11950_p11 = por %p11949_p2, %p11948_p3 }
 0x1f3   : > { %p11951_p1 = pnand %p11950_p11, %p11944_p12 }
 0x1f5   : > { %11954 = shalt.err (!%p11951_p1)
}
 0x1f6   : > { %11158 = dma.hbm_to_vmem [thread:$0]  (!%p14262_p13), %s12532_s5, 512, %s12536_s28, %s12494_s7, %s14246_s21, %s14246_s21, %s14245_s9  }
 0x1f7   : > { %s14264_s12 = sand.u32 1, %s12087_s0   ;;  %s11955_s17 = scalar_lea.hbm %s12725_s15, 256 }
 0x1f8   : > { %s12758_s8 = scalar_lea.sflag [#allocation10], %s14264_s12  ;;  %p11956_p10 = scmp.ne.s32.totalorder %s12725_s15, %s11955_s17 }
 0x1f9   : > { %s11960_s4 = scalar_lea.hbm %s14263_s26, 512  ;;  %p11961_p7 = scmp.lt.u32.totalorder %s12725_s15, %s14263_s26 }
 0x1fa   : > { %p11958_p0 = pnand %p11956_p10, %p14261_p6  ;;  %p11962_p9 = scmp.lt.u32.totalorder %s11960_s4, %s11955_s17 }
 0x1fb   : > { %p11964_p4 = scmp.lt.u32.totalorder %s11955_s17, %s12725_s15 }
 0x1fc   : > { %p11959_p5 = pneg %p11958_p0  ;;  %p11963_p8 = por %p11962_p9, %p11961_p7 }
 0x1fe   : > { %p11965_p12 = por %p11964_p4, %p11963_p8 }
 0x200   : > { %p11966_p3 = pnand %p11965_p12, %p11959_p5 }
 0x202   : > { %11969 = shalt.err (!%p11966_p3)
}
 0x203   : > { %s11970_s7 = scalar_lea.vmem %s12729_s23, 256  ;;  %s12109_s28 = smov [#allocation9]  }
 0x204   : > { %p11971_p2 = scmp.ne.s32.totalorder %s12729_s23, %s11970_s7  ;;  %s11975_s5 = sshll.u32 %s12109_s28, 4  ;;  %s11976_s5 = int_to_ptr.vmem [resolvable:$false] %s11975_s5 }
 0x205   : > { %s11977_s3 = scalar_lea.vmem %s11976_s5, 512  ;;  %p11978_p10 = scmp.lt.s32.totalorder %s12729_s23, %s11976_s5 }
 0x206   : > { %p11973_p11 = pnand %p11971_p2, %p14261_p6  ;;  %p11979_p0 = scmp.lt.s32.totalorder %s11977_s3, %s11970_s7 }
 0x208   : > { %p11974_p1 = pneg %p11973_p11  ;;  %p11980_p7 = por %p11979_p0, %p11978_p10 }
 0x20a   : > { %p11981_p9 = pnand %p11980_p7, %p11974_p1 }
 0x20c   : > { %11984 = shalt.err (!%p11981_p9)
}
 0x20d   : > { %11161 = dma.hbm_to_vmem [thread:$0]  (!%p14262_p13), %s12725_s15, 256, %s12729_s23, %s12758_s8, %s14246_s21, %s14246_s21, %s14245_s9  }
 0x20e   : > { %s14265_s11 = sld [smem:[#allocation44_spill]] }
 0x214   : > { %p14266_p6 = scmp.ne.s32.totalorder %s14265_s11, 0 }
 0x215   : > { %s12788_s10 = sand.u32 (!%p14266_p6), 1, %s12079_s30   ;;  %p14267_p5 = scmp.ne.s32.totalorder (!%p14266_p6), %s14236_s14, 0 }
 0x216   : > { %740 = sbr.rel (%p14266_p6) target bundleno = 14042 (0x36da), region = 92  ;;  %s9526_s22 = sshll.u32 (!%p14266_p6), %s12788_s10, 4 }
 0x217   : > { %s743_s29 = scalar_lea.sflag (!%p14266_p6), [#allocation4], %s12788_s10  ;;  %s12792_s12 = scalar_lea.vmem (!%p14266_p6), [#allocation3], %s9526_s22 }
 0x21d   : > { %12030 = dma.done.wait (%p14267_p5), %s743_s29, 256  }
 0x21e   : > { %12032 = vsyncadd (%p14267_p5), %s743_s29, 4294967040  ;;  %s751_s2 = sand.u32 1, %s12244_s20   ;;  %s9527_s9 = sshll.u32 %s12788_s10, 5 }
 0x21f   : > { %s752_s21 = scalar_lea.sflag [#allocation7], %s751_s2  ;;  %s12800_s15 = scalar_lea.vmem [#allocation6], %s9527_s9 }
 0x220   : > { %12034 = dma.done.wait (%p14267_p5), %s752_s21, 1024  }
 0x221   : > { %12036 = vsyncadd (%p14267_p5), %s752_s21, 4294966272  ;;  %s12806_s23 = scalar_lea.vmem [#allocation8], %s9527_s9  ;;  %s770_s8 = scalar_lea.sflag [#allocation10], %s751_s2 }
 0x222   : > { %s12808_s17 = scalar_lea.vmem [#allocation9], %s9526_s22 }
 0x223   : > { %12038 = dma.done.wait (%p14267_p5), %s770_s8, 256  }
 0x224   : > { %12040 = vsyncadd (%p14267_p5), %s770_s8, 4294967040  ;;  %p14268_p13 = scmp.eq.s32.totalorder %s12244_s20, 0 }
 0x226   : > { %12042 = dma.done.wait (%p14268_p13), [#allocation10], 128   ;;  %p14269_p8 = pmov %p14268_p13 }
 0x228   : > { %12044 = vsyncadd (%p14269_p8), [#allocation10], 4294967168  ;;  %p14270_p4 = pmov %p14269_p8 }
 0x22a   : > { %12046 = dma.done.wait (%p14270_p4), [#allocation13], 48   ;;  %p14271_p12 = pmov %p14270_p4 }
 0x22b   : > { %p14272_p3 = pmov %p14270_p4 }
 0x22c   : > { %12048 = vsyncadd (%p14271_p12), [#allocation13], 4294967248 }
 0x22d   : > { %12050 = dma.done.wait (%p14272_p3), [#allocation16], 784   ;;  %p14273_p2 = pmov %p14272_p3 }
 0x22f   : > { %12052 = vsyncadd (%p14273_p2), [#allocation16], 4294966512  ;;  %p14274_p11 = pmov %p14273_p2 }
 0x230   : > { %p14275_p1 = pmov %p14273_p2 }
 0x231   : > { %12054 = dma.done.wait (%p14274_p11), [#allocation19], 1584  }
 0x232   : > { %12056 = vsyncadd (%p14275_p1), [#allocation19], 4294965712  ;;  %p14276_p10 = pmov %p14275_p1 }
 0x233   : > { %p14277_p0 = pmov %p14275_p1 }
 0x234   : > { %12058 = dma.done.wait (%p14276_p10), [#allocation22], 816  }
 0x235   : > { %12060 = vsyncadd (%p14277_p0), [#allocation22], 4294966480  ;;  %p14278_p7 = pmov %p14277_p0 }
 0x236   : > { %p14279_p9 = pmov %p14277_p0 }
 0x237   : > { %12062 = dma.done.wait (%p14278_p7), [#allocation25], 816  }
 0x238   : > { %12064 = vsyncadd (%p14279_p9), [#allocation25], 4294966480  ;;  %p14280_p6 = pmov %p14277_p0 }
 0x239   : > { %p14281_p5 = pmov %p14277_p0 }
 0x23a   : > { %12066 = dma.done.wait (%p14280_p6), [#allocation28], 64  }
 0x23b   : > { %12068 = vsyncadd (%p14281_p5), [#allocation28], 4294967232  ;;  %vm948_vm0 = vcmask 1045504   ;;  %vm941_vm1 = vcmask 97280   ;;  %v11258_v1 = vld [vmem:[#allocation11] sm:$0x3f]  }
 0x23c   : > { %v11259_v2 = vld [vmem:[%s12792_s12] sm:$0xff]   ;;  %vm1042_vm2 = vcmask 1041408   ;;  %11033 = vmatprep.subr.msk.bf16.mxu0 %vm948_vm0, %v11258_v1  ;;  %v950_v3 = vsel %vm948_vm0, %v11258_v1, 0  ;;  %v11260_v4 = vld [vmem:[%s12792_s12 + $0x8] sm:$0xff]   ;;  %vm1029_vm3 = vcmask 31744   ;;  %v12110_v9 = vmov 0.0  }
 0x23d   : > { %10098 = vmatpush3.bf16.msra.mxu0 %v950_v3  ;;  %10099 = vmatprep.mubr.msk.bf16.mxu0 %vm941_vm1, %v11259_v2  ;;  %v1001_v5 = vld [vmem:[#allocation14] sm:$0x3]  ;;  %v11261_v7 = vld [vmem:[%s12800_s15] sm:$0xff]   ;;  %v11263_v10 = vld [vmem:[%s12800_s15 + $0x10] sm:$0xff]   ;;  %vm12111_vm4 = vmmov 0   ;;  %vm1132_vm5 = vcmask 1043456  }
 0x23e   : > { %11034 = vmatprep.subr.msk.bf16.mxu1 %vm1042_vm2, %v1001_v5  ;;  %v1044_v6 = vsel %vm1042_vm2, %v1001_v5, 0  ;;  %v11262_v8 = vld [vmem:[%s12800_s15 + $0x8] sm:$0xff]   ;;  %10105 = vmatprep.mubr.msk.bf16.mxu1 %vm1029_vm3, %v11261_v7  ;;  %v11264_v11 = vld [vmem:[%s12800_s15 + $0x18] sm:$0xff]   ;;  %v11267_v23 = vld [vmem:[%s12806_s23 + $0x10] sm:$0xff]   ;;  %vm1128_vm6 = vcmask 64512   ;;  %vm1345_vm7 = vcmask 130048  }
 0x23f   : > { %10104 = vmatpush3.bf16.msra.mxu1 %v1044_v6  ;;  %10113 = vmatprep.subr.bf16.mxu0 %v12110_v9  ;;  %v9543_v12 = vld [vmem:[#allocation12] ss:$0 sm:$0xff]  ;;  %v11265_v25 = vld [vmem:[%s12806_s23] sm:$0xff]   ;;  %v11268_v32 = vld [vmem:[%s12806_s23 + $0x18] sm:$0xff]   ;;  %vm1547_vm8 = vcmask 261120   ;;  %vm1648_vm9 = vcmask 523264  }
 0x240   : > { %10100 = vmatmul.mubr.msk.bf16.vlgmr.msra.gmra.mrb[0].mxu0 %vm941_vm1, %v11260_v4  ;;  %10125 = vmatprep.subr.bf16.mxu1 %v12110_v9  ;;  %v11266_v29 = vld [vmem:[%s12806_s23 + $0x8] sm:$0xff]   ;;  %s12112_s14 = smov 96   ;;  %s12113_s27 = smov 64   ;;  %vm9227_vm10 = vcmask 253952  }
 0x241   : > { %10115 = vmatprep.mubr.msk.bf16.mxu0 %vm12111_vm4, %v12110_v9  ;;  %v9549_v41 = vld [vmem:[#allocation15] ss:$0 sm:$0xff]  ;;  %s12114_s6 = smov 88   ;;  %s12115_s4 = smov 120  }
 0x242   : > { %10106 = vmatmul.mubr.msk.bf16.vlgmr.msra.gmra.mrb[0].mxu1 %vm1029_vm3, %v11262_v8  ;;  %s12116_s1 = smov 56   ;;  %s12117_s16 = smov 112  }
 0x243   : > { %10109 = vmatprep.mubr.msk.bf16.mxu1 %vm1029_vm3, %v11263_v10  ;;  %s12118_s7 = smov 80   ;;  %s12119_s28 = smov 48  }
 0x244   : > { %s12120_s5 = smov 72   ;;  %s12121_s3 = smov 104  }
 0x245   : > { %s12122_s11 = smov 40   ;;  %s14282_s22 = sld [smem:[#allocation47_spill]] }
 0x246   : > { %s9761_s29 = sshll.u32 %s12244_s20, 4  ;;  %s891_s12 = scalar_lea.vmem [#allocation30], %s12788_s10 }
 0x247   : > { %s9242_s2 = sshll.u32 %s891_s12, 4  ;;  %s14283_s15 = sld [smem:[#allocation66_spill]]  ;;  %s14106_s2 = int_to_ptr.vmem [resolvable:$true] %s9242_s2 }
 0x248   : > { %s9230_s20 = scalar_lea.sflag [#allocation5], %s12788_s10  ;;  %s11985_s8 = scalar_lea.vmem %s14106_s2, 16 }
 0x249   : > { %p11986_p13 = scmp.ne.s32.totalorder %s14106_s2, %s11985_s8 }
 0x24a   : > { %10110 = vmatmul.mubr.msk.bf16.gmra.mrb[4].mxu1 %vm1029_vm3, %v11264_v11 }
 0x24b   : > { %10127 = vmatprep.mubr.msk.bf16.mxu1 %vm12111_vm4, %v12110_v9  ;;  %p14284_p8 = scmp.ne.s32.totalorder %s14282_s22, 0 }
 0x24d   : > { %p11987_p4 = pnand %p11986_p13, %p14284_p8 }
 0x24f   : > { %p11988_p12 = pneg %p11987_p4 }
 0x313   : > { %v10101_v13 = vpop.f32.mrb[0].mxu0 }
 0x314   : > { %v12854_v14 = vadd.f32 %v10101_v13, %v9543_v12  ;;  %v986_v15 = vpop.f32.mrb[1].mxu0 }
 0x315   : > { %v12856_v16 = vadd.f32 %v9543_v12, %v986_v15  ;;  %v10102_v17 = vpop.f32.mrb[2].mxu0  ;;  %v10107_v33 = vpop.f32.mrb[0].mxu1 }
 0x316   : > { %v989_v18 = vpop.f32.mrb[3].mxu0  ;;  %v1121_v19 = vpack.c.bf16 %v12854_v14, %v12854_v14  ;;  %v12873_v27 = vadd.f32 %v10102_v17, %v9543_v12  ;;  %v1080_v34 = vpop.f32.mrb[1].mxu1  ;;  %v1089_v61 = vadd.f32 %v10107_v33, %v9549_v41 }
 0x317   : > { %v12860_v20 = vadd.f32 %v9543_v12, %v989_v18  ;;  %v1119_v21 = vpack.c.bf16 %v12856_v16, %v12856_v16  ;;  %v10108_v35 = vpop.f32.mrb[2].mxu1  ;;  %v1081_v43 = vadd.f32 %v9549_v41, %v1080_v34  ;;  %v913_v12 = vld [vmem:[%s12808_s17] sm:$0xf] }
 0x318   : > { %v1238_v22 = vsel %vm1132_vm5, %v1121_v19, 0  ;;  %v1122_v30 = vpack.c.bf16 %v12873_v27, %v12873_v27  ;;  %v1083_v36 = vpop.f32.mrb[3].mxu1  ;;  %v1092_v1 = vadd.f32 %v10108_v35, %v9549_v41  ;;  %v12906_v5 = vmax.f32 %v1089_v61, 0.0 }
 0x319   : > { %10126 = vmatpush3.bf16.msra.mxu1 %v1238_v22  ;;  %v1134_v24 = vsel %vm1132_vm5, %v1119_v21, 0  ;;  %v1120_v26 = vpack.c.bf16 %v12860_v20, %v12860_v20  ;;  %v1084_v45 = vadd.f32 %v9549_v41, %v1083_v36  ;;  %v12896_v47 = vmax.f32 %v1081_v43, 0.0 }
 0x31a   : > { %10114 = vmatpush3.bf16.msra.mxu0 %v1134_v24  ;;  %10137 = vmatprep.subr.bf16.mxu1 %v12110_v9  ;;  %v1290_v31 = vsel %vm1132_vm5, %v1122_v30, 0  ;;  %v12908_v8 = vmax.f32 %v1092_v1, 0.0  ;;  %v914_v30 = vld [vmem:[%s12808_s17 + $0x4] sm:$0xf] }
 0x31b   : > { %10119 = vmatprep.subr.bf16.mxu0 %v12110_v9  ;;  %v1186_v28 = vsel %vm1132_vm5, %v1120_v26, 0  ;;  %v12900_v49 = vmax.f32 %v1084_v45, 0.0 }
 0x31c   : > { %10128 = vmatmul.mubr.msk.bf16.vlgmr.msra.gmra.mrb[8].mxu1 %vm1128_vm6, %v11267_v23 }
 0x31d   : > { %10116 = vmatmul.mubr.msk.bf16.vlgmr.msra.gmra.mrb[4].mxu0 %vm1128_vm6, %v11265_v25  ;;  %10139 = vmatprep.mubr.msk.bf16.mxu1 %vm12111_vm4, %v12110_v9  ;;  %v10111_v37 = vpop.f32.mrb[4].mxu1 }
 0x31e   : > { %10120 = vmatpush3.bf16.msra.mxu0 %v1186_v28  ;;  %10121 = vmatprep.mubr.msk.bf16.mxu0 %vm12111_vm4, %v12110_v9  ;;  %v1096_v38 = vpop.f32.mrb[5].mxu1  ;;  %v1105_v15 = vadd.f32 %v10111_v37, %v9549_v41 }
 0x31f   : > { %10131 = vmatprep.subr.bf16.mxu0 %v12110_v9  ;;  %v10112_v39 = vpop.f32.mrb[6].mxu1  ;;  %v1097_v42 = vadd.f32 %v9549_v41, %v1096_v38  ;;  %v916_v38 = vld [vmem:[%s12808_s17 + $0xc] sm:$0xf] }
 0x320   : > { %v1099_v40 = vpop.f32.mrb[7].mxu1  ;;  %v1108_v19 = vadd.f32 %v10112_v39, %v9549_v41  ;;  %v12917_v23 = vmax.f32 %v1105_v15, 0.0  ;;  %v11269_v39 = vld [vmem:[#allocation17] sm:$0xff]  }
 0x321   : > { %v1100_v44 = vadd.f32 %v9549_v41, %v1099_v40  ;;  %v12894_v46 = vmax.f32 %v1097_v42, 0.0  ;;  %v11270_v40 = vld [vmem:[#allocation17 + $0x8] sm:$0xff]   ;;  %v11271_v41 = vld [vmem:[#allocation20] sm:$0xff]   ;;  %v11272_v42 = vld [vmem:[#allocation20 + $0x8] sm:$0xff]  }
 0x322   : > { %v12919_v26 = vmax.f32 %v1108_v19, 0.0 }
 0x323   : > { %v12898_v48 = vmax.f32 %v1100_v44, 0.0 }
 0x325   : > { %10122 = vmatmul.mubr.msk.bf16.vlgmr.msra.gmra.mrb[8].mxu0 %vm1128_vm6, %v11266_v29 }
 0x326   : > { %10132 = vmatpush3.bf16.msra.mxu0 %v1290_v31  ;;  %10133 = vmatprep.mubr.msk.bf16.mxu0 %vm12111_vm4, %v12110_v9  ;;  %v915_v31 = vld [vmem:[%s12808_s17 + $0x8] sm:$0xf] }
 0x327   : > { %10143 = vmatprep.subr.bf16.mxu0 %v12110_v9 }
 0x32d   : > { %10134 = vmatmul.mubr.msk.bf16.vlgmr.msra.gmra.mrb[12].mxu0 %vm1128_vm6, %v11268_v32 }
 0x32e   : > { %10145 = vmatprep.mubr.msk.bf16.mxu0 %vm12111_vm4, %v12110_v9 }
 0x3ef   : > { %v1274_v50 = vpop.f32.mrb[8].mxu1 }
 0x3f0   : > { %v1170_v51 = vpop.f32.mrb[4].mxu0  ;;  %v1275_v52 = vadd.f32 %v1274_v50, %v12894_v46  ;;  %v10129_v53 = vpop.f32.mrb[9].mxu1 }
 0x3f1   : > { %v1171_v54 = vadd.f32 %v1170_v51, %v12896_v47  ;;  %v10117_v55 = vpop.f32.mrb[5].mxu0  ;;  %v1277_v56 = vpop.f32.mrb[10].mxu1 }
 0x3f2   : > { %v1173_v57 = vpop.f32.mrb[6].mxu0  ;;  %v1337_v58 = vmax.f32 %v1275_v52, 0.0  ;;  %v1278_v59 = vadd.f32 %v1277_v56, %v12898_v48  ;;  %v10130_v60 = vpop.f32.mrb[11].mxu1 }
 0x3f3   : > { %v1174_v62 = vadd.f32 %v1173_v57, %v12900_v49  ;;  %v10118_v63 = vpop.f32.mrb[7].mxu0  ;;  %v1333_v2 = vmax.f32 %v1171_v54, 0.0 }
 0x3f4   : > { %v1338_v0 = vmax.f32 %v1278_v59, 0.0 }
 0x3f5   : > { %v1334_v3 = vmax.f32 %v1174_v62, 0.0 }
 0x3f6   : > { %v1343_v4 = vpack.c.bf16 %v1338_v0, %v1337_v58 }
 0x3f7   : > { %v1341_v6 = vpack.c.bf16 %v1334_v3, %v1333_v2 }
 0x3f8   : > { %v1222_v7 = vpop.f32.mrb[8].mxu0 }
 0x3f9   : > { %v1223_v10 = vadd.f32 %v1222_v7, %v12906_v5  ;;  %v10123_v11 = vpop.f32.mrb[9].mxu0  ;;  %10138 = vmatpush3.bf16.msra.mxu1 %v1341_v6  ;;  %v9570_v6 = vld [vmem:[#allocation18] ss:$0 sm:$0xff] }
 0x3fa   : > { %v1225_v13 = vpop.f32.mrb[10].mxu0  ;;  %10149 = vmatprep.subr.bf16.mxu1 %v12110_v9 }
 0x3fb   : > { %v1226_v17 = vadd.f32 %v1225_v13, %v12908_v8  ;;  %v10124_v18 = vpop.f32.mrb[11].mxu0  ;;  %v1335_v21 = vmax.f32 %v1223_v10, 0.0 }
 0x3fc   : > { %10140 = vmatmul.mubr.msk.bf16.vlgmr.msra.gmra.mrb[12].mxu1 %vm1345_vm7, %v913_v12 }
 0x3fd   : > { %v1336_v22 = vmax.f32 %v1226_v17, 0.0  ;;  %10150 = vmatpush3.bf16.msra.mxu1 %v1343_v4  ;;  %10151 = vmatprep.mubr.msk.bf16.mxu1 %vm12111_vm4, %v12110_v9  ;;  %v11274_v4 = vld [vmem:[#allocation20 + $0x18] sm:$0xff]  }
 0x3fe   : > { %10161 = vmatprep.subr.bf16.mxu1 %v11269_v39 }
 0x3ff   : > { %v1342_v24 = vpack.c.bf16 %v1336_v22, %v1335_v21 }
 0x400   : > { %v1326_v25 = vpop.f32.mrb[12].mxu0 }
 0x401   : > { %v1327_v28 = vadd.f32 %v1326_v25, %v12917_v23  ;;  %v10135_v29 = vpop.f32.mrb[13].mxu0  ;;  %10144 = vmatpush3.bf16.msra.mxu0 %v1342_v24  ;;  %v11275_v25 = vld [vmem:[#allocation23] sm:$0xff]  }
 0x402   : > { %v1329_v32 = vpop.f32.mrb[14].mxu0  ;;  %10155 = vmatprep.subr.bf16.mxu0 %v12110_v9 }
 0x403   : > { %v1330_v33 = vadd.f32 %v1329_v32, %v12919_v26  ;;  %v10136_v34 = vpop.f32.mrb[15].mxu0  ;;  %v1339_v35 = vmax.f32 %v1327_v28, 0.0  ;;  %v11276_v28 = vld [vmem:[#allocation23 + $0x8] sm:$0xff]  }
 0x404   : > { %10146 = vmatmul.mubr.msk.bf16.vlgmr.msra.gmra.mrb[16].mxu0 %vm1345_vm7, %v914_v30  ;;  %10152 = vmatmul.mubr.msk.bf16.vlgmr.msra.gmra.mrb[16].mxu1 %vm1345_vm7, %v915_v31  ;;  %v9575_v30 = vld [vmem:[#allocation21] ss:$0 sm:$0xff] }
 0x405   : > { %v1340_v36 = vmax.f32 %v1330_v33, 0.0  ;;  %10157 = vmatprep.mubr.msk.bf16.mxu0 %vm12111_vm4, %v12110_v9  ;;  %10162 = vmatpush3.bf16.msra.mxu1 %v11269_v39 }
 0x406   : > { %10163 = vmatprep.subr.bf16.mxu1 %v11270_v40 }
 0x407   : > { %v1344_v37 = vpack.c.bf16 %v1340_v36, %v1339_v35 }
 0x409   : > { %10156 = vmatpush3.bf16.msra.mxu0 %v1344_v37  ;;  %10164 = vmatpush3.bf16.msra.mxu1 %v11270_v40  ;;  %v9582_v40 = vld [vmem:[#allocation24] ss:$0 sm:$0xff] }
 0x40a   : > { %10169 = vmatprep.subr.bf16.mxu0 %v11271_v41  ;;  %10181 = vmatprep.subr.bf16.mxu1 %v11275_v25 }
 0x40c   : > { %10158 = vmatmul.mubr.msk.bf16.vlgmr.msra.gmra.mrb[20].mxu0 %vm1345_vm7, %v916_v38 }
 0x40d   : > { %10170 = vmatpush3.bf16.msra.mxu0 %v11271_v41 }
 0x40e   : > { %10171 = vmatprep.subr.bf16.mxu0 %v11272_v42 }
 0x411   : > { %10172 = vmatpush3.bf16.msra.mxu0 %v11272_v42 }
 0x4cf   : > { %v1383_v43 = vpop.f32.mrb[12].mxu1 }
 0x4d0   : > { %v10141_v44 = vpop.f32.mrb[13].mxu1  ;;  %v1518_v53 = vadd.f32 %v1383_v43, %v12856_v16 }
 0x4d1   : > { %v1386_v45 = vpop.f32.mrb[14].mxu1 }
 0x4d2   : > { %v10142_v50 = vpop.f32.mrb[15].mxu1 }
 0x4d7   : > { %v1426_v51 = vpop.f32.mrb[16].mxu0  ;;  %v1469_v52 = vpop.f32.mrb[16].mxu1 }
 0x4d8   : > { %v1519_v54 = vadd.f32 %v1426_v51, %v12860_v20  ;;  %v10147_v55 = vpop.f32.mrb[17].mxu0  ;;  %v10153_v56 = vpop.f32.mrb[17].mxu1  ;;  %v1520_v63 = vadd.f32 %v1469_v52, %v12854_v14  ;;  %v11273_v20 = vld [vmem:[#allocation20 + $0x10] sm:$0xff]  }
 0x4d9   : > { %v1429_v57 = vpop.f32.mrb[18].mxu0  ;;  %v1472_v58 = vpop.f32.mrb[18].mxu1  ;;  %10173 = vmatprep.subr.bf16.mxu0 %v11273_v20 }
 0x4da   : > { %v1522_v59 = vpack.c.bf16 %v1519_v54, %v1518_v53  ;;  %v10148_v60 = vpop.f32.mrb[19].mxu0  ;;  %v10154_v61 = vpop.f32.mrb[19].mxu1  ;;  %10174 = vmatpush3.bf16.msra.mxu0 %v11273_v20 }
 0x4db   : > { %10175 = vmatprep.subr.bf16.mxu0 %v11274_v4 }
 0x4dc   : > { %10165 = vmatprep.mubr.msk.bf16.mxu1 %vm1547_vm8, %v1522_v59 }
 0x4de   : > { %10176 = vmatpush3.bf16.msra.mxu0 %v11274_v4 }
 0x4df   : > { %v1512_v62 = vpop.f32.mrb[20].mxu0  ;;  %10195 = vmatprep.subr.bf16.mxu0 %v12110_v9 }
 0x4e0   : > { %v1521_v0 = vadd.f32 %v1512_v62, %v12873_v27  ;;  %v10159_v1 = vpop.f32.mrb[21].mxu0 }
 0x4e1   : > { %v1515_v2 = vpop.f32.mrb[22].mxu0 }
 0x4e2   : > { %v1523_v16 = vpack.c.bf16 %v1521_v0, %v1520_v63  ;;  %v10160_v3 = vpop.f32.mrb[23].mxu0 }
 0x4e4   : > { %10166 = vmatmul.mubr.msk.bf16.vlgmr.msra.gmra.mrb[20].mxu1 %vm1547_vm8, %v1523_v16 }
 0x4e5   : > { %10182 = vmatpush3.bf16.msra.mxu1 %v11275_v25 }
 0x4e6   : > { %10183 = vmatprep.subr.bf16.mxu1 %v11276_v28 }
 0x4e9   : > { %10184 = vmatpush3.bf16.msra.mxu1 %v11276_v28 }
 0x4ea   : > { %10189 = vmatprep.subr.bf16.mxu1 %v12110_v9 }
 0x5b7   : > { %v10167_v7 = vpop.f32.mrb[20].mxu1 }
 0x5b8   : > { %v1597_v10 = vadd.f32 %v10167_v7, %v9570_v6  ;;  %v1588_v14 = vpop.f32.mrb[21].mxu1 }
 0x5b9   : > { %v1589_v11 = vadd.f32 %v9570_v6, %v1588_v14  ;;  %v10168_v27 = vpop.f32.mrb[22].mxu1 }
 0x5ba   : > { %v1600_v12 = vadd.f32 %v10168_v27, %v9570_v6  ;;  %v1591_v13 = vpop.f32.mrb[23].mxu1  ;;  %v1605_v17 = vmax.f32 %v1597_v10, 0.0 }
 0x5bb   : > { %v1592_v15 = vadd.f32 %v9570_v6, %v1591_v13  ;;  %v1603_v19 = vmax.f32 %v1589_v11, 0.0 }
 0x5bc   : > { %v1606_v18 = vmax.f32 %v1600_v12, 0.0 }
 0x5bd   : > { %v1604_v21 = vmax.f32 %v1592_v15, 0.0 }
 0x5be   : > { %v1608_v22 = vpack.c.bf16 %v1606_v18, %v1605_v17 }
 0x5bf   : > { %v1607_v24 = vpack.c.bf16 %v1604_v21, %v1603_v19 }
 0x5c1   : > { %10177 = vmatprep.mubr.msk.bf16.mxu0 %vm1648_vm9, %v1607_v24 }
 0x5c2   : > { %10178 = vmatmul.mubr.msk.bf16.vlgmr.msra.gmra.mrb[24].mxu0 %vm1648_vm9, %v1608_v22 }
 0x5c3   : > { %10197 = vmatprep.mubr.msk.bf16.mxu0 %vm12111_vm4, %v12110_v9 }
 0x695   : > { %v10179_v29 = vpop.f32.mrb[24].mxu0 }
 0x696   : > { %v1689_v31 = vpop.f32.mrb[25].mxu0  ;;  %v1698_v33 = vadd.f32 %v10179_v29, %v9575_v30 }
 0x697   : > { %v10180_v32 = vpop.f32.mrb[26].mxu0  ;;  %v1690_v36 = vadd.f32 %v9575_v30, %v1689_v31 }
 0x698   : > { %v1701_v34 = vadd.f32 %v10180_v32, %v9575_v30  ;;  %v1692_v35 = vpop.f32.mrb[27].mxu0 }
 0x699   : > { %v1693_v37 = vadd.f32 %v9575_v30, %v1692_v35 }
 0x69a   : > { %v1705_v38 = vpack.c.bf16 %v1701_v34, %v1698_v33 }
 0x69b   : > { %v1704_v39 = vpack.c.bf16 %v1693_v37, %v1690_v36 }
 0x69d   : > { %10185 = vmatprep.mubr.msk.bf16.mxu1 %vm1547_vm8, %v1704_v39 }
 0x69e   : > { %10186 = vmatmul.mubr.msk.bf16.vlgmr.msra.gmra.mrb[24].mxu1 %vm1547_vm8, %v1705_v38 }
 0x69f   : > { %10191 = vmatprep.mubr.msk.bf16.mxu1 %vm12111_vm4, %v12110_v9 }
 0x771   : > { %v10187_v41 = vpop.f32.mrb[24].mxu1 }
 0x772   : > { %v1778_v42 = vadd.f32 %v10187_v41, %v9582_v40  ;;  %v1769_v43 = vpop.f32.mrb[25].mxu1 }
 0x773   : > { %v1770_v44 = vadd.f32 %v9582_v40, %v1769_v43  ;;  %v10188_v45 = vpop.f32.mrb[26].mxu1 }
 0x774   : > { %v12948_v50 = vpack.c.bf16 %v1778_v42, %v1778_v42  ;;  %v1781_v51 = vadd.f32 %v10188_v45, %v9582_v40  ;;  %v1772_v52 = vpop.f32.mrb[27].mxu1 }
 0x775   : > { %v12950_v53 = vpack.c.bf16 %v1770_v44, %v1770_v44  ;;  %v1773_v54 = vadd.f32 %v9582_v40, %v1772_v52 }
 0x776   : > { %1891 = vrot.lane.b32.xlu1 %v12948_v50, %s12112_s14  ;;  %v12956_v55 = vpack.c.bf16 %v1781_v51, %v1781_v51 }
 0x777   : > { %1793 = vrot.lane.b32.xlu0 %v12950_v53, %s12112_s14  ;;  %v12958_v56 = vpack.c.bf16 %v1773_v54, %v1773_v54 }
 0x77a   : > { %1940 = vrot.lane.b32.xlu1 %v12956_v55, %s12112_s14 }
 0x77b   : > { %1842 = vrot.lane.b32.xlu0 %v12958_v56, %s12112_s14 }
 0x7e8   : > { %v1892_v59 = vpop.permute.xlu1 %1891 }
 0x7e9   : > { %v1794_v57 = vpop.permute.xlu0 %1793  ;;  %v1897_v62 = vsel %vm1128_vm6, %v1892_v59, 0 }
 0x7ea   : > { %v1799_v58 = vsel %vm1128_vm6, %v1794_v57, 0 }
 0x7eb   : > { %10190 = vmatpush3.bf16.xpose.msra.mxu1 %v1799_v58 }
 0x7ec   : > { %10201 = vmatprep.subr.bf16.mxu1 %v12110_v9  ;;  %v1941_v63 = vpop.permute.xlu1 %1940 }
 0x7ed   : > { %v1843_v60 = vpop.permute.xlu0 %1842  ;;  %v1946_v0 = vsel %vm1128_vm6, %v1941_v63, 0 }
 0x7ee   : > { %v1848_v61 = vsel %vm1128_vm6, %v1843_v60, 0 }
 0x7ef   : > { %10196 = vmatpush3.bf16.xpose.msra.mxu0 %v1848_v61 }
 0x7f0   : > { %10207 = vmatprep.subr.bf16.mxu0 %v12110_v9 }
 0x7f2   : > { %10192 = vmatmul.mubr.msk.bf16.vlgmr.msra.gmra.mrb[28].mxu1 %vm1128_vm6, %v12950_v53 }
 0x7f3   : > { %10202 = vmatpush3.bf16.xpose.msra.mxu1 %v1897_v62  ;;  %10203 = vmatprep.mubr.msk.bf16.mxu1 %vm12111_vm4, %v12110_v9 }
 0x7f4   : > { %10213 = vmatprep.subr.bf16.mxu1 %v12110_v9 }
 0x7f6   : > { %10198 = vmatmul.mubr.msk.bf16.vlgmr.msra.gmra.mrb[28].mxu0 %vm1128_vm6, %v12958_v56 }
 0x7f7   : > { %10208 = vmatpush3.bf16.xpose.msra.mxu0 %v1946_v0  ;;  %10209 = vmatprep.mubr.msk.bf16.mxu0 %vm12111_vm4, %v12110_v9 }
 0x7f8   : > { %10219 = vmatprep.subr.bf16.mxu0 %v12110_v9 }
 0x7fa   : > { %10204 = vmatmul.mubr.msk.bf16.vlgmr.msra.gmra.mrb[32].mxu1 %vm1128_vm6, %v12948_v50 }
 0x7fb   : > { %10215 = vmatprep.mubr.msk.bf16.mxu1 %vm12111_vm4, %v12110_v9 }
 0x7fe   : > { %10210 = vmatmul.mubr.msk.bf16.vlgmr.msra.gmra.mrb[32].mxu0 %vm1128_vm6, %v12956_v55 }
 0x7ff   : > { %10221 = vmatprep.mubr.msk.bf16.mxu0 %vm12111_vm4, %v12110_v9 }
 0x8c5   : > { %v1835_v1 = vpop.f32.mrb[28].mxu1 }
 0x8c6   : > { %v10193_v2 = vpop.f32.mrb[29].mxu1  ;;  %v1988_v16 = vsel %vm1128_vm6, %v1835_v1, -inf }
 0x8c7   : > { %1989 = vmax.xlane.f32.xlu0 %v1988_v16  ;;  %v1838_v3 = vpop.f32.mrb[30].mxu1 }
 0x8c8   : > { %v10194_v20 = vpop.f32.mrb[31].mxu1 }
 0x8c9   : > { %v1884_v4 = vpop.f32.mrb[28].mxu0 }
 0x8ca   : > { %v10199_v6 = vpop.f32.mrb[29].mxu0  ;;  %v1991_v7 = vsel %vm1128_vm6, %v1884_v4, -inf }
 0x8cb   : > { %1992 = vmax.xlane.f32.xlu1 %v1991_v7  ;;  %v1887_v10 = vpop.f32.mrb[30].mxu0 }
 0x8cc   : > { %v10200_v14 = vpop.f32.mrb[31].mxu0 }
 0x8cd   : > { %v1933_v11 = vpop.f32.mrb[32].mxu1 }
 0x8ce   : > { %v10205_v27 = vpop.f32.mrb[33].mxu1  ;;  %v1994_v12 = vsel %vm1128_vm6, %v1933_v11, -inf }
 0x8cf   : > { %1995 = vmax.xlane.f32.xlu0 %v1994_v12  ;;  %v1936_v13 = vpop.f32.mrb[34].mxu1 }
 0x8d0   : > { %v10206_v15 = vpop.f32.mrb[35].mxu1 }
 0x8d1   : > { %v1982_v17 = vpop.f32.mrb[32].mxu0 }
 0x8d2   : > { %v10211_v18 = vpop.f32.mrb[33].mxu0  ;;  %v1997_v19 = vsel %vm1128_vm6, %v1982_v17, -inf }
 0x8d3   : > { %1998 = vmax.xlane.f32.xlu0 %v1997_v19  ;;  %v1985_v21 = vpop.f32.mrb[34].mxu0 }
 0x8d4   : > { %v10212_v22 = vpop.f32.mrb[35].mxu0 }
 0x8dc   : > { %2036 = vrot.lane.b32.xlu1 %v12950_v53, %s12113_s27 }
 0x954   : > { %v1990_v24 = vpop.xlane.xlu0 %1989 }
 0x955   : > { %v2000_v25 = vsub.f32 %v1835_v1, %v1990_v24 }
 0x957   : > { %v2004_v28 = vmul.f32 1.442695, %v2000_v25 }
 0x958   : > { %v1993_v29 = vpop.xlane.xlu1 %1992 }
 0x959   : > { %11293 = vpow2.f32 %v2004_v28  ;;  %v2001_v30 = vsub.f32 %v1884_v4, %v1993_v29 }
 0x95b   : > { %v2006_v31 = vmul.f32 1.442695, %v2001_v30 }
 0x95c   : > { %v2037_v32 = vpop.permute.xlu1 %2036  ;;  %v1996_v38 = vpop.xlane.xlu0 %1995 }
 0x95d   : > { %11295 = vpow2.f32 %v2006_v31  ;;  %v2042_v33 = vsel %vm1132_vm5, %v2037_v32, 0  ;;  %v2002_v40 = vsub.f32 %v1933_v11, %v1996_v38 }
 0x95e   : > { %10214 = vmatpush3.bf16.msra.mxu1 %v2042_v33 }
 0x95f   : > { %10225 = vmatprep.subr.bf16.mxu1 %v12110_v9  ;;  %v2008_v42 = vmul.f32 1.442695, %v2002_v40 }
 0x960   : > { %v1999_v39 = vpop.xlane.xlu0 %1998 }
 0x961   : > { %v2003_v41 = vsub.f32 %v1982_v17, %v1999_v39  ;;  %11297 = vpow2.f32 %v2008_v42 }
 0x963   : > { %v11294_v34 = vpop.eup %11293  ;;  %v2010_v43 = vmul.f32 1.442695, %v2003_v41 }
 0x964   : > { %v2012_v35 = vsel %vm1128_vm6, %v11294_v34, 0.0 }
 0x965   : > { %2013 = vadd.xlane.f32.xlu1 %v2012_v35  ;;  %11299 = vpow2.f32 %v2010_v43 }
 0x967   : > { %v11296_v36 = vpop.eup %11295 }
 0x968   : > { %v2015_v37 = vsel %vm1128_vm6, %v11296_v36, 0.0 }
 0x969   : > { %2016 = vadd.xlane.f32.xlu0 %v2015_v37 }
 0x96b   : > { %v11298_v44 = vpop.eup %11297 }
 0x96c   : > { %v2018_v51 = vsel %vm1128_vm6, %v11298_v44, 0.0 }
 0x96f   : > { %v11300_v45 = vpop.eup %11299 }
 0x970   : > { %v2021_v52 = vsel %vm1128_vm6, %v11300_v45, 0.0 }
 0x976   : > { %2132 = vrot.lane.b32.xlu1 %v12948_v50, %s12113_s27 }
 0x97a   : > { %2180 = vrot.lane.b32.xlu1 %v12956_v55, %s12113_s27 }
 0x97f   : > { %2084 = vrot.lane.b32.xlu0 %v12958_v56, %s12113_s27 }
 0x99e   : > { %2019 = vadd.xlane.f32.xlu1 %v2018_v51  ;;  %2022 = vadd.xlane.f32.xlu0 %v2021_v52 }
 0x9af   : > { %2282 = vrot.lane.b32.xlu1 %v12958_v56, %s12114_s6 }
 0x9b3   : > { %2280 = vrot.lane.b32.xlu1 %v12958_v56, %s12115_s4 }
 0x9b4   : > { %2232 = vrot.lane.b32.xlu0 %v12950_v53, %s12114_s6 }
 0x9b7   : > { %2382 = vrot.lane.b32.xlu1 %v12956_v55, %s12114_s6 }
 0x9b8   : > { %2230 = vrot.lane.b32.xlu0 %v12950_v53, %s12115_s4 }
 0x9bb   : > { %2380 = vrot.lane.b32.xlu1 %v12956_v55, %s12115_s4 }
 0x9bc   : > { %2332 = vrot.lane.b32.xlu0 %v12948_v50, %s12114_s6 }
 0x9c0   : > { %2330 = vrot.lane.b32.xlu0 %v12948_v50, %s12115_s4 }
 0x9f2   : > { %v2014_v54 = vpop.xlane.xlu1 %2013 }
 0x9f3   : > { %11301 = vrcp.f32 %v2014_v54 }
 0x9f6   : > { %v2017_v57 = vpop.xlane.xlu0 %2016  ;;  %v2133_v61 = vpop.permute.xlu1 %2132 }
 0x9f7   : > { %11303 = vrcp.f32 %v2017_v57  ;;  %v2138_v1 = vsel %vm1132_vm5, %v2133_v61, 0 }
 0x9fa   : > { %v2085_v58 = vpop.permute.xlu0 %2084  ;;  %v2181_v16 = vpop.permute.xlu1 %2180 }
 0x9fb   : > { %v2090_v59 = vsel %vm1132_vm5, %v2085_v58, 0  ;;  %v2186_v20 = vsel %vm1132_vm5, %v2181_v16, 0 }
 0x9fc   : > { %10220 = vmatpush3.bf16.msra.mxu0 %v2090_v59 }
 0x9fd   : > { %v11302_v60 = vpop.eup %11301  ;;  %10231 = vmatprep.subr.bf16.mxu0 %v12110_v9 }
 0x9fe   : > { %v2028_v62 = vmul.f32 %v11302_v60, %v11294_v34 }
 0xa00   : > { %v2032_v63 = vpack.c.bf16 %v2028_v62, %v2028_v62 }
 0xa01   : > { %v11304_v0 = vpop.eup %11303 }
 0xa02   : > { %10216 = vmatmul.mubr.msk.bf16.vlgmr.msra.gmra.mrb[36].mxu1 %vm1128_vm6, %v2032_v63  ;;  %v2029_v2 = vmul.f32 %v11304_v0, %v11296_v36 }
 0xa03   : > { %10226 = vmatpush3.bf16.msra.mxu1 %v2138_v1  ;;  %10227 = vmatprep.mubr.msk.bf16.mxu1 %vm12111_vm4, %v12110_v9 }
 0xa04   : > { %v2033_v3 = vpack.c.bf16 %v2029_v2, %v2029_v2  ;;  %10237 = vmatprep.subr.bf16.mxu1 %v12110_v9 }
 0xa06   : > { %10222 = vmatmul.mubr.msk.bf16.vlgmr.msra.gmra.mrb[36].mxu0 %vm1128_vm6, %v2033_v3 }
 0xa07   : > { %10232 = vmatpush3.bf16.msra.mxu0 %v2186_v20  ;;  %10233 = vmatprep.mubr.msk.bf16.mxu0 %vm12111_vm4, %v12110_v9 }
 0xa08   : > { %10243 = vmatprep.subr.bf16.mxu0 %v12110_v9 }
 0xa2b   : > { %v2020_v4 = vpop.xlane.xlu1 %2019  ;;  %v2023_v6 = vpop.xlane.xlu0 %2022 }
 0xa2c   : > { %11305 = vrcp.f32 %v2020_v4 }
 0xa2d   : > { %11307 = vrcp.f32 %v2023_v6 }
 0xa2f   : > { %v2233_v7 = vpop.permute.xlu0 %2232  ;;  %v2283_v10 = vpop.permute.xlu1 %2282 }
 0xa30   : > { %v2238_v18 = vsel %vm1128_vm6, %v2233_v7, 0  ;;  %v2288_v21 = vsel %vm1128_vm6, %v2283_v10, 0 }
 0xa33   : > { %v2231_v15 = vpop.permute.xlu0 %2230  ;;  %v2281_v19 = vpop.permute.xlu1 %2280 }
 0xa36   : > { %v11306_v14 = vpop.eup %11305 }
 0xa37   : > { %v11308_v11 = vpop.eup %11307  ;;  %v2030_v27 = vmul.f32 %v11306_v14, %v11298_v44  ;;  %v2333_v22 = vpop.permute.xlu0 %2332 }
 0xa38   : > { %v2031_v12 = vmul.f32 %v11308_v11, %v11300_v45  ;;  %v2383_v24 = vpop.permute.xlu1 %2382  ;;  %v2338_v25 = vsel %vm1128_vm6, %v2333_v22, 0 }
 0xa39   : > { %v2034_v13 = vpack.c.bf16 %v2030_v27, %v2030_v27  ;;  %v2388_v28 = vsel %vm1128_vm6, %v2383_v24, 0 }
 0xa3a   : > { %v2035_v17 = vpack.c.bf16 %v2031_v12, %v2031_v12 }
 0xa3b   : > { %10228 = vmatmul.mubr.msk.bf16.vlgmr.msra.gmra.mrb[40].mxu1 %vm1128_vm6, %v2034_v13  ;;  %v2331_v29 = vpop.permute.xlu0 %2330 }
 0xa3c   : > { %10234 = vmatmul.mubr.msk.bf16.vlgmr.msra.gmra.mrb[40].mxu0 %vm1128_vm6, %v2035_v17  ;;  %10238 = vmatpush3.bf16.xpose.msra.mxu1 %v2238_v18  ;;  %v2381_v30 = vpop.permute.xlu1 %2380 }
 0xa3d   : > { %10244 = vmatpush3.bf16.xpose.msra.mxu0 %v2288_v21  ;;  %10239 = vmatprep.mubr.msk.bf16.mxu1 %vm12111_vm4, %v12110_v9 }
 0xa3e   : > { %10245 = vmatprep.mubr.msk.bf16.mxu0 %vm12111_vm4, %v12110_v9  ;;  %10249 = vmatprep.subr.bf16.mxu1 %v12110_v9 }
 0xa3f   : > { %10255 = vmatprep.subr.bf16.mxu0 %v12110_v9 }
 0xa43   : > { %10240 = vmatmul.mubr.msk.bf16.vlgmr.msra.gmra.mrb[44].mxu1 %vm1128_vm6, %v2231_v15 }
 0xa44   : > { %10246 = vmatmul.mubr.msk.bf16.vlgmr.msra.gmra.mrb[44].mxu0 %vm1128_vm6, %v2281_v19  ;;  %10250 = vmatpush3.bf16.xpose.msra.mxu1 %v2338_v25 }
 0xa45   : > { %10256 = vmatpush3.bf16.xpose.msra.mxu0 %v2388_v28  ;;  %10251 = vmatprep.mubr.msk.bf16.mxu1 %vm12111_vm4, %v12110_v9 }
 0xa46   : > { %10257 = vmatprep.mubr.msk.bf16.mxu0 %vm12111_vm4, %v12110_v9  ;;  %10261 = vmatprep.subr.bf16.mxu1 %v12110_v9 }
 0xa47   : > { %10267 = vmatprep.subr.bf16.mxu0 %v12110_v9 }
 0xa4b   : > { %10252 = vmatmul.mubr.msk.bf16.vlgmr.msra.gmra.mrb[48].mxu1 %vm1128_vm6, %v2331_v29 }
 0xa4c   : > { %10258 = vmatmul.mubr.msk.bf16.vlgmr.msra.gmra.mrb[48].mxu0 %vm1128_vm6, %v2381_v30  ;;  %10263 = vmatprep.mubr.msk.bf16.mxu1 %vm12111_vm4, %v12110_v9 }
 0xa4d   : > { %10269 = vmatprep.mubr.msk.bf16.mxu0 %vm12111_vm4, %v12110_v9 }
 0xad5   : > { %v13060_v31 = vpop.f32.mrb[36].mxu1 }
 0xad6   : > { %v10217_v32 = vpop.f32.mrb[37].mxu1 }
 0xad7   : > { %v2081_v33 = vpop.f32.mrb[38].mxu1 }
 0xad8   : > { %v10218_v34 = vpop.f32.mrb[39].mxu1 }
 0xad9   : > { %v13062_v35 = vpop.f32.mrb[36].mxu0 }
 0xada   : > { %v2228_v36 = vpack.c.bf16 %v13062_v35, %v13060_v31  ;;  %v10223_v37 = vpop.f32.mrb[37].mxu0 }
 0xadb   : > { %v2129_v38 = vpop.f32.mrb[38].mxu0 }
 0xadc   : > { %v10224_v39 = vpop.f32.mrb[39].mxu0 }
 0xb0e   : > { %v13066_v40 = vpop.f32.mrb[40].mxu1 }
 0xb0f   : > { %v13068_v41 = vpop.f32.mrb[40].mxu0  ;;  %v10229_v42 = vpop.f32.mrb[41].mxu1 }
 0xb10   : > { %v2229_v43 = vpack.c.bf16 %v13068_v41, %v13066_v40  ;;  %v10235_v44 = vpop.f32.mrb[41].mxu0  ;;  %v2177_v45 = vpop.f32.mrb[42].mxu1 }
 0xb11   : > { %v2225_v51 = vpop.f32.mrb[42].mxu0  ;;  %v10230_v52 = vpop.f32.mrb[43].mxu1 }
 0xb12   : > { %v10236_v54 = vpop.f32.mrb[43].mxu0 }
 0xb16   : > { %v2274_v57 = vpop.f32.mrb[44].mxu1 }
 0xb17   : > { %v2324_v58 = vpop.f32.mrb[44].mxu0  ;;  %v10241_v59 = vpop.f32.mrb[45].mxu1  ;;  %v2430_v60 = vsel %vm1128_vm6, %v2274_v57, -inf }
 0xb18   : > { %v10247_v61 = vpop.f32.mrb[45].mxu0  ;;  %v2433_v62 = vsel %vm1128_vm6, %v2324_v58, -inf  ;;  %2431 = vmax.xlane.f32.xlu0 %v2430_v60  ;;  %v2277_v63 = vpop.f32.mrb[46].mxu1 }
 0xb19   : > { %2434 = vmax.xlane.f32.xlu1 %v2433_v62  ;;  %v2327_v0 = vpop.f32.mrb[46].mxu0  ;;  %v10242_v1 = vpop.f32.mrb[47].mxu1 }
 0xb1a   : > { %v10248_v2 = vpop.f32.mrb[47].mxu0 }
 0xb1e   : > { %v2374_v16 = vpop.f32.mrb[48].mxu1 }
 0xb1f   : > { %v2424_v3 = vpop.f32.mrb[48].mxu0  ;;  %v10253_v20 = vpop.f32.mrb[49].mxu1  ;;  %v2436_v4 = vsel %vm1128_vm6, %v2374_v16, -inf }
 0xb20   : > { %v10259_v6 = vpop.f32.mrb[49].mxu0  ;;  %2437 = vmax.xlane.f32.xlu0 %v2436_v4  ;;  %v2377_v7 = vpop.f32.mrb[50].mxu1  ;;  %v2439_v27 = vsel %vm1128_vm6, %v2424_v3, -inf }
 0xb21   : > { %v2427_v10 = vpop.f32.mrb[50].mxu0  ;;  %v10254_v14 = vpop.f32.mrb[51].mxu1 }
 0xb22   : > { %v10260_v11 = vpop.f32.mrb[51].mxu0 }
 0xb24   : > { %2440 = vmax.xlane.f32.xlu0 %v2439_v27 }
 0xb2a   : > { %2478 = vrot.lane.b32.xlu1 %v12950_v53, %s12116_s1 }
 0xba5   : > { %v2432_v12 = vpop.xlane.xlu0 %2431 }
 0xba6   : > { %v2435_v13 = vpop.xlane.xlu1 %2434  ;;  %v2442_v15 = vsub.f32 %v2274_v57, %v2432_v12 }
 0xba7   : > { %v2443_v17 = vsub.f32 %v2324_v58, %v2435_v13 }
 0xba8   : > { %v2446_v18 = vmul.f32 1.442695, %v2442_v15 }
 0xba9   : > { %v2448_v19 = vmul.f32 1.442695, %v2443_v17 }
 0xbaa   : > { %11309 = vpow2.f32 %v2446_v18  ;;  %v2479_v21 = vpop.permute.xlu1 %2478 }
 0xbab   : > { %11311 = vpow2.f32 %v2448_v19  ;;  %v2484_v22 = vsel %vm1132_vm5, %v2479_v21, 0 }
 0xbac   : > { %10262 = vmatpush3.bf16.msra.mxu1 %v2484_v22 }
 0xbad   : > { %v2438_v24 = vpop.xlane.xlu0 %2437  ;;  %10273 = vmatprep.subr.bf16.mxu1 %v12110_v9 }
 0xbae   : > { %v2444_v25 = vsub.f32 %v2374_v16, %v2438_v24  ;;  %v1789_v24 = vld [vmem:[#allocation26 + $0x4] sm:$0xf] }
 0xbb0   : > { %v2450_v28 = vmul.f32 1.442695, %v2444_v25  ;;  %v2679_v25 = vsel %vm1132_vm5, %v1789_v24, 0 }
 0xbb1   : > { %v2441_v29 = vpop.xlane.xlu0 %2440 }
 0xbb2   : > { %11313 = vpow2.f32 %v2450_v28  ;;  %v2445_v30 = vsub.f32 %v2424_v3, %v2441_v29  ;;  %v1788_v28 = vld [vmem:[#allocation26] sm:$0xf] }
 0xbb4   : > { %v11310_v32 = vpop.eup %11309  ;;  %v2452_v33 = vmul.f32 1.442695, %v2445_v30 }
 0xbb5   : > { %v11312_v34 = vpop.eup %11311  ;;  %v2454_v37 = vsel %vm1128_vm6, %v11310_v32, 0.0 }
 0xbb6   : > { %11315 = vpow2.f32 %v2452_v33  ;;  %v2457_v38 = vsel %vm1128_vm6, %v11312_v34, 0.0  ;;  %2455 = vadd.xlane.f32.xlu1 %v2454_v37 }
 0xbb7   : > { %2458 = vadd.xlane.f32.xlu0 %v2457_v38 }
 0xbbc   : > { %v11314_v39 = vpop.eup %11313 }
 0xbbd   : > { %v2460_v42 = vsel %vm1128_vm6, %v11314_v39, 0.0 }
 0xbbe   : > { %2461 = vadd.xlane.f32.xlu1 %v2460_v42 }
 0xbc0   : > { %v11316_v44 = vpop.eup %11315 }
 0xbc1   : > { %v2463_v45 = vsel %vm1128_vm6, %v11316_v44, 0.0 }
 0xbc2   : > { %2464 = vadd.xlane.f32.xlu0 %v2463_v45 }
 0xbcf   : > { %2574 = vrot.lane.b32.xlu1 %v12948_v50, %s12116_s1 }
 0xbd3   : > { %2622 = vrot.lane.b32.xlu1 %v12956_v55, %s12116_s1 }
 0xbd7   : > { %2788 = vrot.lane.b32.xlu1 %v12950_v53, %s12117_s16 }
 0xbd8   : > { %2526 = vrot.lane.b32.xlu0 %v12958_v56, %s12116_s1 }
 0xbdb   : > { %2838 = vrot.lane.b32.xlu1 %v12958_v56, %s12117_s16 }
 0xbdc   : > { %2790 = vrot.lane.b32.xlu0 %v12950_v53, %s12118_s7 }
 0xbdf   : > { %2940 = vrot.lane.b32.xlu1 %v12956_v55, %s12118_s7 }
 0xbe0   : > { %2840 = vrot.lane.b32.xlu0 %v12958_v56, %s12118_s7 }
 0xbe3   : > { %2938 = vrot.lane.b32.xlu1 %v12956_v55, %s12117_s16 }
 0xbe4   : > { %2890 = vrot.lane.b32.xlu0 %v12948_v50, %s12118_s7 }
 0xbe8   : > { %2888 = vrot.lane.b32.xlu0 %v12948_v50, %s12117_s16 }
 0xc43   : > { %v2456_v51 = vpop.xlane.xlu1 %2455 }
 0xc44   : > { %11317 = vrcp.f32 %v2456_v51  ;;  %v2459_v52 = vpop.xlane.xlu0 %2458 }
 0xc45   : > { %11319 = vrcp.f32 %v2459_v52 }
 0xc4b   : > { %v2462_v54 = vpop.xlane.xlu1 %2461 }
 0xc4c   : > { %11321 = vrcp.f32 %v2462_v54 }
 0xc4e   : > { %v11318_v57 = vpop.eup %11317 }
 0xc4f   : > { %v11320_v58 = vpop.eup %11319  ;;  %v2575_v59 = vpop.permute.xlu1 %2574  ;;  %v2470_v61 = vmul.f32 %v11318_v57, %v11310_v32 }
 0xc50   : > { %v2465_v60 = vpop.xlane.xlu0 %2464  ;;  %v2471_v63 = vmul.f32 %v11320_v58, %v11312_v34  ;;  %v2580_v0 = vsel %vm1132_vm5, %v2575_v59, 0  ;;  %v2737_v59 = vsel %vm1132_vm5, %v1788_v28, 0 }
 0xc51   : > { %11323 = vrcp.f32 %v2465_v60  ;;  %v2474_v62 = vpack.c.bf16 %v2470_v61, %v2470_v61 }
 0xc52   : > { %v2475_v20 = vpack.c.bf16 %v2471_v63, %v2471_v63 }
 0xc53   : > { %10264 = vmatmul.mubr.msk.bf16.vlgmr.msra.gmra.mrb[52].mxu1 %vm1128_vm6, %v2474_v62  ;;  %v2623_v16 = vpop.permute.xlu1 %2622 }
 0xc54   : > { %v2527_v1 = vpop.permute.xlu0 %2526  ;;  %10274 = vmatpush3.bf16.msra.mxu1 %v2580_v0  ;;  %10275 = vmatprep.mubr.msk.bf16.mxu1 %vm12111_vm4, %v12110_v9  ;;  %v2628_v6 = vsel %vm1132_vm5, %v2623_v16, 0 }
 0xc55   : > { %v2532_v2 = vsel %vm1132_vm5, %v2527_v1, 0  ;;  %11035 = vmatprep.subr.msk.bf16.mxu1 %vm1132_vm5, %v1789_v24 }
 0xc56   : > { %10268 = vmatpush3.bf16.msra.mxu0 %v2532_v2  ;;  %v11322_v3 = vpop.eup %11321 }
 0xc57   : > { %10279 = vmatprep.subr.bf16.mxu0 %v12110_v9  ;;  %v2472_v4 = vmul.f32 %v11322_v3, %v11314_v39  ;;  %v2789_v13 = vpop.permute.xlu1 %2788 }
 0xc58   : > { %v2791_v27 = vpop.permute.xlu0 %2790 }
 0xc59   : > { %10270 = vmatmul.mubr.msk.bf16.vlgmr.msra.gmra.mrb[52].mxu0 %vm1128_vm6, %v2475_v20  ;;  %v2476_v7 = vpack.c.bf16 %v2472_v4, %v2472_v4  ;;  %v2796_v12 = vsel %vm1128_vm6, %v2791_v27, 0 }
 0xc5a   : > { %10280 = vmatpush3.bf16.msra.mxu0 %v2628_v6  ;;  %10281 = vmatprep.mubr.msk.bf16.mxu0 %vm12111_vm4, %v12110_v9 }
 0xc5b   : > { %v11324_v10 = vpop.eup %11323  ;;  %10297 = vmatprep.subr.bf16.mxu0 %v12110_v9  ;;  %10276 = vmatmul.mubr.msk.bf16.vlgmr.msra.gmra.mrb[56].mxu1 %vm1128_vm6, %v2476_v7  ;;  %v2839_v17 = vpop.permute.xlu1 %2838 }
 0xc5c   : > { %v2473_v14 = vmul.f32 %v11324_v10, %v11316_v44  ;;  %v2841_v15 = vpop.permute.xlu0 %2840  ;;  %10286 = vmatpush3.bf16.msra.mxu1 %v2679_v25 }
 0xc5d   : > { %v2846_v18 = vsel %vm1128_vm6, %v2841_v15, 0  ;;  %11036 = vmatprep.subr.msk.bf16.mxu1 %vm1132_vm5, %v1788_v28 }
 0xc5e   : > { %v2477_v11 = vpack.c.bf16 %v2473_v14, %v2473_v14 }
 0xc5f   : > { %v2941_v19 = vpop.permute.xlu1 %2940 }
 0xc60   : > { %v2946_v21 = vsel %vm1128_vm6, %v2941_v19, 0  ;;  %v2891_v2 = vpop.permute.xlu0 %2890 }
 0xc61   : > { %10282 = vmatmul.mubr.msk.bf16.vlgmr.msra.gmra.mrb[56].mxu0 %vm1128_vm6, %v2477_v11  ;;  %v2896_v3 = vsel %vm1128_vm6, %v2891_v2, 0 }
 0xc62   : > { %10299 = vmatprep.mubr.msk.bf16.mxu0 %vm12111_vm4, %v12110_v9 }
 0xc63   : > { %10298 = vmatpush3.bf16.xpose.msra.mxu0 %v2796_v12  ;;  %v2939_v22 = vpop.permute.xlu1 %2938 }
 0xc64   : > { %10303 = vmatprep.subr.bf16.mxu0 %v12110_v9  ;;  %v2889_v6 = vpop.permute.xlu0 %2888 }
 0xc6a   : > { %10300 = vmatmul.mubr.msk.bf16.vlgmr.msra.gmra.mrb[60].mxu0 %vm1128_vm6, %v2789_v13 }
 0xc6b   : > { %10304 = vmatpush3.bf16.xpose.msra.mxu0 %v2846_v18  ;;  %10305 = vmatprep.mubr.msk.bf16.mxu0 %vm12111_vm4, %v12110_v9 }
 0xc6c   : > { %10315 = vmatprep.subr.bf16.mxu0 %v12110_v9 }
 0xc72   : > { %10306 = vmatmul.mubr.msk.bf16.vlgmr.msra.gmra.mrb[64].mxu0 %vm1128_vm6, %v2839_v17 }
 0xc73   : > { %10316 = vmatpush3.bf16.xpose.msra.mxu0 %v2946_v21  ;;  %10317 = vmatprep.mubr.msk.bf16.mxu0 %vm12111_vm4, %v12110_v9 }
 0xc74   : > { %10327 = vmatprep.subr.bf16.mxu0 %v12110_v9 }
 0xc7a   : > { %10318 = vmatmul.mubr.msk.bf16.vlgmr.msra.gmra.mrb[68].mxu0 %vm1128_vm6, %v2939_v22 }
 0xc7b   : > { %10329 = vmatprep.mubr.msk.bf16.mxu0 %vm12111_vm4, %v12110_v9 }
 0xd26   : > { %v2520_v29 = vpop.f32.mrb[52].mxu1 }
 0xd27   : > { %v10265_v30 = vpop.f32.mrb[53].mxu1 }
 0xd28   : > { %v2523_v32 = vpop.f32.mrb[54].mxu1 }
 0xd29   : > { %v10266_v33 = vpop.f32.mrb[55].mxu1 }
 0xd2c   : > { %v2568_v34 = vpop.f32.mrb[52].mxu0 }
 0xd2d   : > { %v2670_v37 = vpack.c.bf16 %v2568_v34, %v2520_v29  ;;  %v10271_v38 = vpop.f32.mrb[53].mxu0 }
 0xd2e   : > { %v2571_v39 = vpop.f32.mrb[54].mxu0  ;;  %v2616_v44 = vpop.f32.mrb[56].mxu1 }
 0xd2f   : > { %v10272_v42 = vpop.f32.mrb[55].mxu0  ;;  %10287 = vmatprep.mubr.msk.bf16.mxu1 %vm1128_vm6, %v2670_v37  ;;  %v10277_v45 = vpop.f32.mrb[57].mxu1 }
 0xd30   : > { %v2619_v51 = vpop.f32.mrb[58].mxu1 }
 0xd31   : > { %v10278_v52 = vpop.f32.mrb[59].mxu1 }
 0xd34   : > { %v2664_v54 = vpop.f32.mrb[56].mxu0 }
 0xd35   : > { %v2671_v57 = vpack.c.bf16 %v2664_v54, %v2616_v44  ;;  %v10283_v58 = vpop.f32.mrb[57].mxu0 }
 0xd36   : > { %v2667_v60 = vpop.f32.mrb[58].mxu0 }
 0xd37   : > { %v10284_v61 = vpop.f32.mrb[59].mxu0  ;;  %10288 = vmatmul.mubr.msk.bf16.vlgmr.msra.gmra.mrb[60].mxu1 %vm1128_vm6, %v2671_v57 }
 0xd38   : > { %10293 = vmatprep.mubr.msk.bf16.mxu1 %vm1128_vm6, %v2228_v36  ;;  %10292 = vmatpush3.bf16.msra.mxu1 %v2737_v59 }
 0xd39   : > { %10309 = vmatprep.subr.bf16.mxu1 %v12110_v9 }
 0xd3d   : > { %v2832_v62 = vpop.f32.mrb[60].mxu0 }
 0xd3e   : > { %v10301_v63 = vpop.f32.mrb[61].mxu0  ;;  %v2988_v0 = vsel %vm1128_vm6, %v2832_v62, -inf }
 0xd3f   : > { %2989 = vmax.xlane.f32.xlu0 %v2988_v0  ;;  %v2835_v1 = vpop.f32.mrb[62].mxu0 }
 0xd40   : > { %v10302_v16 = vpop.f32.mrb[63].mxu0 }
 0xd43   : > { %10294 = vmatmul.mubr.msk.bf16.vlgmr.msra.gmra.mrb[60].mxu1 %vm1128_vm6, %v2229_v43 }
 0xd44   : > { %10310 = vmatpush3.bf16.xpose.msra.mxu1 %v2896_v3  ;;  %10311 = vmatprep.mubr.msk.bf16.mxu1 %vm12111_vm4, %v12110_v9 }
 0xd45   : > { %v2882_v31 = vpop.f32.mrb[64].mxu0  ;;  %10321 = vmatprep.subr.bf16.mxu1 %v12110_v9 }
 0xd46   : > { %v10307_v35 = vpop.f32.mrb[65].mxu0  ;;  %v2991_v36 = vsel %vm1128_vm6, %v2882_v31, -inf }
 0xd47   : > { %2992 = vmax.xlane.f32.xlu1 %v2991_v36  ;;  %v2885_v20 = vpop.f32.mrb[66].mxu0 }
 0xd48   : > { %v10308_v4 = vpop.f32.mrb[67].mxu0 }
 0xd4b   : > { %10312 = vmatmul.mubr.msk.bf16.vlgmr.msra.gmra.mrb[64].mxu1 %vm1128_vm6, %v2889_v6 }
 0xd4c   : > { %10323 = vmatprep.mubr.msk.bf16.mxu1 %vm12111_vm4, %v12110_v9 }
 0xd4d   : > { %v2982_v40 = vpop.f32.mrb[68].mxu0 }
 0xd4e   : > { %v10319_v41 = vpop.f32.mrb[69].mxu0  ;;  %v2997_v25 = vsel %vm1128_vm6, %v2982_v40, -inf }
 0xd4f   : > { %v2985_v43 = vpop.f32.mrb[70].mxu0 }
 0xd50   : > { %v10320_v7 = vpop.f32.mrb[71].mxu0 }
 0xdcc   : > { %v2990_v10 = vpop.xlane.xlu0 %2989 }
 0xdcd   : > { %v3000_v14 = vsub.f32 %v2832_v62, %v2990_v10 }
 0xdcf   : > { %v3004_v11 = vmul.f32 1.442695, %v3000_v14 }
 0xdd1   : > { %11325 = vpow2.f32 %v3004_v11 }
 0xdd4   : > { %v2993_v13 = vpop.xlane.xlu1 %2992 }
 0xdd5   : > { %v3001_v15 = vsub.f32 %v2882_v31, %v2993_v13 }
 0xdd7   : > { %v3006_v17 = vmul.f32 1.442695, %v3001_v15 }
 0xdd9   : > { %11327 = vpow2.f32 %v3006_v17 }
 0xddb   : > { %v11326_v27 = vpop.eup %11325 }
 0xddc   : > { %v3012_v12 = vsel %vm1128_vm6, %v11326_v27, 0.0 }
 0xddd   : > { %3013 = vadd.xlane.f32.xlu1 %v3012_v12 }
 0xde3   : > { %v11328_v28 = vpop.eup %11327 }
 0xde4   : > { %v3015_v29 = vsel %vm1128_vm6, %v11328_v28, 0.0 }
 0xdee   : > { %3036 = vrot.lane.b32.xlu1 %v12950_v53, %s12119_s28 }
 0xdf2   : > { %3132 = vrot.lane.b32.xlu1 %v12948_v50, %s12119_s28 }
 0xe1e   : > { %v2932_v18 = vpop.f32.mrb[64].mxu1 }
 0xe1f   : > { %v10313_v19 = vpop.f32.mrb[65].mxu1  ;;  %v2994_v21 = vsel %vm1128_vm6, %v2932_v18, -inf }
 0xe20   : > { %2995 = vmax.xlane.f32.xlu0 %v2994_v21  ;;  %v2935_v22 = vpop.f32.mrb[66].mxu1  ;;  %v1790_v19 = vld [vmem:[#allocation26 + $0x8] sm:$0xf] }
 0xe21   : > { %v10314_v24 = vpop.f32.mrb[67].mxu1  ;;  %v3237_v21 = vsel %vm1132_vm5, %v1790_v19, 0 }
 0xe24   : > { %2998 = vmax.xlane.f32.xlu0 %v2997_v25 }
 0xe28   : > { %3016 = vadd.xlane.f32.xlu0 %v3015_v29 }
 0xe6a   : > { %v3014_v30 = vpop.xlane.xlu1 %3013 }
 0xe6b   : > { %11329 = vrcp.f32 %v3014_v30 }
 0xe6e   : > { %v3037_v32 = vpop.permute.xlu1 %3036 }
 0xe6f   : > { %v3042_v33 = vsel %vm1132_vm5, %v3037_v32, 0 }
 0xe70   : > { %10322 = vmatpush3.bf16.msra.mxu1 %v3042_v33 }
 0xe71   : > { %10333 = vmatprep.subr.bf16.mxu1 %v12110_v9 }
 0xe72   : > { %v3133_v38 = vpop.permute.xlu1 %3132 }
 0xe73   : > { %v3138_v42 = vsel %vm1132_vm5, %v3133_v38, 0 }
 0xe75   : > { %v11330_v34 = vpop.eup %11329 }
 0xe76   : > { %v3028_v37 = vmul.f32 %v11330_v34, %v11326_v27 }
 0xe78   : > { %v3032_v39 = vpack.c.bf16 %v3028_v37, %v3028_v37 }
 0xe7a   : > { %10324 = vmatmul.mubr.msk.bf16.vlgmr.msra.gmra.mrb[68].mxu1 %vm1128_vm6, %v3032_v39 }
 0xe7b   : > { %10334 = vmatpush3.bf16.msra.mxu1 %v3138_v42  ;;  %10335 = vmatprep.mubr.msk.bf16.mxu1 %vm12111_vm4, %v12110_v9 }
 0xe7c   : > { %11037 = vmatprep.subr.msk.bf16.mxu1 %vm1132_vm5, %v1790_v19 }
 0xead   : > { %v2996_v44 = vpop.xlane.xlu0 %2995 }
 0xeae   : > { %v3002_v45 = vsub.f32 %v2932_v18, %v2996_v44 }
 0xeb0   : > { %v3008_v51 = vmul.f32 1.442695, %v3002_v45 }
 0xeb1   : > { %v2999_v52 = vpop.xlane.xlu0 %2998 }
 0xeb2   : > { %11331 = vpow2.f32 %v3008_v51  ;;  %v3003_v54 = vsub.f32 %v2982_v40, %v2999_v52 }
 0xeb4   : > { %v3010_v57 = vmul.f32 1.442695, %v3003_v54 }
 0xeb5   : > { %v3017_v62 = vpop.xlane.xlu0 %3016 }
 0xeb6   : > { %11333 = vpow2.f32 %v3010_v57 }
 0xeb7   : > { %11335 = vrcp.f32 %v3017_v62 }
 0xebc   : > { %v11332_v58 = vpop.eup %11331 }
 0xebd   : > { %v3018_v59 = vsel %vm1128_vm6, %v11332_v58, 0.0 }
 0xebe   : > { %3019 = vadd.xlane.f32.xlu1 %v3018_v59 }
 0xec0   : > { %v11334_v60 = vpop.eup %11333 }
 0xec1   : > { %v3021_v61 = vsel %vm1128_vm6, %v11334_v60, 0.0  ;;  %v11336_v16 = vpop.eup %11335 }
 0xec2   : > { %3022 = vadd.xlane.f32.xlu0 %v3021_v61  ;;  %v3029_v35 = vmul.f32 %v11336_v16, %v11328_v28 }
 0xec4   : > { %v3033_v40 = vpack.c.bf16 %v3029_v35, %v3029_v35 }
 0xecf   : > { %3180 = vrot.lane.b32.xlu1 %v12956_v55, %s12119_s28 }
 0xed3   : > { %3344 = vrot.lane.b32.xlu1 %v12958_v56, %s12120_s5 }
 0xed7   : > { %3342 = vrot.lane.b32.xlu1 %v12958_v56, %s12121_s3 }
 0xed8   : > { %3084 = vrot.lane.b32.xlu0 %v12958_v56, %s12119_s28 }
 0xedb   : > { %3444 = vrot.lane.b32.xlu1 %v12956_v55, %s12120_s5 }
 0xedc   : > { %3294 = vrot.lane.b32.xlu0 %v12950_v53, %s12120_s5 }
 0xedf   : > { %3442 = vrot.lane.b32.xlu1 %v12956_v55, %s12121_s3 }
 0xee0   : > { %3292 = vrot.lane.b32.xlu0 %v12950_v53, %s12121_s3 }
 0xee4   : > { %3394 = vrot.lane.b32.xlu0 %v12948_v50, %s12120_s5 }
 0xee8   : > { %3392 = vrot.lane.b32.xlu0 %v12948_v50, %s12121_s3 }
 0xf4b   : > { %v3020_v63 = vpop.xlane.xlu1 %3019 }
 0xf4c   : > { %11337 = vrcp.f32 %v3020_v63 }
 0xf4d   : > { %v3078_v0 = vpop.f32.mrb[68].mxu1 }
 0xf4e   : > { %v10325_v1 = vpop.f32.mrb[69].mxu1 }
 0xf4f   : > { %v3081_v2 = vpop.f32.mrb[70].mxu1  ;;  %v3023_v3 = vpop.xlane.xlu0 %3022 }
 0xf50   : > { %v10326_v31 = vpop.f32.mrb[71].mxu1  ;;  %11339 = vrcp.f32 %v3023_v3  ;;  %v3181_v6 = vpop.permute.xlu1 %3180 }
 0xf51   : > { %v3186_v43 = vsel %vm1132_vm5, %v3181_v6, 0 }
 0xf53   : > { %v3085_v36 = vpop.permute.xlu0 %3084 }
 0xf54   : > { %v3090_v20 = vsel %vm1132_vm5, %v3085_v36, 0  ;;  %v3345_v33 = vpop.permute.xlu1 %3344 }
 0xf55   : > { %10328 = vmatpush3.bf16.msra.mxu0 %v3090_v20  ;;  %v3350_v51 = vsel %vm1128_vm6, %v3345_v33, 0 }
 0xf56   : > { %v11338_v4 = vpop.eup %11337  ;;  %10339 = vmatprep.subr.bf16.mxu0 %v12110_v9 }
 0xf57   : > { %v3030_v41 = vmul.f32 %v11338_v4, %v11332_v58  ;;  %v3295_v14 = vpop.permute.xlu0 %3294 }
 0xf58   : > { %10330 = vmatmul.mubr.msk.bf16.vlgmr.msra.gmra.mrb[72].mxu0 %vm1128_vm6, %v3033_v40  ;;  %v3300_v13 = vsel %vm1128_vm6, %v3295_v14, 0  ;;  %v3343_v44 = vpop.permute.xlu1 %3342 }
 0xf59   : > { %v3034_v7 = vpack.c.bf16 %v3030_v41, %v3030_v41  ;;  %10340 = vmatpush3.bf16.msra.mxu0 %v3186_v43  ;;  %10341 = vmatprep.mubr.msk.bf16.mxu0 %vm12111_vm4, %v12110_v9 }
 0xf5a   : > { %v11340_v10 = vpop.eup %11339  ;;  %10351 = vmatprep.subr.bf16.mxu0 %v12110_v9 }
 0xf5b   : > { %10336 = vmatmul.mubr.msk.bf16.vlgmr.msra.gmra.mrb[72].mxu1 %vm1128_vm6, %v3034_v7  ;;  %v3031_v11 = vmul.f32 %v11340_v10, %v11334_v60  ;;  %v3293_v12 = vpop.permute.xlu0 %3292 }
 0xf5c   : > { %10346 = vmatpush3.bf16.msra.mxu1 %v3237_v21  ;;  %v3445_v54 = vpop.permute.xlu1 %3444 }
 0xf5d   : > { %v3035_v27 = vpack.c.bf16 %v3031_v11, %v3031_v11  ;;  %10357 = vmatprep.subr.bf16.mxu1 %v12110_v9  ;;  %v3450_v60 = vsel %vm1128_vm6, %v3445_v54, 0 }
 0xf5f   : > { %v3395_v15 = vpop.permute.xlu0 %3394 }
 0xf60   : > { %10342 = vmatmul.mubr.msk.bf16.vlgmr.msra.gmra.mrb[76].mxu0 %vm1128_vm6, %v3035_v27  ;;  %v3400_v17 = vsel %vm1128_vm6, %v3395_v15, 0 }
 0xf61   : > { %10353 = vmatprep.mubr.msk.bf16.mxu0 %vm12111_vm4, %v12110_v9 }
 0xf62   : > { %10352 = vmatpush3.bf16.xpose.msra.mxu0 %v3300_v13 }
 0xf63   : > { %10363 = vmatprep.subr.bf16.mxu0 %v12110_v9  ;;  %v3393_v18 = vpop.permute.xlu0 %3392 }
 0xf69   : > { %10354 = vmatmul.mubr.msk.bf16.vlgmr.msra.gmra.mrb[80].mxu0 %vm1128_vm6, %v3293_v12 }
 0xf6a   : > { %10364 = vmatpush3.bf16.xpose.msra.mxu0 %v3400_v17  ;;  %10365 = vmatprep.mubr.msk.bf16.mxu0 %vm12111_vm4, %v12110_v9 }
 0xf6b   : > { %10375 = vmatprep.subr.bf16.mxu0 %v12110_v9 }
 0xf71   : > { %10366 = vmatmul.mubr.msk.bf16.vlgmr.msra.gmra.mrb[84].mxu0 %vm1128_vm6, %v3393_v18 }
 0xf72   : > { %10377 = vmatprep.mubr.msk.bf16.mxu0 %vm12111_vm4, %v12110_v9 }
0x102b   : > { %v3126_v22 = vpop.f32.mrb[72].mxu0 }
0x102c   : > { %v3228_v24 = vpack.c.bf16 %v3126_v22, %v3078_v0  ;;  %v10331_v25 = vpop.f32.mrb[73].mxu0  ;;  %v3443_v0 = vpop.permute.xlu1 %3442 }
0x102d   : > { %v3129_v28 = vpop.f32.mrb[74].mxu0 }
0x102e   : > { %v3174_v29 = vpop.f32.mrb[72].mxu1  ;;  %v10332_v30 = vpop.f32.mrb[75].mxu0  ;;  %10347 = vmatprep.mubr.msk.bf16.mxu1 %vm1128_vm6, %v3228_v24 }
0x102f   : > { %v10337_v32 = vpop.f32.mrb[73].mxu1 }
0x1030   : > { %v3177_v34 = vpop.f32.mrb[74].mxu1 }
0x1031   : > { %v10338_v37 = vpop.f32.mrb[75].mxu1 }
0x1033   : > { %v3222_v38 = vpop.f32.mrb[76].mxu0 }
0x1034   : > { %v3229_v39 = vpack.c.bf16 %v3222_v38, %v3174_v29  ;;  %v10343_v42 = vpop.f32.mrb[77].mxu0 }
0x1035   : > { %v3225_v45 = vpop.f32.mrb[78].mxu0 }
0x1036   : > { %v10344_v52 = vpop.f32.mrb[79].mxu0  ;;  %10348 = vmatmul.mubr.msk.bf16.vlgmr.msra.gmra.mrb[60].mxu1 %vm1128_vm6, %v3229_v39 }
0x1037   : > { %10358 = vmatpush3.bf16.xpose.msra.mxu1 %v3350_v51  ;;  %10359 = vmatprep.mubr.msk.bf16.mxu1 %vm12111_vm4, %v12110_v9 }
0x1038   : > { %10369 = vmatprep.subr.bf16.mxu1 %v12110_v9 }
0x103c   : > { %v3336_v57 = vpop.f32.mrb[80].mxu0 }
0x103d   : > { %v10355_v58 = vpop.f32.mrb[81].mxu0  ;;  %v3492_v59 = vsel %vm1128_vm6, %v3336_v57, -inf }
0x103e   : > { %10360 = vmatmul.mubr.msk.bf16.vlgmr.msra.gmra.mrb[76].mxu1 %vm1128_vm6, %v3343_v44  ;;  %3493 = vmax.xlane.f32.xlu0 %v3492_v59  ;;  %v3339_v61 = vpop.f32.mrb[82].mxu0 }
0x103f   : > { %10370 = vmatpush3.bf16.xpose.msra.mxu1 %v3450_v60  ;;  %v10356_v62 = vpop.f32.mrb[83].mxu0  ;;  %10371 = vmatprep.mubr.msk.bf16.mxu1 %vm12111_vm4, %v12110_v9 }
0x1040   : > { %10381 = vmatprep.subr.bf16.mxu1 %v12110_v9 }
0x1044   : > { %v3436_v63 = vpop.f32.mrb[84].mxu0 }
0x1045   : > { %v10367_v1 = vpop.f32.mrb[85].mxu0  ;;  %v3498_v2 = vsel %vm1128_vm6, %v3436_v63, -inf }
0x1046   : > { %10372 = vmatmul.mubr.msk.bf16.vlgmr.msra.gmra.mrb[80].mxu1 %vm1128_vm6, %v3443_v0  ;;  %3499 = vmax.xlane.f32.xlu0 %v3498_v2  ;;  %v3439_v16 = vpop.f32.mrb[86].mxu0 }
0x1047   : > { %v10368_v3 = vpop.f32.mrb[87].mxu0  ;;  %10383 = vmatprep.mubr.msk.bf16.mxu1 %vm12111_vm4, %v12110_v9 }
0x10cb   : > { %v3494_v31 = vpop.xlane.xlu0 %3493 }
0x10cc   : > { %v3504_v35 = vsub.f32 %v3336_v57, %v3494_v31 }
0x10ce   : > { %v3508_v20 = vmul.f32 1.442695, %v3504_v35 }
0x10d0   : > { %11341 = vpow2.f32 %v3508_v20 }
0x10d3   : > { %v3500_v36 = vpop.xlane.xlu0 %3499 }
0x10d4   : > { %v3506_v4 = vsub.f32 %v3436_v63, %v3500_v36 }
0x10d6   : > { %v3512_v6 = vmul.f32 1.442695, %v3506_v4 }
0x10d8   : > { %11343 = vpow2.f32 %v3512_v6 }
0x10da   : > { %v11342_v7 = vpop.eup %11341 }
0x10db   : > { %v3516_v11 = vsel %vm1128_vm6, %v11342_v7, 0.0 }
0x10e2   : > { %v11344_v27 = vpop.eup %11343 }
0x10e3   : > { %v3522_v17 = vsel %vm1128_vm6, %v11344_v27, 0.0 }
0x1111   : > { %v3386_v40 = vpop.f32.mrb[76].mxu1 }
0x1112   : > { %v10361_v41 = vpop.f32.mrb[77].mxu1  ;;  %v3495_v43 = vsel %vm1128_vm6, %v3386_v40, -inf }
0x1113   : > { %3496 = vmax.xlane.f32.xlu1 %v3495_v43  ;;  %v3389_v10 = vpop.f32.mrb[78].mxu1  ;;  %v1791_v41 = vld [vmem:[#allocation26 + $0xc] sm:$0xf] }
0x1114   : > { %v10362_v14 = vpop.f32.mrb[79].mxu1  ;;  %v3741_v43 = vsel %vm1132_vm5, %v1791_v41, 0 }
0x1117   : > { %3517 = vadd.xlane.f32.xlu1 %v3516_v11 }
0x1119   : > { %v3486_v12 = vpop.f32.mrb[80].mxu1 }
0x111a   : > { %v10373_v13 = vpop.f32.mrb[81].mxu1  ;;  %v3501_v15 = vsel %vm1128_vm6, %v3486_v12, -inf }
0x111b   : > { %v3489_v18 = vpop.f32.mrb[82].mxu1  ;;  %3502 = vmax.xlane.f32.xlu0 %v3501_v15  ;;  %3523 = vadd.xlane.f32.xlu1 %v3522_v17 }
0x111c   : > { %v10374_v19 = vpop.f32.mrb[83].mxu1 }
0x111d   : > { %v9627_v19 = vld [vmem:[#allocation27] ss:$0 sm:$0xff] }
0x112c   : > { %3540 = vrot.lane.b32.xlu1 %v12950_v53, %s12122_s11 }
0x1130   : > { %3636 = vrot.lane.b32.xlu1 %v12948_v50, %s12122_s11 }
0x1134   : > { %3684 = vrot.lane.b32.xlu1 %v12956_v55, %s12122_s11 }
0x1138   : > { %3819 = vrot.lane.b32.xlu1 %v12900_v49, %s12112_s14 }
0x113c   : > { %3871 = vrot.lane.b32.xlu1 %v12908_v8, %s12112_s14 }
0x1140   : > { %3923 = vrot.lane.b32.xlu1 %v12898_v48, %s12112_s14 }
0x1144   : > { %3975 = vrot.lane.b32.xlu1 %v12919_v26, %s12112_s14 }
0x11a0   : > { %v3497_v21 = vpop.xlane.xlu1 %3496 }
0x11a1   : > { %v3505_v53 = vsub.f32 %v3386_v40, %v3497_v21 }
0x11a3   : > { %v3510_v22 = vmul.f32 1.442695, %v3505_v53 }
0x11a4   : > { %v3518_v24 = vpop.xlane.xlu1 %3517 }
0x11a5   : > { %11345 = vpow2.f32 %v3510_v22 }
0x11a6   : > { %11347 = vrcp.f32 %v3518_v24 }
0x11a8   : > { %v3524_v50 = vpop.xlane.xlu1 %3523  ;;  %v3503_v55 = vpop.xlane.xlu0 %3502 }
0x11a9   : > { %v3507_v25 = vsub.f32 %v3486_v12, %v3503_v55  ;;  %11349 = vrcp.f32 %v3524_v50 }
0x11ab   : > { %v3514_v28 = vmul.f32 1.442695, %v3507_v25 }
0x11ac   : > { %v3541_v29 = vpop.permute.xlu1 %3540 }
0x11ad   : > { %11351 = vpow2.f32 %v3514_v28  ;;  %v3546_v30 = vsel %vm1132_vm5, %v3541_v29, 0 }
0x11ae   : > { %10376 = vmatpush3.bf16.msra.mxu0 %v3546_v30 }
0x11af   : > { %v11346_v32 = vpop.eup %11345  ;;  %10387 = vmatprep.subr.bf16.mxu0 %v12110_v9 }
0x11b0   : > { %v11348_v33 = vpop.eup %11347  ;;  %v3519_v34 = vsel %vm1128_vm6, %v11346_v32, 0.0  ;;  %v3637_v38 = vpop.permute.xlu1 %3636 }
0x11b1   : > { %3520 = vadd.xlane.f32.xlu0 %v3519_v34  ;;  %v3532_v37 = vmul.f32 %v11348_v33, %v11342_v7  ;;  %v3642_v44 = vsel %vm1132_vm5, %v3637_v38, 0 }
0x11b3   : > { %v3536_v39 = vpack.c.bf16 %v3532_v37, %v3532_v37  ;;  %v11350_v42 = vpop.eup %11349 }
0x11b4   : > { %v3534_v51 = vmul.f32 %v11350_v42, %v11344_v27  ;;  %v3685_v62 = vpop.permute.xlu1 %3684  ;;  %v11485_v42 = vld [vmem:[%s12806_s23 + $0x10] sm:$0xff]  }
0x11b5   : > { %10378 = vmatmul.mubr.msk.bf16.vlgmr.msra.gmra.mrb[88].mxu0 %vm1128_vm6, %v3536_v39  ;;  %v3690_v0 = vsel %vm1132_vm5, %v3685_v62, 0 }
0x11b6   : > { %10388 = vmatpush3.bf16.msra.mxu0 %v3642_v44  ;;  %10389 = vmatprep.mubr.msk.bf16.mxu0 %vm12111_vm4, %v12110_v9  ;;  %v3538_v54 = vpack.c.bf16 %v3534_v51, %v3534_v51 }
0x11b7   : > { %v11352_v45 = vpop.eup %11351  ;;  %10405 = vmatprep.subr.bf16.mxu0 %v12110_v9 }
0x11b8   : > { %v3525_v52 = vsel %vm1128_vm6, %v11352_v45, 0.0 }
0x11b9   : > { %3526 = vadd.xlane.f32.xlu0 %v3525_v52 }
0x11bd   : > { %10390 = vmatmul.mubr.msk.bf16.vlgmr.msra.gmra.mrb[92].mxu0 %vm1128_vm6, %v3538_v54  ;;  %v11487_v54 = vld [vmem:[%s12806_s23 + $0x8] sm:$0xff]  }
0x11be   : > { %10407 = vmatprep.mubr.msk.bf16.mxu0 %vm12111_vm4, %v12110_v9 }
0x11cf   : > { %3588 = vrot.lane.b32.xlu0 %v12958_v56, %s12122_s11 }
0x11d3   : > { %3817 = vrot.lane.b32.xlu0 %v12896_v47, %s12112_s14 }
0x11d7   : > { %3869 = vrot.lane.b32.xlu0 %v12906_v5, %s12112_s14 }
0x11db   : > { %3921 = vrot.lane.b32.xlu0 %v12894_v46, %s12112_s14 }
0x11df   : > { %3973 = vrot.lane.b32.xlu0 %v12917_v23, %s12112_s14 }
0x123e   : > { %v3521_v57 = vpop.xlane.xlu0 %3520 }
0x123f   : > { %11353 = vrcp.f32 %v3521_v57 }
0x1246   : > { %v3527_v58 = vpop.xlane.xlu0 %3526 }
0x1247   : > { %11355 = vrcp.f32 %v3527_v58  ;;  %v11488_v58 = vld [vmem:[%s12806_s23 + $0x18] sm:$0xff]  }
0x1249   : > { %v11354_v59 = vpop.eup %11353 }
0x124a   : > { %v3589_v60 = vpop.permute.xlu0 %3588  ;;  %v3533_v61 = vmul.f32 %v11354_v59, %v11346_v32  ;;  %v3820_v59 = vpop.permute.xlu1 %3819 }
0x124b   : > { %v3594_v56 = vsel %vm1132_vm5, %v3589_v60, 0 }
0x124c   : > { %10382 = vmatpush3.bf16.msra.mxu1 %v3594_v56  ;;  %v3537_v63 = vpack.c.bf16 %v3533_v61, %v3533_v61 }
0x124d   : > { %10393 = vmatprep.subr.bf16.mxu1 %v12110_v9 }
0x124e   : > { %v3818_v60 = vpop.permute.xlu0 %3817  ;;  %v3872_v61 = vpop.permute.xlu1 %3871 }
0x124f   : > { %10384 = vmatmul.mubr.msk.bf16.vlgmr.msra.gmra.mrb[84].mxu1 %vm1128_vm6, %v3537_v63 }
0x1250   : > { %10394 = vmatpush3.bf16.msra.mxu1 %v3690_v0  ;;  %10395 = vmatprep.mubr.msk.bf16.mxu1 %vm12111_vm4, %v12110_v9 }
0x1251   : > { %v11356_v1 = vpop.eup %11355  ;;  %11038 = vmatprep.subr.msk.bf16.mxu1 %vm1132_vm5, %v1791_v41 }
0x1252   : > { %v3535_v2 = vmul.f32 %v11356_v1, %v11352_v45  ;;  %v11486_v45 = vld [vmem:[%s12806_s23] sm:$0xff]   ;;  %v3870_v56 = vpop.permute.xlu0 %3869  ;;  %v3924_v62 = vpop.permute.xlu1 %3923 }
0x1254   : > { %v3539_v16 = vpack.c.bf16 %v3535_v2, %v3535_v2 }
0x1256   : > { %v3922_v63 = vpop.permute.xlu0 %3921 }
0x1257   : > { %10396 = vmatmul.mubr.msk.bf16.vlgmr.msra.gmra.mrb[88].mxu1 %vm1128_vm6, %v3539_v16 }
0x1258   : > { %10400 = vmatpush3.bf16.msra.mxu1 %v3741_v43 }
0x1259   : > { %10417 = vmatprep.subr.bf16.mxu1 %v12110_v9 }
0x1288   : > { %v3582_v3 = vpop.f32.mrb[88].mxu0 }
0x1289   : > { %v10379_v31 = vpop.f32.mrb[89].mxu0 }
0x128a   : > { %v3585_v35 = vpop.f32.mrb[90].mxu0 }
0x128b   : > { %v10380_v36 = vpop.f32.mrb[91].mxu0 }
0x1290   : > { %v3678_v20 = vpop.f32.mrb[92].mxu0 }
0x1291   : > { %v10391_v4 = vpop.f32.mrb[93].mxu0 }
0x1292   : > { %v3681_v6 = vpop.f32.mrb[94].mxu0 }
0x1293   : > { %v10392_v40 = vpop.f32.mrb[95].mxu0 }
0x1322   : > { %v3630_v7 = vpop.f32.mrb[84].mxu1 }
0x1323   : > { %v3732_v10 = vpack.c.bf16 %v3630_v7, %v3582_v3  ;;  %v10385_v14 = vpop.f32.mrb[85].mxu1 }
0x1324   : > { %v3633_v11 = vpop.f32.mrb[86].mxu1 }
0x1325   : > { %v10386_v27 = vpop.f32.mrb[87].mxu1  ;;  %10401 = vmatprep.mubr.msk.bf16.mxu1 %vm1128_vm6, %v3732_v10 }
0x132a   : > { %v3726_v12 = vpop.f32.mrb[88].mxu1 }
0x132b   : > { %v3733_v13 = vpack.c.bf16 %v3726_v12, %v3678_v20  ;;  %v10397_v15 = vpop.f32.mrb[89].mxu1 }
0x132c   : > { %v3729_v17 = vpop.f32.mrb[90].mxu1 }
0x132d   : > { %v10398_v18 = vpop.f32.mrb[91].mxu1  ;;  %10402 = vmatmul.mubr.msk.bf16.vlgmr.msra.gmra.mrb[60].mxu1 %vm1128_vm6, %v3733_v13 }
0x132e   : > { %10419 = vmatprep.mubr.msk.bf16.mxu1 %vm12111_vm4, %v12110_v9 }
0x1400   : > { %v10403_v21 = vpop.f32.mrb[60].mxu1 }
0x1401   : > { %v3805_v53 = vadd.f32 %v10403_v21, %v9627_v19  ;;  %v3777_v22 = vpop.f32.mrb[61].mxu1 }
0x1402   : > { %v3803_v24 = vadd.f32 %v9627_v19, %v3777_v22  ;;  %v10404_v50 = vpop.f32.mrb[62].mxu1 }
0x1403   : > { %v13290_v55 = vmax.f32 %v3805_v53, 0.0  ;;  %v3780_v25 = vpop.f32.mrb[63].mxu1  ;;  %v3806_v37 = vadd.f32 %v10404_v50, %v9627_v19 }
0x1404   : > { %v13292_v28 = vmax.f32 %v3803_v24, 0.0  ;;  %v3804_v29 = vadd.f32 %v9627_v19, %v3780_v25  ;;  %v11489_v19 = vld [vmem:[%s12808_s17] sm:$0xf]  ;;  %v3974_v24 = vpop.permute.xlu0 %3973 }
0x1405   : > { %v3813_v30 = vpack.c.bf16 %v13290_v55, %v13290_v55  ;;  %v13308_v44 = vmax.f32 %v3806_v37, 0.0 }
0x1406   : > { %v3811_v32 = vpack.c.bf16 %v13292_v28, %v13292_v28  ;;  %v13298_v33 = vmax.f32 %v3804_v29, 0.0 }
0x1407   : > { %v3928_v34 = vsel %vm1132_vm5, %v3813_v30, 0  ;;  %v3814_v52 = vpack.c.bf16 %v13308_v44, %v13308_v44  ;;  %v3976_v30 = vpop.permute.xlu1 %3975 }
0x1408   : > { %v3812_v38 = vpack.c.bf16 %v13298_v33, %v13298_v33  ;;  %10418 = vmatpush3.bf16.msra.mxu1 %v3928_v34  ;;  %v3824_v39 = vsel %vm1132_vm5, %v3811_v32, 0 }
0x1409   : > { %10406 = vmatpush3.bf16.msra.mxu0 %v3824_v39  ;;  %10429 = vmatprep.subr.bf16.mxu1 %v12110_v9  ;;  %v3980_v57 = vsel %vm1132_vm5, %v3814_v52, 0  ;;  %v11491_v39 = vld [vmem:[%s12808_s17 + $0x8] sm:$0xf]  ;;  %v11492_v52 = vld [vmem:[%s12808_s17 + $0xc] sm:$0xf] }
0x140a   : > { %10411 = vmatprep.subr.bf16.mxu0 %v12110_v9  ;;  %v3876_v51 = vsel %vm1132_vm5, %v3812_v38, 0  ;;  %v11490_v38 = vld [vmem:[%s12808_s17 + $0x4] sm:$0xf] }
0x140b   : > { %10420 = vmatmul.mubr.msk.bf16.vlgmr.msra.gmra.mrb[92].mxu1 %vm1128_vm6, %v11485_v42 }
0x140c   : > { %10408 = vmatmul.mubr.msk.bf16.vlgmr.msra.gmra.mrb[96].mxu0 %vm1128_vm6, %v11486_v45  ;;  %10431 = vmatprep.mubr.msk.bf16.mxu1 %vm12111_vm4, %v12110_v9 }
0x140d   : > { %10412 = vmatpush3.bf16.msra.mxu0 %v3876_v51  ;;  %10413 = vmatprep.mubr.msk.bf16.mxu0 %vm12111_vm4, %v12110_v9 }
0x140e   : > { %10423 = vmatprep.subr.bf16.mxu0 %v12110_v9 }
0x1414   : > { %10414 = vmatmul.mubr.msk.bf16.vlgmr.msra.gmra.mrb[100].mxu0 %vm1128_vm6, %v11487_v54  ;;  %v11277_v54 = vld [vmem:[#allocation17 + $0x10] sm:$0xff]  }
0x1415   : > { %10424 = vmatpush3.bf16.msra.mxu0 %v3980_v57  ;;  %10425 = vmatprep.mubr.msk.bf16.mxu0 %vm12111_vm4, %v12110_v9  ;;  %v11278_v57 = vld [vmem:[#allocation17 + $0x18] sm:$0xff]  }
0x1416   : > { %10435 = vmatprep.subr.bf16.mxu0 %v12110_v9 }
0x141c   : > { %10426 = vmatmul.mubr.msk.bf16.vlgmr.msra.gmra.mrb[104].mxu0 %vm1128_vm6, %v11488_v58  ;;  %v11279_v58 = vld [vmem:[#allocation20 + $0x20] sm:$0xff]  }
0x141d   : > { %10437 = vmatprep.mubr.msk.bf16.mxu0 %vm12111_vm4, %v12110_v9 }
0x14de   : > { %v3964_v0 = vpop.f32.mrb[92].mxu1 }
0x14df   : > { %v3965_v1 = vadd.f32 %v3964_v0, %v3922_v63  ;;  %v3860_v2 = vpop.f32.mrb[96].mxu0  ;;  %v10421_v16 = vpop.f32.mrb[93].mxu1 }
0x14e0   : > { %v3861_v3 = vadd.f32 %v3860_v2, %v3818_v60  ;;  %v10409_v31 = vpop.f32.mrb[97].mxu0  ;;  %v3967_v35 = vpop.f32.mrb[94].mxu1 }
0x14e1   : > { %v3968_v36 = vadd.f32 %v3967_v35, %v3924_v62  ;;  %v3863_v20 = vpop.f32.mrb[98].mxu0  ;;  %v10422_v4 = vpop.f32.mrb[95].mxu1  ;;  %v4027_v41 = vmax.f32 %v3965_v1, 0.0 }
0x14e2   : > { %v3864_v6 = vadd.f32 %v3863_v20, %v3820_v59  ;;  %v10410_v40 = vpop.f32.mrb[99].mxu0  ;;  %v4023_v7 = vmax.f32 %v3861_v3, 0.0  ;;  %v11280_v59 = vld [vmem:[#allocation20 + $0x28] sm:$0xff]  }
0x14e3   : > { %v4028_v43 = vmax.f32 %v3968_v36, 0.0 }
0x14e4   : > { %v4024_v10 = vmax.f32 %v3864_v6, 0.0 }
0x14e5   : > { %v4033_v14 = vpack.c.bf16 %v4028_v43, %v4027_v41 }
0x14e6   : > { %v4031_v11 = vpack.c.bf16 %v4024_v10, %v4023_v7 }
0x14e7   : > { %v3912_v27 = vpop.f32.mrb[100].mxu0 }
0x14e8   : > { %v3913_v12 = vadd.f32 %v3912_v27, %v3870_v56  ;;  %v10415_v13 = vpop.f32.mrb[101].mxu0  ;;  %10430 = vmatpush3.bf16.msra.mxu1 %v4031_v11  ;;  %v9636_v11 = vld [vmem:[#allocation18 + $0x1] ss:$0 sm:$0xff] }
0x14e9   : > { %v3915_v15 = vpop.f32.mrb[102].mxu0  ;;  %10441 = vmatprep.subr.bf16.mxu1 %v12110_v9 }
0x14ea   : > { %v3916_v17 = vadd.f32 %v3915_v15, %v3872_v61  ;;  %v10416_v18 = vpop.f32.mrb[103].mxu0  ;;  %v4025_v21 = vmax.f32 %v3913_v12, 0.0 }
0x14eb   : > { %10432 = vmatmul.mubr.msk.bf16.vlgmr.msra.gmra.mrb[96].mxu1 %vm1345_vm7, %v11489_v19 }
0x14ec   : > { %v4026_v53 = vmax.f32 %v3916_v17, 0.0  ;;  %10442 = vmatpush3.bf16.msra.mxu1 %v4033_v14  ;;  %10443 = vmatprep.mubr.msk.bf16.mxu1 %vm12111_vm4, %v12110_v9  ;;  %v11282_v14 = vld [vmem:[#allocation20 + $0x38] sm:$0xff]  }
0x14ed   : > { %10453 = vmatprep.subr.bf16.mxu1 %v11277_v54 }
0x14ee   : > { %v4032_v22 = vpack.c.bf16 %v4026_v53, %v4025_v21 }
0x14ef   : > { %v4016_v50 = vpop.f32.mrb[104].mxu0 }
0x14f0   : > { %v4017_v25 = vadd.f32 %v4016_v50, %v3974_v24  ;;  %v10427_v29 = vpop.f32.mrb[105].mxu0  ;;  %10436 = vmatpush3.bf16.msra.mxu0 %v4032_v22 }
0x14f1   : > { %v4019_v32 = vpop.f32.mrb[106].mxu0  ;;  %10447 = vmatprep.subr.bf16.mxu0 %v12110_v9  ;;  %v11284_v29 = vld [vmem:[#allocation23 + $0x18] sm:$0xff]  }
0x14f2   : > { %v4020_v34 = vadd.f32 %v4019_v32, %v3976_v30  ;;  %v10428_v37 = vpop.f32.mrb[107].mxu0  ;;  %v4029_v42 = vmax.f32 %v4017_v25, 0.0  ;;  %v11283_v25 = vld [vmem:[#allocation23 + $0x10] sm:$0xff]   ;;  %v9641_v32 = vld [vmem:[#allocation21 + $0x1] ss:$0 sm:$0xff] }
0x14f3   : > { %10438 = vmatmul.mubr.msk.bf16.vlgmr.msra.gmra.mrb[108].mxu0 %vm1345_vm7, %v11490_v38  ;;  %10444 = vmatmul.mubr.msk.bf16.vlgmr.msra.gmra.mrb[100].mxu1 %vm1345_vm7, %v11491_v39 }
0x14f4   : > { %v4030_v45 = vmax.f32 %v4020_v34, 0.0  ;;  %10449 = vmatprep.mubr.msk.bf16.mxu0 %vm12111_vm4, %v12110_v9  ;;  %10454 = vmatpush3.bf16.msra.mxu1 %v11277_v54 }
0x14f5   : > { %10455 = vmatprep.subr.bf16.mxu1 %v11278_v57 }
0x14f6   : > { %v4034_v51 = vpack.c.bf16 %v4030_v45, %v4029_v42 }
0x14f8   : > { %10448 = vmatpush3.bf16.msra.mxu0 %v4034_v51  ;;  %10456 = vmatpush3.bf16.msra.mxu1 %v11278_v57  ;;  %v9648_v57 = vld [vmem:[#allocation24 + $0x1] ss:$0 sm:$0xff] }
0x14f9   : > { %10461 = vmatprep.subr.bf16.mxu0 %v11279_v58  ;;  %10473 = vmatprep.subr.bf16.mxu1 %v11283_v25 }
0x14fb   : > { %10450 = vmatmul.mubr.msk.bf16.vlgmr.msra.gmra.mrb[112].mxu0 %vm1345_vm7, %v11492_v52 }
0x14fc   : > { %10462 = vmatpush3.bf16.msra.mxu0 %v11279_v58 }
0x14fd   : > { %10463 = vmatprep.subr.bf16.mxu0 %v11280_v59 }
0x1500   : > { %10464 = vmatpush3.bf16.msra.mxu0 %v11280_v59 }
0x15be   : > { %v4069_v60 = vpop.f32.mrb[96].mxu1 }
0x15bf   : > { %v10433_v61 = vpop.f32.mrb[97].mxu1  ;;  %v4195_v1 = vadd.f32 %v4069_v60, %v13292_v28 }
0x15c0   : > { %v4072_v56 = vpop.f32.mrb[98].mxu1 }
0x15c1   : > { %v10434_v62 = vpop.f32.mrb[99].mxu1 }
0x15c6   : > { %v4109_v63 = vpop.f32.mrb[108].mxu0  ;;  %v4149_v0 = vpop.f32.mrb[100].mxu1 }
0x15c7   : > { %v4196_v2 = vadd.f32 %v4109_v63, %v13298_v33  ;;  %v10439_v16 = vpop.f32.mrb[109].mxu0  ;;  %v10445_v3 = vpop.f32.mrb[101].mxu1  ;;  %v4197_v40 = vadd.f32 %v4149_v0, %v13290_v55  ;;  %v11281_v33 = vld [vmem:[#allocation20 + $0x30] sm:$0xff]  }
0x15c8   : > { %v4112_v31 = vpop.f32.mrb[110].mxu0  ;;  %v4152_v35 = vpop.f32.mrb[102].mxu1  ;;  %10465 = vmatprep.subr.bf16.mxu0 %v11281_v33 }
0x15c9   : > { %v4199_v36 = vpack.c.bf16 %v4196_v2, %v4195_v1  ;;  %v10440_v20 = vpop.f32.mrb[111].mxu0  ;;  %v10446_v4 = vpop.f32.mrb[103].mxu1  ;;  %10466 = vmatpush3.bf16.msra.mxu0 %v11281_v33 }
0x15ca   : > { %10467 = vmatprep.subr.bf16.mxu0 %v11282_v14 }
0x15cb   : > { %10457 = vmatprep.mubr.msk.bf16.mxu1 %vm1547_vm8, %v4199_v36 }
0x15cd   : > { %10468 = vmatpush3.bf16.msra.mxu0 %v11282_v14 }
0x15ce   : > { %v4189_v6 = vpop.f32.mrb[112].mxu0  ;;  %10487 = vmatprep.subr.bf16.mxu0 %v12110_v9 }
0x15cf   : > { %v4198_v41 = vadd.f32 %v4189_v6, %v13308_v44  ;;  %v10451_v43 = vpop.f32.mrb[113].mxu0 }
0x15d0   : > { %v4192_v7 = vpop.f32.mrb[114].mxu0 }
0x15d1   : > { %v4200_v10 = vpack.c.bf16 %v4198_v41, %v4197_v40  ;;  %v10452_v28 = vpop.f32.mrb[115].mxu0 }
0x15d3   : > { %10458 = vmatmul.mubr.msk.bf16.vlgmr.msra.gmra.mrb[104].mxu1 %vm1547_vm8, %v4200_v10 }
0x15d4   : > { %10474 = vmatpush3.bf16.msra.mxu1 %v11283_v25 }
0x15d5   : > { %10475 = vmatprep.subr.bf16.mxu1 %v11284_v29 }
0x15d8   : > { %10476 = vmatpush3.bf16.msra.mxu1 %v11284_v29 }
0x15d9   : > { %10481 = vmatprep.subr.bf16.mxu1 %v12110_v9 }
0x16a6   : > { %v10459_v27 = vpop.f32.mrb[104].mxu1 }
0x16a7   : > { %v4275_v12 = vadd.f32 %v10459_v27, %v9636_v11  ;;  %v4266_v55 = vpop.f32.mrb[105].mxu1 }
0x16a8   : > { %v4267_v13 = vadd.f32 %v9636_v11, %v4266_v55  ;;  %v10460_v44 = vpop.f32.mrb[106].mxu1 }
0x16a9   : > { %v4278_v15 = vadd.f32 %v10460_v44, %v9636_v11  ;;  %v4269_v17 = vpop.f32.mrb[107].mxu1  ;;  %v4283_v19 = vmax.f32 %v4275_v12, 0.0 }
0x16aa   : > { %v4270_v18 = vadd.f32 %v9636_v11, %v4269_v17  ;;  %v4281_v53 = vmax.f32 %v4267_v13, 0.0 }
0x16ab   : > { %v4284_v21 = vmax.f32 %v4278_v15, 0.0 }
0x16ac   : > { %v4282_v22 = vmax.f32 %v4270_v18, 0.0 }
0x16ad   : > { %v4286_v24 = vpack.c.bf16 %v4284_v21, %v4283_v19 }
0x16ae   : > { %v4285_v50 = vpack.c.bf16 %v4282_v22, %v4281_v53 }
0x16b0   : > { %10469 = vmatprep.mubr.msk.bf16.mxu0 %vm1648_vm9, %v4285_v50 }
0x16b1   : > { %10470 = vmatmul.mubr.msk.bf16.vlgmr.msra.gmra.mrb[116].mxu0 %vm1648_vm9, %v4286_v24 }
0x16b2   : > { %10489 = vmatprep.mubr.msk.bf16.mxu0 %vm12111_vm4, %v12110_v9 }
0x1784   : > { %v10471_v30 = vpop.f32.mrb[116].mxu0 }
0x1785   : > { %v4368_v34 = vpop.f32.mrb[117].mxu0  ;;  %v4377_v38 = vadd.f32 %v10471_v30, %v9641_v32 }
0x1786   : > { %v10472_v37 = vpop.f32.mrb[118].mxu0  ;;  %v4369_v45 = vadd.f32 %v9641_v32, %v4368_v34 }
0x1787   : > { %v4380_v39 = vadd.f32 %v10472_v37, %v9641_v32  ;;  %v4371_v42 = vpop.f32.mrb[119].mxu0 }
0x1788   : > { %v4372_v51 = vadd.f32 %v9641_v32, %v4371_v42 }
0x1789   : > { %v4384_v52 = vpack.c.bf16 %v4380_v39, %v4377_v38 }
0x178a   : > { %v4383_v54 = vpack.c.bf16 %v4372_v51, %v4369_v45 }
0x178c   : > { %10477 = vmatprep.mubr.msk.bf16.mxu1 %vm1547_vm8, %v4383_v54 }
0x178d   : > { %10478 = vmatmul.mubr.msk.bf16.vlgmr.msra.gmra.mrb[108].mxu1 %vm1547_vm8, %v4384_v52 }
0x178e   : > { %10483 = vmatprep.mubr.msk.bf16.mxu1 %vm12111_vm4, %v12110_v9 }
0x1860   : > { %v10479_v58 = vpop.f32.mrb[108].mxu1 }
0x1861   : > { %v4450_v59 = vpop.f32.mrb[109].mxu1  ;;  %v4459_v62 = vadd.f32 %v10479_v58, %v9648_v57 }
0x1862   : > { %v4451_v60 = vadd.f32 %v9648_v57, %v4450_v59  ;;  %v10480_v61 = vpop.f32.mrb[110].mxu1 }
0x1863   : > { %v4453_v56 = vpop.f32.mrb[111].mxu1  ;;  %v4462_v1 = vadd.f32 %v10480_v61, %v9648_v57  ;;  %v13366_v16 = vpack.c.bf16 %v4459_v62, %v4459_v62 }
0x1864   : > { %v13360_v63 = vpack.c.bf16 %v4451_v60, %v4451_v60  ;;  %v4454_v0 = vadd.f32 %v9648_v57, %v4453_v56 }
0x1865   : > { %v13370_v3 = vpack.c.bf16 %v4462_v1, %v4462_v1 }
0x1866   : > { %v13362_v2 = vpack.c.bf16 %v4454_v0, %v4454_v0  ;;  %4475 = vrot.lane.b32.xlu0 %v13360_v63, %s12112_s14 }
0x1868   : > { %4524 = vrot.lane.b32.xlu1 %v13362_v2, %s12112_s14 }
0x186a   : > { %4573 = vrot.lane.b32.xlu0 %v13366_v16, %s12112_s14 }
0x186c   : > { %4622 = vrot.lane.b32.xlu1 %v13370_v3, %s12112_s14 }
0x18d8   : > { %v4476_v31 = vpop.permute.xlu0 %4475 }
0x18d9   : > { %v4481_v35 = vsel %vm1128_vm6, %v4476_v31, 0 }
0x18da   : > { %v4525_v36 = vpop.permute.xlu1 %4524  ;;  %10482 = vmatpush3.bf16.xpose.msra.mxu1 %v4481_v35 }
0x18db   : > { %v4530_v20 = vsel %vm1128_vm6, %v4525_v36, 0  ;;  %10493 = vmatprep.subr.bf16.mxu1 %v12110_v9 }
0x18dc   : > { %10488 = vmatpush3.bf16.xpose.msra.mxu0 %v4530_v20  ;;  %v4574_v4 = vpop.permute.xlu0 %4573 }
0x18dd   : > { %10499 = vmatprep.subr.bf16.mxu0 %v12110_v9  ;;  %v4579_v40 = vsel %vm1128_vm6, %v4574_v4, 0 }
0x18de   : > { %v4623_v6 = vpop.permute.xlu1 %4622 }
0x18df   : > { %v4628_v41 = vsel %vm1128_vm6, %v4623_v6, 0 }
0x18e1   : > { %10484 = vmatmul.mubr.msk.bf16.vlgmr.msra.gmra.mrb[112].mxu1 %vm1128_vm6, %v13360_v63 }
0x18e2   : > { %10494 = vmatpush3.bf16.xpose.msra.mxu1 %v4579_v40  ;;  %10495 = vmatprep.mubr.msk.bf16.mxu1 %vm12111_vm4, %v12110_v9 }
0x18e3   : > { %10490 = vmatmul.mubr.msk.bf16.vlgmr.msra.gmra.mrb[120].mxu0 %vm1128_vm6, %v13362_v2  ;;  %10505 = vmatprep.subr.bf16.mxu1 %v12110_v9 }
0x18e4   : > { %10500 = vmatpush3.bf16.xpose.msra.mxu0 %v4628_v41  ;;  %10501 = vmatprep.mubr.msk.bf16.mxu0 %vm12111_vm4, %v12110_v9 }
0x18e5   : > { %10511 = vmatprep.subr.bf16.mxu0 %v12110_v9 }
0x18e9   : > { %10496 = vmatmul.mubr.msk.bf16.vlgmr.msra.gmra.mrb[116].mxu1 %vm1128_vm6, %v13366_v16 }
0x18ea   : > { %10507 = vmatprep.mubr.msk.bf16.mxu1 %vm12111_vm4, %v12110_v9 }
0x18eb   : > { %10502 = vmatmul.mubr.msk.bf16.vlgmr.msra.gmra.mrb[124].mxu0 %vm1128_vm6, %v13370_v3 }
0x18ec   : > { %10513 = vmatprep.mubr.msk.bf16.mxu0 %vm12111_vm4, %v12110_v9 }
0x19b4   : > { %v4517_v43 = vpop.f32.mrb[112].mxu1 }
0x19b5   : > { %v10485_v7 = vpop.f32.mrb[113].mxu1  ;;  %v4670_v10 = vsel %vm1128_vm6, %v4517_v43, -inf }
0x19b6   : > { %v4566_v28 = vpop.f32.mrb[120].mxu0  ;;  %4671 = vmax.xlane.f32.xlu0 %v4670_v10  ;;  %v4520_v33 = vpop.f32.mrb[114].mxu1 }
0x19b7   : > { %v10486_v14 = vpop.f32.mrb[115].mxu1  ;;  %v10491_v11 = vpop.f32.mrb[121].mxu0  ;;  %v4673_v27 = vsel %vm1128_vm6, %v4566_v28, -inf }
0x19b8   : > { %4674 = vmax.xlane.f32.xlu1 %v4673_v27  ;;  %v4569_v12 = vpop.f32.mrb[122].mxu0 }
0x19b9   : > { %v10492_v55 = vpop.f32.mrb[123].mxu0 }
0x19bc   : > { %v4615_v13 = vpop.f32.mrb[116].mxu1 }
0x19bd   : > { %v10497_v44 = vpop.f32.mrb[117].mxu1  ;;  %v4676_v15 = vsel %vm1128_vm6, %v4615_v13, -inf }
0x19be   : > { %v4664_v17 = vpop.f32.mrb[124].mxu0  ;;  %4677 = vmax.xlane.f32.xlu0 %v4676_v15  ;;  %v4618_v18 = vpop.f32.mrb[118].mxu1 }
0x19bf   : > { %v10498_v19 = vpop.f32.mrb[119].mxu1  ;;  %v10503_v21 = vpop.f32.mrb[125].mxu0  ;;  %v4679_v24 = vsel %vm1128_vm6, %v4664_v17, -inf }
0x19c0   : > { %v4667_v53 = vpop.f32.mrb[126].mxu0 }
0x19c1   : > { %v10504_v22 = vpop.f32.mrb[127].mxu0 }
0x19c2   : > { %4680 = vmax.xlane.f32.xlu0 %v4679_v24 }
0x19c9   : > { %4718 = vrot.lane.b32.xlu1 %v13360_v63, %s12113_s27 }
0x1a43   : > { %v4672_v50 = vpop.xlane.xlu0 %4671 }
0x1a44   : > { %v4682_v25 = vsub.f32 %v4517_v43, %v4672_v50 }
0x1a45   : > { %v4675_v29 = vpop.xlane.xlu1 %4674 }
0x1a46   : > { %v4686_v30 = vmul.f32 1.442695, %v4682_v25  ;;  %v4683_v32 = vsub.f32 %v4566_v28, %v4675_v29 }
0x1a48   : > { %11357 = vpow2.f32 %v4686_v30  ;;  %v4688_v34 = vmul.f32 1.442695, %v4683_v32 }
0x1a49   : > { %v4719_v37 = vpop.permute.xlu1 %4718 }
0x1a4a   : > { %11359 = vpow2.f32 %v4688_v34  ;;  %v4724_v38 = vsel %vm1132_vm5, %v4719_v37, 0 }
0x1a4b   : > { %10506 = vmatpush3.bf16.msra.mxu1 %v4724_v38  ;;  %v4678_v52 = vpop.xlane.xlu0 %4677 }
0x1a4c   : > { %10517 = vmatprep.subr.bf16.mxu1 %v12110_v9  ;;  %v4684_v58 = vsub.f32 %v4615_v13, %v4678_v52 }
0x1a4e   : > { %v4690_v60 = vmul.f32 1.442695, %v4684_v58 }
0x1a4f   : > { %v4681_v54 = vpop.xlane.xlu0 %4680 }
0x1a50   : > { %v4685_v57 = vsub.f32 %v4664_v17, %v4681_v54 }
0x1a52   : > { %v11358_v39 = vpop.eup %11357  ;;  %v4692_v59 = vmul.f32 1.442695, %v4685_v57 }
0x1a53   : > { %v4694_v42 = vsel %vm1128_vm6, %v11358_v39, 0.0 }
0x1a54   : > { %v11360_v45 = vpop.eup %11359  ;;  %4695 = vadd.xlane.f32.xlu1 %v4694_v42  ;;  %11361 = vpow2.f32 %v4692_v59 }
0x1a55   : > { %v4697_v51 = vsel %vm1128_vm6, %v11360_v45, 0.0  ;;  %11363 = vpow2.f32 %v4690_v60 }
0x1a56   : > { %4698 = vadd.xlane.f32.xlu0 %v4697_v51 }
0x1a5e   : > { %v11362_v61 = vpop.eup %11361 }
0x1a5f   : > { %v11364_v56 = vpop.eup %11363  ;;  %v4703_v62 = vsel %vm1128_vm6, %v11362_v61, 0.0 }
0x1a60   : > { %v4700_v0 = vsel %vm1128_vm6, %v11364_v56, 0.0 }
0x1a65   : > { %4814 = vrot.lane.b32.xlu1 %v13366_v16, %s12113_s27 }
0x1a69   : > { %4862 = vrot.lane.b32.xlu1 %v13370_v3, %s12113_s27 }
0x1a6c   : > { %4766 = vrot.lane.b32.xlu0 %v13362_v2, %s12113_s27 }
0x1a8b   : > { %4704 = vadd.xlane.f32.xlu0 %v4703_v62 }
0x1a8d   : > { %4701 = vadd.xlane.f32.xlu1 %v4700_v0 }
0x1a9e   : > { %4964 = vrot.lane.b32.xlu1 %v13362_v2, %s12114_s6 }
0x1aa1   : > { %4914 = vrot.lane.b32.xlu0 %v13360_v63, %s12114_s6 }
0x1aa2   : > { %4962 = vrot.lane.b32.xlu1 %v13362_v2, %s12115_s4 }
0x1aa5   : > { %4912 = vrot.lane.b32.xlu0 %v13360_v63, %s12115_s4 }
0x1aa6   : > { %5064 = vrot.lane.b32.xlu1 %v13370_v3, %s12114_s6 }
0x1aa9   : > { %5014 = vrot.lane.b32.xlu0 %v13366_v16, %s12114_s6 }
0x1aaa   : > { %5062 = vrot.lane.b32.xlu1 %v13370_v3, %s12115_s4 }
0x1aad   : > { %5012 = vrot.lane.b32.xlu0 %v13366_v16, %s12115_s4 }
0x1ae1   : > { %v4696_v1 = vpop.xlane.xlu1 %4695 }
0x1ae2   : > { %11365 = vrcp.f32 %v4696_v1 }
0x1ae3   : > { %v4699_v31 = vpop.xlane.xlu0 %4698 }
0x1ae4   : > { %11367 = vrcp.f32 %v4699_v31 }
0x1ae5   : > { %v4815_v20 = vpop.permute.xlu1 %4814 }
0x1ae6   : > { %v4820_v10 = vsel %vm1132_vm5, %v4815_v20, 0 }
0x1ae7   : > { %v4767_v35 = vpop.permute.xlu0 %4766 }
0x1ae8   : > { %v4772_v36 = vsel %vm1132_vm5, %v4767_v35, 0 }
0x1ae9   : > { %10512 = vmatpush3.bf16.msra.mxu0 %v4772_v36  ;;  %v4863_v7 = vpop.permute.xlu1 %4862 }
0x1aea   : > { %10523 = vmatprep.subr.bf16.mxu0 %v12110_v9  ;;  %v4868_v33 = vsel %vm1132_vm5, %v4863_v7, 0 }
0x1aec   : > { %v11366_v4 = vpop.eup %11365 }
0x1aed   : > { %v4710_v6 = vmul.f32 %v11366_v4, %v11358_v39 }
0x1aee   : > { %v11368_v40 = vpop.eup %11367 }
0x1aef   : > { %v4714_v41 = vpack.c.bf16 %v4710_v6, %v4710_v6  ;;  %v4711_v43 = vmul.f32 %v11368_v40, %v11360_v45 }
0x1af1   : > { %10508 = vmatmul.mubr.msk.bf16.vlgmr.msra.gmra.mrb[120].mxu1 %vm1128_vm6, %v4714_v41  ;;  %v4715_v28 = vpack.c.bf16 %v4711_v43, %v4711_v43 }
0x1af2   : > { %10518 = vmatpush3.bf16.msra.mxu1 %v4820_v10  ;;  %10519 = vmatprep.mubr.msk.bf16.mxu1 %vm12111_vm4, %v12110_v9 }
0x1af3   : > { %10514 = vmatmul.mubr.msk.bf16.vlgmr.msra.gmra.mrb[128].mxu0 %vm1128_vm6, %v4715_v28  ;;  %10529 = vmatprep.subr.bf16.mxu1 %v12110_v9 }
0x1af4   : > { %10524 = vmatpush3.bf16.msra.mxu0 %v4868_v33  ;;  %10525 = vmatprep.mubr.msk.bf16.mxu0 %vm12111_vm4, %v12110_v9 }
0x1af5   : > { %10535 = vmatprep.subr.bf16.mxu0 %v12110_v9 }
0x1b18   : > { %v4705_v14 = vpop.xlane.xlu0 %4704 }
0x1b19   : > { %11369 = vrcp.f32 %v4705_v14 }
0x1b1a   : > { %v4702_v11 = vpop.xlane.xlu1 %4701 }
0x1b1b   : > { %11371 = vrcp.f32 %v4702_v11 }
0x1b1c   : > { %v4915_v55 = vpop.permute.xlu0 %4914 }
0x1b1d   : > { %v4920_v22 = vsel %vm1128_vm6, %v4915_v55, 0 }
0x1b1e   : > { %v4965_v27 = vpop.permute.xlu1 %4964 }
0x1b1f   : > { %v4970_v19 = vsel %vm1128_vm6, %v4965_v27, 0 }
0x1b20   : > { %v4913_v53 = vpop.permute.xlu0 %4912 }
0x1b22   : > { %v4963_v18 = vpop.permute.xlu1 %4962 }
0x1b23   : > { %v11370_v12 = vpop.eup %11369 }
0x1b24   : > { %v4713_v13 = vmul.f32 %v11370_v12, %v11362_v61  ;;  %v5015_v50 = vpop.permute.xlu0 %5014 }
0x1b25   : > { %v11372_v44 = vpop.eup %11371  ;;  %v5020_v29 = vsel %vm1128_vm6, %v5015_v50, 0 }
0x1b26   : > { %v4717_v15 = vpack.c.bf16 %v4713_v13, %v4713_v13  ;;  %v4712_v17 = vmul.f32 %v11372_v44, %v11364_v56  ;;  %v5065_v24 = vpop.permute.xlu1 %5064 }
0x1b27   : > { %v5070_v25 = vsel %vm1128_vm6, %v5065_v24, 0 }
0x1b28   : > { %10526 = vmatmul.mubr.msk.bf16.vlgmr.msra.gmra.mrb[132].mxu0 %vm1128_vm6, %v4717_v15  ;;  %v4716_v21 = vpack.c.bf16 %v4712_v17, %v4712_v17  ;;  %v5013_v32 = vpop.permute.xlu0 %5012 }
0x1b29   : > { %10536 = vmatpush3.bf16.xpose.msra.mxu0 %v4970_v19  ;;  %10537 = vmatprep.mubr.msk.bf16.mxu0 %vm12111_vm4, %v12110_v9 }
0x1b2a   : > { %10520 = vmatmul.mubr.msk.bf16.vlgmr.msra.gmra.mrb[124].mxu1 %vm1128_vm6, %v4716_v21  ;;  %10547 = vmatprep.subr.bf16.mxu0 %v12110_v9  ;;  %v5063_v30 = vpop.permute.xlu1 %5062 }
0x1b2b   : > { %10530 = vmatpush3.bf16.xpose.msra.mxu1 %v4920_v22  ;;  %10531 = vmatprep.mubr.msk.bf16.mxu1 %vm12111_vm4, %v12110_v9 }
0x1b2c   : > { %10541 = vmatprep.subr.bf16.mxu1 %v12110_v9 }
0x1b30   : > { %10538 = vmatmul.mubr.msk.bf16.vlgmr.msra.gmra.mrb[136].mxu0 %vm1128_vm6, %v4963_v18 }
0x1b31   : > { %10548 = vmatpush3.bf16.xpose.msra.mxu0 %v5070_v25  ;;  %10549 = vmatprep.mubr.msk.bf16.mxu0 %vm12111_vm4, %v12110_v9 }
0x1b32   : > { %10532 = vmatmul.mubr.msk.bf16.vlgmr.msra.gmra.mrb[128].mxu1 %vm1128_vm6, %v4913_v53  ;;  %10559 = vmatprep.subr.bf16.mxu0 %v12110_v9 }
0x1b33   : > { %10542 = vmatpush3.bf16.xpose.msra.mxu1 %v5020_v29  ;;  %10543 = vmatprep.mubr.msk.bf16.mxu1 %vm12111_vm4, %v12110_v9 }
0x1b34   : > { %10553 = vmatprep.subr.bf16.mxu1 %v12110_v9 }
0x1b38   : > { %10550 = vmatmul.mubr.msk.bf16.vlgmr.msra.gmra.mrb[140].mxu0 %vm1128_vm6, %v5063_v30 }
0x1b39   : > { %10561 = vmatprep.mubr.msk.bf16.mxu0 %vm12111_vm4, %v12110_v9 }
0x1b3a   : > { %10544 = vmatmul.mubr.msk.bf16.vlgmr.msra.gmra.mrb[132].mxu1 %vm1128_vm6, %v5013_v32 }
0x1b3b   : > { %10555 = vmatprep.mubr.msk.bf16.mxu1 %vm12111_vm4, %v12110_v9 }
0x1bc4   : > { %v13472_v34 = vpop.f32.mrb[120].mxu1 }
0x1bc5   : > { %v10509_v37 = vpop.f32.mrb[121].mxu1 }
0x1bc6   : > { %v4763_v38 = vpop.f32.mrb[122].mxu1  ;;  %v13474_v39 = vpop.f32.mrb[128].mxu0 }
0x1bc7   : > { %v4910_v42 = vpack.c.bf16 %v13474_v39, %v13472_v34  ;;  %v10510_v45 = vpop.f32.mrb[123].mxu1  ;;  %v10515_v51 = vpop.f32.mrb[129].mxu0 }
0x1bc8   : > { %v4811_v52 = vpop.f32.mrb[130].mxu0 }
0x1bc9   : > { %v10516_v54 = vpop.f32.mrb[131].mxu0 }
0x1bfb   : > { %v13478_v57 = vpop.f32.mrb[132].mxu0 }
0x1bfc   : > { %v10527_v58 = vpop.f32.mrb[133].mxu0 }
0x1bfd   : > { %v13480_v59 = vpop.f32.mrb[124].mxu1  ;;  %v4907_v60 = vpop.f32.mrb[134].mxu0 }
0x1bfe   : > { %v4911_v61 = vpack.c.bf16 %v13478_v57, %v13480_v59  ;;  %v10521_v56 = vpop.f32.mrb[125].mxu1  ;;  %v10528_v62 = vpop.f32.mrb[135].mxu0 }
0x1bff   : > { %v4859_v0 = vpop.f32.mrb[126].mxu1 }
0x1c00   : > { %v10522_v1 = vpop.f32.mrb[127].mxu1 }
0x1c03   : > { %v5006_v31 = vpop.f32.mrb[136].mxu0 }
0x1c04   : > { %v10539_v35 = vpop.f32.mrb[137].mxu0  ;;  %v5115_v36 = vsel %vm1128_vm6, %v5006_v31, -inf }
0x1c05   : > { %5116 = vmax.xlane.f32.xlu1 %v5115_v36  ;;  %v4956_v20 = vpop.f32.mrb[128].mxu1  ;;  %v5009_v4 = vpop.f32.mrb[138].mxu0 }
0x1c06   : > { %v10533_v6 = vpop.f32.mrb[129].mxu1  ;;  %v10540_v40 = vpop.f32.mrb[139].mxu0  ;;  %v5112_v41 = vsel %vm1128_vm6, %v4956_v20, -inf }
0x1c07   : > { %5113 = vmax.xlane.f32.xlu0 %v5112_v41  ;;  %v4959_v43 = vpop.f32.mrb[130].mxu1 }
0x1c08   : > { %v10534_v7 = vpop.f32.mrb[131].mxu1 }
0x1c0b   : > { %v5106_v10 = vpop.f32.mrb[140].mxu0 }
0x1c0c   : > { %v10551_v28 = vpop.f32.mrb[141].mxu0  ;;  %v5121_v44 = vsel %vm1128_vm6, %v5106_v10, -inf }
0x1c0d   : > { %v5056_v33 = vpop.f32.mrb[132].mxu1  ;;  %v5109_v14 = vpop.f32.mrb[142].mxu0 }
0x1c0e   : > { %v10545_v11 = vpop.f32.mrb[133].mxu1  ;;  %v10552_v27 = vpop.f32.mrb[143].mxu0  ;;  %v5118_v12 = vsel %vm1128_vm6, %v5056_v33, -inf }
0x1c0f   : > { %5119 = vmax.xlane.f32.xlu0 %v5118_v12  ;;  %v5059_v55 = vpop.f32.mrb[134].mxu1 }
0x1c10   : > { %v10546_v13 = vpop.f32.mrb[135].mxu1 }
0x1c13   : > { %5122 = vmax.xlane.f32.xlu0 %v5121_v44 }
0x1c16   : > { %5160 = vrot.lane.b32.xlu1 %v13360_v63, %s12116_s1 }
0x1c92   : > { %v5117_v15 = vpop.xlane.xlu1 %5116 }
0x1c93   : > { %v5125_v17 = vsub.f32 %v5006_v31, %v5117_v15 }
0x1c94   : > { %v5114_v18 = vpop.xlane.xlu0 %5113 }
0x1c95   : > { %v5130_v19 = vmul.f32 1.442695, %v5125_v17  ;;  %v5124_v21 = vsub.f32 %v4956_v20, %v5114_v18 }
0x1c96   : > { %v5161_v53 = vpop.permute.xlu1 %5160 }
0x1c97   : > { %11373 = vpow2.f32 %v5130_v19  ;;  %v5128_v22 = vmul.f32 1.442695, %v5124_v21  ;;  %v5166_v24 = vsel %vm1132_vm5, %v5161_v53, 0 }
0x1c98   : > { %10554 = vmatpush3.bf16.msra.mxu1 %v5166_v24 }
0x1c99   : > { %11375 = vpow2.f32 %v5128_v22  ;;  %10565 = vmatprep.subr.bf16.mxu1 %v12110_v9 }
0x1c9c   : > { %v5120_v50 = vpop.xlane.xlu0 %5119 }
0x1c9d   : > { %v5126_v25 = vsub.f32 %v5056_v33, %v5120_v50  ;;  %v4471_v50 = vld [vmem:[#allocation26 + $0x14] sm:$0xf] }
0x1c9f   : > { %v5132_v29 = vmul.f32 1.442695, %v5126_v25  ;;  %v5361_v25 = vsel %vm1132_vm5, %v4471_v50, 0 }
0x1ca0   : > { %v5123_v30 = vpop.xlane.xlu0 %5122 }
0x1ca1   : > { %v11374_v32 = vpop.eup %11373  ;;  %11377 = vpow2.f32 %v5132_v29  ;;  %v5127_v37 = vsub.f32 %v5106_v10, %v5123_v30  ;;  %v4470_v29 = vld [vmem:[#allocation26 + $0x10] sm:$0xf] }
0x1ca2   : > { %v5139_v38 = vsel %vm1128_vm6, %v11374_v32, 0.0 }
0x1ca3   : > { %v11376_v45 = vpop.eup %11375  ;;  %v5134_v51 = vmul.f32 1.442695, %v5127_v37  ;;  %5140 = vadd.xlane.f32.xlu0 %v5139_v38 }
0x1ca4   : > { %v5136_v52 = vsel %vm1128_vm6, %v11376_v45, 0.0 }
0x1ca5   : > { %11379 = vpow2.f32 %v5134_v51  ;;  %5137 = vadd.xlane.f32.xlu1 %v5136_v52 }
0x1cab   : > { %v11378_v54 = vpop.eup %11377 }
0x1cac   : > { %v5142_v58 = vsel %vm1128_vm6, %v11378_v54, 0.0 }
0x1cad   : > { %5143 = vadd.xlane.f32.xlu1 %v5142_v58 }
0x1caf   : > { %v11380_v60 = vpop.eup %11379 }
0x1cb0   : > { %v5145_v56 = vsel %vm1128_vm6, %v11380_v60, 0.0 }
0x1cb1   : > { %5146 = vadd.xlane.f32.xlu0 %v5145_v56 }
0x1cbe   : > { %5256 = vrot.lane.b32.xlu1 %v13366_v16, %s12116_s1 }
0x1cc2   : > { %5304 = vrot.lane.b32.xlu1 %v13370_v3, %s12116_s1 }
0x1cc6   : > { %5470 = vrot.lane.b32.xlu1 %v13360_v63, %s12117_s16 }
0x1cc7   : > { %5208 = vrot.lane.b32.xlu0 %v13362_v2, %s12116_s1 }
0x1cca   : > { %5520 = vrot.lane.b32.xlu1 %v13362_v2, %s12117_s16 }
0x1ccb   : > { %5472 = vrot.lane.b32.xlu0 %v13360_v63, %s12118_s7 }
0x1cce   : > { %5622 = vrot.lane.b32.xlu1 %v13370_v3, %s12118_s7 }
0x1ccf   : > { %5522 = vrot.lane.b32.xlu0 %v13362_v2, %s12118_s7 }
0x1cd2   : > { %5620 = vrot.lane.b32.xlu1 %v13370_v3, %s12117_s16 }
0x1cd3   : > { %5572 = vrot.lane.b32.xlu0 %v13366_v16, %s12118_s7 }
0x1cd7   : > { %5570 = vrot.lane.b32.xlu0 %v13366_v16, %s12117_s16 }
0x1d30   : > { %v5141_v62 = vpop.xlane.xlu0 %5140 }
0x1d32   : > { %v5138_v0 = vpop.xlane.xlu1 %5137 }
0x1d33   : > { %11381 = vrcp.f32 %v5138_v0 }
0x1d34   : > { %11383 = vrcp.f32 %v5141_v62 }
0x1d3a   : > { %v5144_v1 = vpop.xlane.xlu1 %5143 }
0x1d3b   : > { %11385 = vrcp.f32 %v5144_v1 }
0x1d3d   : > { %v11382_v31 = vpop.eup %11381 }
0x1d3e   : > { %v11384_v35 = vpop.eup %11383  ;;  %v5257_v36 = vpop.permute.xlu1 %5256  ;;  %v5152_v4 = vmul.f32 %v11382_v31, %v11376_v45 }
0x1d3f   : > { %v5147_v20 = vpop.xlane.xlu0 %5146  ;;  %v5153_v40 = vmul.f32 %v11384_v35, %v11374_v32  ;;  %v5262_v41 = vsel %vm1132_vm5, %v5257_v36, 0  ;;  %v5419_v36 = vsel %vm1132_vm5, %v4470_v29, 0 }
0x1d40   : > { %11387 = vrcp.f32 %v5147_v20  ;;  %v5156_v6 = vpack.c.bf16 %v5152_v4, %v5152_v4 }
0x1d41   : > { %v5157_v33 = vpack.c.bf16 %v5153_v40, %v5153_v40 }
0x1d42   : > { %10556 = vmatmul.mubr.msk.bf16.vlgmr.msra.gmra.mrb[136].mxu1 %vm1128_vm6, %v5156_v6  ;;  %v5305_v10 = vpop.permute.xlu1 %5304 }
0x1d43   : > { %v5209_v43 = vpop.permute.xlu0 %5208  ;;  %10566 = vmatpush3.bf16.msra.mxu1 %v5262_v41  ;;  %10567 = vmatprep.mubr.msk.bf16.mxu1 %vm12111_vm4, %v12110_v9  ;;  %v5310_v11 = vsel %vm1132_vm5, %v5305_v10, 0 }
0x1d44   : > { %v5214_v7 = vsel %vm1132_vm5, %v5209_v43, 0  ;;  %11039 = vmatprep.subr.msk.bf16.mxu1 %vm1132_vm5, %v4471_v50 }
0x1d45   : > { %10560 = vmatpush3.bf16.msra.mxu0 %v5214_v7  ;;  %v11386_v28 = vpop.eup %11385 }
0x1d46   : > { %10571 = vmatprep.subr.bf16.mxu0 %v12110_v9  ;;  %v5154_v14 = vmul.f32 %v11386_v28, %v11378_v54  ;;  %v5471_v17 = vpop.permute.xlu1 %5470 }
0x1d47   : > { %v5473_v44 = vpop.permute.xlu0 %5472 }
0x1d48   : > { %10562 = vmatmul.mubr.msk.bf16.vlgmr.msra.gmra.mrb[144].mxu0 %vm1128_vm6, %v5157_v33  ;;  %v5158_v27 = vpack.c.bf16 %v5154_v14, %v5154_v14  ;;  %v5478_v15 = vsel %vm1128_vm6, %v5473_v44, 0 }
0x1d49   : > { %10572 = vmatpush3.bf16.msra.mxu0 %v5310_v11  ;;  %10573 = vmatprep.mubr.msk.bf16.mxu0 %vm12111_vm4, %v12110_v9 }
0x1d4a   : > { %v11388_v12 = vpop.eup %11387  ;;  %10589 = vmatprep.subr.bf16.mxu0 %v12110_v9  ;;  %10568 = vmatmul.mubr.msk.bf16.vlgmr.msra.gmra.mrb[140].mxu1 %vm1128_vm6, %v5158_v27  ;;  %v5521_v19 = vpop.permute.xlu1 %5520 }
0x1d4b   : > { %v5155_v55 = vmul.f32 %v11388_v12, %v11380_v60  ;;  %v5523_v18 = vpop.permute.xlu0 %5522  ;;  %10578 = vmatpush3.bf16.msra.mxu1 %v5361_v25 }
0x1d4c   : > { %v5528_v21 = vsel %vm1128_vm6, %v5523_v18, 0  ;;  %11040 = vmatprep.subr.msk.bf16.mxu1 %vm1132_vm5, %v4470_v29 }
0x1d4d   : > { %v5159_v13 = vpack.c.bf16 %v5155_v55, %v5155_v55 }
0x1d4e   : > { %v5623_v53 = vpop.permute.xlu1 %5622 }
0x1d4f   : > { %v5628_v22 = vsel %vm1128_vm6, %v5623_v53, 0  ;;  %v5573_v7 = vpop.permute.xlu0 %5572 }
0x1d50   : > { %10574 = vmatmul.mubr.msk.bf16.vlgmr.msra.gmra.mrb[148].mxu0 %vm1128_vm6, %v5159_v13  ;;  %v5578_v28 = vsel %vm1128_vm6, %v5573_v7, 0 }
0x1d51   : > { %10591 = vmatprep.mubr.msk.bf16.mxu0 %vm12111_vm4, %v12110_v9 }
0x1d52   : > { %10590 = vmatpush3.bf16.xpose.msra.mxu0 %v5478_v15  ;;  %v5621_v24 = vpop.permute.xlu1 %5620 }
0x1d53   : > { %10595 = vmatprep.subr.bf16.mxu0 %v12110_v9  ;;  %v5571_v11 = vpop.permute.xlu0 %5570 }
0x1d59   : > { %10592 = vmatmul.mubr.msk.bf16.vlgmr.msra.gmra.mrb[152].mxu0 %vm1128_vm6, %v5471_v17 }
0x1d5a   : > { %10596 = vmatpush3.bf16.xpose.msra.mxu0 %v5528_v21  ;;  %10597 = vmatprep.mubr.msk.bf16.mxu0 %vm12111_vm4, %v12110_v9 }
0x1d5b   : > { %10607 = vmatprep.subr.bf16.mxu0 %v12110_v9 }
0x1d61   : > { %10598 = vmatmul.mubr.msk.bf16.vlgmr.msra.gmra.mrb[156].mxu0 %vm1128_vm6, %v5521_v19 }
0x1d62   : > { %10608 = vmatpush3.bf16.xpose.msra.mxu0 %v5628_v22  ;;  %10609 = vmatprep.mubr.msk.bf16.mxu0 %vm12111_vm4, %v12110_v9 }
0x1d63   : > { %10619 = vmatprep.subr.bf16.mxu0 %v12110_v9 }
0x1d69   : > { %10610 = vmatmul.mubr.msk.bf16.vlgmr.msra.gmra.mrb[160].mxu0 %vm1128_vm6, %v5621_v24 }
0x1d6a   : > { %10621 = vmatprep.mubr.msk.bf16.mxu0 %vm12111_vm4, %v12110_v9 }
0x1e15   : > { %v5202_v30 = vpop.f32.mrb[136].mxu1 }
0x1e16   : > { %v10557_v32 = vpop.f32.mrb[137].mxu1 }
0x1e17   : > { %v5205_v37 = vpop.f32.mrb[138].mxu1 }
0x1e18   : > { %v10558_v38 = vpop.f32.mrb[139].mxu1 }
0x1e1b   : > { %v5250_v45 = vpop.f32.mrb[144].mxu0 }
0x1e1c   : > { %v5352_v51 = vpack.c.bf16 %v5250_v45, %v5202_v30  ;;  %v10563_v52 = vpop.f32.mrb[145].mxu0 }
0x1e1d   : > { %v5253_v54 = vpop.f32.mrb[146].mxu0  ;;  %v5298_v60 = vpop.f32.mrb[140].mxu1 }
0x1e1e   : > { %v10564_v58 = vpop.f32.mrb[147].mxu0  ;;  %10579 = vmatprep.mubr.msk.bf16.mxu1 %vm1128_vm6, %v5352_v51  ;;  %v10569_v56 = vpop.f32.mrb[141].mxu1 }
0x1e1f   : > { %v5301_v62 = vpop.f32.mrb[142].mxu1 }
0x1e20   : > { %v10570_v0 = vpop.f32.mrb[143].mxu1 }
0x1e23   : > { %v5346_v1 = vpop.f32.mrb[148].mxu0 }
0x1e24   : > { %v5353_v31 = vpack.c.bf16 %v5346_v1, %v5298_v60  ;;  %v10575_v35 = vpop.f32.mrb[149].mxu0 }
0x1e25   : > { %v5349_v20 = vpop.f32.mrb[150].mxu0 }
0x1e26   : > { %v10576_v4 = vpop.f32.mrb[151].mxu0  ;;  %10580 = vmatmul.mubr.msk.bf16.vlgmr.msra.gmra.mrb[144].mxu1 %vm1128_vm6, %v5353_v31 }
0x1e27   : > { %10585 = vmatprep.mubr.msk.bf16.mxu1 %vm1128_vm6, %v4910_v42  ;;  %10584 = vmatpush3.bf16.msra.mxu1 %v5419_v36 }
0x1e28   : > { %10601 = vmatprep.subr.bf16.mxu1 %v12110_v9 }
0x1e2c   : > { %v5514_v6 = vpop.f32.mrb[152].mxu0 }
0x1e2d   : > { %v10593_v40 = vpop.f32.mrb[153].mxu0  ;;  %v5670_v41 = vsel %vm1128_vm6, %v5514_v6, -inf }
0x1e2e   : > { %5671 = vmax.xlane.f32.xlu0 %v5670_v41  ;;  %v5517_v43 = vpop.f32.mrb[154].mxu0 }
0x1e2f   : > { %v10594_v10 = vpop.f32.mrb[155].mxu0 }
0x1e32   : > { %10586 = vmatmul.mubr.msk.bf16.vlgmr.msra.gmra.mrb[144].mxu1 %vm1128_vm6, %v4911_v61 }
0x1e33   : > { %10602 = vmatpush3.bf16.xpose.msra.mxu1 %v5578_v28  ;;  %10603 = vmatprep.mubr.msk.bf16.mxu1 %vm12111_vm4, %v12110_v9 }
0x1e34   : > { %v5564_v34 = vpop.f32.mrb[156].mxu0  ;;  %10613 = vmatprep.subr.bf16.mxu1 %v12110_v9 }
0x1e35   : > { %v10599_v39 = vpop.f32.mrb[157].mxu0  ;;  %v5673_v42 = vsel %vm1128_vm6, %v5564_v34, -inf }
0x1e36   : > { %5674 = vmax.xlane.f32.xlu1 %v5673_v42  ;;  %v5567_v33 = vpop.f32.mrb[158].mxu0 }
0x1e37   : > { %v10600_v14 = vpop.f32.mrb[159].mxu0 }
0x1e3a   : > { %10604 = vmatmul.mubr.msk.bf16.vlgmr.msra.gmra.mrb[148].mxu1 %vm1128_vm6, %v5571_v11 }
0x1e3b   : > { %10615 = vmatprep.mubr.msk.bf16.mxu1 %vm12111_vm4, %v12110_v9 }
0x1e3c   : > { %v5664_v57 = vpop.f32.mrb[160].mxu0 }
0x1e3d   : > { %v10611_v59 = vpop.f32.mrb[161].mxu0  ;;  %v5679_v25 = vsel %vm1128_vm6, %v5664_v57, -inf }
0x1e3e   : > { %v5667_v61 = vpop.f32.mrb[162].mxu0 }
0x1e3f   : > { %v10612_v27 = vpop.f32.mrb[163].mxu0 }
0x1ebb   : > { %v5672_v12 = vpop.xlane.xlu0 %5671 }
0x1ebc   : > { %v5682_v55 = vsub.f32 %v5514_v6, %v5672_v12 }
0x1ebe   : > { %v5686_v13 = vmul.f32 1.442695, %v5682_v55 }
0x1ec0   : > { %11389 = vpow2.f32 %v5686_v13 }
0x1ec3   : > { %v5675_v17 = vpop.xlane.xlu1 %5674 }
0x1ec4   : > { %v5683_v18 = vsub.f32 %v5564_v34, %v5675_v17 }
0x1ec6   : > { %v5688_v19 = vmul.f32 1.442695, %v5683_v18 }
0x1ec8   : > { %11391 = vpow2.f32 %v5688_v19 }
0x1eca   : > { %v11390_v44 = vpop.eup %11389 }
0x1ecb   : > { %v5694_v15 = vsel %vm1128_vm6, %v11390_v44, 0.0 }
0x1ecc   : > { %5695 = vadd.xlane.f32.xlu1 %v5694_v15 }
0x1ed2   : > { %v11392_v29 = vpop.eup %11391 }
0x1ed3   : > { %v5697_v30 = vsel %vm1128_vm6, %v11392_v29, 0.0 }
0x1edd   : > { %5718 = vrot.lane.b32.xlu1 %v13360_v63, %s12119_s28 }
0x1ee1   : > { %5814 = vrot.lane.b32.xlu1 %v13366_v16, %s12119_s28 }
0x1f0d   : > { %v5614_v21 = vpop.f32.mrb[148].mxu1 }
0x1f0e   : > { %v10605_v53 = vpop.f32.mrb[149].mxu1  ;;  %v5676_v22 = vsel %vm1128_vm6, %v5614_v21, -inf }
0x1f0f   : > { %5677 = vmax.xlane.f32.xlu0 %v5676_v22  ;;  %v5617_v24 = vpop.f32.mrb[150].mxu1  ;;  %v4472_v53 = vld [vmem:[#allocation26 + $0x18] sm:$0xf] }
0x1f10   : > { %v10606_v50 = vpop.f32.mrb[151].mxu1  ;;  %v5919_v22 = vsel %vm1132_vm5, %v4472_v53, 0 }
0x1f13   : > { %5680 = vmax.xlane.f32.xlu0 %v5679_v25 }
0x1f17   : > { %5698 = vadd.xlane.f32.xlu0 %v5697_v30 }
0x1f59   : > { %v5696_v32 = vpop.xlane.xlu1 %5695 }
0x1f5a   : > { %11393 = vrcp.f32 %v5696_v32 }
0x1f5d   : > { %v5719_v37 = vpop.permute.xlu1 %5718 }
0x1f5e   : > { %v5724_v38 = vsel %vm1132_vm5, %v5719_v37, 0 }
0x1f5f   : > { %10614 = vmatpush3.bf16.msra.mxu1 %v5724_v38 }
0x1f60   : > { %10625 = vmatprep.subr.bf16.mxu1 %v12110_v9 }
0x1f61   : > { %v5815_v52 = vpop.permute.xlu1 %5814 }
0x1f62   : > { %v5820_v58 = vsel %vm1132_vm5, %v5815_v52, 0 }
0x1f64   : > { %v11394_v45 = vpop.eup %11393 }
0x1f65   : > { %v5710_v51 = vmul.f32 %v11394_v45, %v11390_v44 }
0x1f67   : > { %v5714_v54 = vpack.c.bf16 %v5710_v51, %v5710_v51 }
0x1f69   : > { %10616 = vmatmul.mubr.msk.bf16.vlgmr.msra.gmra.mrb[152].mxu1 %vm1128_vm6, %v5714_v54 }
0x1f6a   : > { %10626 = vmatpush3.bf16.msra.mxu1 %v5820_v58  ;;  %10627 = vmatprep.mubr.msk.bf16.mxu1 %vm12111_vm4, %v12110_v9 }
0x1f6b   : > { %11041 = vmatprep.subr.msk.bf16.mxu1 %vm1132_vm5, %v4472_v53 }
0x1f9c   : > { %v5678_v60 = vpop.xlane.xlu0 %5677 }
0x1f9d   : > { %v5684_v56 = vsub.f32 %v5614_v21, %v5678_v60 }
0x1f9f   : > { %v5690_v62 = vmul.f32 1.442695, %v5684_v56 }
0x1fa0   : > { %v5681_v0 = vpop.xlane.xlu0 %5680 }
0x1fa1   : > { %11395 = vpow2.f32 %v5690_v62  ;;  %v5685_v1 = vsub.f32 %v5664_v57, %v5681_v0 }
0x1fa3   : > { %v5692_v31 = vmul.f32 1.442695, %v5685_v1 }
0x1fa4   : > { %v5699_v6 = vpop.xlane.xlu0 %5698 }
0x1fa5   : > { %11397 = vpow2.f32 %v5692_v31 }
0x1fa6   : > { %11399 = vrcp.f32 %v5699_v6 }
0x1fab   : > { %v11396_v35 = vpop.eup %11395 }
0x1fac   : > { %v5700_v36 = vsel %vm1128_vm6, %v11396_v35, 0.0 }
0x1fad   : > { %5701 = vadd.xlane.f32.xlu1 %v5700_v36 }
0x1faf   : > { %v11398_v20 = vpop.eup %11397 }
0x1fb0   : > { %v5703_v4 = vsel %vm1128_vm6, %v11398_v20, 0.0  ;;  %v11400_v10 = vpop.eup %11399 }
0x1fb1   : > { %5704 = vadd.xlane.f32.xlu0 %v5703_v4  ;;  %v5711_v39 = vmul.f32 %v11400_v10, %v11392_v29 }
0x1fb3   : > { %v5715_v57 = vpack.c.bf16 %v5711_v39, %v5711_v39 }
0x1fbe   : > { %5862 = vrot.lane.b32.xlu1 %v13370_v3, %s12119_s28 }
0x1fc2   : > { %6026 = vrot.lane.b32.xlu1 %v13362_v2, %s12120_s5 }
0x1fc6   : > { %6024 = vrot.lane.b32.xlu1 %v13362_v2, %s12121_s3 }
0x1fc7   : > { %5766 = vrot.lane.b32.xlu0 %v13362_v2, %s12119_s28 }
0x1fca   : > { %6126 = vrot.lane.b32.xlu1 %v13370_v3, %s12120_s5 }
0x1fcb   : > { %5976 = vrot.lane.b32.xlu0 %v13360_v63, %s12120_s5 }
0x1fce   : > { %6124 = vrot.lane.b32.xlu1 %v13370_v3, %s12121_s3 }
0x1fcf   : > { %5974 = vrot.lane.b32.xlu0 %v13360_v63, %s12121_s3 }
0x1fd3   : > { %6076 = vrot.lane.b32.xlu0 %v13366_v16, %s12120_s5 }
0x1fd7   : > { %6074 = vrot.lane.b32.xlu0 %v13366_v16, %s12121_s3 }
0x203a   : > { %v5702_v40 = vpop.xlane.xlu1 %5701 }
0x203b   : > { %11401 = vrcp.f32 %v5702_v40 }
0x203c   : > { %v5760_v41 = vpop.f32.mrb[152].mxu1 }
0x203d   : > { %v10617_v43 = vpop.f32.mrb[153].mxu1 }
0x203e   : > { %v5763_v7 = vpop.f32.mrb[154].mxu1  ;;  %v5705_v28 = vpop.xlane.xlu0 %5704 }
0x203f   : > { %v10618_v34 = vpop.f32.mrb[155].mxu1  ;;  %11403 = vrcp.f32 %v5705_v28  ;;  %v5863_v11 = vpop.permute.xlu1 %5862 }
0x2040   : > { %v5868_v61 = vsel %vm1132_vm5, %v5863_v11, 0 }
0x2042   : > { %v5767_v42 = vpop.permute.xlu0 %5766 }
0x2043   : > { %v5772_v33 = vsel %vm1132_vm5, %v5767_v42, 0  ;;  %v6027_v38 = vpop.permute.xlu1 %6026 }
0x2044   : > { %10620 = vmatpush3.bf16.msra.mxu0 %v5772_v33  ;;  %v6032_v62 = vsel %vm1128_vm6, %v6027_v38, 0 }
0x2045   : > { %v11402_v14 = vpop.eup %11401  ;;  %10631 = vmatprep.subr.bf16.mxu0 %v12110_v9 }
0x2046   : > { %v5712_v59 = vmul.f32 %v11402_v14, %v11396_v35  ;;  %v5977_v55 = vpop.permute.xlu0 %5976 }
0x2047   : > { %10622 = vmatmul.mubr.msk.bf16.vlgmr.msra.gmra.mrb[164].mxu0 %vm1128_vm6, %v5715_v57  ;;  %v5982_v17 = vsel %vm1128_vm6, %v5977_v55, 0  ;;  %v6025_v60 = vpop.permute.xlu1 %6024 }
0x2048   : > { %v5716_v27 = vpack.c.bf16 %v5712_v59, %v5712_v59  ;;  %10632 = vmatpush3.bf16.msra.mxu0 %v5868_v61  ;;  %10633 = vmatprep.mubr.msk.bf16.mxu0 %vm12111_vm4, %v12110_v9 }
0x2049   : > { %v11404_v12 = vpop.eup %11403  ;;  %10643 = vmatprep.subr.bf16.mxu0 %v12110_v9 }
0x204a   : > { %10628 = vmatmul.mubr.msk.bf16.vlgmr.msra.gmra.mrb[156].mxu1 %vm1128_vm6, %v5716_v27  ;;  %v5713_v13 = vmul.f32 %v11404_v12, %v11398_v20  ;;  %v5975_v15 = vpop.permute.xlu0 %5974 }
0x204b   : > { %10638 = vmatpush3.bf16.msra.mxu1 %v5919_v22  ;;  %v6127_v1 = vpop.permute.xlu1 %6126 }
0x204c   : > { %v5717_v44 = vpack.c.bf16 %v5713_v13, %v5713_v13  ;;  %10649 = vmatprep.subr.bf16.mxu1 %v12110_v9  ;;  %v6132_v20 = vsel %vm1128_vm6, %v6127_v1, 0 }
0x204e   : > { %v6077_v18 = vpop.permute.xlu0 %6076 }
0x204f   : > { %10634 = vmatmul.mubr.msk.bf16.vlgmr.msra.gmra.mrb[168].mxu0 %vm1128_vm6, %v5717_v44  ;;  %v6082_v19 = vsel %vm1128_vm6, %v6077_v18, 0 }
0x2050   : > { %10645 = vmatprep.mubr.msk.bf16.mxu0 %vm12111_vm4, %v12110_v9 }
0x2051   : > { %10644 = vmatpush3.bf16.xpose.msra.mxu0 %v5982_v17 }
0x2052   : > { %10655 = vmatprep.subr.bf16.mxu0 %v12110_v9  ;;  %v6075_v21 = vpop.permute.xlu0 %6074 }
0x2058   : > { %10646 = vmatmul.mubr.msk.bf16.vlgmr.msra.gmra.mrb[172].mxu0 %vm1128_vm6, %v5975_v15 }
0x2059   : > { %10656 = vmatpush3.bf16.xpose.msra.mxu0 %v6082_v19  ;;  %10657 = vmatprep.mubr.msk.bf16.mxu0 %vm12111_vm4, %v12110_v9 }
0x205a   : > { %10667 = vmatprep.subr.bf16.mxu0 %v12110_v9 }
0x2060   : > { %10658 = vmatmul.mubr.msk.bf16.vlgmr.msra.gmra.mrb[176].mxu0 %vm1128_vm6, %v6075_v21 }
0x2061   : > { %10669 = vmatprep.mubr.msk.bf16.mxu0 %vm12111_vm4, %v12110_v9 }
0x211a   : > { %v5808_v24 = vpop.f32.mrb[164].mxu0 }
0x211b   : > { %v5910_v50 = vpack.c.bf16 %v5808_v24, %v5760_v41  ;;  %v10623_v25 = vpop.f32.mrb[165].mxu0  ;;  %v6125_v41 = vpop.permute.xlu1 %6124 }
0x211c   : > { %v5811_v29 = vpop.f32.mrb[166].mxu0 }
0x211d   : > { %v5856_v30 = vpop.f32.mrb[156].mxu1  ;;  %v10624_v32 = vpop.f32.mrb[167].mxu0  ;;  %10639 = vmatprep.mubr.msk.bf16.mxu1 %vm1128_vm6, %v5910_v50 }
0x211e   : > { %v10629_v37 = vpop.f32.mrb[157].mxu1 }
0x211f   : > { %v5859_v45 = vpop.f32.mrb[158].mxu1 }
0x2120   : > { %v10630_v51 = vpop.f32.mrb[159].mxu1 }
0x2122   : > { %v5904_v52 = vpop.f32.mrb[168].mxu0 }
0x2123   : > { %v5911_v54 = vpack.c.bf16 %v5904_v52, %v5856_v30  ;;  %v10635_v58 = vpop.f32.mrb[169].mxu0 }
0x2124   : > { %v5907_v56 = vpop.f32.mrb[170].mxu0 }
0x2125   : > { %v10636_v0 = vpop.f32.mrb[171].mxu0  ;;  %10640 = vmatmul.mubr.msk.bf16.vlgmr.msra.gmra.mrb[144].mxu1 %vm1128_vm6, %v5911_v54 }
0x2126   : > { %10650 = vmatpush3.bf16.xpose.msra.mxu1 %v6032_v62  ;;  %10651 = vmatprep.mubr.msk.bf16.mxu1 %vm12111_vm4, %v12110_v9 }
0x2127   : > { %10661 = vmatprep.subr.bf16.mxu1 %v12110_v9 }
0x212b   : > { %v6018_v31 = vpop.f32.mrb[172].mxu0 }
0x212c   : > { %v10647_v35 = vpop.f32.mrb[173].mxu0  ;;  %v6174_v36 = vsel %vm1128_vm6, %v6018_v31, -inf }
0x212d   : > { %10652 = vmatmul.mubr.msk.bf16.vlgmr.msra.gmra.mrb[160].mxu1 %vm1128_vm6, %v6025_v60  ;;  %6175 = vmax.xlane.f32.xlu0 %v6174_v36  ;;  %v6021_v4 = vpop.f32.mrb[174].mxu0 }
0x212e   : > { %10662 = vmatpush3.bf16.xpose.msra.mxu1 %v6132_v20  ;;  %v10648_v6 = vpop.f32.mrb[175].mxu0  ;;  %10663 = vmatprep.mubr.msk.bf16.mxu1 %vm12111_vm4, %v12110_v9 }
0x212f   : > { %10673 = vmatprep.subr.bf16.mxu1 %v12110_v9 }
0x2133   : > { %v6118_v40 = vpop.f32.mrb[176].mxu0 }
0x2134   : > { %v10659_v43 = vpop.f32.mrb[177].mxu0  ;;  %v6180_v7 = vsel %vm1128_vm6, %v6118_v40, -inf }
0x2135   : > { %10664 = vmatmul.mubr.msk.bf16.vlgmr.msra.gmra.mrb[164].mxu1 %vm1128_vm6, %v6125_v41  ;;  %6181 = vmax.xlane.f32.xlu0 %v6180_v7  ;;  %v6121_v10 = vpop.f32.mrb[178].mxu0 }
0x2136   : > { %v10660_v28 = vpop.f32.mrb[179].mxu0  ;;  %10675 = vmatprep.mubr.msk.bf16.mxu1 %vm12111_vm4, %v12110_v9 }
0x2137   : > { %v4473_v28 = vld [vmem:[#allocation26 + $0x1c] sm:$0xf] }
0x21ba   : > { %v6176_v34 = vpop.xlane.xlu0 %6175 }
0x21bb   : > { %v6186_v39 = vsub.f32 %v6018_v31, %v6176_v34  ;;  %v6423_v34 = vsel %vm1132_vm5, %v4473_v28, 0 }
0x21bd   : > { %v6190_v33 = vmul.f32 1.442695, %v6186_v39 }
0x21bf   : > { %11405 = vpow2.f32 %v6190_v33 }
0x21c2   : > { %v6182_v42 = vpop.xlane.xlu0 %6181 }
0x21c3   : > { %v6188_v14 = vsub.f32 %v6118_v40, %v6182_v42 }
0x21c5   : > { %v6194_v11 = vmul.f32 1.442695, %v6188_v14 }
0x21c7   : > { %11407 = vpow2.f32 %v6194_v11 }
0x21c9   : > { %v11406_v27 = vpop.eup %11405 }
0x21ca   : > { %v6198_v13 = vsel %vm1128_vm6, %v11406_v27, 0.0 }
0x21d1   : > { %v11408_v44 = vpop.eup %11407 }
0x21d2   : > { %v6204_v19 = vsel %vm1128_vm6, %v11408_v44, 0.0 }
0x2200   : > { %v6068_v57 = vpop.f32.mrb[160].mxu1 }
0x2201   : > { %v10653_v59 = vpop.f32.mrb[161].mxu1  ;;  %v6177_v61 = vsel %vm1128_vm6, %v6068_v57, -inf }
0x2202   : > { %6178 = vmax.xlane.f32.xlu1 %v6177_v61  ;;  %v6071_v12 = vpop.f32.mrb[162].mxu1 }
0x2203   : > { %v10654_v55 = vpop.f32.mrb[163].mxu1 }
0x2204   : > { %v9693_v55 = vld [vmem:[#allocation27 + $0x1] ss:$0 sm:$0xff] }
0x2206   : > { %6199 = vadd.xlane.f32.xlu1 %v6198_v13 }
0x2208   : > { %v6168_v15 = vpop.f32.mrb[164].mxu1 }
0x2209   : > { %v10665_v17 = vpop.f32.mrb[165].mxu1  ;;  %v6183_v18 = vsel %vm1128_vm6, %v6168_v15, -inf }
0x220a   : > { %v6171_v21 = vpop.f32.mrb[166].mxu1  ;;  %6184 = vmax.xlane.f32.xlu0 %v6183_v18  ;;  %6205 = vadd.xlane.f32.xlu1 %v6204_v19 }
0x220b   : > { %v10666_v53 = vpop.f32.mrb[167].mxu1 }
0x221b   : > { %6222 = vrot.lane.b32.xlu1 %v13360_v63, %s12122_s11 }
0x221f   : > { %6318 = vrot.lane.b32.xlu1 %v13366_v16, %s12122_s11 }
0x2223   : > { %6366 = vrot.lane.b32.xlu1 %v13370_v3, %s12122_s11 }
0x2227   : > { %6500 = vrot.lane.b32.xlu1 %v12900_v49, %s12113_s27 }
0x222b   : > { %6550 = vrot.lane.b32.xlu1 %v12908_v8, %s12113_s27 }
0x222f   : > { %6600 = vrot.lane.b32.xlu1 %v12898_v48, %s12113_s27 }
0x2233   : > { %6650 = vrot.lane.b32.xlu1 %v12919_v26, %s12113_s27 }
0x228f   : > { %v6179_v22 = vpop.xlane.xlu1 %6178 }
0x2290   : > { %v6187_v63 = vsub.f32 %v6068_v57, %v6179_v22 }
0x2292   : > { %v6192_v24 = vmul.f32 1.442695, %v6187_v63 }
0x2293   : > { %v6200_v50 = vpop.xlane.xlu1 %6199 }
0x2294   : > { %11409 = vpow2.f32 %v6192_v24 }
0x2295   : > { %11411 = vrcp.f32 %v6200_v50 }
0x2297   : > { %v6206_v16 = vpop.xlane.xlu1 %6205  ;;  %v6185_v3 = vpop.xlane.xlu0 %6184 }
0x2298   : > { %v6189_v25 = vsub.f32 %v6168_v15, %v6185_v3  ;;  %11413 = vrcp.f32 %v6206_v16 }
0x229a   : > { %v6196_v49 = vmul.f32 1.442695, %v6189_v25 }
0x229b   : > { %v6223_v29 = vpop.permute.xlu1 %6222 }
0x229c   : > { %11415 = vpow2.f32 %v6196_v49  ;;  %v6228_v8 = vsel %vm1132_vm5, %v6223_v29, 0  ;;  %v11493_v29 = vld [vmem:[%s12806_s23 + $0x10] sm:$0xff]  }
0x229d   : > { %10668 = vmatpush3.bf16.msra.mxu0 %v6228_v8 }
0x229e   : > { %v11410_v48 = vpop.eup %11409  ;;  %10679 = vmatprep.subr.bf16.mxu0 %v12110_v9 }
0x229f   : > { %v11412_v26 = vpop.eup %11411  ;;  %v6201_v30 = vsel %vm1128_vm6, %v11410_v48, 0.0  ;;  %v6319_v37 = vpop.permute.xlu1 %6318 }
0x22a0   : > { %v6214_v32 = vmul.f32 %v11412_v26, %v11406_v27  ;;  %6202 = vadd.xlane.f32.xlu0 %v6201_v30  ;;  %v6324_v51 = vsel %vm1132_vm5, %v6319_v37, 0 }
0x22a2   : > { %v6218_v38 = vpack.c.bf16 %v6214_v32, %v6214_v32  ;;  %v11414_v45 = vpop.eup %11413  ;;  %v11495_v32 = vld [vmem:[%s12806_s23 + $0x8] sm:$0xff]  }
0x22a3   : > { %v6216_v54 = vmul.f32 %v11414_v45, %v11408_v44  ;;  %v6367_v35 = vpop.permute.xlu1 %6366 }
0x22a4   : > { %10670 = vmatmul.mubr.msk.bf16.vlgmr.msra.gmra.mrb[180].mxu0 %vm1128_vm6, %v6218_v38  ;;  %v11496_v38 = vld [vmem:[%s12806_s23 + $0x18] sm:$0xff]  }
0x22a5   : > { %10680 = vmatpush3.bf16.msra.mxu0 %v6324_v51  ;;  %10681 = vmatprep.mubr.msk.bf16.mxu0 %vm12111_vm4, %v12110_v9  ;;  %v6220_v60 = vpack.c.bf16 %v6216_v54, %v6216_v54 }
0x22a6   : > { %v11416_v52 = vpop.eup %11415  ;;  %10697 = vmatprep.subr.bf16.mxu0 %v12110_v9 }
0x22a7   : > { %v6207_v58 = vsel %vm1128_vm6, %v11416_v52, 0.0  ;;  %v6501_v45 = vpop.permute.xlu1 %6500 }
0x22a8   : > { %6208 = vadd.xlane.f32.xlu0 %v6207_v58 }
0x22ac   : > { %10682 = vmatmul.mubr.msk.bf16.vlgmr.msra.gmra.mrb[184].mxu0 %vm1128_vm6, %v6220_v60 }
0x22ad   : > { %10699 = vmatprep.mubr.msk.bf16.mxu0 %vm12111_vm4, %v12110_v9 }
0x22be   : > { %6270 = vrot.lane.b32.xlu0 %v13362_v2, %s12122_s11 }
0x22c2   : > { %6498 = vrot.lane.b32.xlu0 %v12896_v47, %s12113_s27 }
0x22c6   : > { %6548 = vrot.lane.b32.xlu0 %v12906_v5, %s12113_s27  ;;  %v6372_v5 = vsel %vm1132_vm5, %v6367_v35, 0 }
0x22ca   : > { %6598 = vrot.lane.b32.xlu0 %v12894_v46, %s12113_s27 }
0x22ce   : > { %6648 = vrot.lane.b32.xlu0 %v12917_v23, %s12113_s27 }
0x232d   : > { %v6203_v56 = vpop.xlane.xlu0 %6202 }
0x232e   : > { %11417 = vrcp.f32 %v6203_v56 }
0x2335   : > { %v6209_v62 = vpop.xlane.xlu0 %6208 }
0x2336   : > { %11419 = vrcp.f32 %v6209_v62 }
0x2338   : > { %v11418_v0 = vpop.eup %11417 }
0x2339   : > { %v6215_v1 = vmul.f32 %v11418_v0, %v11410_v48  ;;  %v6271_v31 = vpop.permute.xlu0 %6270  ;;  %v11494_v48 = vld [vmem:[%s12806_s23] sm:$0xff]   ;;  %s14104_s23 = scalar_lea.hbm %s14283_s15, %s9761_s29 }
0x233a   : > { %v6276_v2 = vsel %vm1132_vm5, %v6271_v31, 0 }
0x233b   : > { %10674 = vmatpush3.bf16.msra.mxu1 %v6276_v2  ;;  %v6219_v47 = vpack.c.bf16 %v6215_v1, %v6215_v1 }
0x233c   : > { %10685 = vmatprep.subr.bf16.mxu1 %v12110_v9 }
0x233d   : > { %v6499_v51 = vpop.permute.xlu0 %6498 }
0x233e   : > { %10676 = vmatmul.mubr.msk.bf16.vlgmr.msra.gmra.mrb[168].mxu1 %vm1128_vm6, %v6219_v47 }
0x233f   : > { %10686 = vmatpush3.bf16.msra.mxu1 %v6372_v5  ;;  %10687 = vmatprep.mubr.msk.bf16.mxu1 %vm12111_vm4, %v12110_v9 }
0x2340   : > { %v11420_v46 = vpop.eup %11419  ;;  %11042 = vmatprep.subr.msk.bf16.mxu1 %vm1132_vm5, %v4473_v28 }
0x2341   : > { %v6217_v23 = vmul.f32 %v11420_v46, %v11416_v52  ;;  %v6551_v52 = vpop.permute.xlu1 %6550  ;;  %v6549_v54 = vpop.permute.xlu0 %6548 }
0x2343   : > { %v6221_v36 = vpack.c.bf16 %v6217_v23, %v6217_v23 }
0x2345   : > { %v6601_v58 = vpop.permute.xlu1 %6600  ;;  %v6599_v60 = vpop.permute.xlu0 %6598 }
0x2346   : > { %10688 = vmatmul.mubr.msk.bf16.vlgmr.msra.gmra.mrb[172].mxu1 %vm1128_vm6, %v6221_v36 }
0x2347   : > { %10692 = vmatpush3.bf16.msra.mxu1 %v6423_v34 }
0x2348   : > { %10709 = vmatprep.subr.bf16.mxu1 %v12110_v9 }
0x2377   : > { %v6264_v20 = vpop.f32.mrb[180].mxu0 }
0x2378   : > { %v10671_v4 = vpop.f32.mrb[181].mxu0 }
0x2379   : > { %v6267_v6 = vpop.f32.mrb[182].mxu0 }
0x237a   : > { %v10672_v40 = vpop.f32.mrb[183].mxu0 }
0x237f   : > { %v6360_v41 = vpop.f32.mrb[184].mxu0 }
0x2380   : > { %v10683_v43 = vpop.f32.mrb[185].mxu0 }
0x2381   : > { %v6363_v7 = vpop.f32.mrb[186].mxu0 }
0x2382   : > { %v10684_v10 = vpop.f32.mrb[187].mxu0 }
0x2411   : > { %v6312_v39 = vpop.f32.mrb[168].mxu1 }
0x2412   : > { %v6414_v42 = vpack.c.bf16 %v6312_v39, %v6264_v20  ;;  %v10677_v33 = vpop.f32.mrb[169].mxu1 }
0x2413   : > { %v6315_v14 = vpop.f32.mrb[170].mxu1  ;;  %v11497_v33 = vld [vmem:[%s12808_s17] sm:$0xf] }
0x2414   : > { %v10678_v11 = vpop.f32.mrb[171].mxu1  ;;  %10693 = vmatprep.mubr.msk.bf16.mxu1 %vm1128_vm6, %v6414_v42 }
0x2419   : > { %v6408_v57 = vpop.f32.mrb[172].mxu1 }
0x241a   : > { %v6415_v59 = vpack.c.bf16 %v6408_v57, %v6360_v41  ;;  %v10689_v61 = vpop.f32.mrb[173].mxu1 }
0x241b   : > { %v6411_v27 = vpop.f32.mrb[174].mxu1 }
0x241c   : > { %v10690_v12 = vpop.f32.mrb[175].mxu1  ;;  %10694 = vmatmul.mubr.msk.bf16.vlgmr.msra.gmra.mrb[144].mxu1 %vm1128_vm6, %v6415_v59  ;;  %v6649_v59 = vpop.permute.xlu0 %6648 }
0x241d   : > { %10711 = vmatprep.mubr.msk.bf16.mxu1 %vm12111_vm4, %v12110_v9 }
0x24ef   : > { %v10695_v13 = vpop.f32.mrb[144].mxu1 }
0x24f0   : > { %v6488_v44 = vadd.f32 %v10695_v13, %v9693_v55  ;;  %v6459_v15 = vpop.f32.mrb[145].mxu1 }
0x24f1   : > { %v6486_v17 = vadd.f32 %v9693_v55, %v6459_v15  ;;  %v10696_v18 = vpop.f32.mrb[146].mxu1 }
0x24f2   : > { %v13702_v19 = vmax.f32 %v6488_v44, 0.0  ;;  %v6462_v21 = vpop.f32.mrb[147].mxu1  ;;  %v6489_v3 = vadd.f32 %v10696_v18, %v9693_v55  ;;  %v11499_v18 = vld [vmem:[%s12808_s17 + $0x8] sm:$0xf] }
0x24f3   : > { %v13704_v53 = vmax.f32 %v6486_v17, 0.0  ;;  %v6487_v22 = vadd.f32 %v9693_v55, %v6462_v21  ;;  %v6651_v55 = vpop.permute.xlu1 %6650  ;;  %v11498_v17 = vld [vmem:[%s12808_s17 + $0x4] sm:$0xf] }
0x24f4   : > { %v6496_v63 = vpack.c.bf16 %v13702_v19, %v13702_v19  ;;  %v13720_v8 = vmax.f32 %v6489_v3, 0.0  ;;  %v11286_v3 = vld [vmem:[#allocation17 + $0x28] sm:$0xff]  }
0x24f5   : > { %v6494_v24 = vpack.c.bf16 %v13704_v53, %v13704_v53  ;;  %v13710_v50 = vmax.f32 %v6487_v22, 0.0 }
0x24f6   : > { %v6605_v16 = vsel %vm1132_vm5, %v6496_v63, 0  ;;  %v6497_v30 = vpack.c.bf16 %v13720_v8, %v13720_v8 }
0x24f7   : > { %v6495_v25 = vpack.c.bf16 %v13710_v50, %v13710_v50  ;;  %10710 = vmatpush3.bf16.msra.mxu1 %v6605_v16  ;;  %v6505_v49 = vsel %vm1132_vm5, %v6494_v24, 0  ;;  %v11500_v24 = vld [vmem:[%s12808_s17 + $0xc] sm:$0xf]  ;;  %s12124_s17 = smov [#allocation30]  }
0x24f8   : > { %10698 = vmatpush3.bf16.msra.mxu0 %v6505_v49  ;;  %10721 = vmatprep.subr.bf16.mxu1 %v12110_v9  ;;  %v6655_v37 = vsel %vm1132_vm5, %v6497_v30, 0  ;;  %v11285_v16 = vld [vmem:[#allocation17 + $0x20] sm:$0xff]  }
0x24f9   : > { %10703 = vmatprep.subr.bf16.mxu0 %v12110_v9  ;;  %v6555_v26 = vsel %vm1132_vm5, %v6495_v25, 0  ;;  %v11287_v25 = vld [vmem:[#allocation20 + $0x40] sm:$0xff]   ;;  %v11288_v49 = vld [vmem:[#allocation20 + $0x48] sm:$0xff]  }
0x24fa   : > { %10712 = vmatmul.mubr.msk.bf16.vlgmr.msra.gmra.mrb[176].mxu1 %vm1128_vm6, %v11493_v29 }
0x24fb   : > { %10700 = vmatmul.mubr.msk.bf16.vlgmr.msra.gmra.mrb[188].mxu0 %vm1128_vm6, %v11494_v48  ;;  %10723 = vmatprep.mubr.msk.bf16.mxu1 %vm12111_vm4, %v12110_v9 }
0x24fc   : > { %10704 = vmatpush3.bf16.msra.mxu0 %v6555_v26  ;;  %10705 = vmatprep.mubr.msk.bf16.mxu0 %vm12111_vm4, %v12110_v9 }
0x24fd   : > { %10715 = vmatprep.subr.bf16.mxu0 %v12110_v9 }
0x2503   : > { %10706 = vmatmul.mubr.msk.bf16.vlgmr.msra.gmra.mrb[192].mxu0 %vm1128_vm6, %v11495_v32 }
0x2504   : > { %10716 = vmatpush3.bf16.msra.mxu0 %v6655_v37  ;;  %10717 = vmatprep.mubr.msk.bf16.mxu0 %vm12111_vm4, %v12110_v9 }
0x2505   : > { %10727 = vmatprep.subr.bf16.mxu0 %v12110_v9 }
0x250b   : > { %10718 = vmatmul.mubr.msk.bf16.vlgmr.msra.gmra.mrb[196].mxu0 %vm1128_vm6, %v11496_v38 }
0x250c   : > { %10729 = vmatprep.mubr.msk.bf16.mxu0 %vm12111_vm4, %v12110_v9 }
0x25cd   : > { %v6641_v56 = vpop.f32.mrb[176].mxu1 }
0x25ce   : > { %v6642_v62 = vadd.f32 %v6641_v56, %v6599_v60  ;;  %v6541_v0 = vpop.f32.mrb[188].mxu0  ;;  %v10713_v1 = vpop.f32.mrb[177].mxu1 }
0x25cf   : > { %v6542_v31 = vadd.f32 %v6541_v0, %v6499_v51  ;;  %v10701_v2 = vpop.f32.mrb[189].mxu0  ;;  %v6644_v35 = vpop.f32.mrb[178].mxu1 }
0x25d0   : > { %v6645_v47 = vadd.f32 %v6644_v35, %v6601_v58  ;;  %v6544_v5 = vpop.f32.mrb[190].mxu0  ;;  %v10714_v46 = vpop.f32.mrb[179].mxu1  ;;  %v6702_v20 = vmax.f32 %v6642_v62, 0.0 }
0x25d1   : > { %v6545_v23 = vadd.f32 %v6544_v5, %v6501_v45  ;;  %v10702_v36 = vpop.f32.mrb[191].mxu0  ;;  %v6698_v6 = vmax.f32 %v6542_v31, 0.0  ;;  %v11290_v5 = vld [vmem:[#allocation20 + $0x58] sm:$0xff]  }
0x25d2   : > { %v6703_v4 = vmax.f32 %v6645_v47, 0.0  ;;  %v9702_v46 = vld [vmem:[#allocation18 + $0x2] ss:$0 sm:$0xff] }
0x25d3   : > { %v6699_v40 = vmax.f32 %v6545_v23, 0.0 }
0x25d4   : > { %v6708_v41 = vpack.c.bf16 %v6703_v4, %v6702_v20 }
0x25d5   : > { %v6706_v43 = vpack.c.bf16 %v6699_v40, %v6698_v6 }
0x25d6   : > { %v6591_v7 = vpop.f32.mrb[192].mxu0 }
0x25d7   : > { %v6592_v10 = vadd.f32 %v6591_v7, %v6549_v54  ;;  %v10707_v28 = vpop.f32.mrb[193].mxu0  ;;  %10722 = vmatpush3.bf16.msra.mxu1 %v6706_v43 }
0x25d8   : > { %v6594_v34 = vpop.f32.mrb[194].mxu0  ;;  %10733 = vmatprep.subr.bf16.mxu1 %v12110_v9 }
0x25d9   : > { %v6595_v39 = vadd.f32 %v6594_v34, %v6551_v52  ;;  %v10708_v42 = vpop.f32.mrb[195].mxu0  ;;  %v6700_v14 = vmax.f32 %v6592_v10, 0.0 }
0x25da   : > { %10724 = vmatmul.mubr.msk.bf16.vlgmr.msra.gmra.mrb[180].mxu1 %vm1345_vm7, %v11497_v33  ;;  %v11292_v42 = vld [vmem:[#allocation23 + $0x28] sm:$0xff]  }
0x25db   : > { %v6701_v11 = vmax.f32 %v6595_v39, 0.0  ;;  %10734 = vmatpush3.bf16.msra.mxu1 %v6708_v41  ;;  %10735 = vmatprep.mubr.msk.bf16.mxu1 %vm12111_vm4, %v12110_v9  ;;  %v11291_v39 = vld [vmem:[#allocation23 + $0x20] sm:$0xff]  }
0x25dc   : > { %10745 = vmatprep.subr.bf16.mxu1 %v11285_v16 }
0x25dd   : > { %v6707_v57 = vpack.c.bf16 %v6701_v11, %v6700_v14  ;;  %v9707_v14 = vld [vmem:[#allocation21 + $0x2] ss:$0 sm:$0xff] }
0x25de   : > { %v6691_v61 = vpop.f32.mrb[196].mxu0 }
0x25df   : > { %v6692_v27 = vadd.f32 %v6691_v61, %v6649_v59  ;;  %v10719_v12 = vpop.f32.mrb[197].mxu0  ;;  %10728 = vmatpush3.bf16.msra.mxu0 %v6707_v57 }
0x25e0   : > { %v6694_v13 = vpop.f32.mrb[198].mxu0  ;;  %10739 = vmatprep.subr.bf16.mxu0 %v12110_v9 }
0x25e1   : > { %v6695_v44 = vadd.f32 %v6694_v13, %v6651_v55  ;;  %v10720_v15 = vpop.f32.mrb[199].mxu0  ;;  %v6704_v21 = vmax.f32 %v6692_v27, 0.0 }
0x25e2   : > { %10730 = vmatmul.mubr.msk.bf16.vlgmr.msra.gmra.mrb[200].mxu0 %vm1345_vm7, %v11498_v17  ;;  %10736 = vmatmul.mubr.msk.bf16.vlgmr.msra.gmra.mrb[184].mxu1 %vm1345_vm7, %v11499_v18  ;;  %v9714_v15 = vld [vmem:[#allocation24 + $0x2] ss:$0 sm:$0xff] }
0x25e3   : > { %v6705_v22 = vmax.f32 %v6695_v44, 0.0  ;;  %10741 = vmatprep.mubr.msk.bf16.mxu0 %vm12111_vm4, %v12110_v9  ;;  %10746 = vmatpush3.bf16.msra.mxu1 %v11285_v16 }
0x25e4   : > { %10747 = vmatprep.subr.bf16.mxu1 %v11286_v3 }
0x25e5   : > { %v6709_v63 = vpack.c.bf16 %v6705_v22, %v6704_v21 }
0x25e7   : > { %10740 = vmatpush3.bf16.msra.mxu0 %v6709_v63  ;;  %10748 = vmatpush3.bf16.msra.mxu1 %v11286_v3 }
0x25e8   : > { %10753 = vmatprep.subr.bf16.mxu0 %v11287_v25  ;;  %10765 = vmatprep.subr.bf16.mxu1 %v11291_v39 }
0x25ea   : > { %10742 = vmatmul.mubr.msk.bf16.vlgmr.msra.gmra.mrb[204].mxu0 %vm1345_vm7, %v11500_v24 }
0x25eb   : > { %10754 = vmatpush3.bf16.msra.mxu0 %v11287_v25 }
0x25ec   : > { %10755 = vmatprep.subr.bf16.mxu0 %v11288_v49 }
0x25ef   : > { %10756 = vmatpush3.bf16.msra.mxu0 %v11288_v49 }
0x26ad   : > { %v6744_v29 = vpop.f32.mrb[180].mxu1 }
0x26ae   : > { %v10725_v48 = vpop.f32.mrb[181].mxu1  ;;  %v6870_v38 = vadd.f32 %v6744_v29, %v13704_v53 }
0x26af   : > { %v6747_v26 = vpop.f32.mrb[182].mxu1 }
0x26b0   : > { %v10726_v30 = vpop.f32.mrb[183].mxu1 }
0x26b5   : > { %v6784_v32 = vpop.f32.mrb[200].mxu0  ;;  %v6824_v37 = vpop.f32.mrb[184].mxu1 }
0x26b6   : > { %v6871_v45 = vadd.f32 %v6784_v32, %v13710_v50  ;;  %v10731_v51 = vpop.f32.mrb[201].mxu0  ;;  %v10737_v52 = vpop.f32.mrb[185].mxu1  ;;  %v6872_v1 = vadd.f32 %v6824_v37, %v13702_v19  ;;  %v11289_v50 = vld [vmem:[#allocation20 + $0x50] sm:$0xff]  }
0x26b7   : > { %v6787_v54 = vpop.f32.mrb[202].mxu0  ;;  %v6827_v58 = vpop.f32.mrb[186].mxu1  ;;  %10757 = vmatprep.subr.bf16.mxu0 %v11289_v50 }
0x26b8   : > { %v6874_v60 = vpack.c.bf16 %v6871_v45, %v6870_v38  ;;  %v10732_v56 = vpop.f32.mrb[203].mxu0  ;;  %v10738_v62 = vpop.f32.mrb[187].mxu1  ;;  %10758 = vmatpush3.bf16.msra.mxu0 %v11289_v50 }
0x26b9   : > { %10759 = vmatprep.subr.bf16.mxu0 %v11290_v5 }
0x26ba   : > { %10749 = vmatprep.mubr.msk.bf16.mxu1 %vm1547_vm8, %v6874_v60 }
0x26bc   : > { %10760 = vmatpush3.bf16.msra.mxu0 %v11290_v5 }
0x26bd   : > { %v6864_v0 = vpop.f32.mrb[204].mxu0  ;;  %10779 = vmatprep.subr.bf16.mxu0 %v12110_v9 }
0x26be   : > { %v6873_v31 = vadd.f32 %v6864_v0, %v13720_v8  ;;  %v10743_v2 = vpop.f32.mrb[205].mxu0 }
0x26bf   : > { %v6867_v35 = vpop.f32.mrb[206].mxu0 }
0x26c0   : > { %v6875_v47 = vpack.c.bf16 %v6873_v31, %v6872_v1  ;;  %v10744_v53 = vpop.f32.mrb[207].mxu0 }
0x26c2   : > { %10750 = vmatmul.mubr.msk.bf16.vlgmr.msra.gmra.mrb[188].mxu1 %vm1547_vm8, %v6875_v47 }
0x26c3   : > { %10766 = vmatpush3.bf16.msra.mxu1 %v11291_v39 }
0x26c4   : > { %10767 = vmatprep.subr.bf16.mxu1 %v11292_v42 }
0x26c7   : > { %10768 = vmatpush3.bf16.msra.mxu1 %v11292_v42 }
0x26c8   : > { %10773 = vmatprep.subr.bf16.mxu1 %v12110_v9 }
0x2795   : > { %v10751_v23 = vpop.f32.mrb[188].mxu1 }
0x2796   : > { %v6950_v36 = vadd.f32 %v10751_v23, %v9702_v46  ;;  %v6941_v19 = vpop.f32.mrb[189].mxu1 }
0x2797   : > { %v6942_v20 = vadd.f32 %v9702_v46, %v6941_v19  ;;  %v10752_v8 = vpop.f32.mrb[190].mxu1 }
0x2798   : > { %v6953_v4 = vadd.f32 %v10752_v8, %v9702_v46  ;;  %v6944_v6 = vpop.f32.mrb[191].mxu1  ;;  %v6958_v41 = vmax.f32 %v6950_v36, 0.0 }
0x2799   : > { %v6945_v40 = vadd.f32 %v9702_v46, %v6944_v6  ;;  %v6956_v7 = vmax.f32 %v6942_v20, 0.0 }
0x279a   : > { %v6959_v43 = vmax.f32 %v6953_v4, 0.0 }
0x279b   : > { %v6957_v10 = vmax.f32 %v6945_v40, 0.0 }
0x279c   : > { %v6961_v28 = vpack.c.bf16 %v6959_v43, %v6958_v41 }
0x279d   : > { %v6960_v34 = vpack.c.bf16 %v6957_v10, %v6956_v7 }
0x279f   : > { %10761 = vmatprep.mubr.msk.bf16.mxu0 %vm1648_vm9, %v6960_v34 }
0x27a0   : > { %10762 = vmatmul.mubr.msk.bf16.vlgmr.msra.gmra.mrb[208].mxu0 %vm1648_vm9, %v6961_v28 }
0x27a1   : > { %10781 = vmatprep.mubr.msk.bf16.mxu0 %vm12111_vm4, %v12110_v9 }
0x2873   : > { %v10763_v33 = vpop.f32.mrb[208].mxu0 }
0x2874   : > { %v7043_v11 = vpop.f32.mrb[209].mxu0  ;;  %v7052_v59 = vadd.f32 %v10763_v33, %v9707_v14 }
0x2875   : > { %v10764_v57 = vpop.f32.mrb[210].mxu0  ;;  %v7044_v12 = vadd.f32 %v9707_v14, %v7043_v11 }
0x2876   : > { %v7055_v61 = vadd.f32 %v10764_v57, %v9707_v14  ;;  %v7046_v27 = vpop.f32.mrb[211].mxu0 }
0x2877   : > { %v7047_v55 = vadd.f32 %v9707_v14, %v7046_v27 }
0x2878   : > { %v7059_v13 = vpack.c.bf16 %v7055_v61, %v7052_v59 }
0x2879   : > { %v7058_v44 = vpack.c.bf16 %v7047_v55, %v7044_v12 }
0x287b   : > { %10769 = vmatprep.mubr.msk.bf16.mxu1 %vm1547_vm8, %v7058_v44 }
0x287c   : > { %10770 = vmatmul.mubr.msk.bf16.vlgmr.msra.gmra.mrb[192].mxu1 %vm1547_vm8, %v7059_v13 }
0x287d   : > { %10775 = vmatprep.mubr.msk.bf16.mxu1 %vm12111_vm4, %v12110_v9 }
0x294f   : > { %v10771_v17 = vpop.f32.mrb[192].mxu1 }
0x2950   : > { %v7125_v18 = vpop.f32.mrb[193].mxu1  ;;  %v7134_v24 = vadd.f32 %v10771_v17, %v9714_v15 }
0x2951   : > { %v7126_v21 = vadd.f32 %v9714_v15, %v7125_v18  ;;  %v10772_v22 = vpop.f32.mrb[194].mxu1 }
0x2952   : > { %v7128_v63 = vpop.f32.mrb[195].mxu1  ;;  %v7137_v25 = vadd.f32 %v10772_v22, %v9714_v15  ;;  %v13778_v29 = vpack.c.bf16 %v7134_v24, %v7134_v24 }
0x2953   : > { %v13772_v16 = vpack.c.bf16 %v7126_v21, %v7126_v21  ;;  %v7129_v3 = vadd.f32 %v9714_v15, %v7128_v63 }
0x2954   : > { %v13782_v48 = vpack.c.bf16 %v7137_v25, %v7137_v25 }
0x2955   : > { %v13774_v49 = vpack.c.bf16 %v7129_v3, %v7129_v3  ;;  %7150 = vrot.lane.b32.xlu0 %v13772_v16, %s12112_s14 }
0x2957   : > { %7199 = vrot.lane.b32.xlu1 %v13774_v49, %s12112_s14 }
0x2959   : > { %7248 = vrot.lane.b32.xlu0 %v13778_v29, %s12112_s14 }
0x295b   : > { %7297 = vrot.lane.b32.xlu1 %v13782_v48, %s12112_s14  ;;  %s11989_s14 = sshll.u32 %s12124_s17, 4  ;;  %s11990_s14 = int_to_ptr.vmem [resolvable:$false] %s11989_s14 }
0x295c   : > { %p11992_p3 = scmp.lt.s32.totalorder %s14106_s2, %s11990_s14 }
0x29c7   : > { %v7151_v26 = vpop.permute.xlu0 %7150 }
0x29c8   : > { %v7156_v30 = vsel %vm1128_vm6, %v7151_v26, 0 }
0x29c9   : > { %v7200_v32 = vpop.permute.xlu1 %7199  ;;  %10774 = vmatpush3.bf16.xpose.msra.mxu1 %v7156_v30 }
0x29ca   : > { %v7205_v37 = vsel %vm1128_vm6, %v7200_v32, 0  ;;  %10785 = vmatprep.subr.bf16.mxu1 %v12110_v9 }
0x29cb   : > { %10780 = vmatpush3.bf16.xpose.msra.mxu0 %v7205_v37  ;;  %v7249_v38 = vpop.permute.xlu0 %7248 }
0x29cc   : > { %10791 = vmatprep.subr.bf16.mxu0 %v12110_v9  ;;  %v7254_v51 = vsel %vm1128_vm6, %v7249_v38, 0 }
0x29cd   : > { %v7298_v45 = vpop.permute.xlu1 %7297 }
0x29ce   : > { %v7303_v52 = vsel %vm1128_vm6, %v7298_v45, 0 }
0x29d0   : > { %10776 = vmatmul.mubr.msk.bf16.vlgmr.msra.gmra.mrb[196].mxu1 %vm1128_vm6, %v13772_v16 }
0x29d1   : > { %10786 = vmatpush3.bf16.xpose.msra.mxu1 %v7254_v51  ;;  %10787 = vmatprep.mubr.msk.bf16.mxu1 %vm12111_vm4, %v12110_v9 }
0x29d2   : > { %10782 = vmatmul.mubr.msk.bf16.vlgmr.msra.gmra.mrb[212].mxu0 %vm1128_vm6, %v13774_v49  ;;  %10797 = vmatprep.subr.bf16.mxu1 %v12110_v9 }
0x29d3   : > { %10792 = vmatpush3.bf16.xpose.msra.mxu0 %v7303_v52  ;;  %10793 = vmatprep.mubr.msk.bf16.mxu0 %vm12111_vm4, %v12110_v9 }
0x29d4   : > { %10803 = vmatprep.subr.bf16.mxu0 %v12110_v9 }
0x29d8   : > { %10788 = vmatmul.mubr.msk.bf16.vlgmr.msra.gmra.mrb[200].mxu1 %vm1128_vm6, %v13778_v29 }
0x29d9   : > { %10799 = vmatprep.mubr.msk.bf16.mxu1 %vm12111_vm4, %v12110_v9 }
0x29da   : > { %10794 = vmatmul.mubr.msk.bf16.vlgmr.msra.gmra.mrb[216].mxu0 %vm1128_vm6, %v13782_v48 }
0x29db   : > { %10805 = vmatprep.mubr.msk.bf16.mxu0 %vm12111_vm4, %v12110_v9 }
0x2aa3   : > { %v7192_v54 = vpop.f32.mrb[196].mxu1 }
0x2aa4   : > { %v10777_v58 = vpop.f32.mrb[197].mxu1  ;;  %v7345_v60 = vsel %vm1128_vm6, %v7192_v54, -inf }
0x2aa5   : > { %v7241_v56 = vpop.f32.mrb[212].mxu0  ;;  %7346 = vmax.xlane.f32.xlu0 %v7345_v60  ;;  %v7195_v62 = vpop.f32.mrb[198].mxu1 }
0x2aa6   : > { %v10778_v0 = vpop.f32.mrb[199].mxu1  ;;  %v10783_v1 = vpop.f32.mrb[213].mxu0  ;;  %v7348_v31 = vsel %vm1128_vm6, %v7241_v56, -inf }
0x2aa7   : > { %7349 = vmax.xlane.f32.xlu1 %v7348_v31  ;;  %v7244_v2 = vpop.f32.mrb[214].mxu0 }
0x2aa8   : > { %v10784_v35 = vpop.f32.mrb[215].mxu0 }
0x2aab   : > { %v7290_v47 = vpop.f32.mrb[200].mxu1 }
0x2aac   : > { %v10789_v53 = vpop.f32.mrb[201].mxu1  ;;  %v7351_v50 = vsel %vm1128_vm6, %v7290_v47, -inf }
0x2aad   : > { %v7339_v5 = vpop.f32.mrb[216].mxu0  ;;  %7352 = vmax.xlane.f32.xlu0 %v7351_v50  ;;  %v7293_v46 = vpop.f32.mrb[202].mxu1 }
0x2aae   : > { %v10790_v23 = vpop.f32.mrb[203].mxu1  ;;  %v10795_v36 = vpop.f32.mrb[217].mxu0  ;;  %v7354_v8 = vsel %vm1128_vm6, %v7339_v5, -inf }
0x2aaf   : > { %v7342_v19 = vpop.f32.mrb[218].mxu0 }
0x2ab0   : > { %v10796_v20 = vpop.f32.mrb[219].mxu0 }
0x2ab1   : > { %7355 = vmax.xlane.f32.xlu0 %v7354_v8 }
0x2ab8   : > { %7393 = vrot.lane.b32.xlu1 %v13772_v16, %s12113_s27 }
0x2b32   : > { %v7347_v4 = vpop.xlane.xlu0 %7346 }
0x2b33   : > { %v7357_v6 = vsub.f32 %v7192_v54, %v7347_v4 }
0x2b34   : > { %v7350_v40 = vpop.xlane.xlu1 %7349 }
0x2b35   : > { %v7361_v41 = vmul.f32 1.442695, %v7357_v6  ;;  %v7358_v43 = vsub.f32 %v7241_v56, %v7350_v40 }
0x2b37   : > { %11421 = vpow2.f32 %v7361_v41  ;;  %v7363_v7 = vmul.f32 1.442695, %v7358_v43 }
0x2b38   : > { %v7394_v10 = vpop.permute.xlu1 %7393 }
0x2b39   : > { %11423 = vpow2.f32 %v7363_v7  ;;  %v7399_v28 = vsel %vm1132_vm5, %v7394_v10, 0 }
0x2b3a   : > { %10798 = vmatpush3.bf16.msra.mxu1 %v7399_v28  ;;  %v7353_v14 = vpop.xlane.xlu0 %7352 }
0x2b3b   : > { %10809 = vmatprep.subr.bf16.mxu1 %v12110_v9  ;;  %v7359_v59 = vsub.f32 %v7290_v47, %v7353_v14 }
0x2b3d   : > { %v7365_v27 = vmul.f32 1.442695, %v7359_v59 }
0x2b3e   : > { %v7356_v11 = vpop.xlane.xlu0 %7355 }
0x2b3f   : > { %v7360_v57 = vsub.f32 %v7339_v5, %v7356_v11 }
0x2b41   : > { %v11422_v34 = vpop.eup %11421  ;;  %v7367_v61 = vmul.f32 1.442695, %v7360_v57 }
0x2b42   : > { %v7369_v39 = vsel %vm1128_vm6, %v11422_v34, 0.0 }
0x2b43   : > { %v11424_v42 = vpop.eup %11423  ;;  %7370 = vadd.xlane.f32.xlu1 %v7369_v39  ;;  %11425 = vpow2.f32 %v7367_v61 }
0x2b44   : > { %v7372_v33 = vsel %vm1128_vm6, %v11424_v42, 0.0  ;;  %11427 = vpow2.f32 %v7365_v27 }
0x2b45   : > { %7373 = vadd.xlane.f32.xlu0 %v7372_v33 }
0x2b4d   : > { %v11426_v12 = vpop.eup %11425 }
0x2b4e   : > { %v11428_v55 = vpop.eup %11427  ;;  %v7378_v13 = vsel %vm1128_vm6, %v11426_v12, 0.0 }
0x2b4f   : > { %v7375_v44 = vsel %vm1128_vm6, %v11428_v55, 0.0 }
0x2b54   : > { %7489 = vrot.lane.b32.xlu1 %v13778_v29, %s12113_s27 }
0x2b58   : > { %7537 = vrot.lane.b32.xlu1 %v13782_v48, %s12113_s27 }
0x2b5b   : > { %7441 = vrot.lane.b32.xlu0 %v13774_v49, %s12113_s27  ;;  %s11991_s27 = scalar_lea.vmem %s11990_s14, 32 }
0x2b5c   : > { %p11993_p2 = scmp.lt.s32.totalorder %s11991_s27, %s11985_s8 }
0x2b5e   : > { %p11994_p11 = por %p11993_p2, %p11992_p3 }
0x2b60   : > { %p11995_p1 = pnand %p11994_p11, %p11988_p12 }
0x2b7a   : > { %7379 = vadd.xlane.f32.xlu0 %v7378_v13 }
0x2b7c   : > { %7376 = vadd.xlane.f32.xlu1 %v7375_v44 }
0x2b8d   : > { %7639 = vrot.lane.b32.xlu1 %v13774_v49, %s12114_s6 }
0x2b90   : > { %7589 = vrot.lane.b32.xlu0 %v13772_v16, %s12114_s6 }
0x2b91   : > { %7637 = vrot.lane.b32.xlu1 %v13774_v49, %s12115_s4 }
0x2b94   : > { %7587 = vrot.lane.b32.xlu0 %v13772_v16, %s12115_s4 }
0x2b95   : > { %7739 = vrot.lane.b32.xlu1 %v13782_v48, %s12114_s6 }
0x2b98   : > { %7689 = vrot.lane.b32.xlu0 %v13778_v29, %s12114_s6 }
0x2b99   : > { %7737 = vrot.lane.b32.xlu1 %v13782_v48, %s12115_s4 }
0x2b9c   : > { %7687 = vrot.lane.b32.xlu0 %v13778_v29, %s12115_s4 }
0x2bd0   : > { %v7371_v15 = vpop.xlane.xlu1 %7370 }
0x2bd1   : > { %11429 = vrcp.f32 %v7371_v15 }
0x2bd2   : > { %v7374_v17 = vpop.xlane.xlu0 %7373 }
0x2bd3   : > { %11431 = vrcp.f32 %v7374_v17 }
0x2bd4   : > { %v7490_v22 = vpop.permute.xlu1 %7489 }
0x2bd5   : > { %v7495_v32 = vsel %vm1132_vm5, %v7490_v22, 0 }
0x2bd6   : > { %v7442_v18 = vpop.permute.xlu0 %7441 }
0x2bd7   : > { %v7447_v21 = vsel %vm1132_vm5, %v7442_v18, 0 }
0x2bd8   : > { %10804 = vmatpush3.bf16.msra.mxu0 %v7447_v21  ;;  %v7538_v30 = vpop.permute.xlu1 %7537 }
0x2bd9   : > { %10815 = vmatprep.subr.bf16.mxu0 %v12110_v9  ;;  %v7543_v38 = vsel %vm1132_vm5, %v7538_v30, 0 }
0x2bdb   : > { %v11430_v63 = vpop.eup %11429 }
0x2bdc   : > { %v7385_v24 = vmul.f32 %v11430_v63, %v11422_v34 }
0x2bdd   : > { %v11432_v3 = vpop.eup %11431 }
0x2bde   : > { %v7386_v25 = vmul.f32 %v11432_v3, %v11424_v42  ;;  %v7389_v26 = vpack.c.bf16 %v7385_v24, %v7385_v24 }
0x2be0   : > { %10800 = vmatmul.mubr.msk.bf16.vlgmr.msra.gmra.mrb[204].mxu1 %vm1128_vm6, %v7389_v26  ;;  %v7390_v37 = vpack.c.bf16 %v7386_v25, %v7386_v25 }
0x2be1   : > { %10810 = vmatpush3.bf16.msra.mxu1 %v7495_v32  ;;  %10811 = vmatprep.mubr.msk.bf16.mxu1 %vm12111_vm4, %v12110_v9 }
0x2be2   : > { %10806 = vmatmul.mubr.msk.bf16.vlgmr.msra.gmra.mrb[220].mxu0 %vm1128_vm6, %v7390_v37  ;;  %10821 = vmatprep.subr.bf16.mxu1 %v12110_v9 }
0x2be3   : > { %10816 = vmatpush3.bf16.msra.mxu0 %v7543_v38  ;;  %10817 = vmatprep.mubr.msk.bf16.mxu0 %vm12111_vm4, %v12110_v9 }
0x2be4   : > { %10827 = vmatprep.subr.bf16.mxu0 %v12110_v9 }
0x2c07   : > { %v7380_v45 = vpop.xlane.xlu0 %7379 }
0x2c08   : > { %11433 = vrcp.f32 %v7380_v45 }
0x2c09   : > { %v7377_v51 = vpop.xlane.xlu1 %7376 }
0x2c0a   : > { %11435 = vrcp.f32 %v7377_v51 }
0x2c0b   : > { %v7590_v58 = vpop.permute.xlu0 %7589 }
0x2c0c   : > { %v7595_v47 = vsel %vm1128_vm6, %v7590_v58, 0 }
0x2c0d   : > { %v7640_v52 = vpop.permute.xlu1 %7639 }
0x2c0e   : > { %v7645_v31 = vsel %vm1128_vm6, %v7640_v52, 0 }
0x2c0f   : > { %v7588_v35 = vpop.permute.xlu0 %7587 }
0x2c11   : > { %v7638_v1 = vpop.permute.xlu1 %7637 }
0x2c12   : > { %v11434_v54 = vpop.eup %11433 }
0x2c13   : > { %v7388_v60 = vmul.f32 %v11434_v54, %v11426_v12  ;;  %v7690_v50 = vpop.permute.xlu0 %7689 }
0x2c14   : > { %v11436_v56 = vpop.eup %11435  ;;  %v7695_v46 = vsel %vm1128_vm6, %v7690_v50, 0 }
0x2c15   : > { %v7387_v62 = vmul.f32 %v11436_v56, %v11428_v55  ;;  %v7392_v0 = vpack.c.bf16 %v7388_v60, %v7388_v60  ;;  %v7740_v53 = vpop.permute.xlu1 %7739 }
0x2c16   : > { %v7745_v5 = vsel %vm1128_vm6, %v7740_v53, 0 }
0x2c17   : > { %10818 = vmatmul.mubr.msk.bf16.vlgmr.msra.gmra.mrb[224].mxu0 %vm1128_vm6, %v7392_v0  ;;  %v7391_v2 = vpack.c.bf16 %v7387_v62, %v7387_v62  ;;  %v7688_v36 = vpop.permute.xlu0 %7687 }
0x2c18   : > { %10828 = vmatpush3.bf16.xpose.msra.mxu0 %v7645_v31  ;;  %10829 = vmatprep.mubr.msk.bf16.mxu0 %vm12111_vm4, %v12110_v9 }
0x2c19   : > { %10812 = vmatmul.mubr.msk.bf16.vlgmr.msra.gmra.mrb[208].mxu1 %vm1128_vm6, %v7391_v2  ;;  %10839 = vmatprep.subr.bf16.mxu0 %v12110_v9  ;;  %v7738_v23 = vpop.permute.xlu1 %7737 }
0x2c1a   : > { %10822 = vmatpush3.bf16.xpose.msra.mxu1 %v7595_v47  ;;  %10823 = vmatprep.mubr.msk.bf16.mxu1 %vm12111_vm4, %v12110_v9 }
0x2c1b   : > { %10833 = vmatprep.subr.bf16.mxu1 %v12110_v9 }
0x2c1f   : > { %10830 = vmatmul.mubr.msk.bf16.vlgmr.msra.gmra.mrb[228].mxu0 %vm1128_vm6, %v7638_v1 }
0x2c20   : > { %10840 = vmatpush3.bf16.xpose.msra.mxu0 %v7745_v5  ;;  %10841 = vmatprep.mubr.msk.bf16.mxu0 %vm12111_vm4, %v12110_v9 }
0x2c21   : > { %10824 = vmatmul.mubr.msk.bf16.vlgmr.msra.gmra.mrb[212].mxu1 %vm1128_vm6, %v7588_v35  ;;  %10851 = vmatprep.subr.bf16.mxu0 %v12110_v9 }
0x2c22   : > { %10834 = vmatpush3.bf16.xpose.msra.mxu1 %v7695_v46  ;;  %10835 = vmatprep.mubr.msk.bf16.mxu1 %vm12111_vm4, %v12110_v9 }
0x2c23   : > { %10845 = vmatprep.subr.bf16.mxu1 %v12110_v9 }
0x2c27   : > { %10842 = vmatmul.mubr.msk.bf16.vlgmr.msra.gmra.mrb[232].mxu0 %vm1128_vm6, %v7738_v23 }
0x2c28   : > { %10853 = vmatprep.mubr.msk.bf16.mxu0 %vm12111_vm4, %v12110_v9 }
0x2c29   : > { %10836 = vmatmul.mubr.msk.bf16.vlgmr.msra.gmra.mrb[216].mxu1 %vm1128_vm6, %v7688_v36 }
0x2c2a   : > { %10847 = vmatprep.mubr.msk.bf16.mxu1 %vm12111_vm4, %v12110_v9 }
0x2cb3   : > { %v13884_v19 = vpop.f32.mrb[204].mxu1 }
0x2cb4   : > { %v10801_v20 = vpop.f32.mrb[205].mxu1 }
0x2cb5   : > { %v7438_v8 = vpop.f32.mrb[206].mxu1  ;;  %v13886_v4 = vpop.f32.mrb[220].mxu0 }
0x2cb6   : > { %v7585_v6 = vpack.c.bf16 %v13886_v4, %v13884_v19  ;;  %v10802_v40 = vpop.f32.mrb[207].mxu1  ;;  %v10807_v41 = vpop.f32.mrb[221].mxu0 }
0x2cb7   : > { %v7486_v43 = vpop.f32.mrb[222].mxu0 }
0x2cb8   : > { %v10808_v7 = vpop.f32.mrb[223].mxu0 }
0x2cea   : > { %v13890_v10 = vpop.f32.mrb[224].mxu0 }
0x2ceb   : > { %v10819_v28 = vpop.f32.mrb[225].mxu0 }
0x2cec   : > { %v13892_v34 = vpop.f32.mrb[208].mxu1  ;;  %v7582_v39 = vpop.f32.mrb[226].mxu0 }
0x2ced   : > { %v7586_v42 = vpack.c.bf16 %v13890_v10, %v13892_v34  ;;  %v10813_v33 = vpop.f32.mrb[209].mxu1  ;;  %v10820_v14 = vpop.f32.mrb[227].mxu0 }
0x2cee   : > { %v7534_v11 = vpop.f32.mrb[210].mxu1 }
0x2cef   : > { %v10814_v57 = vpop.f32.mrb[211].mxu1 }
0x2cf2   : > { %v7681_v59 = vpop.f32.mrb[228].mxu0 }
0x2cf3   : > { %v10831_v61 = vpop.f32.mrb[229].mxu0  ;;  %v7790_v27 = vsel %vm1128_vm6, %v7681_v59, -inf }
0x2cf4   : > { %7791 = vmax.xlane.f32.xlu1 %v7790_v27  ;;  %v7631_v12 = vpop.f32.mrb[212].mxu1  ;;  %v7684_v55 = vpop.f32.mrb[230].mxu0 }
0x2cf5   : > { %v10825_v13 = vpop.f32.mrb[213].mxu1  ;;  %v10832_v44 = vpop.f32.mrb[231].mxu0  ;;  %v7787_v15 = vsel %vm1128_vm6, %v7631_v12, -inf }
0x2cf6   : > { %7788 = vmax.xlane.f32.xlu0 %v7787_v15  ;;  %v7634_v17 = vpop.f32.mrb[214].mxu1 }
0x2cf7   : > { %v10826_v18 = vpop.f32.mrb[215].mxu1 }
0x2cfa   : > { %v7781_v21 = vpop.f32.mrb[232].mxu0 }
0x2cfb   : > { %v10843_v22 = vpop.f32.mrb[233].mxu0  ;;  %v7796_v37 = vsel %vm1128_vm6, %v7781_v21, -inf }
0x2cfc   : > { %v7731_v63 = vpop.f32.mrb[216].mxu1  ;;  %v7784_v24 = vpop.f32.mrb[234].mxu0 }
0x2cfd   : > { %v10837_v3 = vpop.f32.mrb[217].mxu1  ;;  %v10844_v25 = vpop.f32.mrb[235].mxu0  ;;  %v7793_v26 = vsel %vm1128_vm6, %v7731_v63, -inf }
0x2cfe   : > { %7794 = vmax.xlane.f32.xlu0 %v7793_v26  ;;  %v7734_v30 = vpop.f32.mrb[218].mxu1 }
0x2cff   : > { %v10838_v32 = vpop.f32.mrb[219].mxu1 }
0x2d02   : > { %7797 = vmax.xlane.f32.xlu0 %v7796_v37 }
0x2d05   : > { %7835 = vrot.lane.b32.xlu1 %v13772_v16, %s12116_s1 }
0x2d81   : > { %v7792_v38 = vpop.xlane.xlu1 %7791 }
0x2d82   : > { %v7800_v45 = vsub.f32 %v7681_v59, %v7792_v38  ;;  %v7146_v38 = vld [vmem:[#allocation26 + $0x24] sm:$0xf] }
0x2d83   : > { %v7789_v51 = vpop.xlane.xlu0 %7788 }
0x2d84   : > { %v7805_v52 = vmul.f32 1.442695, %v7800_v45  ;;  %v7799_v54 = vsub.f32 %v7631_v12, %v7789_v51  ;;  %v8036_v45 = vsel %vm1132_vm5, %v7146_v38, 0  ;;  %v7145_v51 = vld [vmem:[#allocation26 + $0x20] sm:$0xf] }
0x2d85   : > { %v7836_v58 = vpop.permute.xlu1 %7835 }
0x2d86   : > { %11437 = vpow2.f32 %v7805_v52  ;;  %v7803_v60 = vmul.f32 1.442695, %v7799_v54  ;;  %v7841_v56 = vsel %vm1132_vm5, %v7836_v58, 0 }
0x2d87   : > { %10846 = vmatpush3.bf16.msra.mxu1 %v7841_v56 }
0x2d88   : > { %11439 = vpow2.f32 %v7803_v60  ;;  %10857 = vmatprep.subr.bf16.mxu1 %v12110_v9 }
0x2d8b   : > { %v7795_v62 = vpop.xlane.xlu0 %7794 }
0x2d8c   : > { %v7801_v0 = vsub.f32 %v7731_v63, %v7795_v62 }
0x2d8e   : > { %v7807_v1 = vmul.f32 1.442695, %v7801_v0 }
0x2d8f   : > { %v7798_v31 = vpop.xlane.xlu0 %7797 }
0x2d90   : > { %v11438_v2 = vpop.eup %11437  ;;  %11441 = vpow2.f32 %v7807_v1  ;;  %v7802_v35 = vsub.f32 %v7781_v21, %v7798_v31 }
0x2d91   : > { %v7814_v47 = vsel %vm1128_vm6, %v11438_v2, 0.0 }
0x2d92   : > { %v11440_v53 = vpop.eup %11439  ;;  %v7809_v50 = vmul.f32 1.442695, %v7802_v35  ;;  %7815 = vadd.xlane.f32.xlu0 %v7814_v47 }
0x2d93   : > { %v7811_v5 = vsel %vm1128_vm6, %v11440_v53, 0.0 }
0x2d94   : > { %11443 = vpow2.f32 %v7809_v50  ;;  %7812 = vadd.xlane.f32.xlu1 %v7811_v5 }
0x2d9a   : > { %v11442_v46 = vpop.eup %11441 }
0x2d9b   : > { %v7817_v23 = vsel %vm1128_vm6, %v11442_v46, 0.0 }
0x2d9c   : > { %7818 = vadd.xlane.f32.xlu1 %v7817_v23  ;;  %v8094_v23 = vsel %vm1132_vm5, %v7145_v51, 0 }
0x2d9e   : > { %v11444_v36 = vpop.eup %11443 }
0x2d9f   : > { %v7820_v20 = vsel %vm1128_vm6, %v11444_v36, 0.0 }
0x2da0   : > { %7821 = vadd.xlane.f32.xlu0 %v7820_v20 }
0x2dad   : > { %7931 = vrot.lane.b32.xlu1 %v13778_v29, %s12116_s1 }
0x2db1   : > { %7979 = vrot.lane.b32.xlu1 %v13782_v48, %s12116_s1 }
0x2db5   : > { %8145 = vrot.lane.b32.xlu1 %v13772_v16, %s12117_s16 }
0x2db6   : > { %7883 = vrot.lane.b32.xlu0 %v13774_v49, %s12116_s1 }
0x2db9   : > { %8195 = vrot.lane.b32.xlu1 %v13774_v49, %s12117_s16 }
0x2dba   : > { %8147 = vrot.lane.b32.xlu0 %v13772_v16, %s12118_s7 }
0x2dbd   : > { %8297 = vrot.lane.b32.xlu1 %v13782_v48, %s12118_s7 }
0x2dbe   : > { %8197 = vrot.lane.b32.xlu0 %v13774_v49, %s12118_s7 }
0x2dc1   : > { %8295 = vrot.lane.b32.xlu1 %v13782_v48, %s12117_s16 }
0x2dc2   : > { %8247 = vrot.lane.b32.xlu0 %v13778_v29, %s12118_s7 }
0x2dc6   : > { %8245 = vrot.lane.b32.xlu0 %v13778_v29, %s12117_s16 }
0x2e1f   : > { %v7816_v8 = vpop.xlane.xlu0 %7815 }
0x2e21   : > { %v7813_v40 = vpop.xlane.xlu1 %7812 }
0x2e22   : > { %11445 = vrcp.f32 %v7813_v40 }
0x2e23   : > { %11447 = vrcp.f32 %v7816_v8 }
0x2e29   : > { %v7819_v41 = vpop.xlane.xlu1 %7818 }
0x2e2a   : > { %11449 = vrcp.f32 %v7819_v41 }
0x2e2c   : > { %v11446_v43 = vpop.eup %11445 }
0x2e2d   : > { %v11448_v7 = vpop.eup %11447  ;;  %v7827_v28 = vmul.f32 %v11446_v43, %v11440_v53  ;;  %v7932_v39 = vpop.permute.xlu1 %7931 }
0x2e2e   : > { %v7822_v33 = vpop.xlane.xlu0 %7821  ;;  %v7828_v11 = vmul.f32 %v11448_v7, %v11438_v2  ;;  %v7937_v57 = vsel %vm1132_vm5, %v7932_v39, 0 }
0x2e2f   : > { %11451 = vrcp.f32 %v7822_v33  ;;  %v7831_v14 = vpack.c.bf16 %v7827_v28, %v7827_v28 }
0x2e30   : > { %v7832_v55 = vpack.c.bf16 %v7828_v11, %v7828_v11 }
0x2e31   : > { %10848 = vmatmul.mubr.msk.bf16.vlgmr.msra.gmra.mrb[220].mxu1 %vm1128_vm6, %v7831_v14  ;;  %v7980_v27 = vpop.permute.xlu1 %7979 }
0x2e32   : > { %v7884_v59 = vpop.permute.xlu0 %7883  ;;  %10858 = vmatpush3.bf16.msra.mxu1 %v7937_v57  ;;  %10859 = vmatprep.mubr.msk.bf16.mxu1 %vm12111_vm4, %v12110_v9  ;;  %v7985_v44 = vsel %vm1132_vm5, %v7980_v27, 0 }
0x2e33   : > { %v7889_v61 = vsel %vm1132_vm5, %v7884_v59, 0  ;;  %11043 = vmatprep.subr.msk.bf16.mxu1 %vm1132_vm5, %v7146_v38 }
0x2e34   : > { %10852 = vmatpush3.bf16.msra.mxu0 %v7889_v61  ;;  %v11450_v12 = vpop.eup %11449 }
0x2e35   : > { %10863 = vmatprep.subr.bf16.mxu0 %v12110_v9  ;;  %v7829_v13 = vmul.f32 %v11450_v12, %v11442_v46  ;;  %v8146_v24 = vpop.permute.xlu1 %8145 }
0x2e36   : > { %v8148_v22 = vpop.permute.xlu0 %8147 }
0x2e37   : > { %10854 = vmatmul.mubr.msk.bf16.vlgmr.msra.gmra.mrb[236].mxu0 %vm1128_vm6, %v7832_v55  ;;  %v7833_v15 = vpack.c.bf16 %v7829_v13, %v7829_v13  ;;  %v8153_v63 = vsel %vm1128_vm6, %v8148_v22, 0 }
0x2e38   : > { %10864 = vmatpush3.bf16.msra.mxu0 %v7985_v44  ;;  %10865 = vmatprep.mubr.msk.bf16.mxu0 %vm12111_vm4, %v12110_v9 }
0x2e39   : > { %v11452_v17 = vpop.eup %11451  ;;  %10881 = vmatprep.subr.bf16.mxu0 %v12110_v9  ;;  %10860 = vmatmul.mubr.msk.bf16.vlgmr.msra.gmra.mrb[224].mxu1 %vm1128_vm6, %v7833_v15  ;;  %v8196_v25 = vpop.permute.xlu1 %8195 }
0x2e3a   : > { %v7830_v18 = vmul.f32 %v11452_v17, %v11444_v36  ;;  %v8198_v3 = vpop.permute.xlu0 %8197  ;;  %10870 = vmatpush3.bf16.msra.mxu1 %v8036_v45 }
0x2e3b   : > { %v8203_v26 = vsel %vm1128_vm6, %v8198_v3, 0  ;;  %11044 = vmatprep.subr.msk.bf16.mxu1 %vm1132_vm5, %v7145_v51 }
0x2e3c   : > { %v7834_v21 = vpack.c.bf16 %v7830_v18, %v7830_v18 }
0x2e3d   : > { %v8298_v30 = vpop.permute.xlu1 %8297 }
0x2e3e   : > { %v8303_v32 = vsel %vm1128_vm6, %v8298_v30, 0  ;;  %v8248_v7 = vpop.permute.xlu0 %8247 }
0x2e3f   : > { %10866 = vmatmul.mubr.msk.bf16.vlgmr.msra.gmra.mrb[240].mxu0 %vm1128_vm6, %v7834_v21  ;;  %v8253_v39 = vsel %vm1128_vm6, %v8248_v7, 0 }
0x2e40   : > { %10883 = vmatprep.mubr.msk.bf16.mxu0 %vm12111_vm4, %v12110_v9 }
0x2e41   : > { %10882 = vmatpush3.bf16.xpose.msra.mxu0 %v8153_v63  ;;  %v8296_v37 = vpop.permute.xlu1 %8295 }
0x2e42   : > { %10887 = vmatprep.subr.bf16.mxu0 %v12110_v9  ;;  %v8246_v11 = vpop.permute.xlu0 %8245 }
0x2e48   : > { %10884 = vmatmul.mubr.msk.bf16.vlgmr.msra.gmra.mrb[244].mxu0 %vm1128_vm6, %v8146_v24 }
0x2e49   : > { %10888 = vmatpush3.bf16.xpose.msra.mxu0 %v8203_v26  ;;  %10889 = vmatprep.mubr.msk.bf16.mxu0 %vm12111_vm4, %v12110_v9 }
0x2e4a   : > { %10899 = vmatprep.subr.bf16.mxu0 %v12110_v9 }
0x2e50   : > { %10890 = vmatmul.mubr.msk.bf16.vlgmr.msra.gmra.mrb[248].mxu0 %vm1128_vm6, %v8196_v25 }
0x2e51   : > { %10900 = vmatpush3.bf16.xpose.msra.mxu0 %v8303_v32  ;;  %10901 = vmatprep.mubr.msk.bf16.mxu0 %vm12111_vm4, %v12110_v9 }
0x2e52   : > { %10911 = vmatprep.subr.bf16.mxu0 %v12110_v9 }
0x2e58   : > { %10902 = vmatmul.mubr.msk.bf16.vlgmr.msra.gmra.mrb[252].mxu0 %vm1128_vm6, %v8296_v37 }
0x2e59   : > { %10913 = vmatprep.mubr.msk.bf16.mxu0 %vm12111_vm4, %v12110_v9 }
0x2f04   : > { %v7877_v52 = vpop.f32.mrb[220].mxu1 }
0x2f05   : > { %v10849_v54 = vpop.f32.mrb[221].mxu1 }
0x2f06   : > { %v7880_v58 = vpop.f32.mrb[222].mxu1 }
0x2f07   : > { %v10850_v60 = vpop.f32.mrb[223].mxu1 }
0x2f0a   : > { %v7925_v56 = vpop.f32.mrb[236].mxu0 }
0x2f0b   : > { %v8027_v62 = vpack.c.bf16 %v7925_v56, %v7877_v52  ;;  %v10855_v0 = vpop.f32.mrb[237].mxu0 }
0x2f0c   : > { %v7928_v1 = vpop.f32.mrb[238].mxu0  ;;  %v7973_v2 = vpop.f32.mrb[224].mxu1 }
0x2f0d   : > { %v10856_v31 = vpop.f32.mrb[239].mxu0  ;;  %10871 = vmatprep.mubr.msk.bf16.mxu1 %vm1128_vm6, %v8027_v62  ;;  %v10861_v35 = vpop.f32.mrb[225].mxu1 }
0x2f0e   : > { %v7976_v47 = vpop.f32.mrb[226].mxu1 }
0x2f0f   : > { %v10862_v53 = vpop.f32.mrb[227].mxu1 }
0x2f12   : > { %v8021_v50 = vpop.f32.mrb[240].mxu0 }
0x2f13   : > { %v8028_v5 = vpack.c.bf16 %v8021_v50, %v7973_v2  ;;  %v10867_v46 = vpop.f32.mrb[241].mxu0 }
0x2f14   : > { %v8024_v36 = vpop.f32.mrb[242].mxu0 }
0x2f15   : > { %v10868_v20 = vpop.f32.mrb[243].mxu0  ;;  %10872 = vmatmul.mubr.msk.bf16.vlgmr.msra.gmra.mrb[228].mxu1 %vm1128_vm6, %v8028_v5 }
0x2f16   : > { %10877 = vmatprep.mubr.msk.bf16.mxu1 %vm1128_vm6, %v7585_v6  ;;  %10876 = vmatpush3.bf16.msra.mxu1 %v8094_v23 }
0x2f17   : > { %10893 = vmatprep.subr.bf16.mxu1 %v12110_v9 }
0x2f1b   : > { %v8189_v8 = vpop.f32.mrb[244].mxu0 }
0x2f1c   : > { %v10885_v40 = vpop.f32.mrb[245].mxu0  ;;  %v8345_v41 = vsel %vm1128_vm6, %v8189_v8, -inf }
0x2f1d   : > { %8346 = vmax.xlane.f32.xlu0 %v8345_v41  ;;  %v8192_v43 = vpop.f32.mrb[246].mxu0 }
0x2f1e   : > { %v10886_v28 = vpop.f32.mrb[247].mxu0 }
0x2f21   : > { %10878 = vmatmul.mubr.msk.bf16.vlgmr.msra.gmra.mrb[228].mxu1 %vm1128_vm6, %v7586_v42 }
0x2f22   : > { %10894 = vmatpush3.bf16.xpose.msra.mxu1 %v8253_v39  ;;  %10895 = vmatprep.mubr.msk.bf16.mxu1 %vm12111_vm4, %v12110_v9 }
0x2f23   : > { %v8239_v19 = vpop.f32.mrb[248].mxu0  ;;  %10905 = vmatprep.subr.bf16.mxu1 %v12110_v9 }
0x2f24   : > { %v10891_v4 = vpop.f32.mrb[249].mxu0  ;;  %v8348_v6 = vsel %vm1128_vm6, %v8239_v19, -inf }
0x2f25   : > { %8349 = vmax.xlane.f32.xlu1 %v8348_v6  ;;  %v8242_v33 = vpop.f32.mrb[250].mxu0 }
0x2f26   : > { %v10892_v14 = vpop.f32.mrb[251].mxu0 }
0x2f29   : > { %10896 = vmatmul.mubr.msk.bf16.vlgmr.msra.gmra.mrb[232].mxu1 %vm1128_vm6, %v8246_v11 }
0x2f2a   : > { %10907 = vmatprep.mubr.msk.bf16.mxu1 %vm12111_vm4, %v12110_v9 }
0x2f2b   : > { %v8339_v10 = vpop.f32.mrb[252].mxu0 }
0x2f2c   : > { %v10903_v34 = vpop.f32.mrb[253].mxu0  ;;  %v8354_v24 = vsel %vm1128_vm6, %v8339_v10, -inf }
0x2f2d   : > { %v8342_v42 = vpop.f32.mrb[254].mxu0 }
0x2f2e   : > { %v10904_v57 = vpop.f32.mrb[255].mxu0 }
0x2faa   : > { %v8347_v59 = vpop.xlane.xlu0 %8346 }
0x2fab   : > { %v8357_v61 = vsub.f32 %v8189_v8, %v8347_v59 }
0x2fad   : > { %v8361_v27 = vmul.f32 1.442695, %v8357_v61  ;;  %v7147_v61 = vld [vmem:[#allocation26 + $0x28] sm:$0xf] }
0x2faf   : > { %11453 = vpow2.f32 %v8361_v27  ;;  %v8594_v27 = vsel %vm1132_vm5, %v7147_v61, 0 }
0x2fb2   : > { %v8350_v13 = vpop.xlane.xlu1 %8349 }
0x2fb3   : > { %v8358_v44 = vsub.f32 %v8239_v19, %v8350_v13 }
0x2fb5   : > { %v8363_v15 = vmul.f32 1.442695, %v8358_v44 }
0x2fb7   : > { %11455 = vpow2.f32 %v8363_v15 }
0x2fb9   : > { %v11454_v12 = vpop.eup %11453 }
0x2fba   : > { %v8369_v55 = vsel %vm1128_vm6, %v11454_v12, 0.0 }
0x2fbb   : > { %8370 = vadd.xlane.f32.xlu1 %v8369_v55 }
0x2fc1   : > { %v11456_v3 = vpop.eup %11455 }
0x2fc2   : > { %v8372_v25 = vsel %vm1128_vm6, %v11456_v3, 0.0 }
0x2fcc   : > { %8393 = vrot.lane.b32.xlu1 %v13772_v16, %s12119_s28 }
0x2fd0   : > { %8489 = vrot.lane.b32.xlu1 %v13778_v29, %s12119_s28 }
0x2ffc   : > { %v8289_v17 = vpop.f32.mrb[232].mxu1 }
0x2ffd   : > { %v10897_v18 = vpop.f32.mrb[233].mxu1  ;;  %v8351_v21 = vsel %vm1128_vm6, %v8289_v17, -inf }
0x2ffe   : > { %8352 = vmax.xlane.f32.xlu0 %v8351_v21  ;;  %v8292_v22 = vpop.f32.mrb[234].mxu1 }
0x2fff   : > { %v10898_v63 = vpop.f32.mrb[235].mxu1 }
0x3002   : > { %8355 = vmax.xlane.f32.xlu0 %v8354_v24 }
0x3006   : > { %8373 = vadd.xlane.f32.xlu0 %v8372_v25 }
0x3048   : > { %v8371_v26 = vpop.xlane.xlu1 %8370 }
0x3049   : > { %11457 = vrcp.f32 %v8371_v26 }
0x304c   : > { %v8394_v30 = vpop.permute.xlu1 %8393 }
0x304d   : > { %v8399_v32 = vsel %vm1132_vm5, %v8394_v30, 0 }
0x304e   : > { %10906 = vmatpush3.bf16.msra.mxu1 %v8399_v32 }
0x304f   : > { %10917 = vmatprep.subr.bf16.mxu1 %v12110_v9 }
0x3050   : > { %v8490_v45 = vpop.permute.xlu1 %8489 }
0x3051   : > { %v8495_v52 = vsel %vm1132_vm5, %v8490_v45, 0 }
0x3053   : > { %v11458_v37 = vpop.eup %11457 }
0x3054   : > { %v8385_v38 = vmul.f32 %v11458_v37, %v11454_v12 }
0x3056   : > { %v8389_v51 = vpack.c.bf16 %v8385_v38, %v8385_v38 }
0x3058   : > { %10908 = vmatmul.mubr.msk.bf16.vlgmr.msra.gmra.mrb[236].mxu1 %vm1128_vm6, %v8389_v51 }
0x3059   : > { %10918 = vmatpush3.bf16.msra.mxu1 %v8495_v52  ;;  %10919 = vmatprep.mubr.msk.bf16.mxu1 %vm12111_vm4, %v12110_v9 }
0x305a   : > { %11045 = vmatprep.subr.msk.bf16.mxu1 %vm1132_vm5, %v7147_v61 }
0x308b   : > { %v8353_v54 = vpop.xlane.xlu0 %8352 }
0x308c   : > { %v8359_v58 = vsub.f32 %v8289_v17, %v8353_v54 }
0x308e   : > { %v8365_v60 = vmul.f32 1.442695, %v8359_v58 }
0x308f   : > { %v8356_v56 = vpop.xlane.xlu0 %8355 }
0x3090   : > { %11459 = vpow2.f32 %v8365_v60  ;;  %v8360_v62 = vsub.f32 %v8339_v10, %v8356_v56 }
0x3092   : > { %v8367_v0 = vmul.f32 1.442695, %v8360_v62 }
0x3093   : > { %v8374_v47 = vpop.xlane.xlu0 %8373 }
0x3094   : > { %11461 = vpow2.f32 %v8367_v0 }
0x3095   : > { %11463 = vrcp.f32 %v8374_v47 }
0x309a   : > { %v11460_v1 = vpop.eup %11459 }
0x309b   : > { %v8375_v31 = vsel %vm1128_vm6, %v11460_v1, 0.0 }
0x309c   : > { %8376 = vadd.xlane.f32.xlu1 %v8375_v31 }
0x309e   : > { %v11462_v2 = vpop.eup %11461 }
0x309f   : > { %v8378_v35 = vsel %vm1128_vm6, %v11462_v2, 0.0  ;;  %v11464_v23 = vpop.eup %11463 }
0x30a0   : > { %8379 = vadd.xlane.f32.xlu0 %v8378_v35  ;;  %v8386_v8 = vmul.f32 %v11464_v23, %v11456_v3 }
0x30a2   : > { %v8390_v28 = vpack.c.bf16 %v8386_v8, %v8386_v8 }
0x30ad   : > { %8537 = vrot.lane.b32.xlu1 %v13782_v48, %s12119_s28 }
0x30b1   : > { %8701 = vrot.lane.b32.xlu1 %v13774_v49, %s12120_s5 }
0x30b5   : > { %8699 = vrot.lane.b32.xlu1 %v13774_v49, %s12121_s3 }
0x30b6   : > { %8441 = vrot.lane.b32.xlu0 %v13774_v49, %s12119_s28 }
0x30b9   : > { %8801 = vrot.lane.b32.xlu1 %v13782_v48, %s12120_s5 }
0x30ba   : > { %8651 = vrot.lane.b32.xlu0 %v13772_v16, %s12120_s5 }
0x30bd   : > { %8799 = vrot.lane.b32.xlu1 %v13782_v48, %s12121_s3 }
0x30be   : > { %8649 = vrot.lane.b32.xlu0 %v13772_v16, %s12121_s3 }
0x30c2   : > { %8751 = vrot.lane.b32.xlu0 %v13778_v29, %s12120_s5 }
0x30c6   : > { %8749 = vrot.lane.b32.xlu0 %v13778_v29, %s12121_s3 }
0x3129   : > { %v8377_v53 = vpop.xlane.xlu1 %8376 }
0x312a   : > { %11465 = vrcp.f32 %v8377_v53 }
0x312b   : > { %v8435_v50 = vpop.f32.mrb[236].mxu1 }
0x312c   : > { %v10909_v5 = vpop.f32.mrb[237].mxu1 }
0x312d   : > { %v8438_v46 = vpop.f32.mrb[238].mxu1  ;;  %v8380_v36 = vpop.xlane.xlu0 %8379 }
0x312e   : > { %v10910_v20 = vpop.f32.mrb[239].mxu1  ;;  %11467 = vrcp.f32 %v8380_v36  ;;  %v8538_v7 = vpop.permute.xlu1 %8537 }
0x312f   : > { %v8543_v19 = vsel %vm1132_vm5, %v8538_v7, 0 }
0x3131   : > { %v8442_v40 = vpop.permute.xlu0 %8441 }
0x3132   : > { %v8447_v41 = vsel %vm1132_vm5, %v8442_v40, 0  ;;  %v8702_v21 = vpop.permute.xlu1 %8701 }
0x3133   : > { %10912 = vmatpush3.bf16.msra.mxu0 %v8447_v41  ;;  %v8707_v32 = vsel %vm1128_vm6, %v8702_v21, 0 }
0x3134   : > { %v11466_v43 = vpop.eup %11465  ;;  %10923 = vmatprep.subr.bf16.mxu0 %v12110_v9 }
0x3135   : > { %v8387_v39 = vmul.f32 %v11466_v43, %v11460_v1  ;;  %v8652_v33 = vpop.permute.xlu0 %8651 }
0x3136   : > { %10914 = vmatmul.mubr.msk.bf16.vlgmr.msra.gmra.mrb[0].mxu0 %vm1128_vm6, %v8390_v28  ;;  %v8657_v34 = vsel %vm1128_vm6, %v8652_v33, 0  ;;  %v8700_v26 = vpop.permute.xlu1 %8699 }
0x3137   : > { %v8391_v4 = vpack.c.bf16 %v8387_v39, %v8387_v39  ;;  %10924 = vmatpush3.bf16.msra.mxu0 %v8543_v19  ;;  %10925 = vmatprep.mubr.msk.bf16.mxu0 %vm12111_vm4, %v12110_v9 }
0x3138   : > { %v11468_v6 = vpop.eup %11467  ;;  %10935 = vmatprep.subr.bf16.mxu0 %v12110_v9 }
0x3139   : > { %10920 = vmatmul.mubr.msk.bf16.vlgmr.msra.gmra.mrb[240].mxu1 %vm1128_vm6, %v8391_v4  ;;  %v8388_v14 = vmul.f32 %v11468_v6, %v11462_v2  ;;  %v8650_v10 = vpop.permute.xlu0 %8649 }
0x313a   : > { %10930 = vmatpush3.bf16.msra.mxu1 %v8594_v27  ;;  %v8802_v38 = vpop.permute.xlu1 %8801 }
0x313b   : > { %v8392_v11 = vpack.c.bf16 %v8388_v14, %v8388_v14  ;;  %10941 = vmatprep.subr.bf16.mxu1 %v12110_v9  ;;  %v8807_v54 = vsel %vm1128_vm6, %v8802_v38, 0 }
0x313d   : > { %v8752_v42 = vpop.permute.xlu0 %8751 }
0x313e   : > { %10926 = vmatmul.mubr.msk.bf16.vlgmr.msra.gmra.mrb[4].mxu0 %vm1128_vm6, %v8392_v11  ;;  %v8757_v57 = vsel %vm1128_vm6, %v8752_v42, 0  ;;  %v8800_v62 = vpop.permute.xlu1 %8799 }
0x313f   : > { %10937 = vmatprep.mubr.msk.bf16.mxu0 %vm12111_vm4, %v12110_v9 }
0x3140   : > { %10936 = vmatpush3.bf16.xpose.msra.mxu0 %v8657_v34 }
0x3141   : > { %10947 = vmatprep.subr.bf16.mxu0 %v12110_v9  ;;  %v8750_v59 = vpop.permute.xlu0 %8749 }
0x3147   : > { %10938 = vmatmul.mubr.msk.bf16.vlgmr.msra.gmra.mrb[8].mxu0 %vm1128_vm6, %v8650_v10 }
0x3148   : > { %10948 = vmatpush3.bf16.xpose.msra.mxu0 %v8757_v57  ;;  %10949 = vmatprep.mubr.msk.bf16.mxu0 %vm12111_vm4, %v12110_v9 }
0x3149   : > { %10959 = vmatprep.subr.bf16.mxu0 %v12110_v9 }
0x314f   : > { %10950 = vmatmul.mubr.msk.bf16.vlgmr.msra.gmra.mrb[12].mxu0 %vm1128_vm6, %v8750_v59 }
0x3150   : > { %10961 = vmatprep.mubr.msk.bf16.mxu0 %vm12111_vm4, %v12110_v9 }
0x3209   : > { %v8483_v12 = vpop.f32.mrb[0].mxu0 }
0x320a   : > { %v8585_v55 = vpack.c.bf16 %v8483_v12, %v8435_v50  ;;  %v10915_v13 = vpop.f32.mrb[1].mxu0 }
0x320b   : > { %v8486_v44 = vpop.f32.mrb[2].mxu0 }
0x320c   : > { %v8531_v15 = vpop.f32.mrb[240].mxu1  ;;  %v10916_v17 = vpop.f32.mrb[3].mxu0  ;;  %10931 = vmatprep.mubr.msk.bf16.mxu1 %vm1128_vm6, %v8585_v55 }
0x320d   : > { %v10921_v18 = vpop.f32.mrb[241].mxu1 }
0x320e   : > { %v8534_v22 = vpop.f32.mrb[242].mxu1 }
0x320f   : > { %v10922_v63 = vpop.f32.mrb[243].mxu1 }
0x3211   : > { %v8579_v24 = vpop.f32.mrb[4].mxu0 }
0x3212   : > { %v8586_v3 = vpack.c.bf16 %v8579_v24, %v8531_v15  ;;  %v10927_v25 = vpop.f32.mrb[5].mxu0 }
0x3213   : > { %v8582_v30 = vpop.f32.mrb[6].mxu0 }
0x3214   : > { %v10928_v37 = vpop.f32.mrb[7].mxu0  ;;  %10932 = vmatmul.mubr.msk.bf16.vlgmr.msra.gmra.mrb[228].mxu1 %vm1128_vm6, %v8586_v3 }
0x3215   : > { %10942 = vmatpush3.bf16.xpose.msra.mxu1 %v8707_v32  ;;  %10943 = vmatprep.mubr.msk.bf16.mxu1 %vm12111_vm4, %v12110_v9 }
0x3216   : > { %10953 = vmatprep.subr.bf16.mxu1 %v12110_v9 }
0x321a   : > { %v8693_v45 = vpop.f32.mrb[8].mxu0 }
0x321b   : > { %v10939_v51 = vpop.f32.mrb[9].mxu0  ;;  %v8849_v52 = vsel %vm1128_vm6, %v8693_v45, -inf }
0x321c   : > { %10944 = vmatmul.mubr.msk.bf16.vlgmr.msra.gmra.mrb[244].mxu1 %vm1128_vm6, %v8700_v26  ;;  %8850 = vmax.xlane.f32.xlu0 %v8849_v52  ;;  %v8696_v58 = vpop.f32.mrb[10].mxu0 }
0x321d   : > { %10954 = vmatpush3.bf16.xpose.msra.mxu1 %v8807_v54  ;;  %v10940_v60 = vpop.f32.mrb[11].mxu0  ;;  %10955 = vmatprep.mubr.msk.bf16.mxu1 %vm12111_vm4, %v12110_v9 }
0x321e   : > { %10965 = vmatprep.subr.bf16.mxu1 %v12110_v9 }
0x3222   : > { %v8793_v56 = vpop.f32.mrb[12].mxu0 }
0x3223   : > { %v10951_v0 = vpop.f32.mrb[13].mxu0  ;;  %v8855_v1 = vsel %vm1128_vm6, %v8793_v56, -inf }
0x3224   : > { %10956 = vmatmul.mubr.msk.bf16.vlgmr.msra.gmra.mrb[248].mxu1 %vm1128_vm6, %v8800_v62  ;;  %8856 = vmax.xlane.f32.xlu0 %v8855_v1  ;;  %v8796_v31 = vpop.f32.mrb[14].mxu0 }
0x3225   : > { %v10952_v2 = vpop.f32.mrb[15].mxu0  ;;  %10967 = vmatprep.mubr.msk.bf16.mxu1 %vm12111_vm4, %v12110_v9 }
0x3226   : > { %v7148_v2 = vld [vmem:[#allocation26 + $0x2c] sm:$0xf] }
0x32a9   : > { %v8851_v35 = vpop.xlane.xlu0 %8850 }
0x32aa   : > { %v8861_v47 = vsub.f32 %v8693_v45, %v8851_v35  ;;  %v9098_v35 = vsel %vm1132_vm5, %v7148_v2, 0 }
0x32ac   : > { %v8865_v50 = vmul.f32 1.442695, %v8861_v47 }
0x32ae   : > { %11469 = vpow2.f32 %v8865_v50 }
0x32b1   : > { %v8857_v53 = vpop.xlane.xlu0 %8856 }
0x32b2   : > { %v8863_v5 = vsub.f32 %v8793_v56, %v8857_v53 }
0x32b4   : > { %v8869_v46 = vmul.f32 1.442695, %v8863_v5 }
0x32b6   : > { %11471 = vpow2.f32 %v8869_v46 }
0x32b8   : > { %v11470_v8 = vpop.eup %11469 }
0x32b9   : > { %v8873_v43 = vsel %vm1128_vm6, %v11470_v8, 0.0 }
0x32c0   : > { %v11472_v7 = vpop.eup %11471 }
0x32c1   : > { %v8879_v4 = vsel %vm1128_vm6, %v11472_v7, 0.0 }
0x32ef   : > { %v8743_v23 = vpop.f32.mrb[244].mxu1 }
0x32f0   : > { %v10945_v36 = vpop.f32.mrb[245].mxu1  ;;  %v8852_v20 = vsel %vm1128_vm6, %v8743_v23, -inf }
0x32f1   : > { %8853 = vmax.xlane.f32.xlu1 %v8852_v20  ;;  %v8746_v40 = vpop.f32.mrb[246].mxu1 }
0x32f2   : > { %v10946_v41 = vpop.f32.mrb[247].mxu1 }
0x32f3   : > { %v9168_v41 = vld [vmem:[#allocation2] sm:$0x1] }
0x32f5   : > { %8874 = vadd.xlane.f32.xlu1 %v8873_v43  ;;  %v12123_v43 = vmov 0  }
0x32f6   : > { %11257 = vset.pattern.permute.xlu0 %v12123_v43 }
0x32f7   : > { %v8843_v28 = vpop.f32.mrb[248].mxu1 }
0x32f8   : > { %v10957_v39 = vpop.f32.mrb[249].mxu1  ;;  %v8858_v19 = vsel %vm1128_vm6, %v8843_v28, -inf }
0x32f9   : > { %v8846_v6 = vpop.f32.mrb[250].mxu1  ;;  %8859 = vmax.xlane.f32.xlu0 %v8858_v19  ;;  %8880 = vadd.xlane.f32.xlu1 %v8879_v4 }
0x32fa   : > { %v10958_v33 = vpop.f32.mrb[251].mxu1 }
0x330a   : > { %8897 = vrot.lane.b32.xlu1 %v13772_v16, %s12122_s11 }
0x330e   : > { %8993 = vrot.lane.b32.xlu1 %v13778_v29, %s12122_s11 }
0x3312   : > { %9041 = vrot.lane.b32.xlu1 %v13782_v48, %s12122_s11 }
0x337e   : > { %v8854_v14 = vpop.xlane.xlu1 %8853 }
0x337f   : > { %v8862_v11 = vsub.f32 %v8743_v23, %v8854_v14 }
0x3381   : > { %v8867_v10 = vmul.f32 1.442695, %v8862_v11 }
0x3382   : > { %v8875_v34 = vpop.xlane.xlu1 %8874 }
0x3383   : > { %11473 = vpow2.f32 %v8867_v10 }
0x3384   : > { %11475 = vrcp.f32 %v8875_v34 }
0x3386   : > { %v8881_v42 = vpop.xlane.xlu1 %8880  ;;  %v8860_v57 = vpop.xlane.xlu0 %8859 }
0x3387   : > { %v8864_v59 = vsub.f32 %v8843_v28, %v8860_v57  ;;  %11477 = vrcp.f32 %v8881_v42  ;;  %v9759_v28 = vld [vmem:[#allocation27 + $0x2] ss:$0 sm:$0xff] }
0x3389   : > { %v8871_v61 = vmul.f32 1.442695, %v8864_v59  ;;  %v9165_v59 = vld [vmem:[#allocation29] sm:$0x1] }
0x338a   : > { %v8898_v27 = vpop.permute.xlu1 %8897 }
0x338b   : > { %11479 = vpow2.f32 %v8871_v61  ;;  %v8903_v16 = vsel %vm1132_vm5, %v8898_v27, 0  ;;  %v9174_v61 = vlaneseq }
0x338c   : > { %10960 = vmatpush3.bf16.msra.mxu0 %v8903_v16 }
0x338d   : > { %v11474_v29 = vpop.eup %11473  ;;  %10971 = vmatprep.subr.bf16.mxu0 %v12110_v9  ;;  %v9175_v27 = vshrl.u32 %v9174_v61, 7 }
0x338e   : > { %v11476_v48 = vpop.eup %11475  ;;  %v8876_v12 = vsel %vm1128_vm6, %v11474_v29, 0.0  ;;  %v8994_v13 = vpop.permute.xlu1 %8993 }
0x338f   : > { %v8889_v55 = vmul.f32 %v11476_v48, %v11470_v8  ;;  %8877 = vadd.xlane.f32.xlu0 %v8876_v12  ;;  %v8999_v17 = vsel %vm1132_vm5, %v8994_v13, 0  ;;  %v9176_v16 = vsub.s32 0, %v9175_v27 }
0x3391   : > { %v8893_v44 = vpack.c.bf16 %v8889_v55, %v8889_v55  ;;  %v11478_v15 = vpop.eup %11477 }
0x3392   : > { %v8891_v21 = vmul.f32 %v11478_v15, %v11472_v7  ;;  %v9042_v37 = vpop.permute.xlu1 %9041 }
0x3393   : > { %10962 = vmatmul.mubr.msk.bf16.vlgmr.msra.gmra.mrb[16].mxu0 %vm1128_vm6, %v8893_v44  ;;  %v9047_v45 = vsel %vm1132_vm5, %v9042_v37, 0 }
0x3394   : > { %10972 = vmatpush3.bf16.msra.mxu0 %v8999_v17  ;;  %10973 = vmatprep.mubr.msk.bf16.mxu0 %vm12111_vm4, %v12110_v9  ;;  %v8895_v63 = vpack.c.bf16 %v8891_v21, %v8891_v21 }
0x3395   : > { %v11480_v18 = vpop.eup %11479  ;;  %10989 = vmatprep.subr.bf16.mxu0 %v12110_v9 }
0x3396   : > { %v8882_v22 = vsel %vm1128_vm6, %v11480_v18, 0.0 }
0x3397   : > { %8883 = vadd.xlane.f32.xlu0 %v8882_v22 }
0x339b   : > { %10974 = vmatmul.mubr.msk.bf16.vlgmr.msra.gmra.mrb[20].mxu0 %vm1128_vm6, %v8895_v63 }
0x339c   : > { %10993 = vmatprep.mubr.msk.bf16.mxu0 %vm12111_vm4, %v12110_v9 }
0x33ad   : > { %8945 = vrot.lane.b32.xlu0 %v13774_v49, %s12122_s11 }
0x33b1   : > { %9171 = vperm.xlu0 %11257, %v9168_v41  }
0x341c   : > { %v8878_v24 = vpop.xlane.xlu0 %8877 }
0x341d   : > { %11481 = vrcp.f32 %v8878_v24 }
0x3424   : > { %v8884_v3 = vpop.xlane.xlu0 %8883 }
0x3425   : > { %11483 = vrcp.f32 %v8884_v3 }
0x3427   : > { %v11482_v25 = vpop.eup %11481 }
0x3428   : > { %v8890_v26 = vmul.f32 %v11482_v25, %v11474_v29  ;;  %v8946_v30 = vpop.permute.xlu0 %8945 }
0x3429   : > { %v8951_v32 = vsel %vm1132_vm5, %v8946_v30, 0 }
0x342a   : > { %10966 = vmatpush3.bf16.msra.mxu1 %v8951_v32  ;;  %v8894_v38 = vpack.c.bf16 %v8890_v26, %v8890_v26 }
0x342b   : > { %10977 = vmatprep.subr.bf16.mxu1 %v12110_v9 }
0x342d   : > { %10968 = vmatmul.mubr.msk.bf16.vlgmr.msra.gmra.mrb[252].mxu1 %vm1128_vm6, %v8894_v38 }
0x342e   : > { %10978 = vmatpush3.bf16.msra.mxu1 %v9047_v45  ;;  %10979 = vmatprep.mubr.msk.bf16.mxu1 %vm12111_vm4, %v12110_v9 }
0x342f   : > { %v11484_v49 = vpop.eup %11483  ;;  %11046 = vmatprep.subr.msk.bf16.mxu1 %vm1132_vm5, %v7148_v2 }
0x3430   : > { %v8892_v51 = vmul.f32 %v11484_v49, %v11480_v18  ;;  %v9172_v29 = vpop.permute.xlu0 %9171 }
0x3431   : > { %v9177_v48 = vrot.slane %v9172_v29, %v9176_v16 }
0x3432   : > { %v8896_v52 = vpack.c.bf16 %v8892_v51, %v8892_v51 }
0x3435   : > { %10980 = vmatmul.mubr.msk.bf16.vlgmr.msra.gmra.mrb[0].mxu1 %vm1128_vm6, %v8896_v52 }
0x3436   : > { %10984 = vmatpush3.bf16.msra.mxu1 %v9098_v35 }
0x3466   : > { %v8939_v54 = vpop.f32.mrb[16].mxu0 }
0x3467   : > { %v10963_v58 = vpop.f32.mrb[17].mxu0 }
0x3468   : > { %v8942_v60 = vpop.f32.mrb[18].mxu0 }
0x3469   : > { %v10964_v56 = vpop.f32.mrb[19].mxu0 }
0x346e   : > { %v9035_v62 = vpop.f32.mrb[20].mxu0 }
0x346f   : > { %v10975_v0 = vpop.f32.mrb[21].mxu0 }
0x3470   : > { %v9038_v1 = vpop.f32.mrb[22].mxu0 }
0x3471   : > { %v10976_v31 = vpop.f32.mrb[23].mxu0 }
0x3500   : > { %v8987_v47 = vpop.f32.mrb[252].mxu1 }
0x3501   : > { %v9089_v53 = vpack.c.bf16 %v8987_v47, %v8939_v54  ;;  %v10969_v50 = vpop.f32.mrb[253].mxu1 }
0x3502   : > { %v8990_v5 = vpop.f32.mrb[254].mxu1 }
0x3503   : > { %v10970_v46 = vpop.f32.mrb[255].mxu1  ;;  %10985 = vmatprep.mubr.msk.bf16.mxu1 %vm1128_vm6, %v9089_v53 }
0x3508   : > { %v9083_v23 = vpop.f32.mrb[0].mxu1 }
0x3509   : > { %v9090_v36 = vpack.c.bf16 %v9083_v23, %v9035_v62  ;;  %v10981_v20 = vpop.f32.mrb[1].mxu1 }
0x350a   : > { %v9086_v8 = vpop.f32.mrb[2].mxu1 }
0x350b   : > { %v10982_v40 = vpop.f32.mrb[3].mxu1  ;;  %10986 = vmatmul.mubr.msk.bf16.vlgmr.msra.gmra.mrb[228].mxu1 %vm1128_vm6, %v9090_v36 }
0x35de   : > { %v10987_v7 = vpop.f32.mrb[228].mxu1 }
0x35df   : > { %v9134_v39 = vpop.f32.mrb[229].mxu1  ;;  %v9163_v4 = vadd.f32 %v10987_v7, %v9759_v28 }
0x35e0   : > { %v10988_v19 = vpop.f32.mrb[230].mxu1  ;;  %v9161_v14 = vadd.f32 %v9759_v28, %v9134_v39 }
0x35e1   : > { %v9164_v6 = vadd.f32 %v10988_v19, %v9759_v28  ;;  %v9137_v33 = vpop.f32.mrb[231].mxu1 }
0x35e2   : > { %v9162_v11 = vadd.f32 %v9759_v28, %v9137_v33 }
0x35e3   : > { %v9167_v10 = vpack.c.bf16 %v9164_v6, %v9163_v4 }
0x35e4   : > { %v9166_v34 = vpack.c.bf16 %v9162_v11, %v9161_v14 }
0x35e5   : > { %v9185_v57 = vsel %vm1547_vm8, %v9167_v10, 0 }
0x35e6   : > { %v9182_v42 = vsel %vm1547_vm8, %v9166_v34, 0 }
0x35e7   : > { %10990 = vmatpush3.bf16.xpose.msra.mxu0 %v9182_v42 }
0x35e8   : > { %10991 = vmatprep.subr.bf16.mxu0 %v12110_v9 }
0x35ef   : > { %10992 = vmatpush3.bf16.xpose.msra.mxu0 %v9185_v57 }
0x35f6   : > { %10994 = vmatmul.mubr.msk.bf16.vlgmr.msra.gmra.mrb[24].mxu0 %vm1547_vm8, %v9165_v59 }
0x36c9   : > { %v9221_v12 = vpop.f32.mrb[24].mxu0 }
0x36ca   : > { %v10995_v55 = vpop.f32.mrb[25].mxu0  ;;  %v9222_v9 = vadd.f32 %v9221_v12, %v9177_v48 }
0x36cb   : > { %v9224_v13 = vpop.f32.mrb[26].mxu0 }
0x36cc   : > { %v10996_v44 = vpop.f32.mrb[27].mxu0  ;;  %9228 = vst.msk [vmem:[%s891_s12] sm:$0x1] %vm9227_vm10, %v9222_v9 }
0x36cd   : > { %11998 = shalt.err (!%p11995_p1)
}
0x36ce   : > { %s11999_s10 = scalar_lea.hbm %s14104_s23, 16  ;;  %s12003_s1 = scalar_lea.hbm %s14283_s15, 32 }
0x36cf   : > { %p12000_p10 = scmp.ne.s32.totalorder %s14104_s23, %s11999_s10  ;;  %p12004_p9 = scmp.lt.u32.totalorder %s14104_s23, %s14283_s15 }
0x36d0   : > { %p12005_p6 = scmp.lt.u32.totalorder %s12003_s1, %s11999_s10  ;;  %p12007_p13 = scmp.lt.u32.totalorder %s11999_s10, %s14104_s23 }
0x36d1   : > { %p12001_p0 = pnand %p12000_p10, %p14284_p8 }
0x36d2   : > { %p12006_p5 = por %p12005_p6, %p12004_p9 }
0x36d3   : > { %p12002_p7 = pneg %p12001_p0 }
0x36d4   : > { %p12008_p4 = por %p12007_p13, %p12006_p5 }
0x36d6   : > { %p12009_p12 = pnand %p12008_p4, %p12002_p7 }
0x36d8   : > { %12012 = shalt.err (!%p12009_p12)
}
0x36d9   : > { %11107 = dma.vmem_to_hbm [thread:$0]  (%p14284_p8), %s14106_s2, 16, %s14104_s23, %s9230_s20  }
0x36da PF: > { %s14285_s28 = sld [smem:[#allocation42_spill]]  ;;  %s14286_s5 = sld [smem:[#allocation48_spill]] }
0x36db   : > { %p14288_p2 = scmp.ge.s32.totalorder %s12087_s0, 2 }
0x36e0   : > { %s9254_s3 = sand.u32 1, %s14285_s28   ;;  %p14287_p3 = scmp.ne.s32.totalorder %s14286_s5, 0 }
0x36e1   : > { %s9255_s11 = scalar_lea.sflag [#allocation5], %s9254_s3 }
0x36e2   : > { %p11163_p11 = pnand %p14288_p2, %p14287_p3 }
0x36e4   : > { %12070 = dma.done.wait (!%p11163_p11), %s9255_s11, 16  }
0x36e5   : > { %12072 = vsyncadd (!%p11163_p11), %s9255_s11, 4294967280  ;;  %s14289_s0 = sld [smem:[#allocation45_spill]]  ;;  %s14290_s12 = sld [smem:[#allocation43_spill]] }
0x36e6   : > { %s14291_s17 = sld [smem:[#allocation46_spill]]  ;;  %s14292_s29 = smov %s12079_s30 }
0x36eb   : > { %p45_p1 = scmp.ge.s32.totalorder %s14289_s0, 4   ;;  %s14293_s30 = smov %s14290_s12 }
0x36ed   :  { %47 = sbr.rel (!%p45_p1) target bundleno = 34 (0x22), region = 242 }
0x36f4   :  { %9259 = vsyncpa [#allocation4], 1 }
0x36f5   :  { %9261 = vsyncpa [#allocation4 + $0x1], 1 }
0x36f6   :  { %9262 = vsyncpa [#allocation7], 1 }
0x36f7   :  { %9264 = vsyncpa [#allocation7 + $0x1], 1 }
0x36f8   :  { %9265 = vsyncpa [#allocation10], 1 }
0x36f9   :  { %9267 = vsyncpa [#allocation10 + $0x1], 1 }
0x36fa   :  { %9268 = vsyncpa [#allocation13], 1 }
0x36fb   :  { %9269 = vsyncpa [#allocation16], 1 }
0x36fc   :  { %9270 = vsyncpa [#allocation19], 1 }
0x36fd   :  { %9271 = vsyncpa [#allocation22], 1 }
0x36fe   :  { %9272 = vsyncpa [#allocation25], 1 }
0x36ff   :  { %9273 = vsyncpa [#allocation28], 1 }
0x3700   :  { %9274 = vsyncpa [#allocation5], 1 }
0x3701   :  { %9276 = vsyncpa [#allocation5 + $0x1], 1 }

</bundles_post_ra>
